<compile_context>
chip_gen: v7x
topology: tpu7x:2x2x1
jax: 0.10.0
libtpu: 0.0.40
codegen_flags: <defaults>
</compile_context>

<pallas_src>
import functools
import numpy as np
import jax
import jax.numpy as jnp
from jax import lax
from jax.experimental import pallas as pl
from jax.experimental.pallas import tpu as pltpu

EPS = 1e-5
# contract the last dim of both operands (A @ B.T), as in the TPU flash kernel
NT_DIMS = (((1,), (1,)), ((), ()))


def _layernorm(x, w, b):
    mu = jnp.mean(x, axis=-1, keepdims=True)
    var = jnp.mean((x - mu) ** 2, axis=-1, keepdims=True)
    return (x - mu) * lax.rsqrt(var + EPS) * w + b


def _silu(x):
    return x * jax.nn.sigmoid(x)


# ---------------------------------------------------------------------------
# Fused kernel: patch embedding + depth x VimBlock + final LayerNorm/tanh
# (one batch element per grid step)
# ---------------------------------------------------------------------------
def t_mamba_kernel(depth, S, T, TCHUNK,
                   img_ref,
                   pe_ln1_w, pe_ln1_b, pe_w, pe_b, pe_ln2_w, pe_ln2_b,
                   pos,
                   ln_w, ln_b, w1, b1, w2, b2,
                   wcf, bcf, wcb, bcb,
                   wdelta_f, wb_f, wc_f, bdt_f, alog_f, dvec_f,
                   wdelta_b, wb_b, wc_b, bdt_b, alog_b, dvec_b,
                   pool1, pool2, gmask, fn_w, fn_b,
                   out_ref):
    f32 = jnp.float32

    def mm(x, w_ref):
        # bf16 operands on the MXU, f32 accumulation; weights pre-cast on host.
        return jnp.dot(x.astype(jnp.bfloat16), w_ref[...],
                       preferred_element_type=f32)

    # ------------- patch embedding: LN -> Linear -> LN -> +pos --------------
    x = img_ref[0]                                            # (S, Pd) f32
    x = _layernorm(x, pe_ln1_w[...], pe_ln1_b[...])
    x = mm(x, pe_w) + pe_b[...]
    x = _layernorm(x, pe_ln2_w[...], pe_ln2_b[...])
    x = x + pos[...]

    # constants shared by every block / timestep (hoisted once)
    A_f = -jnp.exp(alog_f[...])                               # (di, ds)
    A_b = -jnp.exp(alog_b[...])
    D_f = dvec_f[...]                                         # (1, di)
    D_b = dvec_b[...]
    gm = gmask[...]                                           # (T, 1)

    # ---- selective scan; y rows stay in registers (no VMEM round-trip) -----
    def ssm(u, wdelta, wb, wc, bdt, A, Dvec, reverse):
        L = u.shape[0]
        # deltaBC delta-slice and dt_proj are pre-composed into wdelta
        delta = jax.nn.softplus(mm(u, wdelta) + bdt[...])     # (L, di)
        Bm = mm(u, wb)                                        # (L, ds)
        Cm = mm(u, wc)                                        # (L, ds)
        dU = delta * u                                        # (L, di)

        h = jnp.zeros(A.shape, f32)                           # (di, ds)
        rows = [None] * L
        chunks = list(range(0, L, TCHUNK))
        if reverse:                                           # reverse-time scan
            chunks = chunks[::-1]
        for c in chunks:
            n = min(TCHUNK, L - c)
            # per-chunk 3-D temporaries keep VMEM bounded for long sequences
            dA = jnp.exp(delta[c:c + n, :, None] * A[None, :, :])   # (n,di,ds)
            BX = dU[c:c + n, :, None] * Bm[c:c + n, None, :]        # (n,di,ds)
            steps = range(n - 1, -1, -1) if reverse else range(n)
            for j in steps:
                t = c + j
                h = dA[j] * h + BX[j]
                # y_t = C_t . h_t -- off the recurrence critical path (MXU slot)
                rows[t] = lax.dot_general(Cm[t:t + 1, :], h, NT_DIMS,
                                          preferred_element_type=f32)
        y = jnp.concatenate(rows, axis=0)                     # (L, di)
        return y + Dvec * u

    # ----------------- depth x VisionEncoderMambaBlock ----------------------
    for layer in range(depth):
        P = pool1[...] if layer == 0 else pool2[...]          # (T, L)
        skip = jnp.dot(P, x, preferred_element_type=f32)      # (T, D)

        xn = _layernorm(x, ln_w[...], ln_b[...])
        z = mm(xn, w1) + b1[...]
        xp = mm(xn, w2) + b2[...]

        # forward branch: pointwise conv1d -> softplus -> SSM
        uf = jax.nn.softplus(mm(xp, wcf) + bcf[...])
        y1 = ssm(uf, wdelta_f, wb_f, wc_f, bdt_f, A_f, D_f, reverse=False)
        x1 = _silu(jnp.dot(P, y1, preferred_element_type=f32) * gm)

        # backward branch: flip -> conv/SSM -> flip  ==  reverse-time scan
        ub = jax.nn.softplus(mm(xp, wcb) + bcb[...])
        y2 = ssm(ub, wdelta_b, wb_b, wc_b, bdt_b, A_b, D_b, reverse=True)
        x2 = _silu(jnp.dot(P, y2, preferred_element_type=f32) * gm)

        zp = _silu(jnp.dot(P, z, preferred_element_type=f32))
        x = zp * x1 + zp * x2 + skip                          # (T, D)

    # --------------------- final LayerNorm + tanh ---------------------------
    out_ref[0] = jnp.tanh(_layernorm(x, fn_w[...], fn_b[...]))


# ---------------------------------------------------------------------------
# Host-side constants (pooling matrix, gaussian decay mask)
# ---------------------------------------------------------------------------
def adaptive_pool_matrix(L, T):
    # exact nn.AdaptiveAvgPool1d(T) for input length L as a (T, L) matrix
    P = np.zeros((T, L), np.float32)
    for i in range(T):
        s = (i * L) // T
        e = -((-(i + 1) * L) // T)
        P[i, s:e] = 1.0 / (e - s)
    return jnp.asarray(P)


def gaussian_mask(T):
    # gaussian_decay_mask(type='center', method='index') for pooled length T
    center = (T + 1) // 2
    idx = np.arange(T, dtype=np.float32)
    sigma = np.abs(idx - center).mean()
    w = np.exp(-0.5 * (idx - center) ** 2 / (sigma ** 2))
    w = w / w.sum()
    return jnp.asarray(w, dtype=jnp.float32)


# ---------------------------------------------------------------------------
# Parameter preprocessing: transpose to (in, out), bf16-cast matmul weights,
# compose dt_proj with the deltaBC delta-slice, build pooling/mask constants.
# ---------------------------------------------------------------------------
def _prep_inputs(p, seq_length, num_tokens):
    f32 = jnp.float32
    dt_rank = p["wdt_f"].shape[1]
    d_state = (p["wdbc_f"].shape[0] - dt_rank) // 2

    def wT(w):                      # (out, in) -> (in, out), bf16 for the MXU
        return jnp.asarray(w, f32).T.astype(jnp.bfloat16)

    def row(v):                     # 1-D -> (1, n) f32 row
        return jnp.asarray(v, f32).reshape(1, -1)

    def ssm_weights(wdbc, wdt):
        wdbc = jnp.asarray(wdbc, f32)
        wdt = jnp.asarray(wdt, f32)
        wd = wdbc[:dt_rank]                          # (dt_rank, d)  delta slice
        wb = wdbc[dt_rank:dt_rank + d_state]         # (d_state, d)
        wc = wdbc[dt_rank + d_state:]                # (d_state, d)
        # no nonlinearity between deltaBC delta-slice and dt_proj -> compose
        wdelta = (wdt @ wd).T.astype(jnp.bfloat16)   # (d, dim_inner)
        return wdelta, wT(wb), wT(wc)

    wdelta_f, wb_f, wc_f = ssm_weights(p["wdbc_f"], p["wdt_f"])
    wdelta_b, wb_b, wc_b = ssm_weights(p["wdbc_b"], p["wdt_b"])

    pool1 = adaptive_pool_matrix(seq_length, num_tokens)          # (T, S)
    pool2 = adaptive_pool_matrix(num_tokens, num_tokens)          # (T, T)
    gm = gaussian_mask(num_tokens).reshape(num_tokens, 1)         # (T, 1)

    return (
        row(p["pe_ln1_w"]), row(p["pe_ln1_b"]), wT(p["pe_w"]), row(p["pe_b"]),
        row(p["pe_ln2_w"]), row(p["pe_ln2_b"]),
        jnp.asarray(p["pos"], f32)[0],
        row(p["ln_w"]), row(p["ln_b"]),
        wT(p["w1"]), row(p["b1"]), wT(p["w2"]), row(p["b2"]),
        wT(p["wcf"]), row(p["bcf"]), wT(p["wcb"]), row(p["bcb"]),
        wdelta_f, wb_f, wc_f, row(p["bdt_f"]),
        jnp.asarray(p["alog_f"], f32), row(p["D_f"]),
        wdelta_b, wb_b, wc_b, row(p["bdt_b"]),
        jnp.asarray(p["alog_b"], f32), row(p["D_b"]),
        pool1, pool2, gm,
        row(p["fn_w"]), row(p["fn_b"]),
    )


def t_mamba_forward(img, params, depth, num_tokens):
    # TODO(synk): snake_flatten (4-D NCHW image path) is not defined in the
    # source module; this implementation takes pre-flattened (B, seq, patch_dim)
    # inputs. emb_dropout is identity at inference; proj3 is unused in forward.
    B, S, Pd = img.shape
    D = params["w1"].shape[0]
    T = num_tokens
    weights = _prep_inputs(params, S, T)

    kernel = functools.partial(t_mamba_kernel, depth, S, T, min(8, S))

    in_specs = [pl.BlockSpec((1, S, Pd), lambda i: (i, 0, 0))]
    in_specs += [pl.BlockSpec(w.shape, lambda i, nd=w.ndim: (0,) * nd)
                 for w in weights]

    return pl.pallas_call(
        kernel,
        out_shape=jax.ShapeDtypeStruct((B, T, D), jnp.float32),
        grid=(B,),
        in_specs=in_specs,
        out_specs=pl.BlockSpec((1, T, D), lambda i: (i, 0, 0)),
        compiler_params=pltpu.CompilerParams(
            dimension_semantics=("parallel",),
            vmem_limit_bytes=32 * 1024 * 1024),
    )(img, *weights)


# ---------------------------------------------------------------------------
# Parameters (PyTorch orientation: Linear weights are (out, in))
# ---------------------------------------------------------------------------
def init_params(key, channels, patch_size, dim, seq_length):
    patch_dim = channels * patch_size * patch_size
    d = dim
    ks = jax.random.split(key, 10)

    def lin(k, out_f, in_f, scale=0.05):
        return jax.random.normal(k, (out_f, in_f), jnp.float32) * scale

    # A_log = log(arange(1, d_state+1)).repeat(dim_inner, 1); here all dims = d
    alog = jnp.tile(jnp.log(jnp.arange(1, d + 1, dtype=jnp.float32))[None, :],
                    (d, 1))
    return dict(
        # patch embedding
        pe_ln1_w=jnp.ones((patch_dim,)), pe_ln1_b=jnp.zeros((patch_dim,)),
        pe_w=lin(ks[0], d, patch_dim), pe_b=jnp.zeros((d,)),
        pe_ln2_w=jnp.ones((d,)), pe_ln2_b=jnp.zeros((d,)),
        pos=jax.random.normal(ks[1], (1, seq_length, d), jnp.float32) * 0.02,
        # VisionEncoderMambaBlock (weights shared across depth, as in PyTorch)
        ln_w=jnp.ones((d,)), ln_b=jnp.zeros((d,)),
        w1=lin(ks[2], d, d), b1=jnp.zeros((d,)),
        w2=lin(ks[3], d, d), b2=jnp.zeros((d,)),
        wcf=lin(ks[4], d, d), bcf=jnp.zeros((d,)),
        wcb=lin(ks[5], d, d), bcb=jnp.zeros((d,)),
        wdbc_f=lin(ks[6], 3 * d, d), wdt_f=lin(ks[7], d, d),
        bdt_f=jnp.zeros((d,)), alog_f=alog, D_f=jnp.ones((d,)),
        wdbc_b=lin(ks[8], 3 * d, d), wdt_b=lin(ks[9], d, d),
        bdt_b=jnp.zeros((d,)), alog_b=alog, D_b=jnp.ones((d,)),
        # final norm
        fn_w=jnp.ones((d,)), fn_b=jnp.zeros((d,)),
    )


if __name__ == "__main__":
    channels, patch_size = 4, 2
    dim = 32
    depth = 2
    emb_dropout = 0.0
    seq_length = 16
    num_tokens = 8
    batch = 2
    patch_dim = channels * patch_size * patch_size  # 16

    key = jax.random.PRNGKey(0)
    k_img, k_par = jax.random.split(key)
    img = jax.random.normal(k_img, (batch, seq_length, patch_dim), jnp.float32)
    params = init_params(k_par, channels, patch_size, dim, seq_length)

    fwd = jax.jit(functools.partial(t_mamba_forward,
                                    depth=depth, num_tokens=num_tokens))
    out = jax.block_until_ready(fwd(img, params))
    assert out.shape == (batch, num_tokens, dim)
    assert bool(jnp.all(jnp.isfinite(out)))
    print("KERNEL_OK")
</pallas_src>

<mosaic_0001>
module attributes {stable_mosaic.version = 11 : i64} {
  func.func @t_mamba_kernel(%arg0: i32, %arg1: memref<1x16x16xf32, #tpu.memory_space<vmem>>, %arg2: memref<1x16xf32, #tpu.memory_space<vmem>>, %arg3: memref<1x16xf32, #tpu.memory_space<vmem>>, %arg4: memref<16x32xbf16, #tpu.memory_space<vmem>>, %arg5: memref<1x32xf32, #tpu.memory_space<vmem>>, %arg6: memref<1x32xf32, #tpu.memory_space<vmem>>, %arg7: memref<1x32xf32, #tpu.memory_space<vmem>>, %arg8: memref<16x32xf32, #tpu.memory_space<vmem>>, %arg9: memref<1x32xf32, #tpu.memory_space<vmem>>, %arg10: memref<1x32xf32, #tpu.memory_space<vmem>>, %arg11: memref<32x32xbf16, #tpu.memory_space<vmem>>, %arg12: memref<1x32xf32, #tpu.memory_space<vmem>>, %arg13: memref<32x32xbf16, #tpu.memory_space<vmem>>, %arg14: memref<1x32xf32, #tpu.memory_space<vmem>>, %arg15: memref<32x32xbf16, #tpu.memory_space<vmem>>, %arg16: memref<1x32xf32, #tpu.memory_space<vmem>>, %arg17: memref<32x32xbf16, #tpu.memory_space<vmem>>, %arg18: memref<1x32xf32, #tpu.memory_space<vmem>>, %arg19: memref<32x32xbf16, #tpu.memory_space<vmem>>, %arg20: memref<32x32xbf16, #tpu.memory_space<vmem>>, %arg21: memref<32x32xbf16, #tpu.memory_space<vmem>>, %arg22: memref<1x32xf32, #tpu.memory_space<vmem>>, %arg23: memref<32x32xf32, #tpu.memory_space<vmem>>, %arg24: memref<1x32xf32, #tpu.memory_space<vmem>>, %arg25: memref<32x32xbf16, #tpu.memory_space<vmem>>, %arg26: memref<32x32xbf16, #tpu.memory_space<vmem>>, %arg27: memref<32x32xbf16, #tpu.memory_space<vmem>>, %arg28: memref<1x32xf32, #tpu.memory_space<vmem>>, %arg29: memref<32x32xf32, #tpu.memory_space<vmem>>, %arg30: memref<1x32xf32, #tpu.memory_space<vmem>>, %arg31: memref<8x16xf32, #tpu.memory_space<vmem>>, %arg32: memref<8x8xf32, #tpu.memory_space<vmem>>, %arg33: memref<8x1xf32, #tpu.memory_space<vmem>>, %arg34: memref<1x32xf32, #tpu.memory_space<vmem>>, %arg35: memref<1x32xf32, #tpu.memory_space<vmem>>, %arg36: memref<1x8x32xf32, #tpu.memory_space<vmem>>) attributes {dimension_semantics = [#tpu.dimension_semantics<parallel>], iteration_bounds = array<i64: 2>, scalar_prefetch = 0 : i64, scratch_operands = 0 : i64, tpu.core_type = #tpu.core_type<tc>, window_params = [{transform_indices = @transform_0, window_bounds = array<i64: 1, 16, 16>}, {pipeline_mode = #tpu.pipeline_mode<synchronous>, transform_indices = @transform_1, window_bounds = array<i64: 1, 16>}, {pipeline_mode = #tpu.pipeline_mode<synchronous>, transform_indices = @transform_2, window_bounds = array<i64: 1, 16>}, {pipeline_mode = #tpu.pipeline_mode<synchronous>, transform_indices = @transform_3, window_bounds = array<i64: 16, 32>}, {pipeline_mode = #tpu.pipeline_mode<synchronous>, transform_indices = @transform_4, window_bounds = array<i64: 1, 32>}, {pipeline_mode = #tpu.pipeline_mode<synchronous>, transform_indices = @transform_5, window_bounds = array<i64: 1, 32>}, {pipeline_mode = #tpu.pipeline_mode<synchronous>, transform_indices = @transform_6, window_bounds = array<i64: 1, 32>}, {pipeline_mode = #tpu.pipeline_mode<synchronous>, transform_indices = @transform_7, window_bounds = array<i64: 16, 32>}, {pipeline_mode = #tpu.pipeline_mode<synchronous>, transform_indices = @transform_8, window_bounds = array<i64: 1, 32>}, {pipeline_mode = #tpu.pipeline_mode<synchronous>, transform_indices = @transform_9, window_bounds = array<i64: 1, 32>}, {pipeline_mode = #tpu.pipeline_mode<synchronous>, transform_indices = @transform_10, window_bounds = array<i64: 32, 32>}, {pipeline_mode = #tpu.pipeline_mode<synchronous>, transform_indices = @transform_11, window_bounds = array<i64: 1, 32>}, {pipeline_mode = #tpu.pipeline_mode<synchronous>, transform_indices = @transform_12, window_bounds = array<i64: 32, 32>}, {pipeline_mode = #tpu.pipeline_mode<synchronous>, transform_indices = @transform_13, window_bounds = array<i64: 1, 32>}, {pipeline_mode = #tpu.pipeline_mode<synchronous>, transform_indices = @transform_14, window_bounds = array<i64: 32, 32>}, {pipeline_mode = #tpu.pipeline_mode<synchronous>, transform_indices = @transform_15, window_bounds = array<i64: 1, 32>}, {pipeline_mode = #tpu.pipeline_mode<synchronous>, transform_indices = @transform_16, window_bounds = array<i64: 32, 32>}, {pipeline_mode = #tpu.pipeline_mode<synchronous>, transform_indices = @transform_17, window_bounds = array<i64: 1, 32>}, {pipeline_mode = #tpu.pipeline_mode<synchronous>, transform_indices = @transform_18, window_bounds = array<i64: 32, 32>}, {pipeline_mode = #tpu.pipeline_mode<synchronous>, transform_indices = @transform_19, window_bounds = array<i64: 32, 32>}, {pipeline_mode = #tpu.pipeline_mode<synchronous>, transform_indices = @transform_20, window_bounds = array<i64: 32, 32>}, {pipeline_mode = #tpu.pipeline_mode<synchronous>, transform_indices = @transform_21, window_bounds = array<i64: 1, 32>}, {pipeline_mode = #tpu.pipeline_mode<synchronous>, transform_indices = @transform_22, window_bounds = array<i64: 32, 32>}, {pipeline_mode = #tpu.pipeline_mode<synchronous>, transform_indices = @transform_23, window_bounds = array<i64: 1, 32>}, {pipeline_mode = #tpu.pipeline_mode<synchronous>, transform_indices = @transform_24, window_bounds = array<i64: 32, 32>}, {pipeline_mode = #tpu.pipeline_mode<synchronous>, transform_indices = @transform_25, window_bounds = array<i64: 32, 32>}, {pipeline_mode = #tpu.pipeline_mode<synchronous>, transform_indices = @transform_26, window_bounds = array<i64: 32, 32>}, {pipeline_mode = #tpu.pipeline_mode<synchronous>, transform_indices = @transform_27, window_bounds = array<i64: 1, 32>}, {pipeline_mode = #tpu.pipeline_mode<synchronous>, transform_indices = @transform_28, window_bounds = array<i64: 32, 32>}, {pipeline_mode = #tpu.pipeline_mode<synchronous>, transform_indices = @transform_29, window_bounds = array<i64: 1, 32>}, {pipeline_mode = #tpu.pipeline_mode<synchronous>, transform_indices = @transform_30, window_bounds = array<i64: 8, 16>}, {pipeline_mode = #tpu.pipeline_mode<synchronous>, transform_indices = @transform_31, window_bounds = array<i64: 8, 8>}, {pipeline_mode = #tpu.pipeline_mode<synchronous>, transform_indices = @transform_32, window_bounds = array<i64: 8, 1>}, {pipeline_mode = #tpu.pipeline_mode<synchronous>, transform_indices = @transform_33, window_bounds = array<i64: 1, 32>}, {pipeline_mode = #tpu.pipeline_mode<synchronous>, transform_indices = @transform_34, window_bounds = array<i64: 1, 32>}, {transform_indices = @transform_35, window_bounds = array<i64: 1, 8, 32>}]} {
    %c0 = arith.constant 0 : index
    %c0_0 = arith.constant 0 : index
    %c0_1 = arith.constant 0 : index
    %0 = vector.load %arg1[%c0, %c0_0, %c0_1] : memref<1x16x16xf32, #tpu.memory_space<vmem>>, vector<1x16x16xf32>
    %1 = vector.shape_cast %0 : vector<1x16x16xf32> to vector<16x16xf32>
    %c0_2 = arith.constant 0 : index
    %c0_3 = arith.constant 0 : index
    %2 = vector.load %arg2[%c0_2, %c0_3] : memref<1x16xf32, #tpu.memory_space<vmem>>, vector<1x16xf32>
    %c0_4 = arith.constant 0 : index
    %c0_5 = arith.constant 0 : index
    %3 = vector.load %arg3[%c0_4, %c0_5] : memref<1x16xf32, #tpu.memory_space<vmem>>, vector<1x16xf32>
    %cst = arith.constant dense<0.000000e+00> : vector<16xf32>
    %4 = vector.multi_reduction <add>, %1, %cst [1] : vector<16x16xf32> to vector<16xf32>
    %5 = vector.shape_cast %4 : vector<16xf32> to vector<16x1xf32>
    %cst_6 = arith.constant 1.600000e+01 : f32
    %6 = vector.broadcast %cst_6 : f32 to vector<16x1xf32>
    %7 = arith.divf %5, %6 : vector<16x1xf32>
    %8 = vector.broadcast %7 : vector<16x1xf32> to vector<16x16xf32>
    %9 = arith.subf %1, %8 : vector<16x16xf32>
    %10 = arith.mulf %9, %9 : vector<16x16xf32>
    %cst_7 = arith.constant dense<0.000000e+00> : vector<16xf32>
    %11 = vector.multi_reduction <add>, %10, %cst_7 [1] : vector<16x16xf32> to vector<16xf32>
    %12 = vector.shape_cast %11 : vector<16xf32> to vector<16x1xf32>
    %cst_8 = arith.constant 1.600000e+01 : f32
    %13 = vector.broadcast %cst_8 : f32 to vector<16x1xf32>
    %14 = arith.divf %12, %13 : vector<16x1xf32>
    %15 = vector.broadcast %7 : vector<16x1xf32> to vector<16x16xf32>
    %16 = arith.subf %1, %15 : vector<16x16xf32>
    %cst_9 = arith.constant 9.99999974E-6 : f32
    %17 = vector.broadcast %cst_9 : f32 to vector<16x1xf32>
    %18 = arith.addf %14, %17 : vector<16x1xf32>
    %19 = math.rsqrt %18 : vector<16x1xf32>
    %20 = vector.broadcast %19 : vector<16x1xf32> to vector<16x16xf32>
    %21 = arith.mulf %16, %20 : vector<16x16xf32>
    %22 = vector.broadcast %2 : vector<1x16xf32> to vector<16x16xf32>
    %23 = arith.mulf %21, %22 : vector<16x16xf32>
    %24 = vector.broadcast %3 : vector<1x16xf32> to vector<16x16xf32>
    %25 = arith.addf %23, %24 : vector<16x16xf32>
    %26 = arith.truncf %25 : vector<16x16xf32> to vector<16x16xbf16>
    %c0_10 = arith.constant 0 : index
    %c0_11 = arith.constant 0 : index
    %27 = vector.load %arg4[%c0_10, %c0_11] : memref<16x32xbf16, #tpu.memory_space<vmem>>, vector<16x32xbf16>
    %cst_12 = arith.constant dense<0.000000e+00> : vector<16x32xf32>
    %28 = tpu.matmul %26, %27, %cst_12 {dimension_numbers = #tpu.dot_dimension_numbers<[1], [0], [0], [1], [0, 0, 1, 1], [], []>} : vector<16x16xbf16>, vector<16x32xbf16>, vector<16x32xf32> -> vector<16x32xf32>
    %c0_13 = arith.constant 0 : index
    %c0_14 = arith.constant 0 : index
    %29 = vector.load %arg5[%c0_13, %c0_14] : memref<1x32xf32, #tpu.memory_space<vmem>>, vector<1x32xf32>
    %30 = vector.broadcast %29 : vector<1x32xf32> to vector<16x32xf32>
    %31 = arith.addf %28, %30 : vector<16x32xf32>
    %c0_15 = arith.constant 0 : index
    %c0_16 = arith.constant 0 : index
    %32 = vector.load %arg6[%c0_15, %c0_16] : memref<1x32xf32, #tpu.memory_space<vmem>>, vector<1x32xf32>
    %c0_17 = arith.constant 0 : index
    %c0_18 = arith.constant 0 : index
    %33 = vector.load %arg7[%c0_17, %c0_18] : memref<1x32xf32, #tpu.memory_space<vmem>>, vector<1x32xf32>
    %cst_19 = arith.constant dense<0.000000e+00> : vector<16xf32>
    %34 = vector.multi_reduction <add>, %31, %cst_19 [1] : vector<16x32xf32> to vector<16xf32>
    %35 = vector.shape_cast %34 : vector<16xf32> to vector<16x1xf32>
    %cst_20 = arith.constant 3.200000e+01 : f32
    %36 = vector.broadcast %cst_20 : f32 to vector<16x1xf32>
    %37 = arith.divf %35, %36 : vector<16x1xf32>
    %38 = vector.broadcast %37 : vector<16x1xf32> to vector<16x32xf32>
    %39 = arith.subf %31, %38 : vector<16x32xf32>
    %40 = arith.mulf %39, %39 : vector<16x32xf32>
    %cst_21 = arith.constant dense<0.000000e+00> : vector<16xf32>
    %41 = vector.multi_reduction <add>, %40, %cst_21 [1] : vector<16x32xf32> to vector<16xf32>
    %42 = vector.shape_cast %41 : vector<16xf32> to vector<16x1xf32>
    %cst_22 = arith.constant 3.200000e+01 : f32
    %43 = vector.broadcast %cst_22 : f32 to vector<16x1xf32>
    %44 = arith.divf %42, %43 : vector<16x1xf32>
    %45 = vector.broadcast %37 : vector<16x1xf32> to vector<16x32xf32>
    %46 = arith.subf %31, %45 : vector<16x32xf32>
    %cst_23 = arith.constant 9.99999974E-6 : f32
    %47 = vector.broadcast %cst_23 : f32 to vector<16x1xf32>
    %48 = arith.addf %44, %47 : vector<16x1xf32>
    %49 = math.rsqrt %48 : vector<16x1xf32>
    %50 = vector.broadcast %49 : vector<16x1xf32> to vector<16x32xf32>
    %51 = arith.mulf %46, %50 : vector<16x32xf32>
    %52 = vector.broadcast %32 : vector<1x32xf32> to vector<16x32xf32>
    %53 = arith.mulf %51, %52 : vector<16x32xf32>
    %54 = vector.broadcast %33 : vector<1x32xf32> to vector<16x32xf32>
    %55 = arith.addf %53, %54 : vector<16x32xf32>
    %c0_24 = arith.constant 0 : index
    %c0_25 = arith.constant 0 : index
    %56 = vector.load %arg8[%c0_24, %c0_25] : memref<16x32xf32, #tpu.memory_space<vmem>>, vector<16x32xf32>
    %57 = arith.addf %55, %56 : vector<16x32xf32>
    %c0_26 = arith.constant 0 : index
    %c0_27 = arith.constant 0 : index
    %58 = vector.load %arg23[%c0_26, %c0_27] : memref<32x32xf32, #tpu.memory_space<vmem>>, vector<32x32xf32>
    %59 = math.exp %58 : vector<32x32xf32>
    %cst_28 = arith.constant 0.000000e+00 : f32
    %60 = vector.broadcast %cst_28 : f32 to vector<32x32xf32>
    %61 = arith.subf %60, %59 : vector<32x32xf32>
    %c0_29 = arith.constant 0 : index
    %c0_30 = arith.constant 0 : index
    %62 = vector.load %arg29[%c0_29, %c0_30] : memref<32x32xf32, #tpu.memory_space<vmem>>, vector<32x32xf32>
    %63 = math.exp %62 : vector<32x32xf32>
    %cst_31 = arith.constant 0.000000e+00 : f32
    %64 = vector.broadcast %cst_31 : f32 to vector<32x32xf32>
    %65 = arith.subf %64, %63 : vector<32x32xf32>
    %c0_32 = arith.constant 0 : index
    %c0_33 = arith.constant 0 : index
    %66 = vector.load %arg24[%c0_32, %c0_33] : memref<1x32xf32, #tpu.memory_space<vmem>>, vector<1x32xf32>
    %c0_34 = arith.constant 0 : index
    %c0_35 = arith.constant 0 : index
    %67 = vector.load %arg30[%c0_34, %c0_35] : memref<1x32xf32, #tpu.memory_space<vmem>>, vector<1x32xf32>
    %c0_36 = arith.constant 0 : index
    %c0_37 = arith.constant 0 : index
    %68 = vector.load %arg33[%c0_36, %c0_37] : memref<8x1xf32, #tpu.memory_space<vmem>>, vector<8x1xf32>
    %c0_38 = arith.constant 0 : index
    %c0_39 = arith.constant 0 : index
    %69 = vector.load %arg31[%c0_38, %c0_39] : memref<8x16xf32, #tpu.memory_space<vmem>>, vector<8x16xf32>
    %cst_40 = arith.constant dense<0.000000e+00> : vector<8x32xf32>
    %70 = tpu.matmul %69, %57, %cst_40 {dimension_numbers = #tpu.dot_dimension_numbers<[1], [0], [0], [1], [0, 0, 1, 1], [], []>} : vector<8x16xf32>, vector<16x32xf32>, vector<8x32xf32> -> vector<8x32xf32>
    %c0_41 = arith.constant 0 : index
    %c0_42 = arith.constant 0 : index
    %71 = vector.load %arg9[%c0_41, %c0_42] : memref<1x32xf32, #tpu.memory_space<vmem>>, vector<1x32xf32>
    %c0_43 = arith.constant 0 : index
    %c0_44 = arith.constant 0 : index
    %72 = vector.load %arg10[%c0_43, %c0_44] : memref<1x32xf32, #tpu.memory_space<vmem>>, vector<1x32xf32>
    %cst_45 = arith.constant dense<0.000000e+00> : vector<16xf32>
    %73 = vector.multi_reduction <add>, %57, %cst_45 [1] : vector<16x32xf32> to vector<16xf32>
    %74 = vector.shape_cast %73 : vector<16xf32> to vector<16x1xf32>
    %cst_46 = arith.constant 3.200000e+01 : f32
    %75 = vector.broadcast %cst_46 : f32 to vector<16x1xf32>
    %76 = arith.divf %74, %75 : vector<16x1xf32>
    %77 = vector.broadcast %76 : vector<16x1xf32> to vector<16x32xf32>
    %78 = arith.subf %57, %77 : vector<16x32xf32>
    %79 = arith.mulf %78, %78 : vector<16x32xf32>
    %cst_47 = arith.constant dense<0.000000e+00> : vector<16xf32>
    %80 = vector.multi_reduction <add>, %79, %cst_47 [1] : vector<16x32xf32> to vector<16xf32>
    %81 = vector.shape_cast %80 : vector<16xf32> to vector<16x1xf32>
    %cst_48 = arith.constant 3.200000e+01 : f32
    %82 = vector.broadcast %cst_48 : f32 to vector<16x1xf32>
    %83 = arith.divf %81, %82 : vector<16x1xf32>
    %84 = vector.broadcast %76 : vector<16x1xf32> to vector<16x32xf32>
    %85 = arith.subf %57, %84 : vector<16x32xf32>
    %cst_49 = arith.constant 9.99999974E-6 : f32
    %86 = vector.broadcast %cst_49 : f32 to vector<16x1xf32>
    %87 = arith.addf %83, %86 : vector<16x1xf32>
    %88 = math.rsqrt %87 : vector<16x1xf32>
    %89 = vector.broadcast %88 : vector<16x1xf32> to vector<16x32xf32>
    %90 = arith.mulf %85, %89 : vector<16x32xf32>
    %91 = vector.broadcast %71 : vector<1x32xf32> to vector<16x32xf32>
    %92 = arith.mulf %90, %91 : vector<16x32xf32>
    %93 = vector.broadcast %72 : vector<1x32xf32> to vector<16x32xf32>
    %94 = arith.addf %92, %93 : vector<16x32xf32>
    %95 = arith.truncf %94 : vector<16x32xf32> to vector<16x32xbf16>
    %c0_50 = arith.constant 0 : index
    %c0_51 = arith.constant 0 : index
    %96 = vector.load %arg11[%c0_50, %c0_51] : memref<32x32xbf16, #tpu.memory_space<vmem>>, vector<32x32xbf16>
    %cst_52 = arith.constant dense<0.000000e+00> : vector<16x32xf32>
    %97 = tpu.matmul %95, %96, %cst_52 {dimension_numbers = #tpu.dot_dimension_numbers<[1], [0], [0], [1], [0, 0, 1, 1], [], []>} : vector<16x32xbf16>, vector<32x32xbf16>, vector<16x32xf32> -> vector<16x32xf32>
    %c0_53 = arith.constant 0 : index
    %c0_54 = arith.constant 0 : index
    %98 = vector.load %arg12[%c0_53, %c0_54] : memref<1x32xf32, #tpu.memory_space<vmem>>, vector<1x32xf32>
    %99 = vector.broadcast %98 : vector<1x32xf32> to vector<16x32xf32>
    %100 = arith.addf %97, %99 : vector<16x32xf32>
    %101 = arith.truncf %94 : vector<16x32xf32> to vector<16x32xbf16>
    %c0_55 = arith.constant 0 : index
    %c0_56 = arith.constant 0 : index
    %102 = vector.load %arg13[%c0_55, %c0_56] : memref<32x32xbf16, #tpu.memory_space<vmem>>, vector<32x32xbf16>
    %cst_57 = arith.constant dense<0.000000e+00> : vector<16x32xf32>
    %103 = tpu.matmul %101, %102, %cst_57 {dimension_numbers = #tpu.dot_dimension_numbers<[1], [0], [0], [1], [0, 0, 1, 1], [], []>} : vector<16x32xbf16>, vector<32x32xbf16>, vector<16x32xf32> -> vector<16x32xf32>
    %c0_58 = arith.constant 0 : index
    %c0_59 = arith.constant 0 : index
    %104 = vector.load %arg14[%c0_58, %c0_59] : memref<1x32xf32, #tpu.memory_space<vmem>>, vector<1x32xf32>
    %105 = vector.broadcast %104 : vector<1x32xf32> to vector<16x32xf32>
    %106 = arith.addf %103, %105 : vector<16x32xf32>
    %107 = arith.truncf %106 : vector<16x32xf32> to vector<16x32xbf16>
    %c0_60 = arith.constant 0 : index
    %c0_61 = arith.constant 0 : index
    %108 = vector.load %arg15[%c0_60, %c0_61] : memref<32x32xbf16, #tpu.memory_space<vmem>>, vector<32x32xbf16>
    %cst_62 = arith.constant dense<0.000000e+00> : vector<16x32xf32>
    %109 = tpu.matmul %107, %108, %cst_62 {dimension_numbers = #tpu.dot_dimension_numbers<[1], [0], [0], [1], [0, 0, 1, 1], [], []>} : vector<16x32xbf16>, vector<32x32xbf16>, vector<16x32xf32> -> vector<16x32xf32>
    %c0_63 = arith.constant 0 : index
    %c0_64 = arith.constant 0 : index
    %110 = vector.load %arg16[%c0_63, %c0_64] : memref<1x32xf32, #tpu.memory_space<vmem>>, vector<1x32xf32>
    %111 = vector.broadcast %110 : vector<1x32xf32> to vector<16x32xf32>
    %112 = arith.addf %109, %111 : vector<16x32xf32>
    %cst_65 = arith.constant 0.000000e+00 : f32
    %113 = vector.broadcast %cst_65 : f32 to vector<16x32xf32>
    %114 = arith.maximumf %112, %113 : vector<16x32xf32>
    %115 = vector.broadcast %cst_65 : f32 to vector<16x32xf32>
    %116 = arith.subf %112, %115 : vector<16x32xf32>
    %117 = arith.cmpf one, %116, %116 : vector<16x32xf32>
    %118 = vector.broadcast %cst_65 : f32 to vector<16x32xf32>
    %119 = arith.addf %112, %118 : vector<16x32xf32>
    %120 = math.absf %116 : vector<16x32xf32>
    %cst_66 = arith.constant 0.000000e+00 : f32
    %121 = vector.broadcast %cst_66 : f32 to vector<16x32xf32>
    %122 = arith.subf %121, %120 : vector<16x32xf32>
    %123 = math.exp %122 : vector<16x32xf32>
    %124 = math.log1p %123 : vector<16x32xf32>
    %125 = arith.addf %114, %124 : vector<16x32xf32>
    %126 = arith.select %117, %119, %125 : vector<16x32xi1>, vector<16x32xf32>
    %127 = arith.truncf %126 : vector<16x32xf32> to vector<16x32xbf16>
    %c0_67 = arith.constant 0 : index
    %c0_68 = arith.constant 0 : index
    %128 = vector.load %arg19[%c0_67, %c0_68] : memref<32x32xbf16, #tpu.memory_space<vmem>>, vector<32x32xbf16>
    %cst_69 = arith.constant dense<0.000000e+00> : vector<16x32xf32>
    %129 = tpu.matmul %127, %128, %cst_69 {dimension_numbers = #tpu.dot_dimension_numbers<[1], [0], [0], [1], [0, 0, 1, 1], [], []>} : vector<16x32xbf16>, vector<32x32xbf16>, vector<16x32xf32> -> vector<16x32xf32>
    %c0_70 = arith.constant 0 : index
    %c0_71 = arith.constant 0 : index
    %130 = vector.load %arg22[%c0_70, %c0_71] : memref<1x32xf32, #tpu.memory_space<vmem>>, vector<1x32xf32>
    %131 = vector.broadcast %130 : vector<1x32xf32> to vector<16x32xf32>
    %132 = arith.addf %129, %131 : vector<16x32xf32>
    %cst_72 = arith.constant 0.000000e+00 : f32
    %133 = vector.broadcast %cst_72 : f32 to vector<16x32xf32>
    %134 = arith.maximumf %132, %133 : vector<16x32xf32>
    %135 = vector.broadcast %cst_72 : f32 to vector<16x32xf32>
    %136 = arith.subf %132, %135 : vector<16x32xf32>
    %137 = arith.cmpf one, %136, %136 : vector<16x32xf32>
    %138 = vector.broadcast %cst_72 : f32 to vector<16x32xf32>
    %139 = arith.addf %132, %138 : vector<16x32xf32>
    %140 = math.absf %136 : vector<16x32xf32>
    %cst_73 = arith.constant 0.000000e+00 : f32
    %141 = vector.broadcast %cst_73 : f32 to vector<16x32xf32>
    %142 = arith.subf %141, %140 : vector<16x32xf32>
    %143 = math.exp %142 : vector<16x32xf32>
    %144 = math.log1p %143 : vector<16x32xf32>
    %145 = arith.addf %134, %144 : vector<16x32xf32>
    %146 = arith.select %137, %139, %145 : vector<16x32xi1>, vector<16x32xf32>
    %147 = arith.truncf %126 : vector<16x32xf32> to vector<16x32xbf16>
    %c0_74 = arith.constant 0 : index
    %c0_75 = arith.constant 0 : index
    %148 = vector.load %arg20[%c0_74, %c0_75] : memref<32x32xbf16, #tpu.memory_space<vmem>>, vector<32x32xbf16>
    %cst_76 = arith.constant dense<0.000000e+00> : vector<16x32xf32>
    %149 = tpu.matmul %147, %148, %cst_76 {dimension_numbers = #tpu.dot_dimension_numbers<[1], [0], [0], [1], [0, 0, 1, 1], [], []>} : vector<16x32xbf16>, vector<32x32xbf16>, vector<16x32xf32> -> vector<16x32xf32>
    %150 = arith.truncf %126 : vector<16x32xf32> to vector<16x32xbf16>
    %c0_77 = arith.constant 0 : index
    %c0_78 = arith.constant 0 : index
    %151 = vector.load %arg21[%c0_77, %c0_78] : memref<32x32xbf16, #tpu.memory_space<vmem>>, vector<32x32xbf16>
    %cst_79 = arith.constant dense<0.000000e+00> : vector<16x32xf32>
    %152 = tpu.matmul %150, %151, %cst_79 {dimension_numbers = #tpu.dot_dimension_numbers<[1], [0], [0], [1], [0, 0, 1, 1], [], []>} : vector<16x32xbf16>, vector<32x32xbf16>, vector<16x32xf32> -> vector<16x32xf32>
    %153 = arith.mulf %146, %126 : vector<16x32xf32>
    %cst_80 = arith.constant 0.000000e+00 : f32
    %154 = vector.broadcast %cst_80 : f32 to vector<32x32xf32>
    %155 = vector.extract_strided_slice %146 {offsets = [0, 0], sizes = [8, 32], strides = [1, 1]} : vector<16x32xf32> to vector<8x32xf32>
    %156 = vector.shape_cast %155 : vector<8x32xf32> to vector<8x32x1xf32>
    %157 = vector.shape_cast %61 : vector<32x32xf32> to vector<1x32x32xf32>
    %158 = vector.broadcast %156 : vector<8x32x1xf32> to vector<8x32x32xf32>
    %159 = vector.broadcast %157 : vector<1x32x32xf32> to vector<8x32x32xf32>
    %160 = arith.mulf %158, %159 : vector<8x32x32xf32>
    %161 = math.exp %160 : vector<8x32x32xf32>
    %162 = vector.extract_strided_slice %153 {offsets = [0, 0], sizes = [8, 32], strides = [1, 1]} : vector<16x32xf32> to vector<8x32xf32>
    %163 = vector.shape_cast %162 : vector<8x32xf32> to vector<8x32x1xf32>
    %164 = vector.extract_strided_slice %149 {offsets = [0, 0], sizes = [8, 32], strides = [1, 1]} : vector<16x32xf32> to vector<8x32xf32>
    %165 = vector.shape_cast %164 : vector<8x32xf32> to vector<8x1x32xf32>
    %166 = vector.broadcast %163 : vector<8x32x1xf32> to vector<8x32x32xf32>
    %167 = vector.broadcast %165 : vector<8x1x32xf32> to vector<8x32x32xf32>
    %168 = arith.mulf %166, %167 : vector<8x32x32xf32>
    %169 = vector.extract_strided_slice %161 {offsets = [0, 0, 0], sizes = [1, 32, 32], strides = [1, 1, 1]} : vector<8x32x32xf32> to vector<1x32x32xf32>
    %170 = vector.shape_cast %169 : vector<1x32x32xf32> to vector<32x32xf32>
    %171 = arith.mulf %170, %154 : vector<32x32xf32>
    %172 = vector.extract_strided_slice %168 {offsets = [0, 0, 0], sizes = [1, 32, 32], strides = [1, 1, 1]} : vector<8x32x32xf32> to vector<1x32x32xf32>
    %173 = vector.shape_cast %172 : vector<1x32x32xf32> to vector<32x32xf32>
    %174 = arith.addf %171, %173 : vector<32x32xf32>
    %175 = vector.extract_strided_slice %152 {offsets = [0, 0], sizes = [1, 32], strides = [1, 1]} : vector<16x32xf32> to vector<1x32xf32>
    %cst_81 = arith.constant dense<0.000000e+00> : vector<1x32xf32>
    %176 = tpu.matmul %175, %174, %cst_81 {dimension_numbers = #tpu.dot_dimension_numbers<[1], [1], [0], [0], [0, 0, 1, 0], [], []>} : vector<1x32xf32>, vector<32x32xf32>, vector<1x32xf32> -> vector<1x32xf32>
    %177 = vector.extract_strided_slice %161 {offsets = [1, 0, 0], sizes = [1, 32, 32], strides = [1, 1, 1]} : vector<8x32x32xf32> to vector<1x32x32xf32>
    %178 = vector.shape_cast %177 : vector<1x32x32xf32> to vector<32x32xf32>
    %179 = arith.mulf %178, %174 : vector<32x32xf32>
    %180 = vector.extract_strided_slice %168 {offsets = [1, 0, 0], sizes = [1, 32, 32], strides = [1, 1, 1]} : vector<8x32x32xf32> to vector<1x32x32xf32>
    %181 = vector.shape_cast %180 : vector<1x32x32xf32> to vector<32x32xf32>
    %182 = arith.addf %179, %181 : vector<32x32xf32>
    %183 = vector.extract_strided_slice %152 {offsets = [1, 0], sizes = [1, 32], strides = [1, 1]} : vector<16x32xf32> to vector<1x32xf32>
    %cst_82 = arith.constant dense<0.000000e+00> : vector<1x32xf32>
    %184 = tpu.matmul %183, %182, %cst_82 {dimension_numbers = #tpu.dot_dimension_numbers<[1], [1], [0], [0], [0, 0, 1, 0], [], []>} : vector<1x32xf32>, vector<32x32xf32>, vector<1x32xf32> -> vector<1x32xf32>
    %185 = vector.extract_strided_slice %161 {offsets = [2, 0, 0], sizes = [1, 32, 32], strides = [1, 1, 1]} : vector<8x32x32xf32> to vector<1x32x32xf32>
    %186 = vector.shape_cast %185 : vector<1x32x32xf32> to vector<32x32xf32>
    %187 = arith.mulf %186, %182 : vector<32x32xf32>
    %188 = vector.extract_strided_slice %168 {offsets = [2, 0, 0], sizes = [1, 32, 32], strides = [1, 1, 1]} : vector<8x32x32xf32> to vector<1x32x32xf32>
    %189 = vector.shape_cast %188 : vector<1x32x32xf32> to vector<32x32xf32>
    %190 = arith.addf %187, %189 : vector<32x32xf32>
    %191 = vector.extract_strided_slice %152 {offsets = [2, 0], sizes = [1, 32], strides = [1, 1]} : vector<16x32xf32> to vector<1x32xf32>
    %cst_83 = arith.constant dense<0.000000e+00> : vector<1x32xf32>
    %192 = tpu.matmul %191, %190, %cst_83 {dimension_numbers = #tpu.dot_dimension_numbers<[1], [1], [0], [0], [0, 0, 1, 0], [], []>} : vector<1x32xf32>, vector<32x32xf32>, vector<1x32xf32> -> vector<1x32xf32>
    %193 = vector.extract_strided_slice %161 {offsets = [3, 0, 0], sizes = [1, 32, 32], strides = [1, 1, 1]} : vector<8x32x32xf32> to vector<1x32x32xf32>
    %194 = vector.shape_cast %193 : vector<1x32x32xf32> to vector<32x32xf32>
    %195 = arith.mulf %194, %190 : vector<32x32xf32>
    %196 = vector.extract_strided_slice %168 {offsets = [3, 0, 0], sizes = [1, 32, 32], strides = [1, 1, 1]} : vector<8x32x32xf32> to vector<1x32x32xf32>
    %197 = vector.shape_cast %196 : vector<1x32x32xf32> to vector<32x32xf32>
    %198 = arith.addf %195, %197 : vector<32x32xf32>
    %199 = vector.extract_strided_slice %152 {offsets = [3, 0], sizes = [1, 32], strides = [1, 1]} : vector<16x32xf32> to vector<1x32xf32>
    %cst_84 = arith.constant dense<0.000000e+00> : vector<1x32xf32>
    %200 = tpu.matmul %199, %198, %cst_84 {dimension_numbers = #tpu.dot_dimension_numbers<[1], [1], [0], [0], [0, 0, 1, 0], [], []>} : vector<1x32xf32>, vector<32x32xf32>, vector<1x32xf32> -> vector<1x32xf32>
    %201 = vector.extract_strided_slice %161 {offsets = [4, 0, 0], sizes = [1, 32, 32], strides = [1, 1, 1]} : vector<8x32x32xf32> to vector<1x32x32xf32>
    %202 = vector.shape_cast %201 : vector<1x32x32xf32> to vector<32x32xf32>
    %203 = arith.mulf %202, %198 : vector<32x32xf32>
    %204 = vector.extract_strided_slice %168 {offsets = [4, 0, 0], sizes = [1, 32, 32], strides = [1, 1, 1]} : vector<8x32x32xf32> to vector<1x32x32xf32>
    %205 = vector.shape_cast %204 : vector<1x32x32xf32> to vector<32x32xf32>
    %206 = arith.addf %203, %205 : vector<32x32xf32>
    %207 = vector.extract_strided_slice %152 {offsets = [4, 0], sizes = [1, 32], strides = [1, 1]} : vector<16x32xf32> to vector<1x32xf32>
    %cst_85 = arith.constant dense<0.000000e+00> : vector<1x32xf32>
    %208 = tpu.matmul %207, %206, %cst_85 {dimension_numbers = #tpu.dot_dimension_numbers<[1], [1], [0], [0], [0, 0, 1, 0], [], []>} : vector<1x32xf32>, vector<32x32xf32>, vector<1x32xf32> -> vector<1x32xf32>
    %209 = vector.extract_strided_slice %161 {offsets = [5, 0, 0], sizes = [1, 32, 32], strides = [1, 1, 1]} : vector<8x32x32xf32> to vector<1x32x32xf32>
    %210 = vector.shape_cast %209 : vector<1x32x32xf32> to vector<32x32xf32>
    %211 = arith.mulf %210, %206 : vector<32x32xf32>
    %212 = vector.extract_strided_slice %168 {offsets = [5, 0, 0], sizes = [1, 32, 32], strides = [1, 1, 1]} : vector<8x32x32xf32> to vector<1x32x32xf32>
    %213 = vector.shape_cast %212 : vector<1x32x32xf32> to vector<32x32xf32>
    %214 = arith.addf %211, %213 : vector<32x32xf32>
    %215 = vector.extract_strided_slice %152 {offsets = [5, 0], sizes = [1, 32], strides = [1, 1]} : vector<16x32xf32> to vector<1x32xf32>
    %cst_86 = arith.constant dense<0.000000e+00> : vector<1x32xf32>
    %216 = tpu.matmul %215, %214, %cst_86 {dimension_numbers = #tpu.dot_dimension_numbers<[1], [1], [0], [0], [0, 0, 1, 0], [], []>} : vector<1x32xf32>, vector<32x32xf32>, vector<1x32xf32> -> vector<1x32xf32>
    %217 = vector.extract_strided_slice %161 {offsets = [6, 0, 0], sizes = [1, 32, 32], strides = [1, 1, 1]} : vector<8x32x32xf32> to vector<1x32x32xf32>
    %218 = vector.shape_cast %217 : vector<1x32x32xf32> to vector<32x32xf32>
    %219 = arith.mulf %218, %214 : vector<32x32xf32>
    %220 = vector.extract_strided_slice %168 {offsets = [6, 0, 0], sizes = [1, 32, 32], strides = [1, 1, 1]} : vector<8x32x32xf32> to vector<1x32x32xf32>
    %221 = vector.shape_cast %220 : vector<1x32x32xf32> to vector<32x32xf32>
    %222 = arith.addf %219, %221 : vector<32x32xf32>
    %223 = vector.extract_strided_slice %152 {offsets = [6, 0], sizes = [1, 32], strides = [1, 1]} : vector<16x32xf32> to vector<1x32xf32>
    %cst_87 = arith.constant dense<0.000000e+00> : vector<1x32xf32>
    %224 = tpu.matmul %223, %222, %cst_87 {dimension_numbers = #tpu.dot_dimension_numbers<[1], [1], [0], [0], [0, 0, 1, 0], [], []>} : vector<1x32xf32>, vector<32x32xf32>, vector<1x32xf32> -> vector<1x32xf32>
    %225 = vector.extract_strided_slice %161 {offsets = [7, 0, 0], sizes = [1, 32, 32], strides = [1, 1, 1]} : vector<8x32x32xf32> to vector<1x32x32xf32>
    %226 = vector.shape_cast %225 : vector<1x32x32xf32> to vector<32x32xf32>
    %227 = arith.mulf %226, %222 : vector<32x32xf32>
    %228 = vector.extract_strided_slice %168 {offsets = [7, 0, 0], sizes = [1, 32, 32], strides = [1, 1, 1]} : vector<8x32x32xf32> to vector<1x32x32xf32>
    %229 = vector.shape_cast %228 : vector<1x32x32xf32> to vector<32x32xf32>
    %230 = arith.addf %227, %229 : vector<32x32xf32>
    %231 = vector.extract_strided_slice %152 {offsets = [7, 0], sizes = [1, 32], strides = [1, 1]} : vector<16x32xf32> to vector<1x32xf32>
    %cst_88 = arith.constant dense<0.000000e+00> : vector<1x32xf32>
    %232 = tpu.matmul %231, %230, %cst_88 {dimension_numbers = #tpu.dot_dimension_numbers<[1], [1], [0], [0], [0, 0, 1, 0], [], []>} : vector<1x32xf32>, vector<32x32xf32>, vector<1x32xf32> -> vector<1x32xf32>
    %233 = vector.extract_strided_slice %146 {offsets = [8, 0], sizes = [8, 32], strides = [1, 1]} : vector<16x32xf32> to vector<8x32xf32>
    %234 = vector.shape_cast %233 : vector<8x32xf32> to vector<8x32x1xf32>
    %235 = vector.shape_cast %61 : vector<32x32xf32> to vector<1x32x32xf32>
    %236 = vector.broadcast %234 : vector<8x32x1xf32> to vector<8x32x32xf32>
    %237 = vector.broadcast %235 : vector<1x32x32xf32> to vector<8x32x32xf32>
    %238 = arith.mulf %236, %237 : vector<8x32x32xf32>
    %239 = math.exp %238 : vector<8x32x32xf32>
    %240 = vector.extract_strided_slice %153 {offsets = [8, 0], sizes = [8, 32], strides = [1, 1]} : vector<16x32xf32> to vector<8x32xf32>
    %241 = vector.shape_cast %240 : vector<8x32xf32> to vector<8x32x1xf32>
    %242 = vector.extract_strided_slice %149 {offsets = [8, 0], sizes = [8, 32], strides = [1, 1]} : vector<16x32xf32> to vector<8x32xf32>
    %243 = vector.shape_cast %242 : vector<8x32xf32> to vector<8x1x32xf32>
    %244 = vector.broadcast %241 : vector<8x32x1xf32> to vector<8x32x32xf32>
    %245 = vector.broadcast %243 : vector<8x1x32xf32> to vector<8x32x32xf32>
    %246 = arith.mulf %244, %245 : vector<8x32x32xf32>
    %247 = vector.extract_strided_slice %239 {offsets = [0, 0, 0], sizes = [1, 32, 32], strides = [1, 1, 1]} : vector<8x32x32xf32> to vector<1x32x32xf32>
    %248 = vector.shape_cast %247 : vector<1x32x32xf32> to vector<32x32xf32>
    %249 = arith.mulf %248, %230 : vector<32x32xf32>
    %250 = vector.extract_strided_slice %246 {offsets = [0, 0, 0], sizes = [1, 32, 32], strides = [1, 1, 1]} : vector<8x32x32xf32> to vector<1x32x32xf32>
    %251 = vector.shape_cast %250 : vector<1x32x32xf32> to vector<32x32xf32>
    %252 = arith.addf %249, %251 : vector<32x32xf32>
    %253 = vector.extract_strided_slice %152 {offsets = [8, 0], sizes = [1, 32], strides = [1, 1]} : vector<16x32xf32> to vector<1x32xf32>
    %cst_89 = arith.constant dense<0.000000e+00> : vector<1x32xf32>
    %254 = tpu.matmul %253, %252, %cst_89 {dimension_numbers = #tpu.dot_dimension_numbers<[1], [1], [0], [0], [0, 0, 1, 0], [], []>} : vector<1x32xf32>, vector<32x32xf32>, vector<1x32xf32> -> vector<1x32xf32>
    %255 = vector.extract_strided_slice %239 {offsets = [1, 0, 0], sizes = [1, 32, 32], strides = [1, 1, 1]} : vector<8x32x32xf32> to vector<1x32x32xf32>
    %256 = vector.shape_cast %255 : vector<1x32x32xf32> to vector<32x32xf32>
    %257 = arith.mulf %256, %252 : vector<32x32xf32>
    %258 = vector.extract_strided_slice %246 {offsets = [1, 0, 0], sizes = [1, 32, 32], strides = [1, 1, 1]} : vector<8x32x32xf32> to vector<1x32x32xf32>
    %259 = vector.shape_cast %258 : vector<1x32x32xf32> to vector<32x32xf32>
    %260 = arith.addf %257, %259 : vector<32x32xf32>
    %261 = vector.extract_strided_slice %152 {offsets = [9, 0], sizes = [1, 32], strides = [1, 1]} : vector<16x32xf32> to vector<1x32xf32>
    %cst_90 = arith.constant dense<0.000000e+00> : vector<1x32xf32>
    %262 = tpu.matmul %261, %260, %cst_90 {dimension_numbers = #tpu.dot_dimension_numbers<[1], [1], [0], [0], [0, 0, 1, 0], [], []>} : vector<1x32xf32>, vector<32x32xf32>, vector<1x32xf32> -> vector<1x32xf32>
    %263 = vector.extract_strided_slice %239 {offsets = [2, 0, 0], sizes = [1, 32, 32], strides = [1, 1, 1]} : vector<8x32x32xf32> to vector<1x32x32xf32>
    %264 = vector.shape_cast %263 : vector<1x32x32xf32> to vector<32x32xf32>
    %265 = arith.mulf %264, %260 : vector<32x32xf32>
    %266 = vector.extract_strided_slice %246 {offsets = [2, 0, 0], sizes = [1, 32, 32], strides = [1, 1, 1]} : vector<8x32x32xf32> to vector<1x32x32xf32>
    %267 = vector.shape_cast %266 : vector<1x32x32xf32> to vector<32x32xf32>
    %268 = arith.addf %265, %267 : vector<32x32xf32>
    %269 = vector.extract_strided_slice %152 {offsets = [10, 0], sizes = [1, 32], strides = [1, 1]} : vector<16x32xf32> to vector<1x32xf32>
    %cst_91 = arith.constant dense<0.000000e+00> : vector<1x32xf32>
    %270 = tpu.matmul %269, %268, %cst_91 {dimension_numbers = #tpu.dot_dimension_numbers<[1], [1], [0], [0], [0, 0, 1, 0], [], []>} : vector<1x32xf32>, vector<32x32xf32>, vector<1x32xf32> -> vector<1x32xf32>
    %271 = vector.extract_strided_slice %239 {offsets = [3, 0, 0], sizes = [1, 32, 32], strides = [1, 1, 1]} : vector<8x32x32xf32> to vector<1x32x32xf32>
    %272 = vector.shape_cast %271 : vector<1x32x32xf32> to vector<32x32xf32>
    %273 = arith.mulf %272, %268 : vector<32x32xf32>
    %274 = vector.extract_strided_slice %246 {offsets = [3, 0, 0], sizes = [1, 32, 32], strides = [1, 1, 1]} : vector<8x32x32xf32> to vector<1x32x32xf32>
    %275 = vector.shape_cast %274 : vector<1x32x32xf32> to vector<32x32xf32>
    %276 = arith.addf %273, %275 : vector<32x32xf32>
    %277 = vector.extract_strided_slice %152 {offsets = [11, 0], sizes = [1, 32], strides = [1, 1]} : vector<16x32xf32> to vector<1x32xf32>
    %cst_92 = arith.constant dense<0.000000e+00> : vector<1x32xf32>
    %278 = tpu.matmul %277, %276, %cst_92 {dimension_numbers = #tpu.dot_dimension_numbers<[1], [1], [0], [0], [0, 0, 1, 0], [], []>} : vector<1x32xf32>, vector<32x32xf32>, vector<1x32xf32> -> vector<1x32xf32>
    %279 = vector.extract_strided_slice %239 {offsets = [4, 0, 0], sizes = [1, 32, 32], strides = [1, 1, 1]} : vector<8x32x32xf32> to vector<1x32x32xf32>
    %280 = vector.shape_cast %279 : vector<1x32x32xf32> to vector<32x32xf32>
    %281 = arith.mulf %280, %276 : vector<32x32xf32>
    %282 = vector.extract_strided_slice %246 {offsets = [4, 0, 0], sizes = [1, 32, 32], strides = [1, 1, 1]} : vector<8x32x32xf32> to vector<1x32x32xf32>
    %283 = vector.shape_cast %282 : vector<1x32x32xf32> to vector<32x32xf32>
    %284 = arith.addf %281, %283 : vector<32x32xf32>
    %285 = vector.extract_strided_slice %152 {offsets = [12, 0], sizes = [1, 32], strides = [1, 1]} : vector<16x32xf32> to vector<1x32xf32>
    %cst_93 = arith.constant dense<0.000000e+00> : vector<1x32xf32>
    %286 = tpu.matmul %285, %284, %cst_93 {dimension_numbers = #tpu.dot_dimension_numbers<[1], [1], [0], [0], [0, 0, 1, 0], [], []>} : vector<1x32xf32>, vector<32x32xf32>, vector<1x32xf32> -> vector<1x32xf32>
    %287 = vector.extract_strided_slice %239 {offsets = [5, 0, 0], sizes = [1, 32, 32], strides = [1, 1, 1]} : vector<8x32x32xf32> to vector<1x32x32xf32>
    %288 = vector.shape_cast %287 : vector<1x32x32xf32> to vector<32x32xf32>
    %289 = arith.mulf %288, %284 : vector<32x32xf32>
    %290 = vector.extract_strided_slice %246 {offsets = [5, 0, 0], sizes = [1, 32, 32], strides = [1, 1, 1]} : vector<8x32x32xf32> to vector<1x32x32xf32>
    %291 = vector.shape_cast %290 : vector<1x32x32xf32> to vector<32x32xf32>
    %292 = arith.addf %289, %291 : vector<32x32xf32>
    %293 = vector.extract_strided_slice %152 {offsets = [13, 0], sizes = [1, 32], strides = [1, 1]} : vector<16x32xf32> to vector<1x32xf32>
    %cst_94 = arith.constant dense<0.000000e+00> : vector<1x32xf32>
    %294 = tpu.matmul %293, %292, %cst_94 {dimension_numbers = #tpu.dot_dimension_numbers<[1], [1], [0], [0], [0, 0, 1, 0], [], []>} : vector<1x32xf32>, vector<32x32xf32>, vector<1x32xf32> -> vector<1x32xf32>
    %295 = vector.extract_strided_slice %239 {offsets = [6, 0, 0], sizes = [1, 32, 32], strides = [1, 1, 1]} : vector<8x32x32xf32> to vector<1x32x32xf32>
    %296 = vector.shape_cast %295 : vector<1x32x32xf32> to vector<32x32xf32>
    %297 = arith.mulf %296, %292 : vector<32x32xf32>
    %298 = vector.extract_strided_slice %246 {offsets = [6, 0, 0], sizes = [1, 32, 32], strides = [1, 1, 1]} : vector<8x32x32xf32> to vector<1x32x32xf32>
    %299 = vector.shape_cast %298 : vector<1x32x32xf32> to vector<32x32xf32>
    %300 = arith.addf %297, %299 : vector<32x32xf32>
    %301 = vector.extract_strided_slice %152 {offsets = [14, 0], sizes = [1, 32], strides = [1, 1]} : vector<16x32xf32> to vector<1x32xf32>
    %cst_95 = arith.constant dense<0.000000e+00> : vector<1x32xf32>
    %302 = tpu.matmul %301, %300, %cst_95 {dimension_numbers = #tpu.dot_dimension_numbers<[1], [1], [0], [0], [0, 0, 1, 0], [], []>} : vector<1x32xf32>, vector<32x32xf32>, vector<1x32xf32> -> vector<1x32xf32>
    %303 = vector.extract_strided_slice %239 {offsets = [7, 0, 0], sizes = [1, 32, 32], strides = [1, 1, 1]} : vector<8x32x32xf32> to vector<1x32x32xf32>
    %304 = vector.shape_cast %303 : vector<1x32x32xf32> to vector<32x32xf32>
    %305 = arith.mulf %304, %300 : vector<32x32xf32>
    %306 = vector.extract_strided_slice %246 {offsets = [7, 0, 0], sizes = [1, 32, 32], strides = [1, 1, 1]} : vector<8x32x32xf32> to vector<1x32x32xf32>
    %307 = vector.shape_cast %306 : vector<1x32x32xf32> to vector<32x32xf32>
    %308 = arith.addf %305, %307 : vector<32x32xf32>
    %309 = vector.extract_strided_slice %152 {offsets = [15, 0], sizes = [1, 32], strides = [1, 1]} : vector<16x32xf32> to vector<1x32xf32>
    %cst_96 = arith.constant dense<0.000000e+00> : vector<1x32xf32>
    %310 = tpu.matmul %309, %308, %cst_96 {dimension_numbers = #tpu.dot_dimension_numbers<[1], [1], [0], [0], [0, 0, 1, 0], [], []>} : vector<1x32xf32>, vector<32x32xf32>, vector<1x32xf32> -> vector<1x32xf32>
    %311 = tpu.concatenate %176, %184, %192, %200, %208, %216, %224, %232, %254, %262, %270, %278, %286, %294, %302, %310 in 0 : vector<1x32xf32>, vector<1x32xf32>, vector<1x32xf32>, vector<1x32xf32>, vector<1x32xf32>, vector<1x32xf32>, vector<1x32xf32>, vector<1x32xf32>, vector<1x32xf32>, vector<1x32xf32>, vector<1x32xf32>, vector<1x32xf32>, vector<1x32xf32>, vector<1x32xf32>, vector<1x32xf32>, vector<1x32xf32> -> vector<16x32xf32>
    %312 = vector.broadcast %66 : vector<1x32xf32> to vector<16x32xf32>
    %313 = arith.mulf %312, %126 : vector<16x32xf32>
    %314 = arith.addf %311, %313 : vector<16x32xf32>
    %cst_97 = arith.constant dense<0.000000e+00> : vector<8x32xf32>
    %315 = tpu.matmul %69, %314, %cst_97 {dimension_numbers = #tpu.dot_dimension_numbers<[1], [0], [0], [1], [0, 0, 1, 1], [], []>} : vector<8x16xf32>, vector<16x32xf32>, vector<8x32xf32> -> vector<8x32xf32>
    %316 = vector.broadcast %68 : vector<8x1xf32> to vector<8x32xf32>
    %317 = arith.mulf %315, %316 : vector<8x32xf32>
    %318 = arith.negf %317 : vector<8x32xf32>
    %319 = math.exp %318 : vector<8x32xf32>
    %cst_98 = arith.constant 1.000000e+00 : f32
    %320 = vector.broadcast %cst_98 : f32 to vector<8x32xf32>
    %321 = arith.addf %320, %319 : vector<8x32xf32>
    %322 = arith.divf %320, %321 : vector<8x32xf32>
    %323 = arith.mulf %317, %322 : vector<8x32xf32>
    %324 = arith.truncf %106 : vector<16x32xf32> to vector<16x32xbf16>
    %c0_99 = arith.constant 0 : index
    %c0_100 = arith.constant 0 : index
    %325 = vector.load %arg17[%c0_99, %c0_100] : memref<32x32xbf16, #tpu.memory_space<vmem>>, vector<32x32xbf16>
    %cst_101 = arith.constant dense<0.000000e+00> : vector<16x32xf32>
    %326 = tpu.matmul %324, %325, %cst_101 {dimension_numbers = #tpu.dot_dimension_numbers<[1], [0], [0], [1], [0, 0, 1, 1], [], []>} : vector<16x32xbf16>, vector<32x32xbf16>, vector<16x32xf32> -> vector<16x32xf32>
    %c0_102 = arith.constant 0 : index
    %c0_103 = arith.constant 0 : index
    %327 = vector.load %arg18[%c0_102, %c0_103] : memref<1x32xf32, #tpu.memory_space<vmem>>, vector<1x32xf32>
    %328 = vector.broadcast %327 : vector<1x32xf32> to vector<16x32xf32>
    %329 = arith.addf %326, %328 : vector<16x32xf32>
    %cst_104 = arith.constant 0.000000e+00 : f32
    %330 = vector.broadcast %cst_104 : f32 to vector<16x32xf32>
    %331 = arith.maximumf %329, %330 : vector<16x32xf32>
    %332 = vector.broadcast %cst_104 : f32 to vector<16x32xf32>
    %333 = arith.subf %329, %332 : vector<16x32xf32>
    %334 = arith.cmpf one, %333, %333 : vector<16x32xf32>
    %335 = vector.broadcast %cst_104 : f32 to vector<16x32xf32>
    %336 = arith.addf %329, %335 : vector<16x32xf32>
    %337 = math.absf %333 : vector<16x32xf32>
    %cst_105 = arith.constant 0.000000e+00 : f32
    %338 = vector.broadcast %cst_105 : f32 to vector<16x32xf32>
    %339 = arith.subf %338, %337 : vector<16x32xf32>
    %340 = math.exp %339 : vector<16x32xf32>
    %341 = math.log1p %340 : vector<16x32xf32>
    %342 = arith.addf %331, %341 : vector<16x32xf32>
    %343 = arith.select %334, %336, %342 : vector<16x32xi1>, vector<16x32xf32>
    %344 = arith.truncf %343 : vector<16x32xf32> to vector<16x32xbf16>
    %c0_106 = arith.constant 0 : index
    %c0_107 = arith.constant 0 : index
    %345 = vector.load %arg25[%c0_106, %c0_107] : memref<32x32xbf16, #tpu.memory_space<vmem>>, vector<32x32xbf16>
    %cst_108 = arith.constant dense<0.000000e+00> : vector<16x32xf32>
    %346 = tpu.matmul %344, %345, %cst_108 {dimension_numbers = #tpu.dot_dimension_numbers<[1], [0], [0], [1], [0, 0, 1, 1], [], []>} : vector<16x32xbf16>, vector<32x32xbf16>, vector<16x32xf32> -> vector<16x32xf32>
    %c0_109 = arith.constant 0 : index
    %c0_110 = arith.constant 0 : index
    %347 = vector.load %arg28[%c0_109, %c0_110] : memref<1x32xf32, #tpu.memory_space<vmem>>, vector<1x32xf32>
    %348 = vector.broadcast %347 : vector<1x32xf32> to vector<16x32xf32>
    %349 = arith.addf %346, %348 : vector<16x32xf32>
    %cst_111 = arith.constant 0.000000e+00 : f32
    %350 = vector.broadcast %cst_111 : f32 to vector<16x32xf32>
    %351 = arith.maximumf %349, %350 : vector<16x32xf32>
    %352 = vector.broadcast %cst_111 : f32 to vector<16x32xf32>
    %353 = arith.subf %349, %352 : vector<16x32xf32>
    %354 = arith.cmpf one, %353, %353 : vector<16x32xf32>
    %355 = vector.broadcast %cst_111 : f32 to vector<16x32xf32>
    %356 = arith.addf %349, %355 : vector<16x32xf32>
    %357 = math.absf %353 : vector<16x32xf32>
    %cst_112 = arith.constant 0.000000e+00 : f32
    %358 = vector.broadcast %cst_112 : f32 to vector<16x32xf32>
    %359 = arith.subf %358, %357 : vector<16x32xf32>
    %360 = math.exp %359 : vector<16x32xf32>
    %361 = math.log1p %360 : vector<16x32xf32>
    %362 = arith.addf %351, %361 : vector<16x32xf32>
    %363 = arith.select %354, %356, %362 : vector<16x32xi1>, vector<16x32xf32>
    %364 = arith.truncf %343 : vector<16x32xf32> to vector<16x32xbf16>
    %c0_113 = arith.constant 0 : index
    %c0_114 = arith.constant 0 : index
    %365 = vector.load %arg26[%c0_113, %c0_114] : memref<32x32xbf16, #tpu.memory_space<vmem>>, vector<32x32xbf16>
    %cst_115 = arith.constant dense<0.000000e+00> : vector<16x32xf32>
    %366 = tpu.matmul %364, %365, %cst_115 {dimension_numbers = #tpu.dot_dimension_numbers<[1], [0], [0], [1], [0, 0, 1, 1], [], []>} : vector<16x32xbf16>, vector<32x32xbf16>, vector<16x32xf32> -> vector<16x32xf32>
    %367 = arith.truncf %343 : vector<16x32xf32> to vector<16x32xbf16>
    %c0_116 = arith.constant 0 : index
    %c0_117 = arith.constant 0 : index
    %368 = vector.load %arg27[%c0_116, %c0_117] : memref<32x32xbf16, #tpu.memory_space<vmem>>, vector<32x32xbf16>
    %cst_118 = arith.constant dense<0.000000e+00> : vector<16x32xf32>
    %369 = tpu.matmul %367, %368, %cst_118 {dimension_numbers = #tpu.dot_dimension_numbers<[1], [0], [0], [1], [0, 0, 1, 1], [], []>} : vector<16x32xbf16>, vector<32x32xbf16>, vector<16x32xf32> -> vector<16x32xf32>
    %370 = arith.mulf %363, %343 : vector<16x32xf32>
    %cst_119 = arith.constant 0.000000e+00 : f32
    %371 = vector.broadcast %cst_119 : f32 to vector<32x32xf32>
    %372 = vector.extract_strided_slice %363 {offsets = [8, 0], sizes = [8, 32], strides = [1, 1]} : vector<16x32xf32> to vector<8x32xf32>
    %373 = vector.shape_cast %372 : vector<8x32xf32> to vector<8x32x1xf32>
    %374 = vector.shape_cast %65 : vector<32x32xf32> to vector<1x32x32xf32>
    %375 = vector.broadcast %373 : vector<8x32x1xf32> to vector<8x32x32xf32>
    %376 = vector.broadcast %374 : vector<1x32x32xf32> to vector<8x32x32xf32>
    %377 = arith.mulf %375, %376 : vector<8x32x32xf32>
    %378 = math.exp %377 : vector<8x32x32xf32>
    %379 = vector.extract_strided_slice %370 {offsets = [8, 0], sizes = [8, 32], strides = [1, 1]} : vector<16x32xf32> to vector<8x32xf32>
    %380 = vector.shape_cast %379 : vector<8x32xf32> to vector<8x32x1xf32>
    %381 = vector.extract_strided_slice %366 {offsets = [8, 0], sizes = [8, 32], strides = [1, 1]} : vector<16x32xf32> to vector<8x32xf32>
    %382 = vector.shape_cast %381 : vector<8x32xf32> to vector<8x1x32xf32>
    %383 = vector.broadcast %380 : vector<8x32x1xf32> to vector<8x32x32xf32>
    %384 = vector.broadcast %382 : vector<8x1x32xf32> to vector<8x32x32xf32>
    %385 = arith.mulf %383, %384 : vector<8x32x32xf32>
    %386 = vector.extract_strided_slice %378 {offsets = [7, 0, 0], sizes = [1, 32, 32], strides = [1, 1, 1]} : vector<8x32x32xf32> to vector<1x32x32xf32>
    %387 = vector.shape_cast %386 : vector<1x32x32xf32> to vector<32x32xf32>
    %388 = arith.mulf %387, %371 : vector<32x32xf32>
    %389 = vector.extract_strided_slice %385 {offsets = [7, 0, 0], sizes = [1, 32, 32], strides = [1, 1, 1]} : vector<8x32x32xf32> to vector<1x32x32xf32>
    %390 = vector.shape_cast %389 : vector<1x32x32xf32> to vector<32x32xf32>
    %391 = arith.addf %388, %390 : vector<32x32xf32>
    %392 = vector.extract_strided_slice %369 {offsets = [15, 0], sizes = [1, 32], strides = [1, 1]} : vector<16x32xf32> to vector<1x32xf32>
    %cst_120 = arith.constant dense<0.000000e+00> : vector<1x32xf32>
    %393 = tpu.matmul %392, %391, %cst_120 {dimension_numbers = #tpu.dot_dimension_numbers<[1], [1], [0], [0], [0, 0, 1, 0], [], []>} : vector<1x32xf32>, vector<32x32xf32>, vector<1x32xf32> -> vector<1x32xf32>
    %394 = vector.extract_strided_slice %378 {offsets = [6, 0, 0], sizes = [1, 32, 32], strides = [1, 1, 1]} : vector<8x32x32xf32> to vector<1x32x32xf32>
    %395 = vector.shape_cast %394 : vector<1x32x32xf32> to vector<32x32xf32>
    %396 = arith.mulf %395, %391 : vector<32x32xf32>
    %397 = vector.extract_strided_slice %385 {offsets = [6, 0, 0], sizes = [1, 32, 32], strides = [1, 1, 1]} : vector<8x32x32xf32> to vector<1x32x32xf32>
    %398 = vector.shape_cast %397 : vector<1x32x32xf32> to vector<32x32xf32>
    %399 = arith.addf %396, %398 : vector<32x32xf32>
    %400 = vector.extract_strided_slice %369 {offsets = [14, 0], sizes = [1, 32], strides = [1, 1]} : vector<16x32xf32> to vector<1x32xf32>
    %cst_121 = arith.constant dense<0.000000e+00> : vector<1x32xf32>
    %401 = tpu.matmul %400, %399, %cst_121 {dimension_numbers = #tpu.dot_dimension_numbers<[1], [1], [0], [0], [0, 0, 1, 0], [], []>} : vector<1x32xf32>, vector<32x32xf32>, vector<1x32xf32> -> vector<1x32xf32>
    %402 = vector.extract_strided_slice %378 {offsets = [5, 0, 0], sizes = [1, 32, 32], strides = [1, 1, 1]} : vector<8x32x32xf32> to vector<1x32x32xf32>
    %403 = vector.shape_cast %402 : vector<1x32x32xf32> to vector<32x32xf32>
    %404 = arith.mulf %403, %399 : vector<32x32xf32>
    %405 = vector.extract_strided_slice %385 {offsets = [5, 0, 0], sizes = [1, 32, 32], strides = [1, 1, 1]} : vector<8x32x32xf32> to vector<1x32x32xf32>
    %406 = vector.shape_cast %405 : vector<1x32x32xf32> to vector<32x32xf32>
    %407 = arith.addf %404, %406 : vector<32x32xf32>
    %408 = vector.extract_strided_slice %369 {offsets = [13, 0], sizes = [1, 32], strides = [1, 1]} : vector<16x32xf32> to vector<1x32xf32>
    %cst_122 = arith.constant dense<0.000000e+00> : vector<1x32xf32>
    %409 = tpu.matmul %408, %407, %cst_122 {dimension_numbers = #tpu.dot_dimension_numbers<[1], [1], [0], [0], [0, 0, 1, 0], [], []>} : vector<1x32xf32>, vector<32x32xf32>, vector<1x32xf32> -> vector<1x32xf32>
    %410 = vector.extract_strided_slice %378 {offsets = [4, 0, 0], sizes = [1, 32, 32], strides = [1, 1, 1]} : vector<8x32x32xf32> to vector<1x32x32xf32>
    %411 = vector.shape_cast %410 : vector<1x32x32xf32> to vector<32x32xf32>
    %412 = arith.mulf %411, %407 : vector<32x32xf32>
    %413 = vector.extract_strided_slice %385 {offsets = [4, 0, 0], sizes = [1, 32, 32], strides = [1, 1, 1]} : vector<8x32x32xf32> to vector<1x32x32xf32>
    %414 = vector.shape_cast %413 : vector<1x32x32xf32> to vector<32x32xf32>
    %415 = arith.addf %412, %414 : vector<32x32xf32>
    %416 = vector.extract_strided_slice %369 {offsets = [12, 0], sizes = [1, 32], strides = [1, 1]} : vector<16x32xf32> to vector<1x32xf32>
    %cst_123 = arith.constant dense<0.000000e+00> : vector<1x32xf32>
    %417 = tpu.matmul %416, %415, %cst_123 {dimension_numbers = #tpu.dot_dimension_numbers<[1], [1], [0], [0], [0, 0, 1, 0], [], []>} : vector<1x32xf32>, vector<32x32xf32>, vector<1x32xf32> -> vector<1x32xf32>
    %418 = vector.extract_strided_slice %378 {offsets = [3, 0, 0], sizes = [1, 32, 32], strides = [1, 1, 1]} : vector<8x32x32xf32> to vector<1x32x32xf32>
    %419 = vector.shape_cast %418 : vector<1x32x32xf32> to vector<32x32xf32>
    %420 = arith.mulf %419, %415 : vector<32x32xf32>
    %421 = vector.extract_strided_slice %385 {offsets = [3, 0, 0], sizes = [1, 32, 32], strides = [1, 1, 1]} : vector<8x32x32xf32> to vector<1x32x32xf32>
    %422 = vector.shape_cast %421 : vector<1x32x32xf32> to vector<32x32xf32>
    %423 = arith.addf %420, %422 : vector<32x32xf32>
    %424 = vector.extract_strided_slice %369 {offsets = [11, 0], sizes = [1, 32], strides = [1, 1]} : vector<16x32xf32> to vector<1x32xf32>
    %cst_124 = arith.constant dense<0.000000e+00> : vector<1x32xf32>
    %425 = tpu.matmul %424, %423, %cst_124 {dimension_numbers = #tpu.dot_dimension_numbers<[1], [1], [0], [0], [0, 0, 1, 0], [], []>} : vector<1x32xf32>, vector<32x32xf32>, vector<1x32xf32> -> vector<1x32xf32>
    %426 = vector.extract_strided_slice %378 {offsets = [2, 0, 0], sizes = [1, 32, 32], strides = [1, 1, 1]} : vector<8x32x32xf32> to vector<1x32x32xf32>
    %427 = vector.shape_cast %426 : vector<1x32x32xf32> to vector<32x32xf32>
    %428 = arith.mulf %427, %423 : vector<32x32xf32>
    %429 = vector.extract_strided_slice %385 {offsets = [2, 0, 0], sizes = [1, 32, 32], strides = [1, 1, 1]} : vector<8x32x32xf32> to vector<1x32x32xf32>
    %430 = vector.shape_cast %429 : vector<1x32x32xf32> to vector<32x32xf32>
    %431 = arith.addf %428, %430 : vector<32x32xf32>
    %432 = vector.extract_strided_slice %369 {offsets = [10, 0], sizes = [1, 32], strides = [1, 1]} : vector<16x32xf32> to vector<1x32xf32>
    %cst_125 = arith.constant dense<0.000000e+00> : vector<1x32xf32>
    %433 = tpu.matmul %432, %431, %cst_125 {dimension_numbers = #tpu.dot_dimension_numbers<[1], [1], [0], [0], [0, 0, 1, 0], [], []>} : vector<1x32xf32>, vector<32x32xf32>, vector<1x32xf32> -> vector<1x32xf32>
    %434 = vector.extract_strided_slice %378 {offsets = [1, 0, 0], sizes = [1, 32, 32], strides = [1, 1, 1]} : vector<8x32x32xf32> to vector<1x32x32xf32>
    %435 = vector.shape_cast %434 : vector<1x32x32xf32> to vector<32x32xf32>
    %436 = arith.mulf %435, %431 : vector<32x32xf32>
    %437 = vector.extract_strided_slice %385 {offsets = [1, 0, 0], sizes = [1, 32, 32], strides = [1, 1, 1]} : vector<8x32x32xf32> to vector<1x32x32xf32>
    %438 = vector.shape_cast %437 : vector<1x32x32xf32> to vector<32x32xf32>
    %439 = arith.addf %436, %438 : vector<32x32xf32>
    %440 = vector.extract_strided_slice %369 {offsets = [9, 0], sizes = [1, 32], strides = [1, 1]} : vector<16x32xf32> to vector<1x32xf32>
    %cst_126 = arith.constant dense<0.000000e+00> : vector<1x32xf32>
    %441 = tpu.matmul %440, %439, %cst_126 {dimension_numbers = #tpu.dot_dimension_numbers<[1], [1], [0], [0], [0, 0, 1, 0], [], []>} : vector<1x32xf32>, vector<32x32xf32>, vector<1x32xf32> -> vector<1x32xf32>
    %442 = vector.extract_strided_slice %378 {offsets = [0, 0, 0], sizes = [1, 32, 32], strides = [1, 1, 1]} : vector<8x32x32xf32> to vector<1x32x32xf32>
    %443 = vector.shape_cast %442 : vector<1x32x32xf32> to vector<32x32xf32>
    %444 = arith.mulf %443, %439 : vector<32x32xf32>
    %445 = vector.extract_strided_slice %385 {offsets = [0, 0, 0], sizes = [1, 32, 32], strides = [1, 1, 1]} : vector<8x32x32xf32> to vector<1x32x32xf32>
    %446 = vector.shape_cast %445 : vector<1x32x32xf32> to vector<32x32xf32>
    %447 = arith.addf %444, %446 : vector<32x32xf32>
    %448 = vector.extract_strided_slice %369 {offsets = [8, 0], sizes = [1, 32], strides = [1, 1]} : vector<16x32xf32> to vector<1x32xf32>
    %cst_127 = arith.constant dense<0.000000e+00> : vector<1x32xf32>
    %449 = tpu.matmul %448, %447, %cst_127 {dimension_numbers = #tpu.dot_dimension_numbers<[1], [1], [0], [0], [0, 0, 1, 0], [], []>} : vector<1x32xf32>, vector<32x32xf32>, vector<1x32xf32> -> vector<1x32xf32>
    %450 = vector.extract_strided_slice %363 {offsets = [0, 0], sizes = [8, 32], strides = [1, 1]} : vector<16x32xf32> to vector<8x32xf32>
    %451 = vector.shape_cast %450 : vector<8x32xf32> to vector<8x32x1xf32>
    %452 = vector.shape_cast %65 : vector<32x32xf32> to vector<1x32x32xf32>
    %453 = vector.broadcast %451 : vector<8x32x1xf32> to vector<8x32x32xf32>
    %454 = vector.broadcast %452 : vector<1x32x32xf32> to vector<8x32x32xf32>
    %455 = arith.mulf %453, %454 : vector<8x32x32xf32>
    %456 = math.exp %455 : vector<8x32x32xf32>
    %457 = vector.extract_strided_slice %370 {offsets = [0, 0], sizes = [8, 32], strides = [1, 1]} : vector<16x32xf32> to vector<8x32xf32>
    %458 = vector.shape_cast %457 : vector<8x32xf32> to vector<8x32x1xf32>
    %459 = vector.extract_strided_slice %366 {offsets = [0, 0], sizes = [8, 32], strides = [1, 1]} : vector<16x32xf32> to vector<8x32xf32>
    %460 = vector.shape_cast %459 : vector<8x32xf32> to vector<8x1x32xf32>
    %461 = vector.broadcast %458 : vector<8x32x1xf32> to vector<8x32x32xf32>
    %462 = vector.broadcast %460 : vector<8x1x32xf32> to vector<8x32x32xf32>
    %463 = arith.mulf %461, %462 : vector<8x32x32xf32>
    %464 = vector.extract_strided_slice %456 {offsets = [7, 0, 0], sizes = [1, 32, 32], strides = [1, 1, 1]} : vector<8x32x32xf32> to vector<1x32x32xf32>
    %465 = vector.shape_cast %464 : vector<1x32x32xf32> to vector<32x32xf32>
    %466 = arith.mulf %465, %447 : vector<32x32xf32>
    %467 = vector.extract_strided_slice %463 {offsets = [7, 0, 0], sizes = [1, 32, 32], strides = [1, 1, 1]} : vector<8x32x32xf32> to vector<1x32x32xf32>
    %468 = vector.shape_cast %467 : vector<1x32x32xf32> to vector<32x32xf32>
    %469 = arith.addf %466, %468 : vector<32x32xf32>
    %470 = vector.extract_strided_slice %369 {offsets = [7, 0], sizes = [1, 32], strides = [1, 1]} : vector<16x32xf32> to vector<1x32xf32>
    %cst_128 = arith.constant dense<0.000000e+00> : vector<1x32xf32>
    %471 = tpu.matmul %470, %469, %cst_128 {dimension_numbers = #tpu.dot_dimension_numbers<[1], [1], [0], [0], [0, 0, 1, 0], [], []>} : vector<1x32xf32>, vector<32x32xf32>, vector<1x32xf32> -> vector<1x32xf32>
    %472 = vector.extract_strided_slice %456 {offsets = [6, 0, 0], sizes = [1, 32, 32], strides = [1, 1, 1]} : vector<8x32x32xf32> to vector<1x32x32xf32>
    %473 = vector.shape_cast %472 : vector<1x32x32xf32> to vector<32x32xf32>
    %474 = arith.mulf %473, %469 : vector<32x32xf32>
    %475 = vector.extract_strided_slice %463 {offsets = [6, 0, 0], sizes = [1, 32, 32], strides = [1, 1, 1]} : vector<8x32x32xf32> to vector<1x32x32xf32>
    %476 = vector.shape_cast %475 : vector<1x32x32xf32> to vector<32x32xf32>
    %477 = arith.addf %474, %476 : vector<32x32xf32>
    %478 = vector.extract_strided_slice %369 {offsets = [6, 0], sizes = [1, 32], strides = [1, 1]} : vector<16x32xf32> to vector<1x32xf32>
    %cst_129 = arith.constant dense<0.000000e+00> : vector<1x32xf32>
    %479 = tpu.matmul %478, %477, %cst_129 {dimension_numbers = #tpu.dot_dimension_numbers<[1], [1], [0], [0], [0, 0, 1, 0], [], []>} : vector<1x32xf32>, vector<32x32xf32>, vector<1x32xf32> -> vector<1x32xf32>
    %480 = vector.extract_strided_slice %456 {offsets = [5, 0, 0], sizes = [1, 32, 32], strides = [1, 1, 1]} : vector<8x32x32xf32> to vector<1x32x32xf32>
    %481 = vector.shape_cast %480 : vector<1x32x32xf32> to vector<32x32xf32>
    %482 = arith.mulf %481, %477 : vector<32x32xf32>
    %483 = vector.extract_strided_slice %463 {offsets = [5, 0, 0], sizes = [1, 32, 32], strides = [1, 1, 1]} : vector<8x32x32xf32> to vector<1x32x32xf32>
    %484 = vector.shape_cast %483 : vector<1x32x32xf32> to vector<32x32xf32>
    %485 = arith.addf %482, %484 : vector<32x32xf32>
    %486 = vector.extract_strided_slice %369 {offsets = [5, 0], sizes = [1, 32], strides = [1, 1]} : vector<16x32xf32> to vector<1x32xf32>
    %cst_130 = arith.constant dense<0.000000e+00> : vector<1x32xf32>
    %487 = tpu.matmul %486, %485, %cst_130 {dimension_numbers = #tpu.dot_dimension_numbers<[1], [1], [0], [0], [0, 0, 1, 0], [], []>} : vector<1x32xf32>, vector<32x32xf32>, vector<1x32xf32> -> vector<1x32xf32>
    %488 = vector.extract_strided_slice %456 {offsets = [4, 0, 0], sizes = [1, 32, 32], strides = [1, 1, 1]} : vector<8x32x32xf32> to vector<1x32x32xf32>
    %489 = vector.shape_cast %488 : vector<1x32x32xf32> to vector<32x32xf32>
    %490 = arith.mulf %489, %485 : vector<32x32xf32>
    %491 = vector.extract_strided_slice %463 {offsets = [4, 0, 0], sizes = [1, 32, 32], strides = [1, 1, 1]} : vector<8x32x32xf32> to vector<1x32x32xf32>
    %492 = vector.shape_cast %491 : vector<1x32x32xf32> to vector<32x32xf32>
    %493 = arith.addf %490, %492 : vector<32x32xf32>
    %494 = vector.extract_strided_slice %369 {offsets = [4, 0], sizes = [1, 32], strides = [1, 1]} : vector<16x32xf32> to vector<1x32xf32>
    %cst_131 = arith.constant dense<0.000000e+00> : vector<1x32xf32>
    %495 = tpu.matmul %494, %493, %cst_131 {dimension_numbers = #tpu.dot_dimension_numbers<[1], [1], [0], [0], [0, 0, 1, 0], [], []>} : vector<1x32xf32>, vector<32x32xf32>, vector<1x32xf32> -> vector<1x32xf32>
    %496 = vector.extract_strided_slice %456 {offsets = [3, 0, 0], sizes = [1, 32, 32], strides = [1, 1, 1]} : vector<8x32x32xf32> to vector<1x32x32xf32>
    %497 = vector.shape_cast %496 : vector<1x32x32xf32> to vector<32x32xf32>
    %498 = arith.mulf %497, %493 : vector<32x32xf32>
    %499 = vector.extract_strided_slice %463 {offsets = [3, 0, 0], sizes = [1, 32, 32], strides = [1, 1, 1]} : vector<8x32x32xf32> to vector<1x32x32xf32>
    %500 = vector.shape_cast %499 : vector<1x32x32xf32> to vector<32x32xf32>
    %501 = arith.addf %498, %500 : vector<32x32xf32>
    %502 = vector.extract_strided_slice %369 {offsets = [3, 0], sizes = [1, 32], strides = [1, 1]} : vector<16x32xf32> to vector<1x32xf32>
    %cst_132 = arith.constant dense<0.000000e+00> : vector<1x32xf32>
    %503 = tpu.matmul %502, %501, %cst_132 {dimension_numbers = #tpu.dot_dimension_numbers<[1], [1], [0], [0], [0, 0, 1, 0], [], []>} : vector<1x32xf32>, vector<32x32xf32>, vector<1x32xf32> -> vector<1x32xf32>
    %504 = vector.extract_strided_slice %456 {offsets = [2, 0, 0], sizes = [1, 32, 32], strides = [1, 1, 1]} : vector<8x32x32xf32> to vector<1x32x32xf32>
    %505 = vector.shape_cast %504 : vector<1x32x32xf32> to vector<32x32xf32>
    %506 = arith.mulf %505, %501 : vector<32x32xf32>
    %507 = vector.extract_strided_slice %463 {offsets = [2, 0, 0], sizes = [1, 32, 32], strides = [1, 1, 1]} : vector<8x32x32xf32> to vector<1x32x32xf32>
    %508 = vector.shape_cast %507 : vector<1x32x32xf32> to vector<32x32xf32>
    %509 = arith.addf %506, %508 : vector<32x32xf32>
    %510 = vector.extract_strided_slice %369 {offsets = [2, 0], sizes = [1, 32], strides = [1, 1]} : vector<16x32xf32> to vector<1x32xf32>
    %cst_133 = arith.constant dense<0.000000e+00> : vector<1x32xf32>
    %511 = tpu.matmul %510, %509, %cst_133 {dimension_numbers = #tpu.dot_dimension_numbers<[1], [1], [0], [0], [0, 0, 1, 0], [], []>} : vector<1x32xf32>, vector<32x32xf32>, vector<1x32xf32> -> vector<1x32xf32>
    %512 = vector.extract_strided_slice %456 {offsets = [1, 0, 0], sizes = [1, 32, 32], strides = [1, 1, 1]} : vector<8x32x32xf32> to vector<1x32x32xf32>
    %513 = vector.shape_cast %512 : vector<1x32x32xf32> to vector<32x32xf32>
    %514 = arith.mulf %513, %509 : vector<32x32xf32>
    %515 = vector.extract_strided_slice %463 {offsets = [1, 0, 0], sizes = [1, 32, 32], strides = [1, 1, 1]} : vector<8x32x32xf32> to vector<1x32x32xf32>
    %516 = vector.shape_cast %515 : vector<1x32x32xf32> to vector<32x32xf32>
    %517 = arith.addf %514, %516 : vector<32x32xf32>
    %518 = vector.extract_strided_slice %369 {offsets = [1, 0], sizes = [1, 32], strides = [1, 1]} : vector<16x32xf32> to vector<1x32xf32>
    %cst_134 = arith.constant dense<0.000000e+00> : vector<1x32xf32>
    %519 = tpu.matmul %518, %517, %cst_134 {dimension_numbers = #tpu.dot_dimension_numbers<[1], [1], [0], [0], [0, 0, 1, 0], [], []>} : vector<1x32xf32>, vector<32x32xf32>, vector<1x32xf32> -> vector<1x32xf32>
    %520 = vector.extract_strided_slice %456 {offsets = [0, 0, 0], sizes = [1, 32, 32], strides = [1, 1, 1]} : vector<8x32x32xf32> to vector<1x32x32xf32>
    %521 = vector.shape_cast %520 : vector<1x32x32xf32> to vector<32x32xf32>
    %522 = arith.mulf %521, %517 : vector<32x32xf32>
    %523 = vector.extract_strided_slice %463 {offsets = [0, 0, 0], sizes = [1, 32, 32], strides = [1, 1, 1]} : vector<8x32x32xf32> to vector<1x32x32xf32>
    %524 = vector.shape_cast %523 : vector<1x32x32xf32> to vector<32x32xf32>
    %525 = arith.addf %522, %524 : vector<32x32xf32>
    %526 = vector.extract_strided_slice %369 {offsets = [0, 0], sizes = [1, 32], strides = [1, 1]} : vector<16x32xf32> to vector<1x32xf32>
    %cst_135 = arith.constant dense<0.000000e+00> : vector<1x32xf32>
    %527 = tpu.matmul %526, %525, %cst_135 {dimension_numbers = #tpu.dot_dimension_numbers<[1], [1], [0], [0], [0, 0, 1, 0], [], []>} : vector<1x32xf32>, vector<32x32xf32>, vector<1x32xf32> -> vector<1x32xf32>
    %528 = tpu.concatenate %527, %519, %511, %503, %495, %487, %479, %471, %449, %441, %433, %425, %417, %409, %401, %393 in 0 : vector<1x32xf32>, vector<1x32xf32>, vector<1x32xf32>, vector<1x32xf32>, vector<1x32xf32>, vector<1x32xf32>, vector<1x32xf32>, vector<1x32xf32>, vector<1x32xf32>, vector<1x32xf32>, vector<1x32xf32>, vector<1x32xf32>, vector<1x32xf32>, vector<1x32xf32>, vector<1x32xf32>, vector<1x32xf32> -> vector<16x32xf32>
    %529 = vector.broadcast %67 : vector<1x32xf32> to vector<16x32xf32>
    %530 = arith.mulf %529, %343 : vector<16x32xf32>
    %531 = arith.addf %528, %530 : vector<16x32xf32>
    %cst_136 = arith.constant dense<0.000000e+00> : vector<8x32xf32>
    %532 = tpu.matmul %69, %531, %cst_136 {dimension_numbers = #tpu.dot_dimension_numbers<[1], [0], [0], [1], [0, 0, 1, 1], [], []>} : vector<8x16xf32>, vector<16x32xf32>, vector<8x32xf32> -> vector<8x32xf32>
    %533 = vector.broadcast %68 : vector<8x1xf32> to vector<8x32xf32>
    %534 = arith.mulf %532, %533 : vector<8x32xf32>
    %535 = arith.negf %534 : vector<8x32xf32>
    %536 = math.exp %535 : vector<8x32xf32>
    %cst_137 = arith.constant 1.000000e+00 : f32
    %537 = vector.broadcast %cst_137 : f32 to vector<8x32xf32>
    %538 = arith.addf %537, %536 : vector<8x32xf32>
    %539 = arith.divf %537, %538 : vector<8x32xf32>
    %540 = arith.mulf %534, %539 : vector<8x32xf32>
    %cst_138 = arith.constant dense<0.000000e+00> : vector<8x32xf32>
    %541 = tpu.matmul %69, %100, %cst_138 {dimension_numbers = #tpu.dot_dimension_numbers<[1], [0], [0], [1], [0, 0, 1, 1], [], []>} : vector<8x16xf32>, vector<16x32xf32>, vector<8x32xf32> -> vector<8x32xf32>
    %542 = arith.negf %541 : vector<8x32xf32>
    %543 = math.exp %542 : vector<8x32xf32>
    %cst_139 = arith.constant 1.000000e+00 : f32
    %544 = vector.broadcast %cst_139 : f32 to vector<8x32xf32>
    %545 = arith.addf %544, %543 : vector<8x32xf32>
    %546 = arith.divf %544, %545 : vector<8x32xf32>
    %547 = arith.mulf %541, %546 : vector<8x32xf32>
    %548 = arith.mulf %547, %323 : vector<8x32xf32>
    %549 = arith.mulf %547, %540 : vector<8x32xf32>
    %550 = arith.addf %548, %549 : vector<8x32xf32>
    %551 = arith.addf %550, %70 : vector<8x32xf32>
    %c0_140 = arith.constant 0 : index
    %c0_141 = arith.constant 0 : index
    %552 = vector.load %arg32[%c0_140, %c0_141] : memref<8x8xf32, #tpu.memory_space<vmem>>, vector<8x8xf32>
    %cst_142 = arith.constant dense<0.000000e+00> : vector<8x32xf32>
    %553 = tpu.matmul %552, %551, %cst_142 {dimension_numbers = #tpu.dot_dimension_numbers<[1], [0], [0], [1], [0, 0, 1, 1], [], []>} : vector<8x8xf32>, vector<8x32xf32>, vector<8x32xf32> -> vector<8x32xf32>
    %c0_143 = arith.constant 0 : index
    %c0_144 = arith.constant 0 : index
    %554 = vector.load %arg9[%c0_143, %c0_144] : memref<1x32xf32, #tpu.memory_space<vmem>>, vector<1x32xf32>
    %c0_145 = arith.constant 0 : index
    %c0_146 = arith.constant 0 : index
    %555 = vector.load %arg10[%c0_145, %c0_146] : memref<1x32xf32, #tpu.memory_space<vmem>>, vector<1x32xf32>
    %cst_147 = arith.constant dense<0.000000e+00> : vector<8xf32>
    %556 = vector.multi_reduction <add>, %551, %cst_147 [1] : vector<8x32xf32> to vector<8xf32>
    %557 = vector.shape_cast %556 : vector<8xf32> to vector<8x1xf32>
    %cst_148 = arith.constant 3.200000e+01 : f32
    %558 = vector.broadcast %cst_148 : f32 to vector<8x1xf32>
    %559 = arith.divf %557, %558 : vector<8x1xf32>
    %560 = vector.broadcast %559 : vector<8x1xf32> to vector<8x32xf32>
    %561 = arith.subf %551, %560 : vector<8x32xf32>
    %562 = arith.mulf %561, %561 : vector<8x32xf32>
    %cst_149 = arith.constant dense<0.000000e+00> : vector<8xf32>
    %563 = vector.multi_reduction <add>, %562, %cst_149 [1] : vector<8x32xf32> to vector<8xf32>
    %564 = vector.shape_cast %563 : vector<8xf32> to vector<8x1xf32>
    %cst_150 = arith.constant 3.200000e+01 : f32
    %565 = vector.broadcast %cst_150 : f32 to vector<8x1xf32>
    %566 = arith.divf %564, %565 : vector<8x1xf32>
    %567 = vector.broadcast %559 : vector<8x1xf32> to vector<8x32xf32>
    %568 = arith.subf %551, %567 : vector<8x32xf32>
    %cst_151 = arith.constant 9.99999974E-6 : f32
    %569 = vector.broadcast %cst_151 : f32 to vector<8x1xf32>
    %570 = arith.addf %566, %569 : vector<8x1xf32>
    %571 = math.rsqrt %570 : vector<8x1xf32>
    %572 = vector.broadcast %571 : vector<8x1xf32> to vector<8x32xf32>
    %573 = arith.mulf %568, %572 : vector<8x32xf32>
    %574 = vector.broadcast %554 : vector<1x32xf32> to vector<8x32xf32>
    %575 = arith.mulf %573, %574 : vector<8x32xf32>
    %576 = vector.broadcast %555 : vector<1x32xf32> to vector<8x32xf32>
    %577 = arith.addf %575, %576 : vector<8x32xf32>
    %578 = arith.truncf %577 : vector<8x32xf32> to vector<8x32xbf16>
    %c0_152 = arith.constant 0 : index
    %c0_153 = arith.constant 0 : index
    %579 = vector.load %arg11[%c0_152, %c0_153] : memref<32x32xbf16, #tpu.memory_space<vmem>>, vector<32x32xbf16>
    %cst_154 = arith.constant dense<0.000000e+00> : vector<8x32xf32>
    %580 = tpu.matmul %578, %579, %cst_154 {dimension_numbers = #tpu.dot_dimension_numbers<[1], [0], [0], [1], [0, 0, 1, 1], [], []>} : vector<8x32xbf16>, vector<32x32xbf16>, vector<8x32xf32> -> vector<8x32xf32>
    %c0_155 = arith.constant 0 : index
    %c0_156 = arith.constant 0 : index
    %581 = vector.load %arg12[%c0_155, %c0_156] : memref<1x32xf32, #tpu.memory_space<vmem>>, vector<1x32xf32>
    %582 = vector.broadcast %581 : vector<1x32xf32> to vector<8x32xf32>
    %583 = arith.addf %580, %582 : vector<8x32xf32>
    %584 = arith.truncf %577 : vector<8x32xf32> to vector<8x32xbf16>
    %c0_157 = arith.constant 0 : index
    %c0_158 = arith.constant 0 : index
    %585 = vector.load %arg13[%c0_157, %c0_158] : memref<32x32xbf16, #tpu.memory_space<vmem>>, vector<32x32xbf16>
    %cst_159 = arith.constant dense<0.000000e+00> : vector<8x32xf32>
    %586 = tpu.matmul %584, %585, %cst_159 {dimension_numbers = #tpu.dot_dimension_numbers<[1], [0], [0], [1], [0, 0, 1, 1], [], []>} : vector<8x32xbf16>, vector<32x32xbf16>, vector<8x32xf32> -> vector<8x32xf32>
    %c0_160 = arith.constant 0 : index
    %c0_161 = arith.constant 0 : index
    %587 = vector.load %arg14[%c0_160, %c0_161] : memref<1x32xf32, #tpu.memory_space<vmem>>, vector<1x32xf32>
    %588 = vector.broadcast %587 : vector<1x32xf32> to vector<8x32xf32>
    %589 = arith.addf %586, %588 : vector<8x32xf32>
    %590 = arith.truncf %589 : vector<8x32xf32> to vector<8x32xbf16>
    %c0_162 = arith.constant 0 : index
    %c0_163 = arith.constant 0 : index
    %591 = vector.load %arg15[%c0_162, %c0_163] : memref<32x32xbf16, #tpu.memory_space<vmem>>, vector<32x32xbf16>
    %cst_164 = arith.constant dense<0.000000e+00> : vector<8x32xf32>
    %592 = tpu.matmul %590, %591, %cst_164 {dimension_numbers = #tpu.dot_dimension_numbers<[1], [0], [0], [1], [0, 0, 1, 1], [], []>} : vector<8x32xbf16>, vector<32x32xbf16>, vector<8x32xf32> -> vector<8x32xf32>
    %c0_165 = arith.constant 0 : index
    %c0_166 = arith.constant 0 : index
    %593 = vector.load %arg16[%c0_165, %c0_166] : memref<1x32xf32, #tpu.memory_space<vmem>>, vector<1x32xf32>
    %594 = vector.broadcast %593 : vector<1x32xf32> to vector<8x32xf32>
    %595 = arith.addf %592, %594 : vector<8x32xf32>
    %cst_167 = arith.constant 0.000000e+00 : f32
    %596 = vector.broadcast %cst_167 : f32 to vector<8x32xf32>
    %597 = arith.maximumf %595, %596 : vector<8x32xf32>
    %598 = vector.broadcast %cst_167 : f32 to vector<8x32xf32>
    %599 = arith.subf %595, %598 : vector<8x32xf32>
    %600 = arith.cmpf one, %599, %599 : vector<8x32xf32>
    %601 = vector.broadcast %cst_167 : f32 to vector<8x32xf32>
    %602 = arith.addf %595, %601 : vector<8x32xf32>
    %603 = math.absf %599 : vector<8x32xf32>
    %cst_168 = arith.constant 0.000000e+00 : f32
    %604 = vector.broadcast %cst_168 : f32 to vector<8x32xf32>
    %605 = arith.subf %604, %603 : vector<8x32xf32>
    %606 = math.exp %605 : vector<8x32xf32>
    %607 = math.log1p %606 : vector<8x32xf32>
    %608 = arith.addf %597, %607 : vector<8x32xf32>
    %609 = arith.select %600, %602, %608 : vector<8x32xi1>, vector<8x32xf32>
    %610 = arith.truncf %609 : vector<8x32xf32> to vector<8x32xbf16>
    %c0_169 = arith.constant 0 : index
    %c0_170 = arith.constant 0 : index
    %611 = vector.load %arg19[%c0_169, %c0_170] : memref<32x32xbf16, #tpu.memory_space<vmem>>, vector<32x32xbf16>
    %cst_171 = arith.constant dense<0.000000e+00> : vector<8x32xf32>
    %612 = tpu.matmul %610, %611, %cst_171 {dimension_numbers = #tpu.dot_dimension_numbers<[1], [0], [0], [1], [0, 0, 1, 1], [], []>} : vector<8x32xbf16>, vector<32x32xbf16>, vector<8x32xf32> -> vector<8x32xf32>
    %c0_172 = arith.constant 0 : index
    %c0_173 = arith.constant 0 : index
    %613 = vector.load %arg22[%c0_172, %c0_173] : memref<1x32xf32, #tpu.memory_space<vmem>>, vector<1x32xf32>
    %614 = vector.broadcast %613 : vector<1x32xf32> to vector<8x32xf32>
    %615 = arith.addf %612, %614 : vector<8x32xf32>
    %cst_174 = arith.constant 0.000000e+00 : f32
    %616 = vector.broadcast %cst_174 : f32 to vector<8x32xf32>
    %617 = arith.maximumf %615, %616 : vector<8x32xf32>
    %618 = vector.broadcast %cst_174 : f32 to vector<8x32xf32>
    %619 = arith.subf %615, %618 : vector<8x32xf32>
    %620 = arith.cmpf one, %619, %619 : vector<8x32xf32>
    %621 = vector.broadcast %cst_174 : f32 to vector<8x32xf32>
    %622 = arith.addf %615, %621 : vector<8x32xf32>
    %623 = math.absf %619 : vector<8x32xf32>
    %cst_175 = arith.constant 0.000000e+00 : f32
    %624 = vector.broadcast %cst_175 : f32 to vector<8x32xf32>
    %625 = arith.subf %624, %623 : vector<8x32xf32>
    %626 = math.exp %625 : vector<8x32xf32>
    %627 = math.log1p %626 : vector<8x32xf32>
    %628 = arith.addf %617, %627 : vector<8x32xf32>
    %629 = arith.select %620, %622, %628 : vector<8x32xi1>, vector<8x32xf32>
    %630 = arith.truncf %609 : vector<8x32xf32> to vector<8x32xbf16>
    %c0_176 = arith.constant 0 : index
    %c0_177 = arith.constant 0 : index
    %631 = vector.load %arg20[%c0_176, %c0_177] : memref<32x32xbf16, #tpu.memory_space<vmem>>, vector<32x32xbf16>
    %cst_178 = arith.constant dense<0.000000e+00> : vector<8x32xf32>
    %632 = tpu.matmul %630, %631, %cst_178 {dimension_numbers = #tpu.dot_dimension_numbers<[1], [0], [0], [1], [0, 0, 1, 1], [], []>} : vector<8x32xbf16>, vector<32x32xbf16>, vector<8x32xf32> -> vector<8x32xf32>
    %633 = arith.truncf %609 : vector<8x32xf32> to vector<8x32xbf16>
    %c0_179 = arith.constant 0 : index
    %c0_180 = arith.constant 0 : index
    %634 = vector.load %arg21[%c0_179, %c0_180] : memref<32x32xbf16, #tpu.memory_space<vmem>>, vector<32x32xbf16>
    %cst_181 = arith.constant dense<0.000000e+00> : vector<8x32xf32>
    %635 = tpu.matmul %633, %634, %cst_181 {dimension_numbers = #tpu.dot_dimension_numbers<[1], [0], [0], [1], [0, 0, 1, 1], [], []>} : vector<8x32xbf16>, vector<32x32xbf16>, vector<8x32xf32> -> vector<8x32xf32>
    %636 = arith.mulf %629, %609 : vector<8x32xf32>
    %cst_182 = arith.constant 0.000000e+00 : f32
    %637 = vector.broadcast %cst_182 : f32 to vector<32x32xf32>
    %638 = vector.shape_cast %629 : vector<8x32xf32> to vector<8x32x1xf32>
    %639 = vector.shape_cast %61 : vector<32x32xf32> to vector<1x32x32xf32>
    %640 = vector.broadcast %638 : vector<8x32x1xf32> to vector<8x32x32xf32>
    %641 = vector.broadcast %639 : vector<1x32x32xf32> to vector<8x32x32xf32>
    %642 = arith.mulf %640, %641 : vector<8x32x32xf32>
    %643 = math.exp %642 : vector<8x32x32xf32>
    %644 = vector.shape_cast %636 : vector<8x32xf32> to vector<8x32x1xf32>
    %645 = vector.shape_cast %632 : vector<8x32xf32> to vector<8x1x32xf32>
    %646 = vector.broadcast %644 : vector<8x32x1xf32> to vector<8x32x32xf32>
    %647 = vector.broadcast %645 : vector<8x1x32xf32> to vector<8x32x32xf32>
    %648 = arith.mulf %646, %647 : vector<8x32x32xf32>
    %649 = vector.extract_strided_slice %643 {offsets = [0, 0, 0], sizes = [1, 32, 32], strides = [1, 1, 1]} : vector<8x32x32xf32> to vector<1x32x32xf32>
    %650 = vector.shape_cast %649 : vector<1x32x32xf32> to vector<32x32xf32>
    %651 = arith.mulf %650, %637 : vector<32x32xf32>
    %652 = vector.extract_strided_slice %648 {offsets = [0, 0, 0], sizes = [1, 32, 32], strides = [1, 1, 1]} : vector<8x32x32xf32> to vector<1x32x32xf32>
    %653 = vector.shape_cast %652 : vector<1x32x32xf32> to vector<32x32xf32>
    %654 = arith.addf %651, %653 : vector<32x32xf32>
    %655 = vector.extract_strided_slice %635 {offsets = [0, 0], sizes = [1, 32], strides = [1, 1]} : vector<8x32xf32> to vector<1x32xf32>
    %cst_183 = arith.constant dense<0.000000e+00> : vector<1x32xf32>
    %656 = tpu.matmul %655, %654, %cst_183 {dimension_numbers = #tpu.dot_dimension_numbers<[1], [1], [0], [0], [0, 0, 1, 0], [], []>} : vector<1x32xf32>, vector<32x32xf32>, vector<1x32xf32> -> vector<1x32xf32>
    %657 = vector.extract_strided_slice %643 {offsets = [1, 0, 0], sizes = [1, 32, 32], strides = [1, 1, 1]} : vector<8x32x32xf32> to vector<1x32x32xf32>
    %658 = vector.shape_cast %657 : vector<1x32x32xf32> to vector<32x32xf32>
    %659 = arith.mulf %658, %654 : vector<32x32xf32>
    %660 = vector.extract_strided_slice %648 {offsets = [1, 0, 0], sizes = [1, 32, 32], strides = [1, 1, 1]} : vector<8x32x32xf32> to vector<1x32x32xf32>
    %661 = vector.shape_cast %660 : vector<1x32x32xf32> to vector<32x32xf32>
    %662 = arith.addf %659, %661 : vector<32x32xf32>
    %663 = vector.extract_strided_slice %635 {offsets = [1, 0], sizes = [1, 32], strides = [1, 1]} : vector<8x32xf32> to vector<1x32xf32>
    %cst_184 = arith.constant dense<0.000000e+00> : vector<1x32xf32>
    %664 = tpu.matmul %663, %662, %cst_184 {dimension_numbers = #tpu.dot_dimension_numbers<[1], [1], [0], [0], [0, 0, 1, 0], [], []>} : vector<1x32xf32>, vector<32x32xf32>, vector<1x32xf32> -> vector<1x32xf32>
    %665 = vector.extract_strided_slice %643 {offsets = [2, 0, 0], sizes = [1, 32, 32], strides = [1, 1, 1]} : vector<8x32x32xf32> to vector<1x32x32xf32>
    %666 = vector.shape_cast %665 : vector<1x32x32xf32> to vector<32x32xf32>
    %667 = arith.mulf %666, %662 : vector<32x32xf32>
    %668 = vector.extract_strided_slice %648 {offsets = [2, 0, 0], sizes = [1, 32, 32], strides = [1, 1, 1]} : vector<8x32x32xf32> to vector<1x32x32xf32>
    %669 = vector.shape_cast %668 : vector<1x32x32xf32> to vector<32x32xf32>
    %670 = arith.addf %667, %669 : vector<32x32xf32>
    %671 = vector.extract_strided_slice %635 {offsets = [2, 0], sizes = [1, 32], strides = [1, 1]} : vector<8x32xf32> to vector<1x32xf32>
    %cst_185 = arith.constant dense<0.000000e+00> : vector<1x32xf32>
    %672 = tpu.matmul %671, %670, %cst_185 {dimension_numbers = #tpu.dot_dimension_numbers<[1], [1], [0], [0], [0, 0, 1, 0], [], []>} : vector<1x32xf32>, vector<32x32xf32>, vector<1x32xf32> -> vector<1x32xf32>
    %673 = vector.extract_strided_slice %643 {offsets = [3, 0, 0], sizes = [1, 32, 32], strides = [1, 1, 1]} : vector<8x32x32xf32> to vector<1x32x32xf32>
    %674 = vector.shape_cast %673 : vector<1x32x32xf32> to vector<32x32xf32>
    %675 = arith.mulf %674, %670 : vector<32x32xf32>
    %676 = vector.extract_strided_slice %648 {offsets = [3, 0, 0], sizes = [1, 32, 32], strides = [1, 1, 1]} : vector<8x32x32xf32> to vector<1x32x32xf32>
    %677 = vector.shape_cast %676 : vector<1x32x32xf32> to vector<32x32xf32>
    %678 = arith.addf %675, %677 : vector<32x32xf32>
    %679 = vector.extract_strided_slice %635 {offsets = [3, 0], sizes = [1, 32], strides = [1, 1]} : vector<8x32xf32> to vector<1x32xf32>
    %cst_186 = arith.constant dense<0.000000e+00> : vector<1x32xf32>
    %680 = tpu.matmul %679, %678, %cst_186 {dimension_numbers = #tpu.dot_dimension_numbers<[1], [1], [0], [0], [0, 0, 1, 0], [], []>} : vector<1x32xf32>, vector<32x32xf32>, vector<1x32xf32> -> vector<1x32xf32>
    %681 = vector.extract_strided_slice %643 {offsets = [4, 0, 0], sizes = [1, 32, 32], strides = [1, 1, 1]} : vector<8x32x32xf32> to vector<1x32x32xf32>
    %682 = vector.shape_cast %681 : vector<1x32x32xf32> to vector<32x32xf32>
    %683 = arith.mulf %682, %678 : vector<32x32xf32>
    %684 = vector.extract_strided_slice %648 {offsets = [4, 0, 0], sizes = [1, 32, 32], strides = [1, 1, 1]} : vector<8x32x32xf32> to vector<1x32x32xf32>
    %685 = vector.shape_cast %684 : vector<1x32x32xf32> to vector<32x32xf32>
    %686 = arith.addf %683, %685 : vector<32x32xf32>
    %687 = vector.extract_strided_slice %635 {offsets = [4, 0], sizes = [1, 32], strides = [1, 1]} : vector<8x32xf32> to vector<1x32xf32>
    %cst_187 = arith.constant dense<0.000000e+00> : vector<1x32xf32>
    %688 = tpu.matmul %687, %686, %cst_187 {dimension_numbers = #tpu.dot_dimension_numbers<[1], [1], [0], [0], [0, 0, 1, 0], [], []>} : vector<1x32xf32>, vector<32x32xf32>, vector<1x32xf32> -> vector<1x32xf32>
    %689 = vector.extract_strided_slice %643 {offsets = [5, 0, 0], sizes = [1, 32, 32], strides = [1, 1, 1]} : vector<8x32x32xf32> to vector<1x32x32xf32>
    %690 = vector.shape_cast %689 : vector<1x32x32xf32> to vector<32x32xf32>
    %691 = arith.mulf %690, %686 : vector<32x32xf32>
    %692 = vector.extract_strided_slice %648 {offsets = [5, 0, 0], sizes = [1, 32, 32], strides = [1, 1, 1]} : vector<8x32x32xf32> to vector<1x32x32xf32>
    %693 = vector.shape_cast %692 : vector<1x32x32xf32> to vector<32x32xf32>
    %694 = arith.addf %691, %693 : vector<32x32xf32>
    %695 = vector.extract_strided_slice %635 {offsets = [5, 0], sizes = [1, 32], strides = [1, 1]} : vector<8x32xf32> to vector<1x32xf32>
    %cst_188 = arith.constant dense<0.000000e+00> : vector<1x32xf32>
    %696 = tpu.matmul %695, %694, %cst_188 {dimension_numbers = #tpu.dot_dimension_numbers<[1], [1], [0], [0], [0, 0, 1, 0], [], []>} : vector<1x32xf32>, vector<32x32xf32>, vector<1x32xf32> -> vector<1x32xf32>
    %697 = vector.extract_strided_slice %643 {offsets = [6, 0, 0], sizes = [1, 32, 32], strides = [1, 1, 1]} : vector<8x32x32xf32> to vector<1x32x32xf32>
    %698 = vector.shape_cast %697 : vector<1x32x32xf32> to vector<32x32xf32>
    %699 = arith.mulf %698, %694 : vector<32x32xf32>
    %700 = vector.extract_strided_slice %648 {offsets = [6, 0, 0], sizes = [1, 32, 32], strides = [1, 1, 1]} : vector<8x32x32xf32> to vector<1x32x32xf32>
    %701 = vector.shape_cast %700 : vector<1x32x32xf32> to vector<32x32xf32>
    %702 = arith.addf %699, %701 : vector<32x32xf32>
    %703 = vector.extract_strided_slice %635 {offsets = [6, 0], sizes = [1, 32], strides = [1, 1]} : vector<8x32xf32> to vector<1x32xf32>
    %cst_189 = arith.constant dense<0.000000e+00> : vector<1x32xf32>
    %704 = tpu.matmul %703, %702, %cst_189 {dimension_numbers = #tpu.dot_dimension_numbers<[1], [1], [0], [0], [0, 0, 1, 0], [], []>} : vector<1x32xf32>, vector<32x32xf32>, vector<1x32xf32> -> vector<1x32xf32>
    %705 = vector.extract_strided_slice %643 {offsets = [7, 0, 0], sizes = [1, 32, 32], strides = [1, 1, 1]} : vector<8x32x32xf32> to vector<1x32x32xf32>
    %706 = vector.shape_cast %705 : vector<1x32x32xf32> to vector<32x32xf32>
    %707 = arith.mulf %706, %702 : vector<32x32xf32>
    %708 = vector.extract_strided_slice %648 {offsets = [7, 0, 0], sizes = [1, 32, 32], strides = [1, 1, 1]} : vector<8x32x32xf32> to vector<1x32x32xf32>
    %709 = vector.shape_cast %708 : vector<1x32x32xf32> to vector<32x32xf32>
    %710 = arith.addf %707, %709 : vector<32x32xf32>
    %711 = vector.extract_strided_slice %635 {offsets = [7, 0], sizes = [1, 32], strides = [1, 1]} : vector<8x32xf32> to vector<1x32xf32>
    %cst_190 = arith.constant dense<0.000000e+00> : vector<1x32xf32>
    %712 = tpu.matmul %711, %710, %cst_190 {dimension_numbers = #tpu.dot_dimension_numbers<[1], [1], [0], [0], [0, 0, 1, 0], [], []>} : vector<1x32xf32>, vector<32x32xf32>, vector<1x32xf32> -> vector<1x32xf32>
    %713 = tpu.concatenate %656, %664, %672, %680, %688, %696, %704, %712 in 0 : vector<1x32xf32>, vector<1x32xf32>, vector<1x32xf32>, vector<1x32xf32>, vector<1x32xf32>, vector<1x32xf32>, vector<1x32xf32>, vector<1x32xf32> -> vector<8x32xf32>
    %714 = vector.broadcast %66 : vector<1x32xf32> to vector<8x32xf32>
    %715 = arith.mulf %714, %609 : vector<8x32xf32>
    %716 = arith.addf %713, %715 : vector<8x32xf32>
    %cst_191 = arith.constant dense<0.000000e+00> : vector<8x32xf32>
    %717 = tpu.matmul %552, %716, %cst_191 {dimension_numbers = #tpu.dot_dimension_numbers<[1], [0], [0], [1], [0, 0, 1, 1], [], []>} : vector<8x8xf32>, vector<8x32xf32>, vector<8x32xf32> -> vector<8x32xf32>
    %718 = vector.broadcast %68 : vector<8x1xf32> to vector<8x32xf32>
    %719 = arith.mulf %717, %718 : vector<8x32xf32>
    %720 = arith.negf %719 : vector<8x32xf32>
    %721 = math.exp %720 : vector<8x32xf32>
    %cst_192 = arith.constant 1.000000e+00 : f32
    %722 = vector.broadcast %cst_192 : f32 to vector<8x32xf32>
    %723 = arith.addf %722, %721 : vector<8x32xf32>
    %724 = arith.divf %722, %723 : vector<8x32xf32>
    %725 = arith.mulf %719, %724 : vector<8x32xf32>
    %726 = arith.truncf %589 : vector<8x32xf32> to vector<8x32xbf16>
    %c0_193 = arith.constant 0 : index
    %c0_194 = arith.constant 0 : index
    %727 = vector.load %arg17[%c0_193, %c0_194] : memref<32x32xbf16, #tpu.memory_space<vmem>>, vector<32x32xbf16>
    %cst_195 = arith.constant dense<0.000000e+00> : vector<8x32xf32>
    %728 = tpu.matmul %726, %727, %cst_195 {dimension_numbers = #tpu.dot_dimension_numbers<[1], [0], [0], [1], [0, 0, 1, 1], [], []>} : vector<8x32xbf16>, vector<32x32xbf16>, vector<8x32xf32> -> vector<8x32xf32>
    %c0_196 = arith.constant 0 : index
    %c0_197 = arith.constant 0 : index
    %729 = vector.load %arg18[%c0_196, %c0_197] : memref<1x32xf32, #tpu.memory_space<vmem>>, vector<1x32xf32>
    %730 = vector.broadcast %729 : vector<1x32xf32> to vector<8x32xf32>
    %731 = arith.addf %728, %730 : vector<8x32xf32>
    %cst_198 = arith.constant 0.000000e+00 : f32
    %732 = vector.broadcast %cst_198 : f32 to vector<8x32xf32>
    %733 = arith.maximumf %731, %732 : vector<8x32xf32>
    %734 = vector.broadcast %cst_198 : f32 to vector<8x32xf32>
    %735 = arith.subf %731, %734 : vector<8x32xf32>
    %736 = arith.cmpf one, %735, %735 : vector<8x32xf32>
    %737 = vector.broadcast %cst_198 : f32 to vector<8x32xf32>
    %738 = arith.addf %731, %737 : vector<8x32xf32>
    %739 = math.absf %735 : vector<8x32xf32>
    %cst_199 = arith.constant 0.000000e+00 : f32
    %740 = vector.broadcast %cst_199 : f32 to vector<8x32xf32>
    %741 = arith.subf %740, %739 : vector<8x32xf32>
    %742 = math.exp %741 : vector<8x32xf32>
    %743 = math.log1p %742 : vector<8x32xf32>
    %744 = arith.addf %733, %743 : vector<8x32xf32>
    %745 = arith.select %736, %738, %744 : vector<8x32xi1>, vector<8x32xf32>
    %746 = arith.truncf %745 : vector<8x32xf32> to vector<8x32xbf16>
    %c0_200 = arith.constant 0 : index
    %c0_201 = arith.constant 0 : index
    %747 = vector.load %arg25[%c0_200, %c0_201] : memref<32x32xbf16, #tpu.memory_space<vmem>>, vector<32x32xbf16>
    %cst_202 = arith.constant dense<0.000000e+00> : vector<8x32xf32>
    %748 = tpu.matmul %746, %747, %cst_202 {dimension_numbers = #tpu.dot_dimension_numbers<[1], [0], [0], [1], [0, 0, 1, 1], [], []>} : vector<8x32xbf16>, vector<32x32xbf16>, vector<8x32xf32> -> vector<8x32xf32>
    %c0_203 = arith.constant 0 : index
    %c0_204 = arith.constant 0 : index
    %749 = vector.load %arg28[%c0_203, %c0_204] : memref<1x32xf32, #tpu.memory_space<vmem>>, vector<1x32xf32>
    %750 = vector.broadcast %749 : vector<1x32xf32> to vector<8x32xf32>
    %751 = arith.addf %748, %750 : vector<8x32xf32>
    %cst_205 = arith.constant 0.000000e+00 : f32
    %752 = vector.broadcast %cst_205 : f32 to vector<8x32xf32>
    %753 = arith.maximumf %751, %752 : vector<8x32xf32>
    %754 = vector.broadcast %cst_205 : f32 to vector<8x32xf32>
    %755 = arith.subf %751, %754 : vector<8x32xf32>
    %756 = arith.cmpf one, %755, %755 : vector<8x32xf32>
    %757 = vector.broadcast %cst_205 : f32 to vector<8x32xf32>
    %758 = arith.addf %751, %757 : vector<8x32xf32>
    %759 = math.absf %755 : vector<8x32xf32>
    %cst_206 = arith.constant 0.000000e+00 : f32
    %760 = vector.broadcast %cst_206 : f32 to vector<8x32xf32>
    %761 = arith.subf %760, %759 : vector<8x32xf32>
    %762 = math.exp %761 : vector<8x32xf32>
    %763 = math.log1p %762 : vector<8x32xf32>
    %764 = arith.addf %753, %763 : vector<8x32xf32>
    %765 = arith.select %756, %758, %764 : vector<8x32xi1>, vector<8x32xf32>
    %766 = arith.truncf %745 : vector<8x32xf32> to vector<8x32xbf16>
    %c0_207 = arith.constant 0 : index
    %c0_208 = arith.constant 0 : index
    %767 = vector.load %arg26[%c0_207, %c0_208] : memref<32x32xbf16, #tpu.memory_space<vmem>>, vector<32x32xbf16>
    %cst_209 = arith.constant dense<0.000000e+00> : vector<8x32xf32>
    %768 = tpu.matmul %766, %767, %cst_209 {dimension_numbers = #tpu.dot_dimension_numbers<[1], [0], [0], [1], [0, 0, 1, 1], [], []>} : vector<8x32xbf16>, vector<32x32xbf16>, vector<8x32xf32> -> vector<8x32xf32>
    %769 = arith.truncf %745 : vector<8x32xf32> to vector<8x32xbf16>
    %c0_210 = arith.constant 0 : index
    %c0_211 = arith.constant 0 : index
    %770 = vector.load %arg27[%c0_210, %c0_211] : memref<32x32xbf16, #tpu.memory_space<vmem>>, vector<32x32xbf16>
    %cst_212 = arith.constant dense<0.000000e+00> : vector<8x32xf32>
    %771 = tpu.matmul %769, %770, %cst_212 {dimension_numbers = #tpu.dot_dimension_numbers<[1], [0], [0], [1], [0, 0, 1, 1], [], []>} : vector<8x32xbf16>, vector<32x32xbf16>, vector<8x32xf32> -> vector<8x32xf32>
    %772 = arith.mulf %765, %745 : vector<8x32xf32>
    %cst_213 = arith.constant 0.000000e+00 : f32
    %773 = vector.broadcast %cst_213 : f32 to vector<32x32xf32>
    %774 = vector.shape_cast %765 : vector<8x32xf32> to vector<8x32x1xf32>
    %775 = vector.shape_cast %65 : vector<32x32xf32> to vector<1x32x32xf32>
    %776 = vector.broadcast %774 : vector<8x32x1xf32> to vector<8x32x32xf32>
    %777 = vector.broadcast %775 : vector<1x32x32xf32> to vector<8x32x32xf32>
    %778 = arith.mulf %776, %777 : vector<8x32x32xf32>
    %779 = math.exp %778 : vector<8x32x32xf32>
    %780 = vector.shape_cast %772 : vector<8x32xf32> to vector<8x32x1xf32>
    %781 = vector.shape_cast %768 : vector<8x32xf32> to vector<8x1x32xf32>
    %782 = vector.broadcast %780 : vector<8x32x1xf32> to vector<8x32x32xf32>
    %783 = vector.broadcast %781 : vector<8x1x32xf32> to vector<8x32x32xf32>
    %784 = arith.mulf %782, %783 : vector<8x32x32xf32>
    %785 = vector.extract_strided_slice %779 {offsets = [7, 0, 0], sizes = [1, 32, 32], strides = [1, 1, 1]} : vector<8x32x32xf32> to vector<1x32x32xf32>
    %786 = vector.shape_cast %785 : vector<1x32x32xf32> to vector<32x32xf32>
    %787 = arith.mulf %786, %773 : vector<32x32xf32>
    %788 = vector.extract_strided_slice %784 {offsets = [7, 0, 0], sizes = [1, 32, 32], strides = [1, 1, 1]} : vector<8x32x32xf32> to vector<1x32x32xf32>
    %789 = vector.shape_cast %788 : vector<1x32x32xf32> to vector<32x32xf32>
    %790 = arith.addf %787, %789 : vector<32x32xf32>
    %791 = vector.extract_strided_slice %771 {offsets = [7, 0], sizes = [1, 32], strides = [1, 1]} : vector<8x32xf32> to vector<1x32xf32>
    %cst_214 = arith.constant dense<0.000000e+00> : vector<1x32xf32>
    %792 = tpu.matmul %791, %790, %cst_214 {dimension_numbers = #tpu.dot_dimension_numbers<[1], [1], [0], [0], [0, 0, 1, 0], [], []>} : vector<1x32xf32>, vector<32x32xf32>, vector<1x32xf32> -> vector<1x32xf32>
    %793 = vector.extract_strided_slice %779 {offsets = [6, 0, 0], sizes = [1, 32, 32], strides = [1, 1, 1]} : vector<8x32x32xf32> to vector<1x32x32xf32>
    %794 = vector.shape_cast %793 : vector<1x32x32xf32> to vector<32x32xf32>
    %795 = arith.mulf %794, %790 : vector<32x32xf32>
    %796 = vector.extract_strided_slice %784 {offsets = [6, 0, 0], sizes = [1, 32, 32], strides = [1, 1, 1]} : vector<8x32x32xf32> to vector<1x32x32xf32>
    %797 = vector.shape_cast %796 : vector<1x32x32xf32> to vector<32x32xf32>
    %798 = arith.addf %795, %797 : vector<32x32xf32>
    %799 = vector.extract_strided_slice %771 {offsets = [6, 0], sizes = [1, 32], strides = [1, 1]} : vector<8x32xf32> to vector<1x32xf32>
    %cst_215 = arith.constant dense<0.000000e+00> : vector<1x32xf32>
    %800 = tpu.matmul %799, %798, %cst_215 {dimension_numbers = #tpu.dot_dimension_numbers<[1], [1], [0], [0], [0, 0, 1, 0], [], []>} : vector<1x32xf32>, vector<32x32xf32>, vector<1x32xf32> -> vector<1x32xf32>
    %801 = vector.extract_strided_slice %779 {offsets = [5, 0, 0], sizes = [1, 32, 32], strides = [1, 1, 1]} : vector<8x32x32xf32> to vector<1x32x32xf32>
    %802 = vector.shape_cast %801 : vector<1x32x32xf32> to vector<32x32xf32>
    %803 = arith.mulf %802, %798 : vector<32x32xf32>
    %804 = vector.extract_strided_slice %784 {offsets = [5, 0, 0], sizes = [1, 32, 32], strides = [1, 1, 1]} : vector<8x32x32xf32> to vector<1x32x32xf32>
    %805 = vector.shape_cast %804 : vector<1x32x32xf32> to vector<32x32xf32>
    %806 = arith.addf %803, %805 : vector<32x32xf32>
    %807 = vector.extract_strided_slice %771 {offsets = [5, 0], sizes = [1, 32], strides = [1, 1]} : vector<8x32xf32> to vector<1x32xf32>
    %cst_216 = arith.constant dense<0.000000e+00> : vector<1x32xf32>
    %808 = tpu.matmul %807, %806, %cst_216 {dimension_numbers = #tpu.dot_dimension_numbers<[1], [1], [0], [0], [0, 0, 1, 0], [], []>} : vector<1x32xf32>, vector<32x32xf32>, vector<1x32xf32> -> vector<1x32xf32>
    %809 = vector.extract_strided_slice %779 {offsets = [4, 0, 0], sizes = [1, 32, 32], strides = [1, 1, 1]} : vector<8x32x32xf32> to vector<1x32x32xf32>
    %810 = vector.shape_cast %809 : vector<1x32x32xf32> to vector<32x32xf32>
    %811 = arith.mulf %810, %806 : vector<32x32xf32>
    %812 = vector.extract_strided_slice %784 {offsets = [4, 0, 0], sizes = [1, 32, 32], strides = [1, 1, 1]} : vector<8x32x32xf32> to vector<1x32x32xf32>
    %813 = vector.shape_cast %812 : vector<1x32x32xf32> to vector<32x32xf32>
    %814 = arith.addf %811, %813 : vector<32x32xf32>
    %815 = vector.extract_strided_slice %771 {offsets = [4, 0], sizes = [1, 32], strides = [1, 1]} : vector<8x32xf32> to vector<1x32xf32>
    %cst_217 = arith.constant dense<0.000000e+00> : vector<1x32xf32>
    %816 = tpu.matmul %815, %814, %cst_217 {dimension_numbers = #tpu.dot_dimension_numbers<[1], [1], [0], [0], [0, 0, 1, 0], [], []>} : vector<1x32xf32>, vector<32x32xf32>, vector<1x32xf32> -> vector<1x32xf32>
    %817 = vector.extract_strided_slice %779 {offsets = [3, 0, 0], sizes = [1, 32, 32], strides = [1, 1, 1]} : vector<8x32x32xf32> to vector<1x32x32xf32>
    %818 = vector.shape_cast %817 : vector<1x32x32xf32> to vector<32x32xf32>
    %819 = arith.mulf %818, %814 : vector<32x32xf32>
    %820 = vector.extract_strided_slice %784 {offsets = [3, 0, 0], sizes = [1, 32, 32], strides = [1, 1, 1]} : vector<8x32x32xf32> to vector<1x32x32xf32>
    %821 = vector.shape_cast %820 : vector<1x32x32xf32> to vector<32x32xf32>
    %822 = arith.addf %819, %821 : vector<32x32xf32>
    %823 = vector.extract_strided_slice %771 {offsets = [3, 0], sizes = [1, 32], strides = [1, 1]} : vector<8x32xf32> to vector<1x32xf32>
    %cst_218 = arith.constant dense<0.000000e+00> : vector<1x32xf32>
    %824 = tpu.matmul %823, %822, %cst_218 {dimension_numbers = #tpu.dot_dimension_numbers<[1], [1], [0], [0], [0, 0, 1, 0], [], []>} : vector<1x32xf32>, vector<32x32xf32>, vector<1x32xf32> -> vector<1x32xf32>
    %825 = vector.extract_strided_slice %779 {offsets = [2, 0, 0], sizes = [1, 32, 32], strides = [1, 1, 1]} : vector<8x32x32xf32> to vector<1x32x32xf32>
    %826 = vector.shape_cast %825 : vector<1x32x32xf32> to vector<32x32xf32>
    %827 = arith.mulf %826, %822 : vector<32x32xf32>
    %828 = vector.extract_strided_slice %784 {offsets = [2, 0, 0], sizes = [1, 32, 32], strides = [1, 1, 1]} : vector<8x32x32xf32> to vector<1x32x32xf32>
    %829 = vector.shape_cast %828 : vector<1x32x32xf32> to vector<32x32xf32>
    %830 = arith.addf %827, %829 : vector<32x32xf32>
    %831 = vector.extract_strided_slice %771 {offsets = [2, 0], sizes = [1, 32], strides = [1, 1]} : vector<8x32xf32> to vector<1x32xf32>
    %cst_219 = arith.constant dense<0.000000e+00> : vector<1x32xf32>
    %832 = tpu.matmul %831, %830, %cst_219 {dimension_numbers = #tpu.dot_dimension_numbers<[1], [1], [0], [0], [0, 0, 1, 0], [], []>} : vector<1x32xf32>, vector<32x32xf32>, vector<1x32xf32> -> vector<1x32xf32>
    %833 = vector.extract_strided_slice %779 {offsets = [1, 0, 0], sizes = [1, 32, 32], strides = [1, 1, 1]} : vector<8x32x32xf32> to vector<1x32x32xf32>
    %834 = vector.shape_cast %833 : vector<1x32x32xf32> to vector<32x32xf32>
    %835 = arith.mulf %834, %830 : vector<32x32xf32>
    %836 = vector.extract_strided_slice %784 {offsets = [1, 0, 0], sizes = [1, 32, 32], strides = [1, 1, 1]} : vector<8x32x32xf32> to vector<1x32x32xf32>
    %837 = vector.shape_cast %836 : vector<1x32x32xf32> to vector<32x32xf32>
    %838 = arith.addf %835, %837 : vector<32x32xf32>
    %839 = vector.extract_strided_slice %771 {offsets = [1, 0], sizes = [1, 32], strides = [1, 1]} : vector<8x32xf32> to vector<1x32xf32>
    %cst_220 = arith.constant dense<0.000000e+00> : vector<1x32xf32>
    %840 = tpu.matmul %839, %838, %cst_220 {dimension_numbers = #tpu.dot_dimension_numbers<[1], [1], [0], [0], [0, 0, 1, 0], [], []>} : vector<1x32xf32>, vector<32x32xf32>, vector<1x32xf32> -> vector<1x32xf32>
    %841 = vector.extract_strided_slice %779 {offsets = [0, 0, 0], sizes = [1, 32, 32], strides = [1, 1, 1]} : vector<8x32x32xf32> to vector<1x32x32xf32>
    %842 = vector.shape_cast %841 : vector<1x32x32xf32> to vector<32x32xf32>
    %843 = arith.mulf %842, %838 : vector<32x32xf32>
    %844 = vector.extract_strided_slice %784 {offsets = [0, 0, 0], sizes = [1, 32, 32], strides = [1, 1, 1]} : vector<8x32x32xf32> to vector<1x32x32xf32>
    %845 = vector.shape_cast %844 : vector<1x32x32xf32> to vector<32x32xf32>
    %846 = arith.addf %843, %845 : vector<32x32xf32>
    %847 = vector.extract_strided_slice %771 {offsets = [0, 0], sizes = [1, 32], strides = [1, 1]} : vector<8x32xf32> to vector<1x32xf32>
    %cst_221 = arith.constant dense<0.000000e+00> : vector<1x32xf32>
    %848 = tpu.matmul %847, %846, %cst_221 {dimension_numbers = #tpu.dot_dimension_numbers<[1], [1], [0], [0], [0, 0, 1, 0], [], []>} : vector<1x32xf32>, vector<32x32xf32>, vector<1x32xf32> -> vector<1x32xf32>
    %849 = tpu.concatenate %848, %840, %832, %824, %816, %808, %800, %792 in 0 : vector<1x32xf32>, vector<1x32xf32>, vector<1x32xf32>, vector<1x32xf32>, vector<1x32xf32>, vector<1x32xf32>, vector<1x32xf32>, vector<1x32xf32> -> vector<8x32xf32>
    %850 = vector.broadcast %67 : vector<1x32xf32> to vector<8x32xf32>
    %851 = arith.mulf %850, %745 : vector<8x32xf32>
    %852 = arith.addf %849, %851 : vector<8x32xf32>
    %cst_222 = arith.constant dense<0.000000e+00> : vector<8x32xf32>
    %853 = tpu.matmul %552, %852, %cst_222 {dimension_numbers = #tpu.dot_dimension_numbers<[1], [0], [0], [1], [0, 0, 1, 1], [], []>} : vector<8x8xf32>, vector<8x32xf32>, vector<8x32xf32> -> vector<8x32xf32>
    %854 = vector.broadcast %68 : vector<8x1xf32> to vector<8x32xf32>
    %855 = arith.mulf %853, %854 : vector<8x32xf32>
    %856 = arith.negf %855 : vector<8x32xf32>
    %857 = math.exp %856 : vector<8x32xf32>
    %cst_223 = arith.constant 1.000000e+00 : f32
    %858 = vector.broadcast %cst_223 : f32 to vector<8x32xf32>
    %859 = arith.addf %858, %857 : vector<8x32xf32>
    %860 = arith.divf %858, %859 : vector<8x32xf32>
    %861 = arith.mulf %855, %860 : vector<8x32xf32>
    %cst_224 = arith.constant dense<0.000000e+00> : vector<8x32xf32>
    %862 = tpu.matmul %552, %583, %cst_224 {dimension_numbers = #tpu.dot_dimension_numbers<[1], [0], [0], [1], [0, 0, 1, 1], [], []>} : vector<8x8xf32>, vector<8x32xf32>, vector<8x32xf32> -> vector<8x32xf32>
    %863 = arith.negf %862 : vector<8x32xf32>
    %864 = math.exp %863 : vector<8x32xf32>
    %cst_225 = arith.constant 1.000000e+00 : f32
    %865 = vector.broadcast %cst_225 : f32 to vector<8x32xf32>
    %866 = arith.addf %865, %864 : vector<8x32xf32>
    %867 = arith.divf %865, %866 : vector<8x32xf32>
    %868 = arith.mulf %862, %867 : vector<8x32xf32>
    %869 = arith.mulf %868, %725 : vector<8x32xf32>
    %870 = arith.mulf %868, %861 : vector<8x32xf32>
    %871 = arith.addf %869, %870 : vector<8x32xf32>
    %872 = arith.addf %871, %553 : vector<8x32xf32>
    %c0_226 = arith.constant 0 : index
    %c0_227 = arith.constant 0 : index
    %873 = vector.load %arg34[%c0_226, %c0_227] : memref<1x32xf32, #tpu.memory_space<vmem>>, vector<1x32xf32>
    %c0_228 = arith.constant 0 : index
    %c0_229 = arith.constant 0 : index
    %874 = vector.load %arg35[%c0_228, %c0_229] : memref<1x32xf32, #tpu.memory_space<vmem>>, vector<1x32xf32>
    %cst_230 = arith.constant dense<0.000000e+00> : vector<8xf32>
    %875 = vector.multi_reduction <add>, %872, %cst_230 [1] : vector<8x32xf32> to vector<8xf32>
    %876 = vector.shape_cast %875 : vector<8xf32> to vector<8x1xf32>
    %cst_231 = arith.constant 3.200000e+01 : f32
    %877 = vector.broadcast %cst_231 : f32 to vector<8x1xf32>
    %878 = arith.divf %876, %877 : vector<8x1xf32>
    %879 = vector.broadcast %878 : vector<8x1xf32> to vector<8x32xf32>
    %880 = arith.subf %872, %879 : vector<8x32xf32>
    %881 = arith.mulf %880, %880 : vector<8x32xf32>
    %cst_232 = arith.constant dense<0.000000e+00> : vector<8xf32>
    %882 = vector.multi_reduction <add>, %881, %cst_232 [1] : vector<8x32xf32> to vector<8xf32>
    %883 = vector.shape_cast %882 : vector<8xf32> to vector<8x1xf32>
    %cst_233 = arith.constant 3.200000e+01 : f32
    %884 = vector.broadcast %cst_233 : f32 to vector<8x1xf32>
    %885 = arith.divf %883, %884 : vector<8x1xf32>
    %886 = vector.broadcast %878 : vector<8x1xf32> to vector<8x32xf32>
    %887 = arith.subf %872, %886 : vector<8x32xf32>
    %cst_234 = arith.constant 9.99999974E-6 : f32
    %888 = vector.broadcast %cst_234 : f32 to vector<8x1xf32>
    %889 = arith.addf %885, %888 : vector<8x1xf32>
    %890 = math.rsqrt %889 : vector<8x1xf32>
    %891 = vector.broadcast %890 : vector<8x1xf32> to vector<8x32xf32>
    %892 = arith.mulf %887, %891 : vector<8x32xf32>
    %893 = vector.broadcast %873 : vector<1x32xf32> to vector<8x32xf32>
    %894 = arith.mulf %892, %893 : vector<8x32xf32>
    %895 = vector.broadcast %874 : vector<1x32xf32> to vector<8x32xf32>
    %896 = arith.addf %894, %895 : vector<8x32xf32>
    %897 = math.tanh %896 : vector<8x32xf32>
    %c0_235 = arith.constant 0 : index
    %c0_236 = arith.constant 0 : index
    %c0_237 = arith.constant 0 : index
    %898 = vector.load %arg36[%c0_235, %c0_236, %c0_237] : memref<1x8x32xf32, #tpu.memory_space<vmem>>, vector<1x8x32xf32>
    %899 = vector.shape_cast %898 : vector<1x8x32xf32> to vector<8x32xf32>
    %900 = vector.shape_cast %897 : vector<8x32xf32> to vector<1x8x32xf32>
    tpu.vector_store %arg36[%c0_235, %c0_236, %c0_237], %900 {strides = array<i32>} : memref<1x8x32xf32, #tpu.memory_space<vmem>>, vector<1x8x32xf32>,
    return
  }
  func.func @transform_0(%arg0: i32) -> (i32, i32, i32) {
    %c0_i32 = arith.constant 0 : i32
    %c0_i32_0 = arith.constant 0 : i32
    %c0_i32_1 = arith.constant 0 : i32
    return %arg0, %c0_i32, %c0_i32_0 : i32, i32, i32
  }
  func.func @transform_1(%arg0: i32) -> (i32, i32) {
    %c0_i32 = arith.constant 0 : i32
    %c0_i32_0 = arith.constant 0 : i32
    %c0_i32_1 = arith.constant 0 : i32
    return %c0_i32, %c0_i32_0 : i32, i32
  }
  func.func @transform_2(%arg0: i32) -> (i32, i32) {
    %c0_i32 = arith.constant 0 : i32
    %c0_i32_0 = arith.constant 0 : i32
    %c0_i32_1 = arith.constant 0 : i32
    return %c0_i32, %c0_i32_0 : i32, i32
  }
  func.func @transform_3(%arg0: i32) -> (i32, i32) {
    %c0_i32 = arith.constant 0 : i32
    %c0_i32_0 = arith.constant 0 : i32
    %c0_i32_1 = arith.constant 0 : i32
    return %c0_i32, %c0_i32_0 : i32, i32
  }
  func.func @transform_4(%arg0: i32) -> (i32, i32) {
    %c0_i32 = arith.constant 0 : i32
    %c0_i32_0 = arith.constant 0 : i32
    %c0_i32_1 = arith.constant 0 : i32
    return %c0_i32, %c0_i32_0 : i32, i32
  }
  func.func @transform_5(%arg0: i32) -> (i32, i32) {
    %c0_i32 = arith.constant 0 : i32
    %c0_i32_0 = arith.constant 0 : i32
    %c0_i32_1 = arith.constant 0 : i32
    return %c0_i32, %c0_i32_0 : i32, i32
  }
  func.func @transform_6(%arg0: i32) -> (i32, i32) {
    %c0_i32 = arith.constant 0 : i32
    %c0_i32_0 = arith.constant 0 : i32
    %c0_i32_1 = arith.constant 0 : i32
    return %c0_i32, %c0_i32_0 : i32, i32
  }
  func.func @transform_7(%arg0: i32) -> (i32, i32) {
    %c0_i32 = arith.constant 0 : i32
    %c0_i32_0 = arith.constant 0 : i32
    %c0_i32_1 = arith.constant 0 : i32
    return %c0_i32, %c0_i32_0 : i32, i32
  }
  func.func @transform_8(%arg0: i32) -> (i32, i32) {
    %c0_i32 = arith.constant 0 : i32
    %c0_i32_0 = arith.constant 0 : i32
    %c0_i32_1 = arith.constant 0 : i32
    return %c0_i32, %c0_i32_0 : i32, i32
  }
  func.func @transform_9(%arg0: i32) -> (i32, i32) {
    %c0_i32 = arith.constant 0 : i32
    %c0_i32_0 = arith.constant 0 : i32
    %c0_i32_1 = arith.constant 0 : i32
    return %c0_i32, %c0_i32_0 : i32, i32
  }
  func.func @transform_10(%arg0: i32) -> (i32, i32) {
    %c0_i32 = arith.constant 0 : i32
    %c0_i32_0 = arith.constant 0 : i32
    %c0_i32_1 = arith.constant 0 : i32
    return %c0_i32, %c0_i32_0 : i32, i32
  }
  func.func @transform_11(%arg0: i32) -> (i32, i32) {
    %c0_i32 = arith.constant 0 : i32
    %c0_i32_0 = arith.constant 0 : i32
    %c0_i32_1 = arith.constant 0 : i32
    return %c0_i32, %c0_i32_0 : i32, i32
  }
  func.func @transform_12(%arg0: i32) -> (i32, i32) {
    %c0_i32 = arith.constant 0 : i32
    %c0_i32_0 = arith.constant 0 : i32
    %c0_i32_1 = arith.constant 0 : i32
    return %c0_i32, %c0_i32_0 : i32, i32
  }
  func.func @transform_13(%arg0: i32) -> (i32, i32) {
    %c0_i32 = arith.constant 0 : i32
    %c0_i32_0 = arith.constant 0 : i32
    %c0_i32_1 = arith.constant 0 : i32
    return %c0_i32, %c0_i32_0 : i32, i32
  }
  func.func @transform_14(%arg0: i32) -> (i32, i32) {
    %c0_i32 = arith.constant 0 : i32
    %c0_i32_0 = arith.constant 0 : i32
    %c0_i32_1 = arith.constant 0 : i32
    return %c0_i32, %c0_i32_0 : i32, i32
  }
  func.func @transform_15(%arg0: i32) -> (i32, i32) {
    %c0_i32 = arith.constant 0 : i32
    %c0_i32_0 = arith.constant 0 : i32
    %c0_i32_1 = arith.constant 0 : i32
    return %c0_i32, %c0_i32_0 : i32, i32
  }
  func.func @transform_16(%arg0: i32) -> (i32, i32) {
    %c0_i32 = arith.constant 0 : i32
    %c0_i32_0 = arith.constant 0 : i32
    %c0_i32_1 = arith.constant 0 : i32
    return %c0_i32, %c0_i32_0 : i32, i32
  }
  func.func @transform_17(%arg0: i32) -> (i32, i32) {
    %c0_i32 = arith.constant 0 : i32
    %c0_i32_0 = arith.constant 0 : i32
    %c0_i32_1 = arith.constant 0 : i32
    return %c0_i32, %c0_i32_0 : i32, i32
  }
  func.func @transform_18(%arg0: i32) -> (i32, i32) {
    %c0_i32 = arith.constant 0 : i32
    %c0_i32_0 = arith.constant 0 : i32
    %c0_i32_1 = arith.constant 0 : i32
    return %c0_i32, %c0_i32_0 : i32, i32
  }
  func.func @transform_19(%arg0: i32) -> (i32, i32) {
    %c0_i32 = arith.constant 0 : i32
    %c0_i32_0 = arith.constant 0 : i32
    %c0_i32_1 = arith.constant 0 : i32
    return %c0_i32, %c0_i32_0 : i32, i32
  }
  func.func @transform_20(%arg0: i32) -> (i32, i32) {
    %c0_i32 = arith.constant 0 : i32
    %c0_i32_0 = arith.constant 0 : i32
    %c0_i32_1 = arith.constant 0 : i32
    return %c0_i32, %c0_i32_0 : i32, i32
  }
  func.func @transform_21(%arg0: i32) -> (i32, i32) {
    %c0_i32 = arith.constant 0 : i32
    %c0_i32_0 = arith.constant 0 : i32
    %c0_i32_1 = arith.constant 0 : i32
    return %c0_i32, %c0_i32_0 : i32, i32
  }
  func.func @transform_22(%arg0: i32) -> (i32, i32) {
    %c0_i32 = arith.constant 0 : i32
    %c0_i32_0 = arith.constant 0 : i32
    %c0_i32_1 = arith.constant 0 : i32
    return %c0_i32, %c0_i32_0 : i32, i32
  }
  func.func @transform_23(%arg0: i32) -> (i32, i32) {
    %c0_i32 = arith.constant 0 : i32
    %c0_i32_0 = arith.constant 0 : i32
    %c0_i32_1 = arith.constant 0 : i32
    return %c0_i32, %c0_i32_0 : i32, i32
  }
  func.func @transform_24(%arg0: i32) -> (i32, i32) {
    %c0_i32 = arith.constant 0 : i32
    %c0_i32_0 = arith.constant 0 : i32
    %c0_i32_1 = arith.constant 0 : i32
    return %c0_i32, %c0_i32_0 : i32, i32
  }
  func.func @transform_25(%arg0: i32) -> (i32, i32) {
    %c0_i32 = arith.constant 0 : i32
    %c0_i32_0 = arith.constant 0 : i32
    %c0_i32_1 = arith.constant 0 : i32
    return %c0_i32, %c0_i32_0 : i32, i32
  }
  func.func @transform_26(%arg0: i32) -> (i32, i32) {
    %c0_i32 = arith.constant 0 : i32
    %c0_i32_0 = arith.constant 0 : i32
    %c0_i32_1 = arith.constant 0 : i32
    return %c0_i32, %c0_i32_0 : i32, i32
  }
  func.func @transform_27(%arg0: i32) -> (i32, i32) {
    %c0_i32 = arith.constant 0 : i32
    %c0_i32_0 = arith.constant 0 : i32
    %c0_i32_1 = arith.constant 0 : i32
    return %c0_i32, %c0_i32_0 : i32, i32
  }
  func.func @transform_28(%arg0: i32) -> (i32, i32) {
    %c0_i32 = arith.constant 0 : i32
    %c0_i32_0 = arith.constant 0 : i32
    %c0_i32_1 = arith.constant 0 : i32
    return %c0_i32, %c0_i32_0 : i32, i32
  }
  func.func @transform_29(%arg0: i32) -> (i32, i32) {
    %c0_i32 = arith.constant 0 : i32
    %c0_i32_0 = arith.constant 0 : i32
    %c0_i32_1 = arith.constant 0 : i32
    return %c0_i32, %c0_i32_0 : i32, i32
  }
  func.func @transform_30(%arg0: i32) -> (i32, i32) {
    %c0_i32 = arith.constant 0 : i32
    %c0_i32_0 = arith.constant 0 : i32
    %c0_i32_1 = arith.constant 0 : i32
    return %c0_i32, %c0_i32_0 : i32, i32
  }
  func.func @transform_31(%arg0: i32) -> (i32, i32) {
    %c0_i32 = arith.constant 0 : i32
    %c0_i32_0 = arith.constant 0 : i32
    %c0_i32_1 = arith.constant 0 : i32
    return %c0_i32, %c0_i32_0 : i32, i32
  }
  func.func @transform_32(%arg0: i32) -> (i32, i32) {
    %c0_i32 = arith.constant 0 : i32
    %c0_i32_0 = arith.constant 0 : i32
    %c0_i32_1 = arith.constant 0 : i32
    return %c0_i32, %c0_i32_0 : i32, i32
  }
  func.func @transform_33(%arg0: i32) -> (i32, i32) {
    %c0_i32 = arith.constant 0 : i32
    %c0_i32_0 = arith.constant 0 : i32
    %c0_i32_1 = arith.constant 0 : i32
    return %c0_i32, %c0_i32_0 : i32, i32
  }
  func.func @transform_34(%arg0: i32) -> (i32, i32) {
    %c0_i32 = arith.constant 0 : i32
    %c0_i32_0 = arith.constant 0 : i32
    %c0_i32_1 = arith.constant 0 : i32
    return %c0_i32, %c0_i32_0 : i32, i32
  }
  func.func @transform_35(%arg0: i32) -> (i32, i32, i32) {
    %c0_i32 = arith.constant 0 : i32
    %c0_i32_0 = arith.constant 0 : i32
    %c0_i32_1 = arith.constant 0 : i32
    return %arg0, %c0_i32, %c0_i32_0 : i32, i32, i32
  }
}

</mosaic_0001>

<bundles_post_ra>
// kernel: t_mamba_forward.1
= control target key start
LH: loop header
LB: loop body
LE: loop exit
PB: predicated region body
PF: predicated region fallthrough
CT: control target
= control target key end

     0   :  { %s13624_s6 = smov 1   ;;  %s13625_s10 = smov 2   ;;  %s16374_s0 = inlined_call_operand.smem [shape: u32[36], index: -1, kind: input, shape index: {}] }
   0x1   :  { %s13673_s5 = sld [smem:[%s16374_s0]]   ;;  %s13626_s14 = smov 3  }
   0x2   :  { %s13678_s9 = sld [smem:[%s16374_s0 + %s13624_s6]]   ;;  %s13627_s18 = smov 4  }
   0x3   :  { %s13683_s13 = sld [smem:[%s16374_s0 + %s13625_s10]]   ;;  %s13628_s22 = smov 5  }
   0x4   :  { %s13688_s17 = sld [smem:[%s16374_s0 + %s13626_s14]]   ;;  %s13629_s26 = smov 6  }
   0x5   :  { %s13693_s21 = sld [smem:[%s16374_s0 + %s13627_s18]]   ;;  %s13630_s30 = smov 7  }
   0x6   :  { %s13698_s25 = sld [smem:[%s16374_s0 + %s13628_s22]]   ;;  %s13631_s4 = smov 8  }
   0x7   :  { %16467 = sst [smem:[#allocation5_spill]] %s13673_s5  ;;  %s13632_s10 = smov 9  }
   0x8   :  { %16468 = sst [smem:[#allocation6_spill]] %s13678_s9  ;;  %s13633_s15 = smov 10  }
   0x9   :  { %16469 = sst [smem:[#allocation7_spill]] %s13683_s13  ;;  %s13634_s20 = smov 11  }
   0xa   :  { %16470 = sst [smem:[#allocation8_spill]] %s13688_s17  ;;  %s13636_s1 = smov 13  }
   0xb   :  { %16471 = sst [smem:[#allocation9_spill]] %s13693_s21  ;;  %s13637_s7 = smov 14  }
   0xc   :  { %16472 = sst [smem:[#allocation10_spill]] %s13698_s25  ;;  %s13639_s22 = smov 16  }
   0xd   :  { %s13703_s29 = sld [smem:[%s16374_s0 + %s13629_s26]]   ;;  %s13635_s26 = smov 12  }
   0xe   :  { %s13708_s3 = sld [smem:[%s16374_s0 + %s13630_s30]]   ;;  %s13640_s28 = smov 17  }
   0xf   :  { %s13713_s8 = sld [smem:[%s16374_s0 + %s13631_s4]]  }
  0x10   :  { %s13718_s14 = sld [smem:[%s16374_s0 + %s13632_s10]]  }
  0x11   :  { %s13723_s19 = sld [smem:[%s16374_s0 + %s13633_s15]]   ;;  %s13638_s15 = smov 15  }
  0x12   :  { %s13728_s24 = sld [smem:[%s16374_s0 + %s13634_s20]]  }
  0x13   :  { %16473 = sst [smem:[#allocation11_spill]] %s13703_s29 }
  0x14   :  { %16474 = sst [smem:[#allocation12_spill]] %s13708_s3 }
  0x15   :  { %16475 = sst [smem:[#allocation13_spill]] %s13713_s8 }
  0x16   :  { %s13733_s30 = sld [smem:[%s16374_s0 + %s13635_s26]]  }
  0x17   :  { %s13738_s6 = sld [smem:[%s16374_s0 + %s13636_s1]]  }
  0x18   :  { %16476 = sst [smem:[#allocation14_spill]] %s13728_s24 }
  0x19   :  { %s13743_s12 = sld [smem:[%s16374_s0 + %s13637_s7]]   ;;  %s13641_s7 = smov 18  }
  0x1a   :  { %s13748_s20 = sld [smem:[%s16374_s0 + %s13638_s15]]   ;;  %s13642_s15 = smov 19  }
  0x1b   :  { %s13753_s27 = sld [smem:[%s16374_s0 + %s13639_s22]]   ;;  %s13643_s22 = smov 20  }
  0x1c   :  { %s13758_s4 = sld [smem:[%s16374_s0 + %s13640_s28]]   ;;  %s13644_s28 = smov 21  }
  0x1d   :  { %16477 = sst [smem:[#allocation15_spill]] %s13738_s6 }
  0x1e   :  { %s13763_s6 = sld [smem:[%s16374_s0 + %s13641_s7]]   ;;  %s13645_s7 = smov 22  }
  0x20   :  { %16478 = sst [smem:[#allocation16_spill]] %s13748_s20 }
  0x21   :  { %16479 = sst [smem:[#allocation17_spill]] %s13753_s27 }
  0x22   :  { %16480 = sst [smem:[#allocation18_spill]] %s13758_s4 }
  0x23   :  { %s13768_s20 = sld [smem:[%s16374_s0 + %s13642_s15]]   ;;  %s13646_s15 = smov 23  }
  0x24   :  { %16481 = sst [smem:[#allocation19_spill]] %s13763_s6 }
  0x25   :  { %s13773_s27 = sld [smem:[%s16374_s0 + %s13643_s22]]   ;;  %s13647_s22 = smov 24  }
  0x26   :  { %s13778_s4 = sld [smem:[%s16374_s0 + %s13644_s28]]   ;;  %s13648_s28 = smov 25  }
  0x27   :  { %s13783_s6 = sld [smem:[%s16374_s0 + %s13645_s7]]   ;;  %s13649_s7 = smov 26  }
  0x29   :  { %16482 = sst [smem:[#allocation20_spill]] %s13768_s20 }
  0x2a   :  { %s13788_s20 = sld [smem:[%s16374_s0 + %s13646_s15]]   ;;  %s13650_s15 = smov 27  }
  0x2b   :  { %16483 = sst [smem:[#allocation21_spill]] %s13773_s27 }
  0x2c   :  { %16484 = sst [smem:[#allocation22_spill]] %s13778_s4 }
  0x2d   :  { %16485 = sst [smem:[#allocation23_spill]] %s13783_s6 }
  0x2e   :  { %s13793_s27 = sld [smem:[%s16374_s0 + %s13647_s22]]   ;;  %s13651_s22 = smov 28  }
  0x2f   :  { %s13798_s4 = sld [smem:[%s16374_s0 + %s13648_s28]]   ;;  %s13652_s28 = smov 29  }
  0x30   :  { %16486 = sst [smem:[#allocation24_spill]] %s13788_s20 }
  0x31   :  { %s13803_s6 = sld [smem:[%s16374_s0 + %s13649_s7]]   ;;  %s13653_s7 = smov 30  }
  0x32   :  { %s13808_s20 = sld [smem:[%s16374_s0 + %s13650_s15]]   ;;  %s13654_s15 = smov 31  }
  0x34   :  { %16487 = sst [smem:[#allocation25_spill]] %s13793_s27 }
  0x35   :  { %16488 = sst [smem:[#allocation26_spill]] %s13798_s4 }
  0x36   :  { %s13813_s27 = sld [smem:[%s16374_s0 + %s13651_s22]]   ;;  %s13655_s22 = smov 32  }
  0x37   :  { %16489 = sst [smem:[#allocation27_spill]] %s13803_s6 }
  0x38   :  { %16490 = sst [smem:[#allocation28_spill]] %s13808_s20 }
  0x39   :  { %s13818_s4 = sld [smem:[%s16374_s0 + %s13652_s28]]   ;;  %s13656_s28 = smov 33  }
  0x3a   :  { %s13823_s6 = sld [smem:[%s16374_s0 + %s13653_s7]]   ;;  %s13657_s7 = smov 34  }
  0x3b   :  { %s13828_s20 = sld [smem:[%s16374_s0 + %s13654_s15]]   ;;  %s13658_s15 = smov 35  }
  0x3c   :  { %16491 = sst [smem:[#allocation29_spill]] %s13813_s27 }
  0x3d   :  { %s13833_s27 = sld [smem:[%s16374_s0 + %s13655_s22]]  }
  0x3e   :  { %s13843_s24 = sld [smem:[%s16374_s0 + %s13657_s7]]  }
  0x3f   :  { %16492 = sst [smem:[#allocation30_spill]] %s13818_s4 }
  0x40   :  { %16493 = sst [smem:[#allocation31_spill]] %s13823_s6 }
  0x41   :  { %16494 = sst [smem:[#allocation32_spill]] %s13828_s20 }
  0x42   :  { %s13838_s4 = sld [smem:[%s16374_s0 + %s13656_s28]]  }
  0x43   :  { %s13848_s20 = sld [smem:[%s16374_s0 + %s13658_s15]]  }
  0x48   :  { %16495 = sst [smem:[#allocation33_spill]] %s13838_s4 }
  0x49   :  { %76 = vsyncpa [#allocation3], 0 }
  0x4a   :  { %78 = vsyncpa [#allocation3 + $0x1], 0  ;;  %s13850_s22 = smov 0   ;;  %s13852_s23 = smov 0  }
  0x4b   :  { %s13854_s26 = smov 0   ;;  %s13856_s28 = smov 0  }
  0x4c LB: > { %s16496_s8 = sld [smem:[#allocation13_spill]]  ;;  %s16497_s6 = sld [smem:[#allocation31_spill]]  ;;  %s13618_s26 = sphi %s13854_s26, %s16684_s26   ;;  %s13614_s23 = sphi %s13852_s23, %s16686_s23   ;;  %s13610_s22 = sphi %s13850_s22, %s16685_s22   ;;  %s13622_s28 = sphi %s13856_s28, %s16682_s28  }
  0x4d   : > { %s16498_s3 = sld [smem:[#allocation12_spill]]  ;;  %16499 = sst [smem:[#allocation34_spill]] %s13618_s26 }
  0x4e   : > { %s13871_s0 = sadd.s32 4294967295, %s13622_s28   ;;  %s11150_s1 = sadd.s32 4294967294, %s13622_s28  }
  0x4f   : > { %s13875_s2 = sadd.s32 1, %s13622_s28   ;;  %s831_s7 = sadd.s32 1, %s13618_s26 }
  0x50   : > { %16500 = sst [smem:[#allocation35_spill]] %s13875_s2  ;;  %s828_s10 = ssub.s32 %s13622_s28, %s13875_s2 }
  0x51   : > { %p841_p0 = scmp.ne.s32.totalorder %s13618_s26, %s13614_s23  ;;  %p829_p1 = scmp.eq.s32.totalorder %s828_s10, 0 }
  0x52   : > { %p842_p2 = scmp.eq.s32.totalorder %s13871_s0, 1  ;;  %p847_p3 = scmp.ne.s32.totalorder %s13614_s23, %s13610_s22 }
  0x53   : > { %p848_p4 = scmp.eq.s32.totalorder %s11150_s1, 1  ;;  %p11153_p7 = scmp.ge.s32.totalorder %s13622_s28, 1 }
  0x54   : > { %s13886_s11 = scalar_select %p829_p1, %s13618_s26, %s831_s7  }
  0x55   : > { %p13888_p5 = por %p842_p2, %p841_p0  ;;  %p13892_p6 = por %p848_p4, %p847_p3 }
  0x56   : > { %16501 = sst [smem:[#allocation36_spill]] %s13886_s11  ;;  %p976_p8 = scmp.lt.s32.totalorder %s13622_s28, 3 }
  0x57   : > { %s16503_s16 = scalar_select %p13892_p6, 1, 0 }
  0x58   : > { %p977_p9 = pnand %p11153_p7, %p976_p8 }
  0x59   : > { %16504 = sst [smem:[#allocation37_spill]] %s16503_s16 }
  0x5a   : > { %980 = sbr.rel (%p977_p9) target bundleno = 6611 (0x19d3), region = 160 }
  0x61   : > { %s16505_s5 = sld [smem:[#allocation5_spill]]  ;;  %p1064_p10 = scmp.lt.s32.totalorder %s13871_s0, 1  ;;  %vm1074_vm0 = vcmask 130048   ;;  %v16394_v15 = vmov 0.0   ;;  %vm13660_vm1 = vmmov 0   ;;  %vm1180_vm2 = vcmask 261120  }
  0x62   : > { %s16506_s17 = sld [smem:[#allocation8_spill]]  ;;  %11797 = vmatprep.subr.bf16.mxu0 %v16394_v15  ;;  %s16507_s9 = sld [smem:[#allocation6_spill]]  ;;  %11799 = vmatprep.mubr.msk.bf16.mxu0 %vm13660_vm1, %v16394_v15  ;;  %v16396_v52 = vmov 0.0|0.0   ;;  %vm14224_vm11 = vmpackc.low %vm1180_vm2, %vm1180_vm2  ;;  %vm4411_vm12 = vcmask 1040384   ;;  %vm4413_vm13 = vcmask 1041408   ;;  %vm4415_vm14 = vcmask 1042432  }
  0x63   : > { %s1065_s18 = scalar_select %p1064_p10, %s13871_s0, 1  ;;  %11807 = vmatprep.mubr.msk.f32.mxu1 %vm13660_vm1, %v16394_v15  ;;  %12539 = vmatprep.subr.bf16.mxu1 %v16396_v52  ;;  %vm4417_vm15 = vcmask 1043456  }
  0x64   : > { %s16508_s13 = sld [smem:[#allocation7_spill]]  ;;  %s16509_s21 = sld [smem:[#allocation9_spill]] }
  0x65   : > { %s11474_s1 = sshll.u32 %s1065_s18, 4  ;;  %s16510_s25 = sld [smem:[#allocation10_spill]] }
  0x66   : > { %s16511_s29 = sld [smem:[#allocation11_spill]]  ;;  %s16512_s10 = sld [smem:[#allocation14_spill]] }
  0x67   : > { %s1068_s7 = scalar_lea.vmem %s16505_s5, %s11474_s1  ;;  %s16513_s18 = sld [smem:[#allocation15_spill]] }
  0x68   : > { %v1070_v0 = vld [vmem:[%s1068_s7] sm:$0xff]  ;;  %v1071_v1 = vld [vmem:[%s1068_s7 + $0x8] sm:$0xff]  ;;  %s16515_s1 = sld [smem:[#allocation19_spill]]  ;;  %s16516_s7 = sld [smem:[#allocation20_spill]] }
  0x69   : > { %v1075_v2 = vsel %vm1074_vm0, %v1070_v0, 0.0  ;;  %v1078_v3 = vsel %vm1074_vm0, %v1071_v1, 0.0  ;;  %v13015_v14 = vld [vmem:[%s16506_s17] sm:$0xff]   ;;  %s16521_s5 = sld [smem:[#allocation21_spill]]  ;;  %s16551_s17 = sld [smem:[#allocation26_spill]] }
  0x6a   : > { %1076 = vadd.xlane.f32.xlu0 %v1075_v2  ;;  %11798 = vmatpush3.bf16.msra.mxu0 %v13015_v14  ;;  %v11157_v24 = vld [vmem:[%s16507_s9] ss:$0 sm:$0xff]  ;;  %s16522_s9 = sld [smem:[#allocation22_spill]]  ;;  %s16557_s11 = sld [smem:[#allocation27_spill]] }
  0x6b   : > { %11810 = vmatprep.subr.bf16.mxu0 %v16394_v15  ;;  %v11158_v28 = vld [vmem:[%s16508_s13] ss:$0 sm:$0xff]  ;;  %s16534_s13 = sld [smem:[#allocation23_spill]]  ;;  %s16560_s26 = sld [smem:[#allocation28_spill]] }
  0x6c   : > { %v11159_v33 = vld [vmem:[%s16509_s21] ss:$0 sm:$0xff]  ;;  %s16552_s21 = sld [smem:[#allocation24_spill]]  ;;  %s16679_s4 = sld [smem:[#allocation33_spill]] }
  0x6d   : > { %v11162_v60 = vld [vmem:[%s16510_s25] ss:$0 sm:$0xff]  ;;  %s16553_s25 = sld [smem:[#allocation18_spill]] }
  0x6e   : > { %1079 = vadd.xlane.f32.xlu0 %v1078_v3  ;;  %v11163_v63 = vld [vmem:[%s16511_s29] ss:$0 sm:$0xff]  ;;  %s16554_s29 = sld [smem:[#allocation25_spill]] }
  0x6f   : > { %v1224_v2 = vld [vmem:[%s16498_s3] sm:$0xff] }
  0x71   : > { %s16561_s2 = smov %s16560_s26 }
  0xf7   : > { %v1077_v4 = vpop.xlane.xlu0 %1076 }
  0xf8   : > { %v1082_v5 = vmul.f32 0.0625, %v1077_v4 }
  0xfa   : > { %v1084_v6 = vsub.f32 %v1070_v0, %v1082_v5  ;;  %v1225_v5 = vld [vmem:[%s16498_s3 + $0x8] sm:$0xff]  ;;  %s16519_s3 = sld [smem:[#allocation16_spill]] }
  0xfb   : > { %v1080_v7 = vpop.xlane.xlu0 %1079 }
  0xfc   : > { %v1083_v8 = vmul.f32 0.0625, %v1080_v7  ;;  %v1086_v9 = vmul.f32 %v1084_v6, %v1084_v6 }
  0xfe   : > { %v1085_v10 = vsub.f32 %v1071_v1, %v1083_v8  ;;  %v1088_v11 = vsel %vm1074_vm0, %v1086_v9, 0.0 }
  0xff   : > { %1089 = vadd.xlane.f32.xlu1 %v1088_v11 }
 0x100   : > { %v1087_v12 = vmul.f32 %v1085_v10, %v1085_v10 }
 0x102   : > { %v1091_v13 = vsel %vm1074_vm0, %v1087_v12, 0.0 }
 0x103   : > { %1092 = vadd.xlane.f32.xlu1 %v1091_v13 }
 0x18c   : > { %v1090_v16 = vpop.xlane.xlu1 %1089 }
 0x18d   : > { %v1094_v17 = vmul.f32 0.0625, %v1090_v16 }
 0x18f   : > { %v1096_v18 = vadd.f32 1e-05, %v1094_v17 }
 0x190   : > { %v1093_v19 = vpop.xlane.xlu1 %1092 }
 0x191   : > { %13036 = vrsqrt.f32 %v1096_v18  ;;  %v1095_v20 = vmul.f32 0.0625, %v1093_v19 }
 0x193   : > { %v1097_v21 = vadd.f32 1e-05, %v1095_v20 }
 0x195   : > { %13038 = vrsqrt.f32 %v1097_v21 }
 0x19b   : > { %v13037_v22 = vpop.eup %13036 }
 0x19c   : > { %v1100_v23 = vmul.f32 %v13037_v22, %v1084_v6 }
 0x19e   : > { %v1108_v27 = vmul.f32 %v11157_v24, %v1100_v23  ;;  %v1263_v23 = vld [vmem:[%s16497_s6] sm:$0xff] }
 0x19f   : > { %v13039_v25 = vpop.eup %13038 }
 0x1a0   : > { %v1101_v26 = vmul.f32 %v13039_v25, %v1085_v10  ;;  %v1116_v30 = vadd.f32 %v11158_v28, %v1108_v27  ;;  %v13017_v25 = vld [vmem:[%s13733_s30] sm:$0xff]   ;;  %v13019_v27 = vld [vmem:[%s13733_s30 + $0x8] sm:$0xff]  }
 0x1a2   : > { %v1109_v29 = vmul.f32 %v11157_v24, %v1101_v26  ;;  %v13016_v24 = vld [vmem:[%s13723_s19] sm:$0xff]   ;;  %v13018_v26 = vld [vmem:[%s13723_s19 + $0x8] sm:$0xff]  }
 0x1a4   : > { %v1117_v31 = vadd.f32 %v11158_v28, %v1109_v29 }
 0x1a6   : > { %v1118_v32 = vpack.c.bf16 %v1117_v31, %v1116_v30 }
 0x1a8   : > { %11800 = vmatmul.mubr.msk.bf16.vlgmr.msra.gmra.mrb[0].mxu0 %vm1074_vm0, %v1118_v32 }
 0x1a9   : > { %11814 = vmatprep.mubr.msk.bf16.mxu0 %vm13660_vm1, %v16394_v15  ;;  %11811 = vmatpush3.bf16.msra.mxu0 %v13016_v24 }
 0x1aa   : > { %11812 = vmatprep.subr.bf16.mxu0 %v16394_v15 }
 0x1ad   : > { %11813 = vmatpush3.bf16.msra.mxu0 %v13018_v26 }
 0x1ae   : > { %11826 = vmatprep.subr.bf16.mxu0 %v16394_v15 }
 0x27b   : > { %v1171_v34 = vpop.f32.mrb[0].mxu0 }
 0x27c   : > { %v1172_v35 = vadd.f32 %v11159_v33, %v1171_v34  ;;  %v11801_v36 = vpop.f32.mrb[1].mxu0 }
 0x27d   : > { %v1174_v37 = vpop.f32.mrb[2].mxu0 }
 0x27e   : > { %v1175_v38 = vadd.f32 %v11159_v33, %v1174_v37  ;;  %v11802_v39 = vpop.f32.mrb[3].mxu0  ;;  %v1181_v40 = vsel %vm1180_vm2, %v1172_v35, 0.0 }
 0x27f   : > { %1182 = vadd.xlane.f32.xlu0 %v1181_v40  ;;  %v11166_v40 = vld [vmem:[%s13718_s14] ss:$0 sm:$0xff] }
 0x280   : > { %v1184_v41 = vsel %vm1180_vm2, %v1175_v38, 0.0 }
 0x281   : > { %1185 = vadd.xlane.f32.xlu1 %v1184_v41 }
 0x30c   : > { %v1183_v42 = vpop.xlane.xlu0 %1182 }
 0x30d   : > { %v1188_v43 = vmul.f32 0.03125, %v1183_v42 }
 0x30e   : > { %v1186_v44 = vpop.xlane.xlu1 %1185 }
 0x30f   : > { %v1190_v45 = vsub.f32 %v1172_v35, %v1188_v43  ;;  %v1189_v46 = vmul.f32 0.03125, %v1186_v44  ;;  %v11165_v35 = vld [vmem:[%s16496_s8] ss:$0 sm:$0xff] }
 0x311   : > { %v1191_v47 = vsub.f32 %v1175_v38, %v1189_v46  ;;  %v1192_v48 = vmul.f32 %v1190_v45, %v1190_v45 }
 0x313   : > { %v1194_v49 = vsel %vm1180_vm2, %v1192_v48, 0.0  ;;  %v1193_v50 = vmul.f32 %v1191_v47, %v1191_v47  ;;  %v13021_v48 = vld [vmem:[%s13743_s12 + $0x8] sm:$0xff]  }
 0x314   : > { %1195 = vadd.xlane.f32.xlu0 %v1194_v49  ;;  %v11167_v49 = vld [vmem:[%s16512_s10] ss:$0 sm:$0xff] }
 0x315   : > { %v1197_v51 = vsel %vm1180_vm2, %v1193_v50, 0.0 }
 0x316   : > { %1198 = vadd.xlane.f32.xlu1 %v1197_v51  ;;  %v11171_v51 = vld [vmem:[%s16513_s18] ss:$0 sm:$0xff] }
 0x3a1   : > { %v1196_v53 = vpop.xlane.xlu0 %1195 }
 0x3a2   : > { %v1200_v54 = vmul.f32 0.03125, %v1196_v53 }
 0x3a3   : > { %v1199_v55 = vpop.xlane.xlu1 %1198 }
 0x3a4   : > { %v1202_v56 = vadd.f32 1e-05, %v1200_v54  ;;  %v1201_v57 = vmul.f32 0.03125, %v1199_v55 }
 0x3a6   : > { %13040 = vrsqrt.f32 %v1202_v56  ;;  %v1203_v58 = vadd.f32 1e-05, %v1201_v57 }
 0x3a8   : > { %13042 = vrsqrt.f32 %v1203_v58 }
 0x3b0   : > { %v13041_v59 = vpop.eup %13040 }
 0x3b1   : > { %v1206_v61 = vmul.f32 %v13041_v59, %v1190_v45 }
 0x3b2   : > { %v13043_v62 = vpop.eup %13042 }
 0x3b3   : > { %v1214_v0 = vmul.f32 %v11162_v60, %v1206_v61  ;;  %v1207_v1 = vmul.f32 %v13043_v62, %v1191_v47  ;;  %v13020_v47 = vld [vmem:[%s13743_s12] sm:$0xff]  }
 0x3b5   : > { %v1222_v3 = vadd.f32 %v11163_v63, %v1214_v0  ;;  %v1215_v4 = vmul.f32 %v11162_v60, %v1207_v1 }
 0x3b7   : > { %v1226_v6 = vadd.f32 %v1224_v2, %v1222_v3  ;;  %v1223_v7 = vadd.f32 %v11163_v63, %v1215_v4  ;;  %v13022_v2 = vld [vmem:[%s16515_s1] sm:$0xff]   ;;  %v13024_v4 = vld [vmem:[%s16515_s1 + $0x8] sm:$0xff]  }
 0x3b8   : > { %v13023_v3 = vld [vmem:[%s16516_s7] sm:$0xff]  }
 0x3b9   : > { %v1339_v8 = vsel %vm1180_vm2, %v1226_v6, 0.0  ;;  %v1227_v9 = vadd.f32 %v1225_v5, %v1223_v7  ;;  %v13025_v5 = vld [vmem:[%s16516_s7 + $0x8] sm:$0xff]  }
 0x3ba   : > { %1340 = vadd.xlane.f32.xlu0 %v1339_v8 }
 0x3bb   : > { %v1342_v10 = vsel %vm1180_vm2, %v1227_v9, 0.0  ;;  %v12540_v11 = vpack.c.bf16 %v1227_v9, %v1226_v6 }
 0x3bc   : > { %1343 = vadd.xlane.f32.xlu1 %v1342_v10 }
 0x3bd   : > { %12541 = vmatpush3.bf16.msra.mxu1 %v12540_v11 }
 0x3be   : > { %11818 = vmatprep.subr.bf16.mxu1 %v16394_v15 }
 0x3c0   : > { %11808 = vmatmul.mubr.msk.f32.vlgmr.msra.gmra.mrb[0].mxu1 %vm1074_vm0, %v1263_v23 }
 0x3c1   : > { %11819 = vmatpush3.bf16.msra.mxu1 %v13017_v25  ;;  %11822 = vmatprep.mubr.msk.bf16.mxu1 %vm13660_vm1, %v16394_v15 }
 0x3c2   : > { %11820 = vmatprep.subr.bf16.mxu1 %v16394_v15 }
 0x3c5   : > { %11821 = vmatpush3.bf16.msra.mxu1 %v13019_v27 }
 0x3c6   : > { %11834 = vmatprep.subr.bf16.mxu1 %v16394_v15 }
 0x447   : > { %v1341_v12 = vpop.xlane.xlu0 %1340 }
 0x448   : > { %v1345_v13 = vmul.f32 0.03125, %v1341_v12 }
 0x449   : > { %v1344_v14 = vpop.xlane.xlu1 %1343 }
 0x44a   : > { %v1347_v16 = vsub.f32 %v1226_v6, %v1345_v13  ;;  %v1346_v17 = vmul.f32 0.03125, %v1344_v14  ;;  %v11175_v6 = vld [vmem:[%s16519_s3] ss:$0 sm:$0xff] }
 0x44c   : > { %v1348_v18 = vsub.f32 %v1227_v9, %v1346_v17  ;;  %v1349_v19 = vmul.f32 %v1347_v16, %v1347_v16 }
 0x44e   : > { %v1351_v20 = vsel %vm1180_vm2, %v1349_v19, 0.0  ;;  %v1350_v21 = vmul.f32 %v1348_v18, %v1348_v18 }
 0x44f   : > { %1352 = vadd.xlane.f32.xlu0 %v1351_v20 }
 0x450   : > { %v1354_v22 = vsel %vm1180_vm2, %v1350_v21, 0.0 }
 0x451   : > { %1355 = vadd.xlane.f32.xlu1 %v1354_v22 }
 0x493   : > { %v13952_v45 = vpop.f32.mrb[0].mxu1 }
 0x494   : > { %16514 = vst [vmem:[#allocation38_spill] sm:$0xff] %v13952_v45  ;;  %v11809_v46 = vpop.f32.mrb[1].mxu1 }
 0x4dc   : > { %v1353_v28 = vpop.xlane.xlu0 %1352 }
 0x4dd   : > { %v1357_v29 = vmul.f32 0.03125, %v1353_v28 }
 0x4de   : > { %v1356_v30 = vpop.xlane.xlu1 %1355 }
 0x4df   : > { %v1359_v31 = vadd.f32 1e-05, %v1357_v29  ;;  %v1358_v32 = vmul.f32 0.03125, %v1356_v30 }
 0x4e1   : > { %13044 = vrsqrt.f32 %v1359_v31  ;;  %v1360_v33 = vadd.f32 1e-05, %v1358_v32 }
 0x4e3   : > { %13046 = vrsqrt.f32 %v1360_v33 }
 0x4eb   : > { %v13045_v34 = vpop.eup %13044 }
 0x4ec   : > { %v1363_v36 = vmul.f32 %v13045_v34, %v1347_v16 }
 0x4ed   : > { %v13047_v37 = vpop.eup %13046 }
 0x4ee   : > { %v1371_v38 = vmul.f32 %v11165_v35, %v1363_v36  ;;  %v1364_v39 = vmul.f32 %v13047_v37, %v1348_v18 }
 0x4f0   : > { %v1372_v41 = vmul.f32 %v11165_v35, %v1364_v39  ;;  %v1379_v42 = vadd.f32 %v11166_v40, %v1371_v38 }
 0x4f2   : > { %v1380_v43 = vadd.f32 %v11166_v40, %v1372_v41 }
 0x4f4   : > { %v1381_v44 = vpack.c.bf16 %v1380_v43, %v1379_v42 }
 0x4f6   : > { %11815 = vmatmul.mubr.msk.bf16.vlgmr.msra.gmra.mrb[4].mxu0 %vm1180_vm2, %v1381_v44  ;;  %11823 = vmatmul.mubr.msk.bf16.vlgmr.msra.gmra.mrb[4].mxu1 %vm1180_vm2, %v1381_v44  ;;  %v13026_v44 = vld [vmem:[%s16521_s5] sm:$0xff]  }
 0x4f7   : > { %11830 = vmatprep.mubr.msk.bf16.mxu0 %vm13660_vm1, %v16394_v15  ;;  %11838 = vmatprep.mubr.msk.bf16.mxu1 %vm13660_vm1, %v16394_v15 }
 0x4f8   : > { %11827 = vmatpush3.bf16.msra.mxu0 %v13020_v47  ;;  %11835 = vmatpush3.bf16.msra.mxu1 %v13022_v2  ;;  %v13027_v47 = vld [vmem:[%s16521_s5 + $0x8] sm:$0xff]  }
 0x4f9   : > { %11828 = vmatprep.subr.bf16.mxu0 %v16394_v15  ;;  %11836 = vmatprep.subr.bf16.mxu1 %v16394_v15 }
 0x4fc   : > { %11829 = vmatpush3.bf16.msra.mxu0 %v13021_v48  ;;  %11837 = vmatpush3.bf16.msra.mxu1 %v13024_v4  ;;  %v14001_v48 = vld [vmem:[%s16522_s9] ss:$0 sm:$0xff] }
 0x4fd   : > { %11842 = vmatprep.subr.bf16.mxu0 %v16394_v15  ;;  %11850 = vmatprep.subr.bf16.mxu1 %v16394_v15 }
 0x5c9   : > { %v1442_v50 = vpop.f32.mrb[4].mxu0  ;;  %v1506_v53 = vpop.f32.mrb[4].mxu1 }
 0x5ca   : > { %v11816_v54 = vpop.f32.mrb[5].mxu0  ;;  %v11824_v55 = vpop.f32.mrb[5].mxu1  ;;  %v13960_v58 = vadd.f32 %v11167_v49, %v1442_v50  ;;  %v1507_v59 = vadd.f32 %v11171_v51, %v1506_v53 }
 0x5cb   : > { %v1445_v56 = vpop.f32.mrb[6].mxu0  ;;  %v1509_v57 = vpop.f32.mrb[6].mxu1 }
 0x5cc   : > { %16517 = vst [vmem:[#allocation39_spill] sm:$0xff] %v13960_v58  ;;  %v13962_v60 = vadd.f32 %v11167_v49, %v1445_v56  ;;  %v1510_v61 = vadd.f32 %v11171_v51, %v1509_v57  ;;  %v11817_v62 = vpop.f32.mrb[7].mxu0  ;;  %v11825_v63 = vpop.f32.mrb[7].mxu1 }
 0x5ce   : > { %16518 = vst [vmem:[#allocation40_spill] sm:$0xff] %v13962_v60  ;;  %v13966_v1 = vpack.c.bf16 %v1510_v61, %v1507_v59 }
 0x5d0   : > { %16520 = vst [vmem:[#allocation41_spill] sm:$0xff] %v13966_v1  ;;  %11831 = vmatmul.mubr.msk.bf16.vlgmr.msra.gmra.mrb[8].mxu0 %vm1180_vm2, %v13966_v1 }
 0x5d1   : > { %11846 = vmatprep.mubr.msk.bf16.mxu0 %vm13660_vm1, %v16394_v15  ;;  %11843 = vmatpush3.bf16.msra.mxu0 %v13023_v3 }
 0x5d2   : > { %11844 = vmatprep.subr.bf16.mxu0 %v16394_v15 }
 0x5d5   : > { %11845 = vmatpush3.bf16.msra.mxu0 %v13025_v5 }
 0x5d6   : > { %12542 = vmatprep.subr.bf16.mxu0 %v16396_v52 }
 0x6a3   : > { %v1574_v7 = vpop.f32.mrb[8].mxu0 }
 0x6a4   : > { %v1575_v8 = vadd.f32 %v11175_v6, %v1574_v7  ;;  %v11832_v9 = vpop.f32.mrb[9].mxu0 }
 0x6a5   : > { %v1577_v10 = vpop.f32.mrb[10].mxu0 }
 0x6a6   : > { %v1587_v11 = vand.u32 2147483647, %v1575_v8  ;;  %v1578_v12 = vadd.f32 %v11175_v6, %v1577_v10  ;;  %v11833_v13 = vpop.f32.mrb[11].mxu0  ;;  %v1581_v34 = vmax.f32 %v1575_v8, 0.0  ;;  %vm1583_vm5 = vcmp.ne.f32.partialorder %v1575_v8, %v1575_v8 }
 0x6a8   : > { %v1589_v14 = vsub.f32 0.0, %v1587_v11  ;;  %v1588_v16 = vand.u32 2147483647, %v1578_v12  ;;  %v1582_v39 = vmax.f32 %v1578_v12, 0.0  ;;  %vm1584_vm6 = vcmp.ne.f32.partialorder %v1578_v12, %v1578_v12 }
 0x6a9   : > { %v1837_v11 = vlaneseq }
 0x6aa   : > { %v1591_v17 = vmul.f32 1.442695, %v1589_v14  ;;  %v1590_v18 = vsub.f32 0.0, %v1588_v16 }
 0x6ac   : > { %13048 = vpow2.f32 %v1591_v17  ;;  %v1593_v19 = vmul.f32 1.442695, %v1590_v18  ;;  %v14014_v18 = vshrl.u32 %v1837_v11, 7 }
 0x6ae   : > { %13050 = vpow2.f32 %v1593_v19 }
 0x6b6   : > { %v13049_v20 = vpop.eup %13048 }
 0x6b7   : > { %v1595_v21 = vadd.f32 1.0, %v13049_v20  ;;  %v1598_v24 = vmul.f32 -0.5, %v13049_v20  ;;  %v1601_v27 = vand.u32 2147483647, %v13049_v20 }
 0x6b8   : > { %v13051_v22 = vpop.eup %13050 }
 0x6b9   : > { %13052 = vlog2.f32 %v1595_v21  ;;  %v1604_v23 = vadd.f32 1.0, %v13051_v22  ;;  %v1607_v25 = vmul.f32 -0.5, %v13051_v22  ;;  %v1599_v26 = vadd.f32 1.0, %v1598_v24 }
 0x6ba   : > { %v1610_v30 = vand.u32 2147483647, %v13051_v22  ;;  %vm1602_vm3 = vcmp.lt.f32.partialorder %v1601_v27, 0.0004427343  ;;  %v14029_v27 = vsub.s32 3, %v14014_v18 }
 0x6bb   : > { %13054 = vlog2.f32 %v1604_v23  ;;  %v1608_v28 = vadd.f32 1.0, %v1607_v25  ;;  %v1600_v32 = vmul.f32 %v13049_v20, %v1599_v26  ;;  %v14017_v20 = vsub.s32 0, %v14014_v18 }
 0x6bc   : > { %vm1611_vm4 = vcmp.lt.f32.partialorder %v1610_v30, 0.0004427343  ;;  %v14021_v23 = vsub.s32 1, %v14014_v18  ;;  %v14025_v25 = vsub.s32 2, %v14014_v18  ;;  %16529 = vst [vmem:[#allocation48_spill] sm:$0xff] %v14029_v27 }
 0x6bd   : > { %v1609_v37 = vmul.f32 %v13051_v22, %v1608_v28 }
 0x6be   : > { %16527 = vst [vmem:[#allocation46_spill] sm:$0xff] %v14021_v23  ;;  %16528 = vst [vmem:[#allocation47_spill] sm:$0xff] %v14025_v25 }
 0x6c3   : > { %v13053_v29 = vpop.eup %13052 }
 0x6c4   : > { %v1597_v31 = vmul.f32 0.6931472, %v13053_v29  ;;  %v14033_v29 = vsub.s32 4, %v14014_v18 }
 0x6c5   : > { %v13055_v33 = vpop.eup %13054 }
 0x6c6   : > { %v1603_v35 = vsel %vm1602_vm3, %v1600_v32, %v1597_v31  ;;  %v1606_v36 = vmul.f32 0.6931472, %v13055_v33  ;;  %16530 = vst [vmem:[#allocation49_spill] sm:$0xff] %v14033_v29  ;;  %v14037_v31 = vsub.s32 5, %v14014_v18  ;;  %v14041_v33 = vsub.s32 6, %v14014_v18 }
 0x6c7   : > { %v1613_v38 = vadd.f32 %v1603_v35, %v1581_v34  ;;  %v14045_v35 = vsub.s32 7, %v14014_v18  ;;  %vm4419_vm3 = vcmask 1044480  }
 0x6c8   : > { %v1612_v40 = vsel %vm1611_vm4, %v1609_v37, %v1606_v36  ;;  %16531 = vst [vmem:[#allocation50_spill] sm:$0xff] %v14037_v31  ;;  %16532 = vst [vmem:[#allocation51_spill] sm:$0xff] %v14041_v33  ;;  %vm4421_vm4 = vcmask 1045504  }
 0x6c9   : > { %v1614_v41 = vadd.f32 %v1612_v40, %v1582_v39  ;;  %v13981_v42 = vsel %vm1583_vm5, %v1575_v8, %v1613_v38  ;;  %16533 = vst [vmem:[#allocation52_spill] sm:$0xff] %v14045_v35  ;;  %vm4423_vm5 = vcmask 1046528  }
 0x6ca   : > { %16523 = vst [vmem:[#allocation42_spill] sm:$0xff] %v13981_v42 }
 0x6cb   : > { %v13983_v43 = vsel %vm1584_vm6, %v1578_v12, %v1614_v41 }
 0x6cc   : > { %16524 = vst [vmem:[#allocation43_spill] sm:$0xff] %v13983_v43  ;;  %v1617_v46 = vpack.c.bf16 %v13983_v43, %v13981_v42 }
 0x6ce   : > { %11839 = vmatmul.mubr.msk.bf16.vlgmr.msra.gmra.mrb[8].mxu1 %vm1180_vm2, %v1617_v46  ;;  %11847 = vmatmul.mubr.msk.bf16.vlgmr.msra.gmra.mrb[12].mxu0 %vm1180_vm2, %v1617_v46 }
 0x6cf   : > { %11851 = vmatpush3.bf16.msra.mxu1 %v13026_v44  ;;  %11854 = vmatprep.mubr.msk.bf16.mxu1 %vm13660_vm1, %v16394_v15 }
 0x6d0   : > { %11852 = vmatprep.subr.bf16.mxu1 %v16394_v15  ;;  %11866 = vmatprep.mubr.msk.f32.mxu0 %vm13660_vm1, %v16394_v15 }
 0x6d3   : > { %11853 = vmatpush3.bf16.msra.mxu1 %v13027_v47 }
 0x6d4   : > { %12550 = vmatprep.subr.bf16.mxu1 %v16396_v52 }
 0x6d6   : > { %11855 = vmatmul.mubr.msk.bf16.vlgmr.msra.gmra.mrb[12].mxu1 %vm1180_vm2, %v1617_v46 }
 0x6d7   : > { %11877 = vmatprep.mubr.msk.f32.mxu1 %vm13660_vm1, %v16394_v15 }
 0x7a1   : > { %v1678_v49 = vpop.f32.mrb[8].mxu1  ;;  %v14003_v50 = vpop.f32.mrb[12].mxu0 }
 0x7a2   : > { %v1679_v51 = vadd.f32 %v14001_v48, %v1678_v49  ;;  %v11840_v53 = vpop.f32.mrb[9].mxu1  ;;  %v11848_v54 = vpop.f32.mrb[13].mxu0 }
 0x7a3   : > { %v14006_v55 = vpop.f32.mrb[10].mxu1  ;;  %v14008_v56 = vpop.f32.mrb[14].mxu0 }
 0x7a4   : > { %16525 = vst [vmem:[#allocation44_spill] sm:$0xff] %v14008_v56  ;;  %v1691_v57 = vand.u32 2147483647, %v1679_v51  ;;  %v11841_v59 = vpop.f32.mrb[11].mxu1  ;;  %v11849_v61 = vpop.f32.mrb[15].mxu0  ;;  %v1685_v16 = vmax.f32 %v1679_v51, 0.0  ;;  %vm1687_vm8 = vcmp.ne.f32.partialorder %v1679_v51, %v1679_v51  ;;  %v1682_v37 = vadd.f32 %v14001_v48, %v14006_v55 }
 0x7a6   : > { %v1693_v62 = vsub.f32 0.0, %v1691_v57  ;;  %v1692_v39 = vand.u32 2147483647, %v1682_v37  ;;  %vm1688_vm10 = vcmp.ne.f32.partialorder %v1682_v37, %v1682_v37 }
 0x7a8   : > { %v1695_v63 = vmul.f32 1.442695, %v1693_v62  ;;  %v1694_v40 = vsub.f32 0.0, %v1692_v39 }
 0x7a9   : > { %v14010_v2 = vpop.f32.mrb[12].mxu1 }
 0x7aa   : > { %13056 = vpow2.f32 %v1695_v63  ;;  %v11856_v3 = vpop.f32.mrb[13].mxu1  ;;  %v1697_v44 = vmul.f32 1.442695, %v1694_v40 }
 0x7ab   : > { %v14012_v4 = vpop.f32.mrb[14].mxu1 }
 0x7ac   : > { %16526 = vst [vmem:[#allocation45_spill] sm:$0xff] %v14012_v4  ;;  %v11857_v5 = vpop.f32.mrb[15].mxu1 }
 0x7ad   : > { %v1686_v5 = vmax.f32 %v1682_v37, 0.0 }
 0x7b4   : > { %v13057_v6 = vpop.eup %13056 }
 0x7b5   : > { %v1699_v7 = vadd.f32 1.0, %v13057_v6  ;;  %v1702_v8 = vmul.f32 -0.5, %v13057_v6  ;;  %v1705_v10 = vand.u32 2147483647, %v13057_v6 }
 0x7b7   : > { %13058 = vlog2.f32 %v1699_v7  ;;  %v1703_v9 = vadd.f32 1.0, %v1702_v8  ;;  %vm1706_vm7 = vcmp.lt.f32.partialorder %v1705_v10, 0.0004427343 }
 0x7b8   : > { %13060 = vpow2.f32 %v1697_v44 }
 0x7b9   : > { %v1704_v14 = vmul.f32 %v13057_v6, %v1703_v9 }
 0x7c1   : > { %v13059_v12 = vpop.eup %13058 }
 0x7c2   : > { %v1701_v13 = vmul.f32 0.6931472, %v13059_v12  ;;  %v13061_v48 = vpop.eup %13060 }
 0x7c3   : > { %v1711_v53 = vmul.f32 -0.5, %v13061_v48  ;;  %v1714_v61 = vand.u32 2147483647, %v13061_v48 }
 0x7c4   : > { %v1707_v17 = vsel %vm1706_vm7, %v1704_v14, %v1701_v13 }
 0x7c5   : > { %v1717_v19 = vadd.f32 %v1707_v17, %v1685_v16  ;;  %v1712_v57 = vadd.f32 1.0, %v1711_v53  ;;  %vm1715_vm9 = vcmp.lt.f32.partialorder %v1714_v61, 0.0004427343 }
 0x7c7   : > { %v1719_v21 = vsel %vm1687_vm8, %v1679_v51, %v1717_v19  ;;  %v1708_v51 = vadd.f32 1.0, %v13061_v48  ;;  %v1713_v63 = vmul.f32 %v13061_v48, %v1712_v57 }
 0x7c8   : > { %v1840_v22 = vrot.slane %v1719_v21, %v14017_v20  ;;  %v1859_v24 = vrot.slane %v1719_v21, %v14021_v23  ;;  %v1878_v26 = vrot.slane %v1719_v21, %v14025_v25  ;;  %v1897_v28 = vrot.slane %v1719_v21, %v14029_v27 }
 0x7c9   : > { %v1916_v30 = vrot.slane %v1719_v21, %v14033_v29  ;;  %v1935_v32 = vrot.slane %v1719_v21, %v14037_v31  ;;  %v1954_v34 = vrot.slane %v1719_v21, %v14041_v33  ;;  %v1973_v36 = vrot.slane %v1719_v21, %v14045_v35 }
 0x7ca   : > { %1846 = vbcast.lane.b32.xlu1 %v1840_v22, 264  ;;  %1842 = vbcast.lane.b32.xlu0 %v1840_v22, 256  ;;  %v1835_v38 = vmul.f32 %v1719_v21, %v13981_v42  ;;  %13062 = vlog2.f32 %v1708_v51 }
 0x7cc   : > { %v2088_v41 = vrot.slane %v1835_v38, %v14017_v20  ;;  %v2107_v46 = vrot.slane %v1835_v38, %v14021_v23  ;;  %v2126_v47 = vrot.slane %v1835_v38, %v14025_v25  ;;  %v2145_v49 = vrot.slane %v1835_v38, %v14029_v27 }
 0x7cd   : > { %v2164_v54 = vrot.slane %v1835_v38, %v14033_v29  ;;  %v2183_v59 = vrot.slane %v1835_v38, %v14037_v31  ;;  %v2202_v7 = vrot.slane %v1835_v38, %v14041_v33  ;;  %v2221_v12 = vrot.slane %v1835_v38, %v14045_v35 }
 0x7ce   : > { %1861 = vbcast.lane.b32.xlu1 %v1859_v24, 256  ;;  %1850 = vbcast.lane.b32.xlu0 %v1840_v22, 272 }
 0x7d2   : > { %1865 = vbcast.lane.b32.xlu1 %v1859_v24, 264  ;;  %1869 = vbcast.lane.b32.xlu0 %v1859_v24, 272 }
 0x7d4   : > { %v13063_v55 = vpop.eup %13062 }
 0x7d5   : > { %v1710_v62 = vmul.f32 0.6931472, %v13063_v55 }
 0x7d6   : > { %1854 = vbcast.lane.b32.xlu1 %v1840_v22, 280  ;;  %1880 = vbcast.lane.b32.xlu0 %v1878_v26, 256 }
 0x7d7   : > { %v1716_v3 = vsel %vm1715_vm9, %v1713_v63, %v1710_v62 }
 0x7d8   : > { %v1718_v6 = vadd.f32 %v1716_v3, %v1686_v5 }
 0x7da   : > { %1873 = vbcast.lane.b32.xlu1 %v1859_v24, 280  ;;  %1899 = vbcast.lane.b32.xlu0 %v1897_v28, 256  ;;  %v14058_v8 = vsel %vm1688_vm10, %v1682_v37, %v1718_v6  ;;  %v13662_v6 = vmov 1966171168  }
 0x7db   : > { %v3106_v9 = vrot.slane %v14058_v8, %v14017_v20  ;;  %v3125_v16 = vrot.slane %v14058_v8, %v14021_v23  ;;  %v3144_v39 = vrot.slane %v14058_v8, %v14025_v25  ;;  %v3182_v3 = vrot.slane %v14058_v8, %v14033_v29 }
 0x7dc   : > { %v14176_v52 = vrot.slane %v14058_v8, %v14045_v35 }
 0x7de   : > { %1884 = vbcast.lane.b32.xlu1 %v1878_v26, 264  ;;  %1888 = vbcast.lane.b32.xlu0 %v1878_v26, 272 }
 0x7e2   : > { %1903 = vbcast.lane.b32.xlu1 %v1897_v28, 264  ;;  %1907 = vbcast.lane.b32.xlu0 %v1897_v28, 272 }
 0x7e6   : > { %1892 = vbcast.lane.b32.xlu1 %v1878_v26, 280  ;;  %1918 = vbcast.lane.b32.xlu0 %v1916_v30, 256 }
 0x7ea   : > { %1911 = vbcast.lane.b32.xlu1 %v1897_v28, 280  ;;  %1937 = vbcast.lane.b32.xlu0 %v1935_v32, 256  ;;  %v1228_v28 = vld [vmem:[%s16534_s13] sm:$0xff] }
 0x7ee   : > { %1922 = vbcast.lane.b32.xlu1 %v1916_v30, 264  ;;  %1926 = vbcast.lane.b32.xlu0 %v1916_v30, 272 }
 0x7f2   : > { %1941 = vbcast.lane.b32.xlu1 %v1935_v32, 264  ;;  %1945 = vbcast.lane.b32.xlu0 %v1935_v32, 272 }
 0x7f6   : > { %1930 = vbcast.lane.b32.xlu1 %v1916_v30, 280  ;;  %1956 = vbcast.lane.b32.xlu0 %v1954_v34, 256 }
 0x7fa   : > { %1949 = vbcast.lane.b32.xlu1 %v1935_v32, 280  ;;  %1975 = vbcast.lane.b32.xlu0 %v1973_v36, 256 }
 0x7fe   : > { %1960 = vbcast.lane.b32.xlu1 %v1954_v34, 264  ;;  %1964 = vbcast.lane.b32.xlu0 %v1954_v34, 272 }
 0x802   : > { %1979 = vbcast.lane.b32.xlu1 %v1973_v36, 264  ;;  %1983 = vbcast.lane.b32.xlu0 %v1973_v36, 272 }
 0x806   : > { %1968 = vbcast.lane.b32.xlu1 %v1954_v34, 280  ;;  %2090 = vbcast.lane.b32.xlu0 %v2088_v41, 256  ;;  %v1232_v34 = vmul.f32 1.442695, %v1228_v28 }
 0x808   : > { %13064 = vpow2.f32 %v1232_v34 }
 0x80a   : > { %1987 = vbcast.lane.b32.xlu1 %v1973_v36, 280  ;;  %2109 = vbcast.lane.b32.xlu0 %v2107_v46, 256  ;;  %v1229_v36 = vld [vmem:[%s16534_s13 + $0x8] sm:$0xff] }
 0x80b   : > { %v1234_v40 = vmul.f32 1.442695, %v1229_v36  ;;  %v3201_v36 = vrot.slane %v14058_v8, %v14037_v31 }
 0x80d   : > { %13066 = vpow2.f32 %v1234_v40 }
 0x80e   : > { %2094 = vbcast.lane.b32.xlu1 %v2088_v41, 264  ;;  %2098 = vbcast.lane.b32.xlu0 %v2088_v41, 272 }
 0x812   : > { %2113 = vbcast.lane.b32.xlu1 %v2107_v46, 264  ;;  %2117 = vbcast.lane.b32.xlu0 %v2107_v46, 272 }
 0x816   : > { %2102 = vbcast.lane.b32.xlu1 %v2088_v41, 280  ;;  %2128 = vbcast.lane.b32.xlu0 %v2126_v47, 256  ;;  %v1230_v41 = vld [vmem:[%s16534_s13 + $0x10] sm:$0xff] }
 0x817   : > { %v1236_v48 = vmul.f32 1.442695, %v1230_v41 }
 0x819   : > { %13068 = vpow2.f32 %v1236_v48 }
 0x81a   : > { %2121 = vbcast.lane.b32.xlu1 %v2107_v46, 280  ;;  %2147 = vbcast.lane.b32.xlu0 %v2145_v49, 256 }
 0x81e   : > { %2132 = vbcast.lane.b32.xlu1 %v2126_v47, 264  ;;  %2136 = vbcast.lane.b32.xlu0 %v2126_v47, 272 }
 0x822   : > { %2151 = vbcast.lane.b32.xlu1 %v2145_v49, 264  ;;  %2155 = vbcast.lane.b32.xlu0 %v2145_v49, 272 }
 0x826   : > { %2140 = vbcast.lane.b32.xlu1 %v2126_v47, 280  ;;  %2166 = vbcast.lane.b32.xlu0 %v2164_v54, 256  ;;  %v3163_v47 = vrot.slane %v14058_v8, %v14029_v27 }
 0x82a   : > { %2159 = vbcast.lane.b32.xlu1 %v2145_v49, 280  ;;  %2185 = vbcast.lane.b32.xlu0 %v2183_v59, 256  ;;  %v1231_v49 = vld [vmem:[%s16534_s13 + $0x18] sm:$0xff]  ;;  %s16549_s13 = sld [smem:[#allocation17_spill]] }
 0x82e   : > { %2170 = vbcast.lane.b32.xlu1 %v2164_v54, 264  ;;  %2174 = vbcast.lane.b32.xlu0 %v2164_v54, 272 }
 0x832   : > { %2189 = vbcast.lane.b32.xlu1 %v2183_v59, 264  ;;  %2193 = vbcast.lane.b32.xlu0 %v2183_v59, 272 }
 0x836   : > { %2178 = vbcast.lane.b32.xlu1 %v2164_v54, 280  ;;  %2204 = vbcast.lane.b32.xlu0 %v2202_v7, 256  ;;  %v1238_v54 = vmul.f32 1.442695, %v1231_v49 }
 0x838   : > { %13070 = vpow2.f32 %v1238_v54 }
 0x83a   : > { %2197 = vbcast.lane.b32.xlu1 %v2183_v59, 280  ;;  %3108 = vbcast.lane.b32.xlu0 %v3106_v9, 256  ;;  %v13065_v59 = vpop.eup %13064 }
 0x83b   : > { %v14113_v61 = vsub.f32 0.0, %v13065_v59  ;;  %v13067_v5 = vpop.eup %13066 }
 0x83c   : > { %v14062_v10 = vpop.permute.xlu1 %1846  ;;  %v14064_v11 = vpop.permute.xlu0 %1842 }
 0x83d   : > { %16535 = vst [vmem:[#allocation53_spill] sm:$0xff] %v14113_v61 }
 0x83e   : > { %2208 = vbcast.lane.b32.xlu1 %v2202_v7, 264  ;;  %2223 = vbcast.lane.b32.xlu0 %v2221_v12, 256 }
 0x840   : > { %v14067_v13 = vpop.permute.xlu1 %1861  ;;  %v14069_v14 = vpop.permute.xlu0 %1850 }
 0x842   : > { %3112 = vbcast.lane.b32.xlu1 %v3106_v9, 264  ;;  %3127 = vbcast.lane.b32.xlu0 %v3125_v16, 256 }
 0x844   : > { %v14073_v17 = vpop.permute.xlu1 %1865  ;;  %v14075_v19 = vpop.permute.xlu0 %1869 }
 0x846   : > { %2227 = vbcast.lane.b32.xlu1 %v2221_v12, 264  ;;  %2212 = vbcast.lane.b32.xlu0 %v2202_v7, 272 }
 0x848   : > { %v14077_v21 = vpop.permute.xlu1 %1854  ;;  %v14079_v22 = vpop.permute.xlu0 %1880 }
 0x84a   : > { %3131 = vbcast.lane.b32.xlu1 %v3125_v16, 264  ;;  %3116 = vbcast.lane.b32.xlu0 %v3106_v9, 272 }
 0x84c   : > { %v14081_v24 = vpop.permute.xlu1 %1873  ;;  %v14083_v26 = vpop.permute.xlu0 %1899 }
 0x84e   : > { %2216 = vbcast.lane.b32.xlu1 %v2202_v7, 280  ;;  %2231 = vbcast.lane.b32.xlu0 %v2221_v12, 272  ;;  %v2240_v7 = vunpack.c.l.s4 %v13662_v6  ;;  %v1993_v6 = vmul.f32 %v14067_v13, %v14113_v61 }
 0x850   : > { %v14086_v30 = vpop.permute.xlu1 %1884  ;;  %v14088_v32 = vpop.permute.xlu0 %1888  ;;  %v2241_v40 = vunpack.c.0.s8 %v2240_v7 }
 0x852   : > { %3120 = vbcast.lane.b32.xlu1 %v3106_v9, 280  ;;  %3135 = vbcast.lane.b32.xlu0 %v3125_v16, 272  ;;  %v13069_v9 = vpop.eup %13068  ;;  %v14140_v59 = vsub.s32 %v2241_v40, %v14014_v18  ;;  %v2029_v40 = vmul.f32 1.442695, %v1993_v6 }
 0x853   : > { %v14131_v41 = vsub.f32 0.0, %v13069_v9 }
 0x854   : > { %v14091_v37 = vpop.permute.xlu1 %1903  ;;  %v14093_v38 = vpop.permute.xlu0 %1907  ;;  %16538 = vst [vmem:[#allocation56_spill] sm:$0xff] %v14140_v59  ;;  %v2245_v18 = vrot.slane %v14003_v50, %v14140_v59 }
 0x855   : > { %16537 = vst [vmem:[#allocation55_spill] sm:$0xff] %v14131_v41 }
 0x856   : > { %2235 = vbcast.lane.b32.xlu1 %v2221_v12, 280  ;;  %3146 = vbcast.lane.b32.xlu0 %v3144_v39, 256  ;;  %v14121_v12 = vsub.f32 0.0, %v13067_v5  ;;  %v14167_v0 = vrot.slane %v2245_v18, %v14140_v59 }
 0x858   : > { %v14098_v44 = vpop.permute.xlu1 %1892  ;;  %v14100_v46 = vpop.permute.xlu0 %1918  ;;  %16536 = vst [vmem:[#allocation54_spill] sm:$0xff] %v14121_v12  ;;  %v2283_v1 = vcombine.high %v14167_v0, %v14167_v0 }
 0x85a   : > { %3139 = vbcast.lane.b32.xlu1 %v3125_v16, 280  ;;  %3165 = vbcast.lane.b32.xlu0 %v3163_v47, 256  ;;  %v1989_v16 = vmul.f32 %v14064_v11, %v14113_v61  ;;  %v13071_v11 = vpop.eup %13070 }
 0x85c   : > { %v14105_v51 = vpop.permute.xlu1 %1911  ;;  %v14107_v53 = vpop.permute.xlu0 %1937  ;;  %v2021_v48 = vmul.f32 1.442695, %v1989_v16  ;;  %v1994_v16 = vmul.f32 %v14073_v17, %v14121_v12 }
 0x85e   : > { %3150 = vbcast.lane.b32.xlu1 %v3144_v39, 264  ;;  %3154 = vbcast.lane.b32.xlu0 %v3144_v39, 272  ;;  %13072 = vpow2.f32 %v2021_v48  ;;  %v2031_v17 = vmul.f32 1.442695, %v1994_v16  ;;  %v14180_v16 = vrot.slane %v14167_v0, %v14017_v20 }
 0x860   : > { %v14109_v55 = vpop.permute.xlu1 %1922  ;;  %v14111_v57 = vpop.permute.xlu0 %1926 }
 0x862   : > { %3169 = vbcast.lane.b32.xlu1 %v3163_v47, 264  ;;  %3173 = vbcast.lane.b32.xlu0 %v3163_v47, 272 }
 0x864   : > { %v14115_v62 = vpop.permute.xlu1 %1941  ;;  %v14117_v63 = vpop.permute.xlu0 %1945 }
 0x866   : > { %3158 = vbcast.lane.b32.xlu1 %v3144_v39, 280  ;;  %3184 = vbcast.lane.b32.xlu0 %v3182_v3, 256  ;;  %v1990_v39 = vmul.f32 %v14062_v10, %v14121_v12  ;;  %v14146_v10 = vsub.f32 0.0, %v13071_v11  ;;  %v14164_v11 = vrot.slane %v14058_v8, %v14041_v33 }
 0x868   : > { %v14125_v28 = vpop.permute.xlu1 %1930  ;;  %v14127_v34 = vpop.permute.xlu0 %1956  ;;  %v2023_v5 = vmul.f32 1.442695, %v1990_v39  ;;  %16539 = vst [vmem:[#allocation57_spill] sm:$0xff] %v14146_v10  ;;  %v1992_v13 = vmul.f32 %v14077_v21, %v14146_v10  ;;  %v1995_v21 = vmul.f32 %v14075_v19, %v14131_v41  ;;  %v1996_v19 = vmul.f32 %v14081_v24, %v14146_v10 }
 0x869   : > { %v1998_v24 = vmul.f32 %v14086_v30, %v14121_v12 }
 0x86a   : > { %3177 = vbcast.lane.b32.xlu1 %v3163_v47, 280  ;;  %3203 = vbcast.lane.b32.xlu0 %v3201_v36, 256  ;;  %v1991_v47 = vmul.f32 %v14069_v14, %v14131_v41  ;;  %13074 = vpow2.f32 %v2023_v5  ;;  %v2027_v5 = vmul.f32 1.442695, %v1992_v13  ;;  %v2033_v13 = vmul.f32 1.442695, %v1995_v21 }
 0x86b   : > { %v2001_v21 = vmul.f32 %v14083_v26, %v14113_v61 }
 0x86c   : > { %v14135_v49 = vpop.permute.xlu1 %1949  ;;  %v14137_v54 = vpop.permute.xlu0 %1975  ;;  %v2025_v14 = vmul.f32 1.442695, %v1991_v47  ;;  %v2253_v47 = vcombine.high %v2245_v18, %v2245_v18 }
 0x86d   : > { %v13073_v18 = vpop.eup %13072  ;;  %v2045_v4 = vmul.f32 1.442695, %v2001_v21 }
 0x86e   : > { %3188 = vbcast.lane.b32.xlu1 %v3182_v3, 264  ;;  %3192 = vbcast.lane.b32.xlu0 %v3182_v3, 272  ;;  %13076 = vpow2.f32 %v2025_v14  ;;  %v2359_v60 = vmul.f32 0.0, %v13073_v18 }
 0x86f   : > { %13078 = vpow2.f32 %v2029_v40  ;;  %v14189_v40 = vrot.slane %v2253_v47, %v14140_v59  ;;  %v14203_v47 = vmul.f32 %v14058_v8, %v13983_v43  ;;  %v2039_v8 = vmul.f32 1.442695, %v1998_v24 }
 0x870   : > { %v14148_v7 = vpop.permute.xlu1 %1960  ;;  %v14150_v9 = vpop.permute.xlu0 %1964  ;;  %13080 = vpow2.f32 %v2031_v17  ;;  %v2035_v17 = vmul.f32 1.442695, %v1996_v19 }
 0x871   : > { %13082 = vpow2.f32 %v2027_v5 }
 0x872   : > { %3207 = vbcast.lane.b32.xlu1 %v3201_v36, 264  ;;  %3211 = vbcast.lane.b32.xlu0 %v3201_v36, 272  ;;  %13084 = vpow2.f32 %v2033_v13  ;;  %v2002_v13 = vmul.f32 %v14091_v37, %v14121_v12 }
 0x874   : > { %v14158_v39 = vpop.permute.xlu1 %1979  ;;  %v14160_v48 = vpop.permute.xlu0 %1983  ;;  %v2047_v21 = vmul.f32 1.442695, %v2002_v13 }
 0x875   : > { %v13075_v42 = vpop.eup %13074 }
 0x876   : > { %3196 = vbcast.lane.b32.xlu1 %v3182_v3, 280  ;;  %3222 = vbcast.lane.b32.xlu0 %v14164_v11, 256  ;;  %v1997_v3 = vmul.f32 %v14079_v22, %v14113_v61  ;;  %v2360_v18 = vmul.f32 0.0, %v13075_v42 }
 0x878   : > { %v14172_v6 = vpop.permute.xlu1 %1968  ;;  %v2091_v15 = vpop.permute.xlu0 %2090  ;;  %v2037_v22 = vmul.f32 1.442695, %v1997_v3 }
 0x879   : > { %v2327_v14 = vmul.f32 %v14180_v16, %v2091_v15  ;;  %v13077_v30 = vpop.eup %13076 }
 0x87a   : > { %3215 = vbcast.lane.b32.xlu1 %v3201_v36, 280  ;;  %3241 = vbcast.lane.b32.xlu0 %v14176_v52, 256  ;;  %v14199_v36 = vrot.slane %v14189_v40, %v14017_v20  ;;  %13086 = vpow2.f32 %v2037_v22  ;;  %v2361_v43 = vmul.f32 0.0, %v13077_v30  ;;  %v2000_v30 = vmul.f32 %v14098_v44, %v14146_v10 }
 0x87b   : > { %v2363_v15 = vadd.f32 %v2359_v60, %v2327_v14  ;;  %v1999_v60 = vmul.f32 %v14088_v32, %v14131_v41  ;;  %v13079_v14 = vpop.eup %13078  ;;  %13088 = vpow2.f32 %v2035_v17  ;;  %v14220_v17 = vrot.slane %v14203_v47, %v14017_v20 }
 0x87c   : > { %v14191_v45 = vpop.permute.xlu1 %1987  ;;  %v2110_v58 = vpop.permute.xlu0 %2109  ;;  %13090 = vpow2.f32 %v2039_v8  ;;  %v2005_v44 = vmul.f32 %v14100_v46, %v14113_v61  ;;  %v14244_v8 = vrot.slane %v14203_v47, %v14021_v23  ;;  %v2004_v46 = vmul.f32 %v14105_v51, %v14146_v10 }
 0x87d   : > { %16540 = vst [vmem:[#allocation58_spill] sm:$0xff] %v14191_v45  ;;  %v2331_v42 = vmul.f32 %v14199_v36, %v2110_v58  ;;  %v2452_v26 = vmul.f32 %v13079_v14, %v2363_v15  ;;  %v2041_v58 = vmul.f32 1.442695, %v1999_v60  ;;  %v14234_v14 = vrot.slane %v2283_v1, %v14017_v20 }
 0x87e   : > { %3226 = vbcast.lane.b32.xlu1 %v14164_v11, 264  ;;  %3230 = vbcast.lane.b32.xlu0 %v14164_v11, 272  ;;  %13092 = vpow2.f32 %v2045_v4  ;;  %v16543_v1 = vmov 0.0|0.0   ;;  %v2053_v51 = vmul.f32 1.442695, %v2005_v44 }
 0x87f   : > { %v2456_v35 = vadd.f32 %v2452_v26, %v2331_v42  ;;  %13094 = vpow2.f32 %v2041_v58  ;;  %v2043_v26 = vmul.f32 1.442695, %v2000_v30 }
 0x880   : > { %v2095_v5 = vpop.permute.xlu1 %2094  ;;  %v2099_v3 = vpop.permute.xlu0 %2098  ;;  %13096 = vpow2.f32 %v2047_v21 }
 0x881   : > { %v2328_v19 = vmul.f32 %v14180_v16, %v2095_v5  ;;  %v2329_v32 = vmul.f32 %v14180_v16, %v2099_v3  ;;  %v13081_v5 = vpop.eup %13080  ;;  %13098 = vpow2.f32 %v2043_v26 }
 0x882   : > { %3245 = vbcast.lane.b32.xlu1 %v14176_v52, 264  ;;  %3249 = vbcast.lane.b32.xlu0 %v14176_v52, 272 }
 0x883   : > { %v2364_v22 = vadd.f32 %v2360_v18, %v2328_v19  ;;  %v13083_v19 = vpop.eup %13082  ;;  %v2365_v45 = vadd.f32 %v2361_v43, %v2329_v32 }
 0x884   : > { %v2114_v56 = vpop.permute.xlu1 %2113  ;;  %v2118_v0 = vpop.permute.xlu0 %2117  ;;  %v2362_v43 = vmul.f32 0.0, %v13083_v19 }
 0x885   : > { %v12543_v24 = vpack.c.bf16 %v2364_v22, %v2363_v15  ;;  %v2332_v18 = vmul.f32 %v14199_v36, %v2114_v56  ;;  %v2453_v3 = vmul.f32 %v13081_v5, %v2364_v22  ;;  %v2003_v56 = vmul.f32 %v14093_v38, %v14131_v41  ;;  %v13085_v4 = vpop.eup %13084 }
 0x886   : > { %3234 = vbcast.lane.b32.xlu1 %v14164_v11, 280  ;;  %3356 = vbcast.lane.b32.xlu0 %v14220_v17, 256  ;;  %v2238_v38 = vcombine.high %v14003_v50, %v14003_v50  ;;  %v13087_v22 = vpop.eup %13086  ;;  %v2333_v32 = vmul.f32 %v14199_v36, %v2118_v0  ;;  %v2454_v5 = vmul.f32 %v13085_v4, %v2365_v45 }
 0x887   : > { %v2457_v60 = vadd.f32 %v2453_v3, %v2332_v18  ;;  %12545 = vmatpush3.bf16.xpose.msk.msra.mxu0 %vm14224_vm11, %v12543_v24  ;;  %v13089_v50 = vpop.eup %13088  ;;  %v2285_v24 = vcombine.high %v14189_v40, %v14189_v40  ;;  %v2049_v18 = vmul.f32 1.442695, %v2003_v56  ;;  %v2545_v21 = vmul.f32 %v13087_v22, %v2456_v35 }
 0x888   : > { %v2103_v15 = vpop.permute.xlu1 %2102  ;;  %v2129_v11 = vpop.permute.xlu0 %2128  ;;  %12546 = vmatprep.subr.bf16.mxu0 %v16543_v1  ;;  %v2458_v40 = vadd.f32 %v2454_v5, %v2333_v32 }
 0x889   : > { %v12551_v13 = vpack.c.bf16 %v2457_v60, %v2456_v35  ;;  %v2330_v42 = vmul.f32 %v14180_v16, %v2103_v15  ;;  %v2335_v16 = vmul.f32 %v14234_v14, %v2129_v11  ;;  %v14263_v15 = vrot.slane %v2238_v38, %v14140_v59 }
 0x88a   : > { %3253 = vbcast.lane.b32.xlu1 %v14176_v52, 280  ;;  %3375 = vbcast.lane.b32.xlu0 %v14244_v8, 256  ;;  %v2051_v11 = vmul.f32 1.442695, %v2004_v46  ;;  %13100 = vpow2.f32 %v2049_v18  ;;  %v2009_v35 = vmul.f32 %v14107_v53, %v14113_v61 }
 0x88b   : > { %v2366_v58 = vadd.f32 %v2362_v43, %v2330_v42  ;;  %12553 = vmatpush3.bf16.xpose.msk.msra.mxu1 %vm14224_vm11, %v12551_v13  ;;  %v2006_v43 = vmul.f32 %v14109_v55, %v14121_v12  ;;  %v2549_v56 = vadd.f32 %v2545_v21, %v2335_v16  ;;  %v14276_v55 = vrot.slane %v2285_v24, %v14017_v20 }
 0x88c   : > { %v2122_v3 = vpop.permute.xlu1 %2121  ;;  %v2148_v52 = vpop.permute.xlu0 %2147  ;;  %12554 = vmatprep.subr.bf16.mxu1 %v16543_v1  ;;  %13102 = vpow2.f32 %v2053_v51  ;;  %v14282_v22 = vrot.slane %v14263_v15, %v14140_v59  ;;  %v2061_v24 = vmul.f32 1.442695, %v2009_v35 }
 0x88d   : > { %v12547_v19 = vpack.c.bf16 %v2366_v58, %v2365_v45  ;;  %v2334_v0 = vmul.f32 %v14199_v36, %v2122_v3  ;;  %v2455_v30 = vmul.f32 %v13089_v50, %v2366_v58  ;;  %v13091_v45 = vpop.eup %13090  ;;  %v2007_v36 = vmul.f32 %v14111_v57, %v14131_v41 }
 0x88e   : > { %3360 = vbcast.lane.b32.xlu1 %v14220_v17, 264  ;;  %3364 = vbcast.lane.b32.xlu0 %v14220_v17, 272  ;;  %v2546_v26 = vmul.f32 %v13091_v45, %v2457_v60  ;;  %v13093_v46 = vpop.eup %13092  ;;  %13104 = vpow2.f32 %v2051_v11  ;;  %v2055_v53 = vmul.f32 1.442695, %v2006_v43  ;;  %v2010_v57 = vmul.f32 %v14115_v62, %v14121_v12 }
 0x88f   : > { %v2459_v44 = vadd.f32 %v2455_v30, %v2334_v0  ;;  %12549 = vmatpush3.bf16.xpose.msk.msra.mxu0 %vm14224_vm11, %v12547_v19  ;;  %v13095_v32 = vpop.eup %13094  ;;  %v2339_v5 = vmul.f32 %v14276_v55, %v2148_v52  ;;  %v2638_v58 = vmul.f32 %v13093_v46, %v2549_v56  ;;  %v2057_v18 = vmul.f32 1.442695, %v2007_v36 }
 0x890   : > { %v2133_v13 = vpop.permute.xlu1 %2132  ;;  %v2137_v42 = vpop.permute.xlu0 %2136  ;;  %12558 = vmatprep.subr.bf16.mxu0 %v16543_v1  ;;  %v14294_v62 = vrot.slane %v14203_v47, %v14025_v25  ;;  %v2547_v52 = vmul.f32 %v13095_v32, %v2458_v40  ;;  %v2254_v30 = vcombine.high %v14263_v15, %v14263_v15  ;;  %13106 = vpow2.f32 %v2055_v53 }
 0x891   : > { %v12555_v4 = vpack.c.bf16 %v2459_v44, %v2458_v40  ;;  %v2336_v38 = vmul.f32 %v14234_v14, %v2133_v13  ;;  %v2337_v60 = vmul.f32 %v14234_v14, %v2137_v42  ;;  %v13097_v50 = vpop.eup %13096  ;;  %v2063_v11 = vmul.f32 1.442695, %v2010_v57 }
 0x892   : > { %3379 = vbcast.lane.b32.xlu1 %v14244_v8, 264  ;;  %3383 = vbcast.lane.b32.xlu0 %v14244_v8, 272  ;;  %v2008_v43 = vmul.f32 %v14125_v28, %v14146_v10  ;;  %v14306_v45 = vrot.slane %v14282_v22, %v14017_v20  ;;  %v2642_v40 = vadd.f32 %v2638_v58, %v2339_v5  ;;  %v13099_v15 = vpop.eup %13098  ;;  %13108 = vpow2.f32 %v2061_v24 }
 0x893   : > { %v2550_v16 = vadd.f32 %v2546_v26, %v2336_v38  ;;  %12557 = vmatpush3.bf16.xpose.msk.msra.mxu1 %vm14224_vm11, %v12555_v4  ;;  %v2011_v36 = vmul.f32 %v14117_v63, %v14131_v41  ;;  %v14316_v13 = vrot.slane %v14203_v47, %v14029_v27  ;;  %v2460_v42 = vrot.slane %v14010_v2, 1 }
 0x894   : > { %v2152_v51 = vpop.permute.xlu1 %2151  ;;  %v2156_v3 = vpop.permute.xlu0 %2155  ;;  %12566 = vmatprep.subr.bf16.mxu1 %v16543_v1  ;;  %v16544_v4 = vmov 0.0   ;;  %13110 = vpow2.f32 %v2057_v18  ;;  %v2548_v46 = vmul.f32 %v13099_v15, %v2459_v44  ;;  %v2059_v53 = vmul.f32 1.442695, %v2008_v43 }
 0x895   : > { %v12559_v19 = vpack.c.bf16 %v2550_v16, %v2549_v56  ;;  %v2340_v21 = vmul.f32 %v14276_v55, %v2152_v51  ;;  %v2639_v0 = vmul.f32 %v13097_v50, %v2550_v16  ;;  %v2551_v56 = vadd.f32 %v2547_v52, %v2337_v60  ;;  %v13101_v63 = vpop.eup %13100 }
 0x896   : > { %3368 = vbcast.lane.b32.xlu1 %v14220_v17, 280  ;;  %3394 = vbcast.lane.b32.xlu0 %v14294_v62, 256  ;;  %13112 = vpow2.f32 %v2063_v11  ;;  %v2012_v57 = vmul.f32 %v14135_v49, %v14146_v10  ;;  %v13103_v32 = vpop.eup %13102  ;;  %v2341_v5 = vmul.f32 %v14276_v55, %v2156_v3  ;;  %v14331_v60 = vrot.slane %v2254_v30, %v14140_v59 }
 0x897   : > { %v2643_v35 = vadd.f32 %v2639_v0, %v2340_v21  ;;  %11867 = vmatmul.mubr.msk.f32.vlgmr.msra.gmra.mrb[16].mxu0 %vm1180_vm2, %v14010_v2  ;;  %v2640_v58 = vmul.f32 %v13101_v63, %v2551_v56  ;;  %v2065_v50 = vmul.f32 1.442695, %v2011_v36  ;;  %v2013_v49 = vmul.f32 %v14127_v34, %v14113_v61 }
 0x898   : > { %12561 = vmatpush3.bf16.xpose.msk.msra.mxu0 %vm14224_vm11, %v12559_v19  ;;  %v2141_v28 = vpop.permute.xlu1 %2140  ;;  %v2167_v17 = vpop.permute.xlu0 %2166  ;;  %11888 = vmatprep.mubr.msk.f32.mxu0 %vm13660_vm1, %v16544_v4  ;;  %v2731_v51 = vmul.f32 %v13103_v32, %v2642_v40  ;;  %13114 = vpow2.f32 %v2059_v53  ;;  %v2067_v52 = vmul.f32 1.442695, %v2012_v57  ;;  %v2014_v34 = vmul.f32 %v14148_v7, %v14121_v12 }
 0x899   : > { %v12567_v38 = vpack.c.bf16 %v2643_v35, %v2642_v40  ;;  %v2338_v26 = vmul.f32 %v14234_v14, %v2141_v28  ;;  %12562 = vmatprep.subr.bf16.mxu0 %v16543_v1  ;;  %v2343_v14 = vmul.f32 %v14306_v45, %v2167_v17  ;;  %v13105_v44 = vpop.eup %13104  ;;  %v2644_v21 = vadd.f32 %v2640_v58, %v2341_v5 }
 0x89a   : > { %3387 = vbcast.lane.b32.xlu1 %v14244_v8, 280  ;;  %3413 = vbcast.lane.b32.xlu0 %v14316_v13, 256  ;;  %v13107_v11 = vpop.eup %13106  ;;  %13116 = vpow2.f32 %v2065_v50  ;;  %v2069_v43 = vmul.f32 1.442695, %v2013_v49  ;;  %v14349_v15 = vrot.slane %v14331_v60, %v14017_v20  ;;  %v2071_v17 = vmul.f32 1.442695, %v2014_v34 }
 0x89b   : > { %v2552_v16 = vadd.f32 %v2548_v46, %v2338_v26  ;;  %11878 = vmatmul.mubr.msk.f32.vlgmr.msra.gmra.mrb[2].mxu1 %vm1180_vm2, %v2460_v42  ;;  %v2735_v0 = vadd.f32 %v2731_v51, %v2343_v14  ;;  %v2732_v36 = vmul.f32 %v13107_v11, %v2643_v35  ;;  %13118 = vpow2.f32 %v2067_v52 }
 0x89c   : > { %12569 = vmatpush3.bf16.xpose.msk.msra.mxu1 %vm14224_vm11, %v12567_v38  ;;  %v2160_v8 = vpop.permute.xlu1 %2159  ;;  %v2186_v24 = vpop.permute.xlu0 %2185  ;;  %11899 = vmatprep.mubr.msk.f32.mxu1 %vm13660_vm1, %v16544_v4  ;;  %13120 = vpow2.f32 %v2069_v43  ;;  %v2017_v35 = vmul.f32 %v14137_v54, %v14113_v61  ;;  %v14363_v5 = vrot.slane %v14203_v47, %v14033_v29  ;;  %v2553_v58 = vrot.slane %v14010_v2, 2 }
 0x89d   : > { %v12563_v18 = vpack.c.bf16 %v2552_v16, %v2551_v56  ;;  %v2342_v3 = vmul.f32 %v14276_v55, %v2160_v8  ;;  %v2641_v19 = vmul.f32 %v13105_v44, %v2552_v16  ;;  %12570 = vmatprep.subr.bf16.mxu1 %v16543_v1  ;;  %v13109_v28 = vpop.eup %13108  ;;  %v2347_v38 = vmul.f32 %v14349_v15, %v2186_v24 }
 0x89e   : > { %3398 = vbcast.lane.b32.xlu1 %v14294_v62, 264  ;;  %3402 = vbcast.lane.b32.xlu0 %v14294_v62, 272  ;;  %v13111_v42 = vpop.eup %13110  ;;  %v2824_v26 = vmul.f32 %v13109_v28, %v2735_v0  ;;  %13122 = vpow2.f32 %v2071_v17  ;;  %v2018_v54 = vmul.f32 %v14158_v39, %v14121_v12  ;;  %v2284_v51 = vcombine.high %v14282_v22, %v14282_v22 }
 0x89f   : > { %v2645_v30 = vadd.f32 %v2641_v19, %v2342_v3  ;;  %v2733_v14 = vmul.f32 %v13111_v42, %v2644_v21  ;;  %v14379_v39 = vrot.slane %v14203_v47, %v14037_v31  ;;  %v2077_v52 = vmul.f32 1.442695, %v2017_v35 }
 0x8a0   : > { %12565 = vmatpush3.bf16.xpose.msk.msra.mxu0 %vm14224_vm11, %v12563_v18  ;;  %v2171_v55 = vpop.permute.xlu1 %2170  ;;  %v2175_v40 = vpop.permute.xlu0 %2174  ;;  %v2828_v49 = vadd.f32 %v2824_v26, %v2347_v38  ;;  %v2079_v11 = vmul.f32 1.442695, %v2018_v54  ;;  %v2016_v42 = vmul.f32 %v14172_v6, %v14146_v10 }
 0x8a1   : > { %v12571_v56 = vpack.c.bf16 %v2645_v30, %v2644_v21  ;;  %v2344_v7 = vmul.f32 %v14306_v45, %v2171_v55  ;;  %12574 = vmatprep.subr.bf16.mxu0 %v16543_v1  ;;  %v2345_v63 = vmul.f32 %v14306_v45, %v2175_v40  ;;  %v13113_v53 = vpop.eup %13112  ;;  %13124 = vpow2.f32 %v2077_v52 }
 0x8a2   : > { %3417 = vbcast.lane.b32.xlu1 %v14316_v13, 264  ;;  %3421 = vbcast.lane.b32.xlu0 %v14316_v13, 272  ;;  %v13115_v18 = vpop.eup %13114  ;;  %13126 = vpow2.f32 %v2079_v11  ;;  %v2832_v11 = vrot.slane %v14010_v2, 5 }
 0x8a3   : > { %v2736_v46 = vadd.f32 %v2732_v36, %v2344_v7  ;;  %v2737_v8 = vadd.f32 %v2733_v14, %v2345_v63  ;;  %v2015_v7 = vmul.f32 %v14150_v9, %v14131_v41  ;;  %v2075_v14 = vmul.f32 1.442695, %v2016_v42 }
 0x8a4   : > { %12573 = vmatpush3.bf16.xpose.msk.msra.mxu1 %vm14224_vm11, %v12571_v56  ;;  %v2190_v57 = vpop.permute.xlu1 %2189  ;;  %v2194_v32 = vpop.permute.xlu0 %2193 }
 0x8a5   : > { %v12575_v16 = vpack.c.bf16 %v2736_v46, %v2735_v0  ;;  %v2348_v44 = vmul.f32 %v14349_v15, %v2190_v57  ;;  %v2825_v50 = vmul.f32 %v13113_v53, %v2736_v46  ;;  %12582 = vmatprep.subr.bf16.mxu1 %v16543_v1  ;;  %v2734_v0 = vmul.f32 %v13115_v18, %v2645_v30  ;;  %v13117_v22 = vpop.eup %13116 }
 0x8a6   : > { %3406 = vbcast.lane.b32.xlu1 %v14294_v62, 280  ;;  %3432 = vbcast.lane.b32.xlu0 %v14363_v5, 256  ;;  %v2646_v62 = vrot.slane %v14010_v2, 3  ;;  %v2349_v43 = vmul.f32 %v14349_v15, %v2194_v32  ;;  %v2826_v55 = vmul.f32 %v13117_v22, %v2737_v8  ;;  %v13119_v56 = vpop.eup %13118  ;;  %v2073_v53 = vmul.f32 1.442695, %v2015_v7 }
 0x8a7   : > { %v2829_v24 = vadd.f32 %v2825_v50, %v2348_v44  ;;  %11889 = vmatmul.mubr.msk.f32.vlgmr.msra.gmra.mrb[18].mxu0 %vm1180_vm2, %v2553_v58  ;;  %v13121_v9 = vpop.eup %13120 }
 0x8a8   : > { %12577 = vmatpush3.bf16.xpose.msk.msra.mxu0 %vm14224_vm11, %v12575_v16  ;;  %v2179_v3 = vpop.permute.xlu1 %2178  ;;  %v2205_v19 = vpop.permute.xlu0 %2204  ;;  %11910 = vmatprep.mubr.msk.f32.mxu0 %vm13660_vm1, %v16544_v4  ;;  %v14407_v38 = vadd.f32 %v2826_v55, %v2349_v43  ;;  %v2917_v57 = vmul.f32 %v13121_v9, %v2828_v49  ;;  %13128 = vpow2.f32 %v2073_v53 }
 0x8a9   : > { %v12583_v34 = vpack.c.bf16 %v2829_v24, %v2828_v49  ;;  %v2346_v21 = vmul.f32 %v14306_v45, %v2179_v3  ;;  %12578 = vmatprep.subr.bf16.mxu0 %v16543_v1  ;;  %v14393_v45 = vrot.slane %v2284_v51, %v14017_v20  ;;  %v13123_v63 = vpop.eup %13122  ;;  %v2739_v51 = vrot.slane %v14010_v2, 4  ;;  %v16545_v3 = vld [vmem:[#allocation58_spill] sm:$0xff] }
 0x8aa   : > { %3425 = vbcast.lane.b32.xlu1 %v14316_v13, 280  ;;  %3451 = vbcast.lane.b32.xlu0 %v14379_v39, 256  ;;  %v2918_v16 = vmul.f32 %v13123_v63, %v2829_v24  ;;  %v2019_v24 = vmul.f32 %v14160_v48, %v14131_v41  ;;  %13130 = vpow2.f32 %v2075_v14 }
 0x8ab   : > { %v2738_v40 = vadd.f32 %v2734_v0, %v2346_v21  ;;  %11900 = vmatmul.mubr.msk.f32.vlgmr.msra.gmra.mrb[16].mxu1 %vm1180_vm2, %v2646_v62  ;;  %v2351_v26 = vmul.f32 %v14393_v45, %v2205_v19  ;;  %v2020_v19 = vmul.f32 %v16545_v3, %v14146_v10  ;;  %v13125_v62 = vpop.eup %13124  ;;  %v16546_v0 = vld [vmem:[#allocation52_spill] sm:$0xff] }
 0x8ac   : > { %12585 = vmatpush3.bf16.xpose.msk.msra.mxu1 %vm14224_vm11, %v12583_v34  ;;  %v2198_v30 = vpop.permute.xlu1 %2197  ;;  %v14397_v13 = vpop.permute.xlu0 %3108  ;;  %11921 = vmatprep.mubr.msk.f32.mxu1 %vm13660_vm1, %v16544_v4  ;;  %v3487_v22 = vrot.slane %v14203_v47, %v16546_v0 }
 0x8ad   : > { %v12579_v36 = vpack.c.bf16 %v2738_v40, %v2737_v8  ;;  %v2350_v28 = vmul.f32 %v14349_v15, %v2198_v30  ;;  %v2827_v17 = vmul.f32 %v13119_v56, %v2738_v40  ;;  %12586 = vmatprep.subr.bf16.mxu1 %v16543_v1  ;;  %v2286_v15 = vcombine.high %v14331_v60, %v14331_v60  ;;  %v13127_v34 = vpop.eup %13126 }
 0x8ae   : > { %3436 = vbcast.lane.b32.xlu1 %v14363_v5, 264  ;;  %3440 = vbcast.lane.b32.xlu0 %v14363_v5, 272  ;;  %v2921_v60 = vadd.f32 %v2917_v57, %v2351_v26  ;;  %v3468_v8 = vrot.slane %v14203_v47, %v14041_v33  ;;  %v2083_v56 = vmul.f32 1.442695, %v2020_v19  ;;  %v2925_v19 = vrot.slane %v14010_v2, 6 }
 0x8af   : > { %v14410_v46 = vadd.f32 %v2827_v17, %v2350_v28  ;;  %v14423_v50 = vrot.slane %v2286_v15, %v14017_v20 }
 0x8b0   : > { %12581 = vmatpush3.bf16.xpose.msk.msra.mxu0 %vm14224_vm11, %v12579_v36  ;;  %v2209_v35 = vpop.permute.xlu1 %2208  ;;  %v2224_v6 = vpop.permute.xlu0 %2223  ;;  %v3010_v43 = vmul.f32 %v13125_v62, %v2921_v60 }
 0x8b1   : > { %v12587_v32 = vpack.c.bf16 %v14410_v46, %v14407_v38  ;;  %v2352_v58 = vmul.f32 %v14393_v45, %v2209_v35  ;;  %12590 = vmatprep.subr.bf16.mxu0 %v16543_v1  ;;  %v2355_v52 = vmul.f32 %v14423_v50, %v2224_v6 }
 0x8b2   : > { %3455 = vbcast.lane.b32.xlu1 %v14379_v39, 264  ;;  %3459 = vbcast.lane.b32.xlu0 %v14379_v39, 272 }
 0x8b3   : > { %v2922_v44 = vadd.f32 %v2918_v16, %v2352_v58  ;;  %v14452_v7 = vadd.f32 %v3010_v43, %v2355_v52 }
 0x8b4   : > { %12589 = vmatpush3.bf16.xpose.msk.msra.mxu1 %vm14224_vm11, %v12587_v32  ;;  %v14427_v54 = vpop.permute.xlu1 %3112  ;;  %v14429_v49 = vpop.permute.xlu0 %3127 }
 0x8b5   : > { %v12591_v18 = vpack.c.bf16 %v2922_v44, %v2921_v60  ;;  %12598 = vmatprep.subr.bf16.mxu1 %v16543_v1  ;;  %v3011_v40 = vmul.f32 %v13127_v34, %v2922_v44 }
 0x8b6   : > { %3444 = vbcast.lane.b32.xlu1 %v14363_v5, 280  ;;  %3470 = vbcast.lane.b32.xlu0 %v3468_v8, 256  ;;  %v2081_v5 = vmul.f32 1.442695, %v2019_v24 }
 0x8b7   : > { %11911 = vmatmul.mubr.msk.f32.vlgmr.msra.gmra.mrb[20].mxu0 %vm1180_vm2, %v2739_v51 }
 0x8b8   : > { %12593 = vmatpush3.bf16.xpose.msk.msra.mxu0 %vm14224_vm11, %v12591_v18  ;;  %v2228_v48 = vpop.permute.xlu1 %2227  ;;  %v2213_v21 = vpop.permute.xlu0 %2212  ;;  %11932 = vmatprep.mubr.msk.f32.mxu0 %vm13660_vm1, %v16544_v4  ;;  %13132 = vpow2.f32 %v2081_v5 }
 0x8b9   : > { %v2356_v55 = vmul.f32 %v14423_v50, %v2228_v48  ;;  %12594 = vmatprep.subr.bf16.mxu0 %v16543_v1  ;;  %13134 = vpow2.f32 %v2083_v56  ;;  %v2353_v17 = vmul.f32 %v14393_v45, %v2213_v21  ;;  %v3018_v21 = vrot.slane %v14010_v2, 7 }
 0x8ba   : > { %3463 = vbcast.lane.b32.xlu1 %v14379_v39, 280  ;;  %3489 = vbcast.lane.b32.xlu0 %v3487_v22, 256  ;;  %v13129_v39 = vpop.eup %13128  ;;  %v3255_v2 = vmul.f32 %v14397_v13, %v14113_v61 }
 0x8bb   : > { %v14454_v30 = vadd.f32 %v3011_v40, %v2356_v55  ;;  %11922 = vmatmul.mubr.msk.f32.vlgmr.msra.gmra.mrb[18].mxu1 %vm1180_vm2, %v2832_v11  ;;  %v13131_v9 = vpop.eup %13130  ;;  %v2919_v63 = vmul.f32 %v13129_v39, %v14407_v38 }
 0x8bc   : > { %v14457_v47 = vpop.permute.xlu1 %3131  ;;  %v14459_v36 = vpop.permute.xlu0 %3116  ;;  %11943 = vmatprep.mubr.msk.f32.mxu1 %vm13660_vm1, %v16544_v4  ;;  %v2920_v53 = vmul.f32 %v13131_v9, %v14410_v46  ;;  %v3287_v39 = vmul.f32 1.442695, %v3255_v2 }
 0x8bd   : > { %v12599_v28 = vpack.c.bf16 %v14454_v30, %v14452_v7  ;;  %v2923_v35 = vadd.f32 %v2919_v63, %v2353_v17  ;;  %v3257_v63 = vmul.f32 %v14459_v36, %v14131_v41 }
 0x8be   : > { %3474 = vbcast.lane.b32.xlu1 %v3468_v8, 264  ;;  %3478 = vbcast.lane.b32.xlu0 %v3468_v8, 272  ;;  %13136 = vpow2.f32 %v3287_v39 }
 0x8bf   : > { %12601 = vmatpush3.bf16.xpose.msk.msra.mxu1 %vm14224_vm11, %v12599_v28 }
 0x8c0   : > { %v2217_v42 = vpop.permute.xlu1 %2216  ;;  %v2232_v26 = vpop.permute.xlu0 %2231  ;;  %12602 = vmatprep.subr.bf16.mxu1 %v16543_v1 }
 0x8c1   : > { %v2354_v15 = vmul.f32 %v14393_v45, %v2217_v42  ;;  %v2357_v14 = vmul.f32 %v14423_v50, %v2232_v26  ;;  %v3259_v42 = vmul.f32 %v14429_v49, %v14113_v61  ;;  %v3256_v26 = vmul.f32 %v14427_v54, %v14121_v12 }
 0x8c2   : > { %3493 = vbcast.lane.b32.xlu1 %v3487_v22, 264  ;;  %3497 = vbcast.lane.b32.xlu0 %v3487_v22, 272  ;;  %v13133_v16 = vpop.eup %13132  ;;  %v3260_v54 = vmul.f32 %v14457_v47, %v14121_v12 }
 0x8c3   : > { %v2924_v6 = vadd.f32 %v2920_v53, %v2354_v15  ;;  %v13135_v60 = vpop.eup %13134  ;;  %v3012_v45 = vmul.f32 %v13133_v16, %v2923_v35  ;;  %v3295_v53 = vmul.f32 1.442695, %v3259_v42  ;;  %v3291_v16 = vmul.f32 1.442695, %v3257_v63 }
 0x8c4   : > { %v3121_v57 = vpop.permute.xlu1 %3120  ;;  %v3136_v32 = vpop.permute.xlu0 %3135 }
 0x8c5   : > { %v12595_v58 = vpack.c.bf16 %v2924_v6, %v2923_v35  ;;  %v3013_v24 = vmul.f32 %v13135_v60, %v2924_v6  ;;  %v14477_v18 = vadd.f32 %v3012_v45, %v2357_v14  ;;  %v16547_v35 = vld [vmem:[#allocation44_spill] sm:$0xff]  ;;  %13138 = vpow2.f32 %v3295_v53 }
 0x8c6   : > { %3482 = vbcast.lane.b32.xlu1 %v3468_v8, 280  ;;  %v3511_v6 = vrot.slane %v16547_v35, %v14140_v59  ;;  %v3258_v36 = vmul.f32 %v3121_v57, %v14146_v10  ;;  %v3261_v45 = vmul.f32 %v3136_v32, %v14131_v41 }
 0x8c7   : > { %12597 = vmatpush3.bf16.xpose.msk.msra.mxu0 %vm14224_vm11, %v12595_v58  ;;  %v3289_v58 = vmul.f32 1.442695, %v3256_v26 }
 0x8c8   : > { %v2236_v38 = vpop.permute.xlu1 %2235  ;;  %v3147_v44 = vpop.permute.xlu0 %3146  ;;  %12606 = vmatprep.subr.bf16.mxu0 %v16543_v1  ;;  %v3519_v60 = vcombine.high %v3511_v6, %v3511_v6  ;;  %v3299_v39 = vmul.f32 1.442695, %v3261_v45 }
 0x8c9   : > { %v2358_v46 = vmul.f32 %v14423_v50, %v2236_v38  ;;  %v14546_v38 = vrot.slane %v3511_v6, %v14140_v59  ;;  %13140 = vpow2.f32 %v3289_v58  ;;  %v3263_v47 = vmul.f32 %v3147_v44, %v14113_v61 }
 0x8ca   : > { %3501 = vbcast.lane.b32.xlu1 %v3487_v22, 280  ;;  %13142 = vpow2.f32 %v3291_v16  ;;  %v14555_v2 = vrot.slane %v3519_v60, %v14140_v59 }
 0x8cb   : > { %v14479_v51 = vadd.f32 %v3013_v24, %v2358_v46  ;;  %v14559_v57 = vrot.slane %v14546_v38, %v14017_v20  ;;  %v3303_v53 = vmul.f32 1.442695, %v3263_v47 }
 0x8cc   : > { %v14481_v8 = vpop.permute.xlu1 %3139  ;;  %v14483_v3 = vpop.permute.xlu0 %3165  ;;  %v14569_v6 = vrot.slane %v14555_v2, %v14017_v20 }
 0x8cd   : > { %v12603_v62 = vpack.c.bf16 %v14479_v51, %v14477_v18  ;;  %v3262_v44 = vmul.f32 %v14481_v8, %v14146_v10  ;;  %v3267_v58 = vmul.f32 %v14483_v3, %v14113_v61 }
 0x8ce   : > { %11933 = vmatmul.mubr.msk.f32.vlgmr.msra.gmra.mrb[22].mxu0 %vm1180_vm2, %v2925_v19  ;;  %v3297_v19 = vmul.f32 1.442695, %v3260_v54 }
 0x8cf   : > { %12605 = vmatpush3.bf16.xpose.msk.msra.mxu1 %vm14224_vm11, %v12603_v62  ;;  %11954 = vmatprep.mubr.msk.f32.mxu0 %vm13660_vm1, %v16544_v4  ;;  %v13137_v62 = vpop.eup %13136 }
 0x8d0   : > { %v3151_v50 = vpop.permute.xlu1 %3150  ;;  %v14493_v52 = vpop.permute.xlu0 %3154  ;;  %12614 = vmatprep.subr.bf16.mxu1 %v16543_v1  ;;  %13144 = vpow2.f32 %v3297_v19  ;;  %v3625_v63 = vmul.f32 %v13137_v62, %v14452_v7 }
 0x8d1   : > { %v13139_v54 = vpop.eup %13138  ;;  %v3265_v47 = vmul.f32 %v14493_v52, %v14131_v41 }
 0x8d3   : > { %v13141_v45 = vpop.eup %13140 }
 0x8d4   : > { %v14496_v34 = vpop.permute.xlu1 %3169  ;;  %v14498_v48 = vpop.permute.xlu0 %3173  ;;  %v3626_v23 = vmul.f32 %v13141_v45, %v14454_v30  ;;  %v3551_v45 = vcombine.high %v14555_v2, %v14555_v2 }
 0x8d5   : > { %v13143_v8 = vpop.eup %13142  ;;  %v3268_v52 = vmul.f32 %v14496_v34, %v14121_v12 }
 0x8d6   : > { %11944 = vmatmul.mubr.msk.f32.vlgmr.msra.gmra.mrb[20].mxu1 %vm1180_vm2, %v3018_v21  ;;  %v3293_v21 = vmul.f32 1.442695, %v3258_v36  ;;  %v3264_v36 = vmul.f32 %v3151_v50, %v14121_v12 }
 0x8d7   : > { %11965 = vmatprep.mubr.msk.f32.mxu1 %vm13660_vm1, %v16544_v4 }
 0x8d8   : > { %v14504_v22 = vpop.permute.xlu1 %3158  ;;  %v14506_v11 = vpop.permute.xlu0 %3184  ;;  %13146 = vpow2.f32 %v3293_v21  ;;  %v3301_v21 = vmul.f32 1.442695, %v3262_v44  ;;  %v3305_v3 = vmul.f32 1.442695, %v3264_v36  ;;  %v3307_v44 = vmul.f32 1.442695, %v3265_v47 }
 0x8d9   : > { %13148 = vpow2.f32 %v3299_v39  ;;  %v3311_v39 = vmul.f32 1.442695, %v3267_v58 }
 0x8da   : > { %13150 = vpow2.f32 %v3303_v53  ;;  %v3549_v53 = vcombine.high %v14546_v38, %v14546_v38  ;;  %v13145_v58 = vpop.eup %13144 }
 0x8db   : > { %13152 = vpow2.f32 %v3301_v21 }
 0x8dc   : > { %v14508_v5 = vpop.permute.xlu1 %3177  ;;  %v14510_v43 = vpop.permute.xlu0 %3203  ;;  %13154 = vpow2.f32 %v3311_v39  ;;  %v14598_v2 = vrot.slane %v3549_v53, %v14017_v20 }
 0x8dd   : > { %13156 = vpow2.f32 %v3305_v3 }
 0x8de   : > { %13158 = vpow2.f32 %v3307_v44 }
 0x8e0   : > { %v14512_v55 = vpop.permute.xlu1 %3188  ;;  %v14514_v40 = vpop.permute.xlu0 %3192 }
 0x8e2   : > { %v13147_v30 = vpop.eup %13146 }
 0x8e3   : > { %v3628_v44 = vmul.f32 %v13147_v30, %v14479_v51  ;;  %v3275_v51 = vmul.f32 %v14510_v43, %v14113_v61 }
 0x8e4   : > { %v14518_v56 = vpop.permute.xlu1 %3207  ;;  %v14520_v28 = vpop.permute.xlu0 %3211 }
 0x8e8   : > { %v14522_v17 = vpop.permute.xlu1 %3196  ;;  %v14524_v9 = vpop.permute.xlu0 %3222 }
 0x8ec   : > { %v14532_v13 = vpop.permute.xlu1 %3215  ;;  %v14534_v15 = vpop.permute.xlu0 %3241 }
 0x8f0   : > { %v14538_v14 = vpop.permute.xlu1 %3226  ;;  %v14540_v49 = vpop.permute.xlu0 %3230 }
 0x8f4   : > { %v14549_v46 = vpop.permute.xlu1 %3245  ;;  %v14551_v24 = vpop.permute.xlu0 %3249 }
 0x8f8   : > { %v14561_v42 = vpop.permute.xlu1 %3234  ;;  %v3357_v32 = vpop.permute.xlu0 %3356 }
 0x8f9   : > { %v3593_v26 = vmul.f32 %v14559_v57, %v3357_v32 }
 0x8fb   : > { %v3629_v16 = vadd.f32 %v3625_v63, %v3593_v26 }
 0x8fc   : > { %v14574_v60 = vpop.permute.xlu1 %3253  ;;  %v3376_v7 = vpop.permute.xlu0 %3375 }
 0x8fd   : > { %v3597_v19 = vmul.f32 %v14569_v6, %v3376_v7  ;;  %v3718_v62 = vmul.f32 %v13139_v54, %v3629_v16  ;;  %v3627_v7 = vmul.f32 %v13143_v8, %v14477_v18  ;;  %v3269_v54 = vmul.f32 %v14498_v48, %v14131_v41  ;;  %v13149_v8 = vpop.eup %13148 }
 0x8fe   : > { %v3266_v18 = vmul.f32 %v14504_v22, %v14146_v10 }
 0x8ff   : > { %v3722_v32 = vadd.f32 %v3718_v62, %v3597_v19  ;;  %v3315_v3 = vmul.f32 1.442695, %v3269_v54 }
 0x900   : > { %v3361_v26 = vpop.permute.xlu1 %3360  ;;  %v3365_v63 = vpop.permute.xlu0 %3364 }
 0x901   : > { %v3594_v50 = vmul.f32 %v14559_v57, %v3361_v26  ;;  %v3595_v25 = vmul.f32 %v14559_v57, %v3365_v63  ;;  %v3504_v26 = vcombine.high %v16547_v35, %v16547_v35  ;;  %v3309_v63 = vmul.f32 1.442695, %v3266_v18 }
 0x902   : > { %v14611_v35 = vrot.slane %v3551_v45, %v14017_v20 }
 0x903   : > { %v3630_v36 = vadd.f32 %v3626_v23, %v3594_v50  ;;  %v3631_v19 = vadd.f32 %v3627_v7, %v3595_v25  ;;  %v3313_v23 = vmul.f32 1.442695, %v3268_v52  ;;  %v3271_v25 = vmul.f32 %v14506_v11, %v14113_v61 }
 0x904   : > { %v3380_v38 = vpop.permute.xlu1 %3379  ;;  %v3384_v62 = vpop.permute.xlu0 %3383 }
 0x905   : > { %v12607_v21 = vpack.c.bf16 %v3630_v36, %v3629_v16  ;;  %v3598_v34 = vmul.f32 %v14569_v6, %v3380_v38  ;;  %v3719_v47 = vmul.f32 %v13145_v58, %v3630_v36  ;;  %v3599_v39 = vmul.f32 %v14569_v6, %v3384_v62  ;;  %v13151_v16 = vpop.eup %13150 }
 0x906   : > { %v3720_v48 = vmul.f32 %v13149_v8, %v3631_v19  ;;  %v3811_v54 = vmul.f32 %v13151_v16, %v3722_v32  ;;  %13160 = vpow2.f32 %v3313_v23  ;;  %v3319_v36 = vmul.f32 1.442695, %v3271_v25 }
 0x907   : > { %v3723_v22 = vadd.f32 %v3719_v47, %v3598_v34  ;;  %12609 = vmatpush3.bf16.xpose.msk.msra.mxu0 %vm14224_vm11, %v12607_v21  ;;  %v3270_v38 = vmul.f32 %v14508_v5, %v14146_v10  ;;  %13162 = vpow2.f32 %v3315_v3  ;;  %v3272_v5 = vmul.f32 %v14512_v55, %v14121_v12 }
 0x908   : > { %v3724_v50 = vadd.f32 %v3720_v48, %v3599_v39  ;;  %v3369_v7 = vpop.permute.xlu1 %3368  ;;  %v3395_v52 = vpop.permute.xlu0 %3394  ;;  %12610 = vmatprep.subr.bf16.mxu0 %v16543_v1  ;;  %13164 = vpow2.f32 %v3309_v63  ;;  %v3273_v25 = vmul.f32 %v14514_v40, %v14131_v41  ;;  %v3327_v55 = vmul.f32 1.442695, %v3275_v51 }
 0x909   : > { %v12615_v11 = vpack.c.bf16 %v3723_v22, %v3722_v32  ;;  %v3596_v53 = vmul.f32 %v14559_v57, %v3369_v7  ;;  %v3601_v58 = vmul.f32 %v14598_v2, %v3395_v52  ;;  %v13153_v57 = vpop.eup %13152  ;;  %v3518_v32 = vrot.slane %v3504_v26, %v14140_v59 }
 0x90a   : > { %v13155_v8 = vpop.eup %13154  ;;  %13166 = vpow2.f32 %v3319_v36  ;;  %v3317_v23 = vmul.f32 1.442695, %v3270_v38  ;;  %v3321_v26 = vmul.f32 1.442695, %v3272_v5  ;;  %v3276_v36 = vmul.f32 %v14518_v56, %v14121_v12 }
 0x90b   : > { %v3632_v30 = vadd.f32 %v3628_v44, %v3596_v53  ;;  %v14615_v18 = vadd.f32 %v3811_v54, %v3601_v58  ;;  %12617 = vmatpush3.bf16.xpose.msk.msra.mxu1 %vm14224_vm11, %v12615_v11  ;;  %v13157_v39 = vpop.eup %13156  ;;  %v14636_v58 = vrot.slane %v3518_v32, %v14140_v59  ;;  %v3323_v54 = vmul.f32 1.442695, %v3273_v25 }
 0x90c   : > { %v3388_v62 = vpop.permute.xlu1 %3387  ;;  %v3414_v45 = vpop.permute.xlu0 %3413  ;;  %12618 = vmatprep.subr.bf16.mxu1 %v16543_v1  ;;  %v3812_v7 = vmul.f32 %v13157_v39, %v3723_v22  ;;  %13168 = vpow2.f32 %v3317_v23  ;;  %v3277_v22 = vmul.f32 %v14520_v28, %v14131_v41 }
 0x90d   : > { %v12611_v21 = vpack.c.bf16 %v3632_v30, %v3631_v19  ;;  %v3600_v43 = vmul.f32 %v14569_v6, %v3388_v62  ;;  %v3721_v34 = vmul.f32 %v13153_v57, %v3632_v30  ;;  %v3605_v47 = vmul.f32 %v14611_v35, %v3414_v45  ;;  %v13159_v16 = vpop.eup %13158 }
 0x90e   : > { %v3904_v48 = vmul.f32 %v13155_v8, %v14615_v18  ;;  %v3520_v19 = vcombine.high %v3518_v32, %v3518_v32  ;;  %v3813_v53 = vmul.f32 %v13159_v16, %v3724_v50  ;;  %13170 = vpow2.f32 %v3327_v55 }
 0x90f   : > { %v3725_v3 = vadd.f32 %v3721_v34, %v3600_v43  ;;  %12613 = vmatpush3.bf16.xpose.msk.msra.mxu0 %vm14224_vm11, %v12611_v21  ;;  %13172 = vpow2.f32 %v3321_v26  ;;  %v3274_v57 = vmul.f32 %v14522_v17, %v14146_v10  ;;  %v3329_v43 = vmul.f32 1.442695, %v3276_v36 }
 0x910   : > { %v14630_v6 = vadd.f32 %v3904_v48, %v3605_v47  ;;  %v3399_v63 = vpop.permute.xlu1 %3398  ;;  %v3403_v44 = vpop.permute.xlu0 %3402  ;;  %12622 = vmatprep.subr.bf16.mxu0 %v16543_v1  ;;  %13174 = vpow2.f32 %v3323_v54  ;;  %v3279_v34 = vmul.f32 %v14524_v9, %v14113_v61  ;;  %v16548_v47 = vld [vmem:[#allocation45_spill] sm:$0xff]  ;;  %v14662_v39 = vrot.slane %v14636_v58, %v14017_v20 }
 0x911   : > { %v12619_v52 = vpack.c.bf16 %v3725_v3, %v3724_v50  ;;  %v3602_v40 = vmul.f32 %v14598_v2, %v3399_v63  ;;  %v3603_v11 = vmul.f32 %v14598_v2, %v3403_v44  ;;  %v13161_v30 = vpop.eup %13160  ;;  %v14647_v50 = vrot.slane %v3520_v19, %v14140_v59 }
 0x912   : > { %v13163_v5 = vpop.eup %13162  ;;  %v3325_v48 = vmul.f32 1.442695, %v3274_v57  ;;  %v3726_v26 = vrot.slane %v16548_v47, 1  ;;  %13176 = vpow2.f32 %v3329_v43 }
 0x913   : > { %v3816_v38 = vadd.f32 %v3812_v7, %v3602_v40  ;;  %v14642_v51 = vadd.f32 %v3813_v53, %v3603_v11  ;;  %12621 = vmatpush3.bf16.xpose.msk.msra.mxu1 %vm14224_vm11, %v12619_v52  ;;  %v13165_v21 = vpop.eup %13164  ;;  %v3335_v40 = vmul.f32 1.442695, %v3279_v34  ;;  %v3278_v11 = vmul.f32 %v14532_v13, %v14146_v10 }
 0x914   : > { %v3418_v32 = vpop.permute.xlu1 %3417  ;;  %v3422_v56 = vpop.permute.xlu0 %3421  ;;  %12630 = vmatprep.subr.bf16.mxu1 %v16543_v1  ;;  %v3814_v16 = vmul.f32 %v13165_v21, %v3725_v3  ;;  %v14679_v3 = vrot.slane %v14647_v50, %v14017_v20  ;;  %v3283_v53 = vmul.f32 %v14534_v15, %v14113_v61 }
 0x915   : > { %v12623_v28 = vpack.c.bf16 %v3816_v38, %v14615_v18  ;;  %v3606_v62 = vmul.f32 %v14611_v35, %v3418_v32  ;;  %v3905_v45 = vmul.f32 %v13161_v30, %v3816_v38  ;;  %v3607_v8 = vmul.f32 %v14611_v35, %v3422_v56  ;;  %v13167_v25 = vpop.eup %13166 }
 0x916   : > { %v3906_v17 = vmul.f32 %v13163_v5, %v14642_v51  ;;  %11955 = vmatmul.mubr.msk.f32.vlgmr.msra.gmra.mrb[24].mxu0 %vm1180_vm2, %v16548_v47  ;;  %v3331_v18 = vmul.f32 1.442695, %v3277_v22  ;;  %v3997_v52 = vmul.f32 %v13167_v25, %v14630_v6  ;;  %v13169_v13 = vpop.eup %13168  ;;  %v3333_v5 = vmul.f32 1.442695, %v3278_v11 }
 0x917   : > { %v3909_v23 = vadd.f32 %v3905_v45, %v3606_v62  ;;  %12625 = vmatpush3.bf16.xpose.msk.msra.mxu0 %vm14224_vm11, %v12623_v28  ;;  %11976 = vmatprep.mubr.msk.f32.mxu0 %vm13660_vm1, %v16544_v4  ;;  %v3281_v28 = vmul.f32 %v14540_v49, %v14131_v41  ;;  %v3343_v62 = vmul.f32 1.442695, %v3283_v53 }
 0x918   : > { %v3910_v9 = vadd.f32 %v3906_v17, %v3607_v8  ;;  %v3407_v55 = vpop.permute.xlu1 %3406  ;;  %v3433_v19 = vpop.permute.xlu0 %3432  ;;  %12626 = vmatprep.subr.bf16.mxu0 %v16543_v1  ;;  %13178 = vpow2.f32 %v3331_v18 }
 0x919   : > { %v12631_v63 = vpack.c.bf16 %v3909_v23, %v14630_v6  ;;  %v3604_v7 = vmul.f32 %v14598_v2, %v3407_v55  ;;  %v3609_v44 = vmul.f32 %v14662_v39, %v3433_v19  ;;  %13180 = vpow2.f32 %v3325_v48  ;;  %v13171_v38 = vpop.eup %13170 }
 0x91a   : > { %11966 = vmatmul.mubr.msk.f32.vlgmr.msra.gmra.mrb[22].mxu1 %vm1180_vm2, %v3726_v26  ;;  %v3280_v6 = vmul.f32 %v14538_v14, %v14121_v12  ;;  %v13173_v56 = vpop.eup %13172  ;;  %13182 = vpow2.f32 %v3335_v40  ;;  %v3550_v48 = vcombine.high %v14636_v58, %v14636_v58  ;;  %v3339_v55 = vmul.f32 1.442695, %v3281_v28 }
 0x91b   : > { %v3818_v2 = vadd.f32 %v3814_v16, %v3604_v7  ;;  %v14683_v54 = vadd.f32 %v3997_v52, %v3609_v44  ;;  %12633 = vmatpush3.bf16.xpose.msk.msra.mxu1 %vm14224_vm11, %v12631_v63  ;;  %11987 = vmatprep.mubr.msk.f32.mxu1 %vm13660_vm1, %v16544_v4  ;;  %v13175_v8 = vpop.eup %13174  ;;  %v3998_v43 = vmul.f32 %v13173_v56, %v3909_v23  ;;  %13184 = vpow2.f32 %v3333_v5 }
 0x91c   : > { %v3426_v36 = vpop.permute.xlu1 %3425  ;;  %v3452_v22 = vpop.permute.xlu0 %3451  ;;  %12634 = vmatprep.subr.bf16.mxu1 %v16543_v1  ;;  %v3999_v25 = vmul.f32 %v13175_v8, %v3910_v9  ;;  %v3284_v16 = vmul.f32 %v14549_v46, %v14121_v12  ;;  %13186 = vpow2.f32 %v3343_v62  ;;  %v3285_v23 = vmul.f32 %v14551_v24, %v14131_v41 }
 0x91d   : > { %v12627_v15 = vpack.c.bf16 %v3818_v2, %v14642_v51  ;;  %v3608_v30 = vmul.f32 %v14611_v35, %v3426_v36  ;;  %v3907_v57 = vmul.f32 %v13169_v13, %v3818_v2  ;;  %v3613_v32 = vmul.f32 %v14679_v3, %v3452_v22  ;;  %v13177_v63 = vpop.eup %13176 }
 0x91e   : > { %v4090_v14 = vmul.f32 %v13171_v38, %v14683_v54  ;;  %v3337_v51 = vmul.f32 1.442695, %v3280_v6  ;;  %v3819_v58 = vrot.slane %v16548_v47, 2  ;;  %v3345_v53 = vmul.f32 1.442695, %v3284_v16 }
 0x91f   : > { %v3911_v45 = vadd.f32 %v3907_v57, %v3608_v30  ;;  %12629 = vmatpush3.bf16.xpose.msk.msra.mxu0 %vm14224_vm11, %v12627_v15  ;;  %v3282_v2 = vmul.f32 %v14561_v42, %v14146_v10  ;;  %v3552_v6 = vcombine.high %v14647_v50, %v14647_v50  ;;  %v3347_v36 = vmul.f32 1.442695, %v3285_v23 }
 0x920   : > { %v4094_v21 = vadd.f32 %v4090_v14, %v3613_v32  ;;  %v3437_v35 = vpop.permute.xlu1 %3436  ;;  %v3441_v34 = vpop.permute.xlu0 %3440  ;;  %12638 = vmatprep.subr.bf16.mxu0 %v16543_v1  ;;  %13188 = vpow2.f32 %v3337_v51  ;;  %v3912_v32 = vrot.slane %v16548_v47, 3  ;;  %v3286_v62 = vmul.f32 %v14574_v60, %v14146_v10 }
 0x921   : > { %v12635_v17 = vpack.c.bf16 %v3911_v45, %v3910_v9  ;;  %v3610_v18 = vmul.f32 %v14662_v39, %v3437_v35  ;;  %v3611_v49 = vmul.f32 %v14662_v39, %v3441_v34  ;;  %13190 = vpow2.f32 %v3339_v55 }
 0x922   : > { %v13179_v44 = vpop.eup %13178  ;;  %13192 = vpow2.f32 %v3345_v53  ;;  %v3341_v14 = vmul.f32 1.442695, %v3282_v2  ;;  %v3584_v51 = vrot.slane %v3552_v6, %v14017_v20 }
 0x923   : > { %v4002_v19 = vadd.f32 %v3998_v43, %v3610_v18  ;;  %v4003_v26 = vadd.f32 %v3999_v25, %v3611_v49  ;;  %12637 = vmatpush3.bf16.xpose.msk.msra.mxu1 %vm14224_vm11, %v12635_v17  ;;  %v13181_v11 = vpop.eup %13180  ;;  %13194 = vpow2.f32 %v3347_v36  ;;  %v3349_v25 = vmul.f32 1.442695, %v3286_v62 }
 0x924   : > { %v3456_v9 = vpop.permute.xlu1 %3455  ;;  %v3460_v7 = vpop.permute.xlu0 %3459  ;;  %12646 = vmatprep.subr.bf16.mxu1 %v16543_v1  ;;  %v4000_v30 = vmul.f32 %v13181_v11, %v3911_v45  ;;  %13196 = vpow2.f32 %v3341_v14  ;;  %v4005_v11 = vrot.slane %v16548_v47, 4 }
 0x925   : > { %v12639_v46 = vpack.c.bf16 %v4002_v19, %v14683_v54  ;;  %v3614_v52 = vmul.f32 %v14679_v3, %v3456_v9  ;;  %v4091_v40 = vmul.f32 %v13177_v63, %v4002_v19  ;;  %v3615_v24 = vmul.f32 %v14679_v3, %v3460_v7  ;;  %v13183_v38 = vpop.eup %13182 }
 0x926   : > { %v4092_v13 = vmul.f32 %v13179_v44, %v4003_v26  ;;  %11977 = vmatmul.mubr.msk.f32.vlgmr.msra.gmra.mrb[26].mxu0 %vm1180_vm2, %v3819_v58  ;;  %v14724_v54 = vrot.slane %v3550_v48, %v14017_v20  ;;  %v4183_v28 = vmul.f32 %v13183_v38, %v4094_v21  ;;  %13198 = vpow2.f32 %v3349_v25 }
 0x927   : > { %v4095_v22 = vadd.f32 %v4091_v40, %v3614_v52  ;;  %12641 = vmatpush3.bf16.xpose.msk.msra.mxu0 %vm14224_vm11, %v12639_v46  ;;  %11998 = vmatprep.mubr.msk.f32.mxu0 %vm13660_vm1, %v16544_v4 }
 0x928   : > { %v4096_v15 = vadd.f32 %v4092_v13, %v3615_v24  ;;  %v3445_v42 = vpop.permute.xlu1 %3444  ;;  %v3471_v57 = vpop.permute.xlu0 %3470  ;;  %12642 = vmatprep.subr.bf16.mxu0 %v16543_v1 }
 0x929   : > { %v12647_v50 = vpack.c.bf16 %v4095_v22, %v4094_v21  ;;  %v3612_v56 = vmul.f32 %v14662_v39, %v3445_v42  ;;  %v3617_v5 = vmul.f32 %v14724_v54, %v3471_v57  ;;  %v13185_v39 = vpop.eup %13184  ;;  %v4098_v57 = vrot.slane %v16548_v47, 5 }
 0x92a   : > { %11988 = vmatmul.mubr.msk.f32.vlgmr.msra.gmra.mrb[24].mxu1 %vm1180_vm2, %v3912_v32  ;;  %v13187_v43 = vpop.eup %13186 }
 0x92b   : > { %v4004_v45 = vadd.f32 %v4000_v30, %v3612_v56  ;;  %v4187_v8 = vadd.f32 %v4183_v28, %v3617_v5  ;;  %12649 = vmatpush3.bf16.xpose.msk.msra.mxu1 %vm14224_vm11, %v12647_v50  ;;  %12009 = vmatprep.mubr.msk.f32.mxu1 %vm13660_vm1, %v16544_v4  ;;  %v13189_v49 = vpop.eup %13188 }
 0x92c   : > { %v3464_v21 = vpop.permute.xlu1 %3463  ;;  %v3490_v35 = vpop.permute.xlu0 %3489  ;;  %12650 = vmatprep.subr.bf16.mxu1 %v16543_v1  ;;  %v4184_v63 = vmul.f32 %v13189_v49, %v4095_v22 }
 0x92d   : > { %v12643_v60 = vpack.c.bf16 %v4004_v45, %v4003_v26  ;;  %v3616_v34 = vmul.f32 %v14679_v3, %v3464_v21  ;;  %v4093_v17 = vmul.f32 %v13185_v39, %v4004_v45  ;;  %v3621_v18 = vmul.f32 %v3584_v51, %v3490_v35  ;;  %v13191_v16 = vpop.eup %13190  ;;  %v13028_v35 = vld [vmem:[%s16549_s13] sm:$0xff]  }
 0x92e   : > { %v4276_v48 = vmul.f32 %v13187_v43, %v4187_v8  ;;  %v4185_v58 = vmul.f32 %v13191_v16, %v4096_v15  ;;  %v13193_v52 = vpop.eup %13192  ;;  %v4191_v21 = vrot.slane %v16548_v47, 6  ;;  %v13029_v43 = vld [vmem:[%s16549_s13 + $0x8] sm:$0xff]  }
 0x92f   : > { %v4097_v55 = vadd.f32 %v4093_v17, %v3616_v34  ;;  %12645 = vmatpush3.bf16.xpose.msk.msra.mxu0 %vm14224_vm11, %v12643_v60  ;;  %v13195_v53 = vpop.eup %13194  ;;  %v16550_v60 = vld [vmem:[#allocation41_spill] sm:$0xff] }
 0x930   : > { %v4280_v23 = vadd.f32 %v4276_v48, %v3621_v18  ;;  %v3475_v19 = vpop.permute.xlu1 %3474  ;;  %v3479_v9 = vpop.permute.xlu0 %3478  ;;  %12654 = vmatprep.subr.bf16.mxu0 %v16543_v1 }
 0x931   : > { %v12651_v26 = vpack.c.bf16 %v4097_v55, %v4096_v15  ;;  %v3618_v3 = vmul.f32 %v14724_v54, %v3475_v19  ;;  %v3619_v7 = vmul.f32 %v14724_v54, %v3479_v9  ;;  %v13197_v15 = vpop.eup %13196 }
 0x932   : > { %v4186_v56 = vmul.f32 %v13197_v15, %v4097_v55  ;;  %v13199_v28 = vpop.eup %13198  ;;  %v13031_v15 = vld [vmem:[%s16551_s17] sm:$0xff]  }
 0x933   : > { %v4188_v44 = vadd.f32 %v4184_v63, %v3618_v3  ;;  %v4189_v46 = vadd.f32 %v4185_v58, %v3619_v7  ;;  %12653 = vmatpush3.bf16.xpose.msk.msra.mxu1 %vm14224_vm11, %v12651_v26 }
 0x934   : > { %v3494_v40 = vpop.permute.xlu1 %3493  ;;  %v3498_v24 = vpop.permute.xlu0 %3497  ;;  %12662 = vmatprep.subr.bf16.mxu1 %v16543_v1 }
 0x935   : > { %v12655_v2 = vpack.c.bf16 %v4188_v44, %v4187_v8  ;;  %v3622_v13 = vmul.f32 %v3584_v51, %v3494_v40  ;;  %v4277_v6 = vmul.f32 %v13193_v52, %v4188_v44  ;;  %v3623_v36 = vmul.f32 %v3584_v51, %v3498_v24 }
 0x936   : > { %v4278_v22 = vmul.f32 %v13195_v53, %v4189_v46  ;;  %11999 = vmatmul.mubr.msk.f32.vlgmr.msra.gmra.mrb[28].mxu0 %vm1180_vm2, %v4005_v11 }
 0x937   : > { %v4281_v38 = vadd.f32 %v4277_v6, %v3622_v13  ;;  %12657 = vmatpush3.bf16.xpose.msk.msra.mxu0 %vm14224_vm11, %v12655_v2  ;;  %12020 = vmatprep.mubr.msk.f32.mxu0 %vm13660_vm1, %v16544_v4 }
 0x938   : > { %v4282_v42 = vadd.f32 %v4278_v22, %v3623_v36  ;;  %v3483_v30 = vpop.permute.xlu1 %3482  ;;  %12658 = vmatprep.subr.bf16.mxu0 %v16543_v1 }
 0x939   : > { %v12663_v32 = vpack.c.bf16 %v4281_v38, %v4280_v23  ;;  %v3620_v50 = vmul.f32 %v14724_v54, %v3483_v30 }
 0x93a   : > { %12010 = vmatmul.mubr.msk.f32.vlgmr.msra.gmra.mrb[26].mxu1 %vm1180_vm2, %v4098_v57 }
 0x93b   : > { %v4190_v5 = vadd.f32 %v4186_v56, %v3620_v50  ;;  %12665 = vmatpush3.bf16.xpose.msk.msra.mxu1 %vm14224_vm11, %v12663_v32  ;;  %12031 = vmatprep.mubr.msk.f32.mxu1 %vm13660_vm1, %v16544_v4 }
 0x93c   : > { %v3502_v14 = vpop.permute.xlu1 %3501  ;;  %12666 = vmatprep.subr.bf16.mxu1 %v16543_v1 }
 0x93d   : > { %v12659_v62 = vpack.c.bf16 %v4190_v5, %v4189_v46  ;;  %v3624_v45 = vmul.f32 %v3584_v51, %v3502_v14  ;;  %v4279_v8 = vmul.f32 %v13199_v28, %v4190_v5  ;;  %v4284_v51 = vrot.slane %v16548_v47, 7 }
 0x93f   : > { %v4283_v54 = vadd.f32 %v4279_v8, %v3624_v45  ;;  %12661 = vmatpush3.bf16.xpose.msk.msra.mxu0 %vm14224_vm11, %v12659_v62 }
 0x940   : > { %12670 = vmatprep.subr.bf16.mxu0 %v16543_v1 }
 0x941   : > { %v12667_v39 = vpack.c.bf16 %v4283_v54, %v4282_v42  ;;  %v13033_v42 = vld [vmem:[%s16551_s17 + $0x8] sm:$0xff]  }
 0x943   : > { %12669 = vmatpush3.bf16.xpose.msk.msra.mxu1 %vm14224_vm11, %v12667_v39 }
 0x944   : > { %12041 = vmatprep.subr.bf16.mxu1 %v16544_v4 }
 0x946   : > { %12021 = vmatmul.mubr.msk.f32.vlgmr.msra.gmra.mrb[30].mxu0 %vm1180_vm2, %v4191_v21 }
 0x947   : > { %12038 = vmatprep.mubr.msk.f32.mxu0 %vm13660_vm1, %v16544_v4 }
 0x94a   : > { %12032 = vmatmul.mubr.msk.f32.vlgmr.msra.gmra.mrb[28].mxu1 %vm1180_vm2, %v4284_v51 }
 0x94b   : > { %12042 = vmatpush3.bf16.msra.mxu1 %v13028_v35  ;;  %12045 = vmatprep.mubr.msk.bf16.mxu1 %vm13660_vm1, %v16544_v4 }
 0x94c   : > { %12043 = vmatprep.subr.bf16.mxu1 %v16544_v4 }
 0x94f   : > { %12044 = vmatpush3.bf16.msra.mxu1 %v13029_v43 }
 0x950   : > { %12057 = vmatprep.subr.bf16.mxu1 %v16544_v4 }
 0x952   : > { %12046 = vmatmul.mubr.msk.bf16.vlgmr.msra.gmra.mrb[32].mxu1 %vm1180_vm2, %v16550_v60 }
 0x953   : > { %12061 = vmatprep.mubr.msk.bf16.mxu1 %vm13660_vm1, %v16544_v4  ;;  %12058 = vmatpush3.bf16.msra.mxu1 %v13031_v15  ;;  %v13526_v15 = vld [vmem:[%s16497_s6] sm:$0xff] }
 0x954   : > { %12059 = vmatprep.subr.bf16.mxu1 %v16544_v4 }
 0x957   : > { %12060 = vmatpush3.bf16.msra.mxu1 %v13033_v42 }
 0x958   : > { %12673 = vmatprep.subr.bf16.mxu1 %v16543_v1 }
 0x96a   : > { %v2448_v34 = vpop.f32.mrb[16].mxu0 }
 0x96b   : > { %v11868_v47 = vpop.f32.mrb[17].mxu0 }
 0x96e   : > { %v2541_v17 = vpop.f32.mrb[2].mxu1 }
 0x96f   : > { %v4370_v18 = vrot.slane %v2541_v17, 7  ;;  %v11879_v49 = vpop.f32.mrb[3].mxu1 }
 0x971   : > { %v4412_v25 = vsel %vm4411_vm12, %v2448_v34, %v4370_v18 }
 0x97a   : > { %v2634_v48 = vpop.f32.mrb[18].mxu0 }
 0x97b   : > { %v4373_v55 = vrot.slane %v2634_v48, 6  ;;  %v11890_v16 = vpop.f32.mrb[19].mxu0 }
 0x97d   : > { %v4414_v23 = vsel %vm4413_vm13, %v4412_v25, %v4373_v55  ;;  %v11269_v55 = vld [vmem:[%s16552_s21] ss:$0 sm:$0xff] }
 0x97e   : > { %v2727_v19 = vpop.f32.mrb[16].mxu1 }
 0x97f   : > { %v4376_v63 = vrot.slane %v2727_v19, 5  ;;  %v11901_v9 = vpop.f32.mrb[17].mxu1 }
 0x980   : > { %v16555_v9 = vld [vmem:[#allocation42_spill] sm:$0xff] }
 0x981   : > { %v4416_v26 = vsel %vm4415_vm14, %v4414_v23, %v4376_v63 }
 0x98a   : > { %v2820_v3 = vpop.f32.mrb[20].mxu0 }
 0x98b   : > { %v4379_v7 = vrot.slane %v2820_v3, 4  ;;  %v11912_v58 = vpop.f32.mrb[21].mxu0  ;;  %v16556_v3 = vld [vmem:[#allocation43_spill] sm:$0xff] }
 0x98d   : > { %v4418_v44 = vsel %vm4417_vm15, %v4416_v26, %v4379_v7  ;;  %v4438_v26 = vmul.f32 %v11269_v55, %v16555_v9  ;;  %v4439_v7 = vmul.f32 %v11269_v55, %v16556_v3  ;;  %v13035_v9 = vld [vmem:[%s16557_s11 + $0x8] sm:$0xff]  }
 0x98e   : > { %v2913_v46 = vpop.f32.mrb[18].mxu1 }
 0x98f   : > { %v4382_v52 = vrot.slane %v2913_v46, 3  ;;  %v11923_v40 = vpop.f32.mrb[19].mxu1 }
 0x990   : > { %v11272_v40 = vld [vmem:[%s16553_s25] ss:$0 sm:$0xff] }
 0x991   : > { %v4420_v24 = vsel %vm4419_vm3, %v4418_v44, %v4382_v52 }
 0x9a1   : > { %v3006_v11 = vpop.f32.mrb[22].mxu0 }
 0x9a2   : > { %v4385_v53 = vrot.slane %v3006_v11, 2  ;;  %v11934_v2 = vpop.f32.mrb[23].mxu0  ;;  %v13030_v11 = vld [vmem:[%s16554_s29] sm:$0xff]  }
 0x9a4   : > { %v4422_v13 = vsel %vm4421_vm4, %v4420_v24, %v4385_v53 }
 0x9a9   : > { %v3099_v6 = vpop.f32.mrb[20].mxu1 }
 0x9aa   : > { %v4388_v36 = vrot.slane %v3099_v6, 1  ;;  %v11945_v22 = vpop.f32.mrb[21].mxu1 }
 0x9ac   : > { %v4424_v38 = vsel %vm4423_vm5, %v4422_v13, %v4388_v36 }
 0x9ad   : > { %v4440_v44 = vadd.f32 %v4438_v26, %v4424_v38  ;;  %v13032_v38 = vld [vmem:[%s16554_s29 + $0x8] sm:$0xff]  }
 0x9e9   : > { %v3714_v30 = vpop.f32.mrb[24].mxu0 }
 0x9ea   : > { %v11956_v57 = vpop.f32.mrb[25].mxu0 }
 0x9ed   : > { %v3807_v32 = vpop.f32.mrb[22].mxu1 }
 0x9ee   : > { %v4391_v50 = vrot.slane %v3807_v32, 7  ;;  %v11967_v56 = vpop.f32.mrb[23].mxu1 }
 0x9f0   : > { %v4425_v5 = vsel %vm4411_vm12, %v3714_v30, %v4391_v50 }
 0x9f9   : > { %v3900_v28 = vpop.f32.mrb[26].mxu0 }
 0x9fa   : > { %v4394_v14 = vrot.slane %v3900_v28, 6  ;;  %v11978_v62 = vpop.f32.mrb[27].mxu0 }
 0x9fc   : > { %v4426_v45 = vsel %vm4413_vm13, %v4425_v5, %v4394_v14 }
 0x9fd   : > { %v3993_v8 = vpop.f32.mrb[24].mxu1 }
 0x9fe   : > { %v4397_v54 = vrot.slane %v3993_v8, 5  ;;  %v11989_v39 = vpop.f32.mrb[25].mxu1 }
 0xa00   : > { %v4427_v21 = vsel %vm4415_vm14, %v4426_v45, %v4397_v54 }
 0xa09   : > { %v4086_v35 = vpop.f32.mrb[28].mxu0 }
 0xa0a   : > { %v4400_v51 = vrot.slane %v4086_v35, 4  ;;  %v12000_v43 = vpop.f32.mrb[29].mxu0 }
 0xa0c   : > { %v4428_v60 = vsel %vm4417_vm15, %v4427_v21, %v4400_v51 }
 0xa0d   : > { %v4179_v34 = vpop.f32.mrb[26].mxu1 }
 0xa0e   : > { %v4403_v47 = vrot.slane %v4179_v34, 3  ;;  %v12011_v17 = vpop.f32.mrb[27].mxu1 }
 0xa10   : > { %v4429_v18 = vsel %vm4419_vm3, %v4428_v60, %v4403_v47 }
 0xa19   : > { %v4272_v49 = vpop.f32.mrb[30].mxu0 }
 0xa1a   : > { %v4406_v25 = vrot.slane %v4272_v49, 2  ;;  %v12022_v48 = vpop.f32.mrb[31].mxu0 }
 0xa1c   : > { %v4430_v16 = vsel %vm4421_vm4, %v4429_v18, %v4406_v25 }
 0xa1d   : > { %v4365_v23 = vpop.f32.mrb[28].mxu1 }
 0xa1e   : > { %v4409_v19 = vrot.slane %v4365_v23, 1  ;;  %v12033_v63 = vpop.f32.mrb[29].mxu1 }
 0xa20   : > { %v4431_v58 = vsel %vm4423_vm5, %v4430_v16, %v4409_v19  ;;  %v13034_v19 = vld [vmem:[%s16557_s11] sm:$0xff]  }
 0xa21   : > { %v4441_v46 = vadd.f32 %v4439_v7, %v4431_v58  ;;  %v11276_v7 = vld [vmem:[%s16560_s26] ss:$0 sm:$0xff]  ;;  %s16577_s26 = sld [smem:[#allocation29_spill]] }
 0xa23   : > { %v12671_v52 = vpack.c.bf16 %v4441_v46, %v4440_v44 }
 0xa25   : > { %12672 = vmatpush3.bf16.msra.mxu0 %v12671_v52  ;;  %v4582_v24 = vpop.f32.mrb[32].mxu1 }
 0xa26   : > { %v4583_v53 = vadd.f32 %v11272_v40, %v4582_v24  ;;  %v12047_v2 = vpop.f32.mrb[33].mxu1  ;;  %12049 = vmatprep.subr.bf16.mxu0 %v16544_v4 }
 0xa27   : > { %v4585_v13 = vpop.f32.mrb[34].mxu1  ;;  %s16578_s16 = smov %s16577_s26 }
 0xa28   : > { %v4595_v6 = vand.u32 2147483647, %v4583_v53  ;;  %v4586_v36 = vadd.f32 %v11272_v40, %v4585_v13  ;;  %v12048_v22 = vpop.f32.mrb[35].mxu1  ;;  %12039 = vmatmul.mubr.msk.f32.vlgmr.msra.gmra.mrb[32].mxu0 %vm1074_vm0, %v13526_v15  ;;  %v4589_v34 = vmax.f32 %v4583_v53, 0.0  ;;  %vm4591_vm8 = vcmp.ne.f32.partialorder %v4583_v53, %v4583_v53 }
 0xa29   : > { %12050 = vmatpush3.bf16.msra.mxu0 %v13030_v11  ;;  %12053 = vmatprep.mubr.msk.bf16.mxu0 %vm13660_vm1, %v16544_v4 }
 0xa2a   : > { %v4597_v42 = vsub.f32 0.0, %v4595_v6  ;;  %v4596_v30 = vand.u32 2147483647, %v4586_v36  ;;  %12051 = vmatprep.subr.bf16.mxu0 %v16544_v4  ;;  %v4590_v25 = vmax.f32 %v4586_v36, 0.0  ;;  %vm4592_vm9 = vcmp.ne.f32.partialorder %v4586_v36, %v4586_v36 }
 0xa2c   : > { %v4599_v57 = vmul.f32 1.442695, %v4597_v42  ;;  %v4598_v32 = vsub.f32 0.0, %v4596_v30 }
 0xa2d   : > { %12052 = vmatpush3.bf16.msra.mxu0 %v13032_v38 }
 0xa2e   : > { %13200 = vpow2.f32 %v4599_v57  ;;  %v4601_v50 = vmul.f32 1.442695, %v4598_v32  ;;  %12065 = vmatprep.subr.bf16.mxu0 %v16544_v4 }
 0xa30   : > { %13202 = vpow2.f32 %v4601_v50 }
 0xa38   : > { %v13201_v56 = vpop.eup %13200 }
 0xa39   : > { %v4603_v5 = vadd.f32 1.0, %v13201_v56  ;;  %v4606_v62 = vmul.f32 -0.5, %v13201_v56  ;;  %v4609_v54 = vand.u32 2147483647, %v13201_v56 }
 0xa3a   : > { %v13203_v28 = vpop.eup %13202 }
 0xa3b   : > { %13204 = vlog2.f32 %v4603_v5  ;;  %v4612_v14 = vadd.f32 1.0, %v13203_v28  ;;  %v4615_v45 = vmul.f32 -0.5, %v13203_v28  ;;  %v4607_v8 = vadd.f32 1.0, %v4606_v62 }
 0xa3c   : > { %v4618_v35 = vand.u32 2147483647, %v13203_v28  ;;  %vm4610_vm6 = vcmp.lt.f32.partialorder %v4609_v54, 0.0004427343 }
 0xa3d   : > { %13206 = vlog2.f32 %v4612_v14  ;;  %v4616_v39 = vadd.f32 1.0, %v4615_v45  ;;  %v4608_v43 = vmul.f32 %v13201_v56, %v4607_v8 }
 0xa3e   : > { %vm4619_vm7 = vcmp.lt.f32.partialorder %v4618_v35, 0.0004427343 }
 0xa3f   : > { %v4617_v18 = vmul.f32 %v13203_v28, %v4616_v39 }
 0xa45   : > { %v13205_v21 = vpop.eup %13204 }
 0xa46   : > { %v4605_v51 = vmul.f32 0.6931472, %v13205_v21 }
 0xa47   : > { %v13207_v60 = vpop.eup %13206 }
 0xa48   : > { %v4611_v47 = vsel %vm4610_vm6, %v4608_v43, %v4605_v51  ;;  %v4614_v17 = vmul.f32 0.6931472, %v13207_v60 }
 0xa49   : > { %v4621_v49 = vadd.f32 %v4611_v47, %v4589_v34 }
 0xa4a   : > { %v4620_v48 = vsel %vm4619_vm7, %v4617_v18, %v4614_v17 }
 0xa4b   : > { %v4622_v55 = vadd.f32 %v4620_v48, %v4590_v25  ;;  %v14818_v16 = vsel %vm4591_vm8, %v4583_v53, %v4621_v49 }
 0xa4c   : > { %16558 = vst [vmem:[#allocation58_spill] sm:$0xff] %v14818_v16 }
 0xa4d   : > { %v14820_v23 = vsel %vm4592_vm9, %v4586_v36, %v4622_v55 }
 0xa4e   : > { %16559 = vst [vmem:[#allocation44_spill] sm:$0xff] %v14820_v23  ;;  %v4625_v63 = vpack.c.bf16 %v14820_v23, %v14818_v16 }
 0xa50   : > { %12054 = vmatmul.mubr.msk.bf16.vlgmr.msra.gmra.mrb[36].mxu0 %vm1180_vm2, %v4625_v63  ;;  %12062 = vmatmul.mubr.msk.bf16.vlgmr.msra.gmra.mrb[36].mxu1 %vm1180_vm2, %v4625_v63 }
 0xa51   : > { %12066 = vmatpush3.bf16.msra.mxu0 %v13034_v19  ;;  %12069 = vmatprep.mubr.msk.bf16.mxu0 %vm13660_vm1, %v16544_v4 }
 0xa52   : > { %12067 = vmatprep.subr.bf16.mxu0 %v16544_v4  ;;  %12081 = vmatprep.mubr.msk.f32.mxu1 %vm13660_vm1, %v16544_v4 }
 0xa55   : > { %12068 = vmatpush3.bf16.msra.mxu0 %v13035_v9 }
 0xa56   : > { %12681 = vmatprep.subr.bf16.mxu0 %v16543_v1 }
 0xa58   : > { %12070 = vmatmul.mubr.msk.bf16.vlgmr.msra.gmra.mrb[40].mxu0 %vm1180_vm2, %v4625_v63 }
 0xa59   : > { %12092 = vmatprep.mubr.msk.f32.mxu0 %vm13660_vm1, %v16544_v4 }
 0xafb   : > { %v14837_v26 = vpop.f32.mrb[32].mxu0 }
 0xafc   : > { %16562 = vst [vmem:[#allocation45_spill] sm:$0xff] %v14837_v26  ;;  %v12040_v3 = vpop.f32.mrb[33].mxu0  ;;  %v1244_v26 = vld [vmem:[%s16578_s16] sm:$0xff] }
 0xb23   : > { %v4686_v58 = vpop.f32.mrb[36].mxu0  ;;  %v14840_v44 = vpop.f32.mrb[36].mxu1 }
 0xb24   : > { %v4687_v46 = vadd.f32 %v11276_v7, %v4686_v58  ;;  %v12055_v52 = vpop.f32.mrb[37].mxu0  ;;  %v12063_v40 = vpop.f32.mrb[37].mxu1 }
 0xb25   : > { %v4689_v24 = vpop.f32.mrb[38].mxu0  ;;  %v14842_v11 = vpop.f32.mrb[38].mxu1 }
 0xb26   : > { %v4699_v53 = vand.u32 2147483647, %v4687_v46  ;;  %v12056_v2 = vpop.f32.mrb[39].mxu0  ;;  %v12064_v13 = vpop.f32.mrb[39].mxu1  ;;  %v4690_v57 = vadd.f32 %v11276_v7, %v4689_v24  ;;  %v4693_v39 = vmax.f32 %v4687_v46, 0.0  ;;  %vm4695_vm6 = vcmp.ne.f32.partialorder %v4687_v46, %v4687_v46 }
 0xb28   : > { %v4701_v6 = vsub.f32 0.0, %v4699_v53  ;;  %v4700_v50 = vand.u32 2147483647, %v4690_v57  ;;  %v4694_v3 = vmax.f32 %v4690_v57, 0.0  ;;  %vm4696_vm8 = vcmp.ne.f32.partialorder %v4690_v57, %v4690_v57 }
 0xb2a   : > { %v4703_v36 = vmul.f32 1.442695, %v4701_v6  ;;  %v4702_v5 = vsub.f32 0.0, %v4700_v50 }
 0xb2b   : > { %v14844_v22 = vpop.f32.mrb[40].mxu0 }
 0xb2c   : > { %16563 = vst [vmem:[#allocation41_spill] sm:$0xff] %v14844_v22  ;;  %13208 = vpow2.f32 %v4703_v36  ;;  %v12071_v15 = vpop.f32.mrb[41].mxu0  ;;  %v4705_v62 = vmul.f32 1.442695, %v4702_v5 }
 0xb2d   : > { %v14846_v38 = vpop.f32.mrb[42].mxu0  ;;  %v16565_v15 = vld [vmem:[#allocation46_spill] sm:$0xff] }
 0xb2e   : > { %v12072_v42 = vpop.f32.mrb[43].mxu0 }
 0xb36   : > { %v13209_v30 = vpop.eup %13208 }
 0xb37   : > { %v4707_v32 = vadd.f32 1.0, %v13209_v30  ;;  %v4710_v56 = vmul.f32 -0.5, %v13209_v30  ;;  %v4713_v14 = vand.u32 2147483647, %v13209_v30 }
 0xb39   : > { %13210 = vlog2.f32 %v4707_v32  ;;  %v4711_v28 = vadd.f32 1.0, %v4710_v56  ;;  %vm4714_vm10 = vcmp.lt.f32.partialorder %v4713_v14, 0.0004427343 }
 0xb3a   : > { %13212 = vpow2.f32 %v4705_v62 }
 0xb3b   : > { %v4712_v54 = vmul.f32 %v13209_v30, %v4711_v28 }
 0xb43   : > { %v13211_v45 = vpop.eup %13210 }
 0xb44   : > { %v4709_v8 = vmul.f32 0.6931472, %v13211_v45  ;;  %v13213_v34 = vpop.eup %13212 }
 0xb45   : > { %v4716_v47 = vadd.f32 1.0, %v13213_v34  ;;  %v4719_v18 = vmul.f32 -0.5, %v13213_v34  ;;  %v4722_v55 = vand.u32 2147483647, %v13213_v34 }
 0xb46   : > { %v4715_v21 = vsel %vm4714_vm10, %v4712_v54, %v4709_v8 }
 0xb47   : > { %v4725_v35 = vadd.f32 %v4715_v21, %v4693_v39  ;;  %13214 = vlog2.f32 %v4716_v47  ;;  %v4720_v48 = vadd.f32 1.0, %v4719_v18  ;;  %vm4723_vm7 = vcmp.lt.f32.partialorder %v4722_v55, 0.0004427343 }
 0xb49   : > { %v14848_v51 = vsel %vm4695_vm6, %v4687_v46, %v4725_v35  ;;  %v4721_v63 = vmul.f32 %v13213_v34, %v4720_v48  ;;  %v16564_v46 = vld [vmem:[#allocation47_spill] sm:$0xff] }
 0xb4a   : > { %v6247_v43 = vrot.slane %v14848_v51, %v16546_v0  ;;  %v6228_v60 = vrot.slane %v14848_v51, %v14041_v33  ;;  %v6209_v17 = vrot.slane %v14848_v51, %v14037_v31  ;;  %v6190_v49 = vrot.slane %v14848_v51, %v14033_v29 }
 0xb4b   : > { %v14860_v7 = vrot.slane %v14848_v51, %v14029_v27  ;;  %v14866_v52 = vrot.slane %v14848_v51, %v16564_v46 }
 0xb4c   : > { %6253 = vbcast.lane.b32.xlu1 %v6247_v43, 264  ;;  %6249 = vbcast.lane.b32.xlu0 %v6247_v43, 256 }
 0xb50   : > { %6234 = vbcast.lane.b32.xlu1 %v6228_v60, 264  ;;  %6230 = vbcast.lane.b32.xlu0 %v6228_v60, 256 }
 0xb51   : > { %v13215_v25 = vpop.eup %13214 }
 0xb52   : > { %v4718_v19 = vmul.f32 0.6931472, %v13215_v25 }
 0xb54   : > { %6261 = vbcast.lane.b32.xlu1 %v6247_v43, 280  ;;  %6257 = vbcast.lane.b32.xlu0 %v6247_v43, 272  ;;  %v4724_v9 = vsel %vm4723_vm7, %v4721_v63, %v4718_v19 }
 0xb55   : > { %v4726_v58 = vadd.f32 %v4724_v9, %v4694_v3 }
 0xb57   : > { %v4728_v40 = vsel %vm4696_vm8, %v4690_v57, %v4726_v58  ;;  %v14880_v57 = vmul.f32 %v14848_v51, %v14818_v16 }
 0xb58   : > { %6242 = vbcast.lane.b32.xlu1 %v6228_v60, 280  ;;  %6238 = vbcast.lane.b32.xlu0 %v6228_v60, 272  ;;  %v4981_v24 = vrot.slane %v4728_v40, %v16546_v0  ;;  %v4962_v53 = vrot.slane %v4728_v40, %v14041_v33  ;;  %v4943_v2 = vrot.slane %v4728_v40, %v14037_v31 }
 0xb59   : > { %v4924_v13 = vrot.slane %v4728_v40, %v14033_v29  ;;  %v4905_v6 = vrot.slane %v4728_v40, %v14029_v27  ;;  %v4886_v36 = vrot.slane %v4728_v40, %v16564_v46  ;;  %v4867_v42 = vrot.slane %v4728_v40, %v16565_v15 }
 0xb5a   : > { %v4848_v30 = vrot.slane %v4728_v40, %v14017_v20  ;;  %v6495_v32 = vrot.slane %v14880_v57, %v16546_v0  ;;  %v6476_v50 = vrot.slane %v14880_v57, %v14041_v33  ;;  %v14896_v62 = vrot.slane %v14880_v57, %v14037_v31 }
 0xb5b   : > { %v14901_v45 = vmul.f32 %v4728_v40, %v14820_v23  ;;  %v14909_v39 = vrot.slane %v14880_v57, %v14033_v29 }
 0xb5c   : > { %6215 = vbcast.lane.b32.xlu1 %v6209_v17, 264  ;;  %6211 = vbcast.lane.b32.xlu0 %v6209_v17, 256 }
 0xb5d   : > { %v5229_v43 = vrot.slane %v14901_v45, %v16546_v0  ;;  %v5210_v47 = vrot.slane %v14901_v45, %v14041_v33  ;;  %v5191_v63 = vrot.slane %v14901_v45, %v14037_v31  ;;  %v5172_v58 = vrot.slane %v14901_v45, %v14033_v29 }
 0xb5e   : > { %v5115_v10 = vrot.slane %v14901_v45, %v16565_v15 }
 0xb60   : > { %6196 = vbcast.lane.b32.xlu1 %v6190_v49, 264  ;;  %6192 = vbcast.lane.b32.xlu0 %v6190_v49, 256 }
 0xb64   : > { %6223 = vbcast.lane.b32.xlu1 %v6209_v17, 280  ;;  %6219 = vbcast.lane.b32.xlu0 %v6209_v17, 272  ;;  %v13663_v17 = vmov 0  }
 0xb65   : > { %13014 = vset.pattern.permute.xlu0 %v13663_v17 }
 0xb68   : > { %6204 = vbcast.lane.b32.xlu1 %v6190_v49, 280  ;;  %6200 = vbcast.lane.b32.xlu0 %v6190_v49, 272 }
 0xb6c   : > { %6177 = vbcast.lane.b32.xlu1 %v14860_v7, 264  ;;  %6173 = vbcast.lane.b32.xlu0 %v14860_v7, 256 }
 0xb70   : > { %6158 = vbcast.lane.b32.xlu1 %v14866_v52, 264  ;;  %6154 = vbcast.lane.b32.xlu0 %v14866_v52, 256 }
 0xb74   : > { %4987 = vbcast.lane.b32.xlu1 %v4981_v24, 264  ;;  %4983 = vbcast.lane.b32.xlu0 %v4981_v24, 256 }
 0xb78   : > { %4968 = vbcast.lane.b32.xlu1 %v4962_v53, 264  ;;  %4964 = vbcast.lane.b32.xlu0 %v4962_v53, 256 }
 0xb7c   : > { %4995 = vbcast.lane.b32.xlu1 %v4981_v24, 280  ;;  %4991 = vbcast.lane.b32.xlu0 %v4981_v24, 272 }
 0xb80   : > { %4976 = vbcast.lane.b32.xlu1 %v4962_v53, 280  ;;  %4972 = vbcast.lane.b32.xlu0 %v4962_v53, 272 }
 0xb84   : > { %4949 = vbcast.lane.b32.xlu1 %v4943_v2, 264  ;;  %4945 = vbcast.lane.b32.xlu0 %v4943_v2, 256 }
 0xb88   : > { %4930 = vbcast.lane.b32.xlu1 %v4924_v13, 264  ;;  %4926 = vbcast.lane.b32.xlu0 %v4924_v13, 256 }
 0xb8c   : > { %4957 = vbcast.lane.b32.xlu1 %v4943_v2, 280  ;;  %4953 = vbcast.lane.b32.xlu0 %v4943_v2, 272 }
 0xb90   : > { %4938 = vbcast.lane.b32.xlu1 %v4924_v13, 280  ;;  %4934 = vbcast.lane.b32.xlu0 %v4924_v13, 272 }
 0xb94   : > { %4911 = vbcast.lane.b32.xlu1 %v4905_v6, 264  ;;  %4907 = vbcast.lane.b32.xlu0 %v4905_v6, 256 }
 0xb98   : > { %4892 = vbcast.lane.b32.xlu1 %v4886_v36, 264  ;;  %4888 = vbcast.lane.b32.xlu0 %v4886_v36, 256 }
 0xb9c   : > { %4919 = vbcast.lane.b32.xlu1 %v4905_v6, 280  ;;  %4915 = vbcast.lane.b32.xlu0 %v4905_v6, 272 }
 0xba0   : > { %4900 = vbcast.lane.b32.xlu1 %v4886_v36, 280  ;;  %4896 = vbcast.lane.b32.xlu0 %v4886_v36, 272  ;;  %v5153_v36 = vrot.slane %v14901_v45, %v14029_v27 }
 0xba4   : > { %4873 = vbcast.lane.b32.xlu1 %v4867_v42, 264  ;;  %4869 = vbcast.lane.b32.xlu0 %v4867_v42, 256 }
 0xba8   : > { %4854 = vbcast.lane.b32.xlu1 %v4848_v30, 264  ;;  %4850 = vbcast.lane.b32.xlu0 %v4848_v30, 256 }
 0xbac   : > { %4881 = vbcast.lane.b32.xlu1 %v4867_v42, 280  ;;  %4877 = vbcast.lane.b32.xlu0 %v4867_v42, 272 }
 0xbb0   : > { %4862 = vbcast.lane.b32.xlu1 %v4848_v30, 280  ;;  %4858 = vbcast.lane.b32.xlu0 %v4848_v30, 272 }
 0xbb4   : > { %6501 = vbcast.lane.b32.xlu1 %v6495_v32, 264  ;;  %6497 = vbcast.lane.b32.xlu0 %v6495_v32, 256 }
 0xbb8   : > { %6482 = vbcast.lane.b32.xlu1 %v6476_v50, 264  ;;  %6478 = vbcast.lane.b32.xlu0 %v6476_v50, 256 }
 0xbbc   : > { %6509 = vbcast.lane.b32.xlu1 %v6495_v32, 280  ;;  %6505 = vbcast.lane.b32.xlu0 %v6495_v32, 272  ;;  %v5134_v32 = vrot.slane %v14901_v45, %v16564_v46 }
 0xbbe   : > { %v14886_v56 = vpop.permute.xlu1 %6253  ;;  %v14888_v5 = vpop.permute.xlu0 %6249 }
 0xbc0   : > { %6490 = vbcast.lane.b32.xlu1 %v6476_v50, 280  ;;  %6486 = vbcast.lane.b32.xlu0 %v6476_v50, 272 }
 0xbc2   : > { %v14890_v28 = vpop.permute.xlu1 %6234  ;;  %v14892_v14 = vpop.permute.xlu0 %6230 }
 0xbc4   : > { %6463 = vbcast.lane.b32.xlu1 %v14896_v62, 264  ;;  %6459 = vbcast.lane.b32.xlu0 %v14896_v62, 256 }
 0xbc6   : > { %v14903_v8 = vpop.permute.xlu1 %6261  ;;  %v14905_v54 = vpop.permute.xlu0 %6257 }
 0xbc8   : > { %6444 = vbcast.lane.b32.xlu1 %v14909_v39, 264  ;;  %6440 = vbcast.lane.b32.xlu0 %v14909_v39, 256 }
 0xbca   : > { %v14913_v21 = vpop.permute.xlu1 %6242  ;;  %v14915_v35 = vpop.permute.xlu0 %6238 }
 0xbcc   : > { %5235 = vbcast.lane.b32.xlu1 %v5229_v43, 264  ;;  %5231 = vbcast.lane.b32.xlu0 %v5229_v43, 256 }
 0xbce   : > { %v14919_v60 = vpop.permute.xlu1 %6215  ;;  %v14921_v34 = vpop.permute.xlu0 %6211 }
 0xbcf   : > { %16566 = vst [vmem:[#allocation42_spill] sm:$0xff] %v14921_v34 }
 0xbd0   : > { %5216 = vbcast.lane.b32.xlu1 %v5210_v47, 264  ;;  %5212 = vbcast.lane.b32.xlu0 %v5210_v47, 256 }
 0xbd2   : > { %v14925_v18 = vpop.permute.xlu1 %6196  ;;  %v14927_v49 = vpop.permute.xlu0 %6192 }
 0xbd3   : > { %16567 = vst [vmem:[#allocation43_spill] sm:$0xff] %v14925_v18  ;;  %16568 = vst [vmem:[#allocation59_spill] sm:$0xff] %v14927_v49 }
 0xbd4   : > { %5243 = vbcast.lane.b32.xlu1 %v5229_v43, 280  ;;  %5239 = vbcast.lane.b32.xlu0 %v5229_v43, 272 }
 0xbd6   : > { %v14929_v25 = vpop.permute.xlu1 %6223  ;;  %v14931_v48 = vpop.permute.xlu0 %6219 }
 0xbd7   : > { %16569 = vst [vmem:[#allocation60_spill] sm:$0xff] %v14929_v25  ;;  %16570 = vst [vmem:[#allocation61_spill] sm:$0xff] %v14931_v48 }
 0xbd8   : > { %5224 = vbcast.lane.b32.xlu1 %v5210_v47, 280  ;;  %5220 = vbcast.lane.b32.xlu0 %v5210_v47, 272 }
 0xbda   : > { %v14933_v55 = vpop.permute.xlu1 %6204  ;;  %v14935_v19 = vpop.permute.xlu0 %6200 }
 0xbdb   : > { %16571 = vst [vmem:[#allocation62_spill] sm:$0xff] %v14933_v55  ;;  %16572 = vst [vmem:[#allocation63_spill] sm:$0xff] %v14935_v19 }
 0xbdc   : > { %5197 = vbcast.lane.b32.xlu1 %v5191_v63, 264  ;;  %5193 = vbcast.lane.b32.xlu0 %v5191_v63, 256 }
 0xbde   : > { %v14939_v9 = vpop.permute.xlu1 %6177  ;;  %v14941_v3 = vpop.permute.xlu0 %6173 }
 0xbdf   : > { %16573 = vst [vmem:[#allocation64_spill] sm:$0xff] %v14939_v9  ;;  %16574 = vst [vmem:[#allocation65_spill] sm:$0xff] %v14941_v3  ;;  %v6419_v9 = vrot.slane %v14880_v57, %v14029_v27 }
 0xbe0   : > { %5178 = vbcast.lane.b32.xlu1 %v5172_v58, 264  ;;  %5174 = vbcast.lane.b32.xlu0 %v5172_v58, 256 }
 0xbe2   : > { %v14945_v40 = vpop.permute.xlu1 %6158  ;;  %v14947_v24 = vpop.permute.xlu0 %6154 }
 0xbe3   : > { %16575 = vst [vmem:[#allocation66_spill] sm:$0xff] %v14945_v40  ;;  %16576 = vst [vmem:[#allocation67_spill] sm:$0xff] %v14947_v24  ;;  %v1248_v40 = vmul.f32 1.442695, %v1244_v26 }
 0xbe4   : > { %5205 = vbcast.lane.b32.xlu1 %v5191_v63, 280  ;;  %5201 = vbcast.lane.b32.xlu0 %v5191_v63, 272 }
 0xbe6   : > { %v14949_v53 = vpop.permute.xlu1 %4987  ;;  %v14951_v2 = vpop.permute.xlu0 %4983 }
 0xbe8   : > { %5186 = vbcast.lane.b32.xlu1 %v5172_v58, 280  ;;  %5182 = vbcast.lane.b32.xlu0 %v5172_v58, 272 }
 0xbea   : > { %v14953_v13 = vpop.permute.xlu1 %4968  ;;  %v14955_v6 = vpop.permute.xlu0 %4964 }
 0xbec   : > { %5159 = vbcast.lane.b32.xlu1 %v5153_v36, 264  ;;  %5155 = vbcast.lane.b32.xlu0 %v5153_v36, 256 }
 0xbee   : > { %v14959_v42 = vpop.permute.xlu1 %4995  ;;  %v14961_v30 = vpop.permute.xlu0 %4991 }
 0xbf0   : > { %5140 = vbcast.lane.b32.xlu1 %v5134_v32, 264  ;;  %5136 = vbcast.lane.b32.xlu0 %v5134_v32, 256 }
 0xbf2   : > { %v14965_v50 = vpop.permute.xlu1 %4976  ;;  %v14967_v43 = vpop.permute.xlu0 %4972 }
 0xbf4   : > { %5167 = vbcast.lane.b32.xlu1 %v5153_v36, 280  ;;  %5163 = vbcast.lane.b32.xlu0 %v5153_v36, 272  ;;  %v5096_v36 = vrot.slane %v14901_v45, %v14017_v20 }
 0xbf6   : > { %v14969_v47 = vpop.permute.xlu1 %4949  ;;  %v14971_v17 = vpop.permute.xlu0 %4945 }
 0xbf8   : > { %5148 = vbcast.lane.b32.xlu1 %v5134_v32, 280  ;;  %5144 = vbcast.lane.b32.xlu0 %v5134_v32, 272 }
 0xbfa   : > { %v14973_v63 = vpop.permute.xlu1 %4930  ;;  %v14975_v58 = vpop.permute.xlu0 %4926 }
 0xbfc   : > { %5121 = vbcast.lane.b32.xlu1 %v5115_v10, 264  ;;  %5117 = vbcast.lane.b32.xlu0 %v5115_v10, 256 }
 0xbfe   : > { %v14979_v41 = vpop.permute.xlu1 %4957  ;;  %v14981_v12 = vpop.permute.xlu0 %4953 }
 0xc00   : > { %5102 = vbcast.lane.b32.xlu1 %v5096_v36, 264  ;;  %5098 = vbcast.lane.b32.xlu0 %v5096_v36, 256 }
 0xc02   : > { %v14985_v61 = vpop.permute.xlu1 %4938  ;;  %v14987_v32 = vpop.permute.xlu0 %4934 }
 0xc04   : > { %5129 = vbcast.lane.b32.xlu1 %v5115_v10, 280  ;;  %5125 = vbcast.lane.b32.xlu0 %v5115_v10, 272 }
 0xc06   : > { %v14989_v0 = vpop.permute.xlu1 %4911  ;;  %v14991_v33 = vpop.permute.xlu0 %4907 }
 0xc08   : > { %5110 = vbcast.lane.b32.xlu1 %v5096_v36, 280  ;;  %5106 = vbcast.lane.b32.xlu0 %v5096_v36, 272  ;;  %v1245_v36 = vld [vmem:[%s16577_s26 + $0x8] sm:$0xff]  ;;  %s16646_s26 = sld [smem:[#allocation30_spill]] }
 0xc0a   : > { %v14993_v31 = vpop.permute.xlu1 %4892  ;;  %v14995_v29 = vpop.permute.xlu0 %4888 }
 0xc0c   : > { %6471 = vbcast.lane.b32.xlu1 %v14896_v62, 280  ;;  %6467 = vbcast.lane.b32.xlu0 %v14896_v62, 272  ;;  %v1250_v62 = vmul.f32 1.442695, %v1245_v36  ;;  %v1246_v36 = vld [vmem:[%s16578_s16 + $0x10] sm:$0xff] }
 0xc0e   : > { %v14999_v45 = vpop.permute.xlu1 %4919  ;;  %v15001_v23 = vpop.permute.xlu0 %4915  ;;  %13216 = vpow2.f32 %v1250_v62  ;;  %v1252_v62 = vmul.f32 1.442695, %v1246_v36  ;;  %v6114_v36 = vrot.slane %v14848_v51, %v14017_v20 }
 0xc0f   : > { %13218 = vpow2.f32 %v1248_v40  ;;  %v6400_v40 = vrot.slane %v14880_v57, %v16564_v46  ;;  %v5246_v46 = vcombine.high %v14842_v11, %v14842_v11 }
 0xc10   : > { %6185 = vbcast.lane.b32.xlu1 %v14860_v7, 280  ;;  %6181 = vbcast.lane.b32.xlu0 %v14860_v7, 272 }
 0xc12   : > { %v15005_v10 = vpop.permute.xlu1 %4900  ;;  %v15007_v16 = vpop.permute.xlu0 %4896 }
 0xc14   : > { %6452 = vbcast.lane.b32.xlu1 %v14909_v39, 280  ;;  %6448 = vbcast.lane.b32.xlu0 %v14909_v39, 272  ;;  %v1247_v39 = vld [vmem:[%s16578_s16 + $0x18] sm:$0xff] }
 0xc15   : > { %v1254_v19 = vmul.f32 1.442695, %v1247_v39 }
 0xc16   : > { %v15013_v22 = vpop.permute.xlu1 %4873  ;;  %v15015_v24 = vpop.permute.xlu0 %4869 }
 0xc17   : > { %16579 = vst [vmem:[#allocation68_spill] sm:$0xff] %v15015_v24  ;;  %13220 = vpow2.f32 %v1254_v19  ;;  %v6512_v19 = vcombine.high %v14840_v44, %v14840_v44 }
 0xc18   : > { %6166 = vbcast.lane.b32.xlu1 %v14866_v52, 280  ;;  %6162 = vbcast.lane.b32.xlu0 %v14866_v52, 272  ;;  %v6133_v52 = vrot.slane %v14848_v51, %v16565_v15  ;;  %13222 = vpow2.f32 %v1252_v62  ;;  %v13217_v39 = vpop.eup %13216 }
 0xc19   : > { %v13219_v25 = vpop.eup %13218 }
 0xc1a   : > { %v15019_v7 = vpop.permute.xlu1 %4854  ;;  %v15021_v3 = vpop.permute.xlu0 %4850  ;;  %v15051_v62 = vsub.f32 0.0, %v13219_v25 }
 0xc1b   : > { %16580 = vst [vmem:[#allocation69_spill] sm:$0xff] %v15019_v7  ;;  %16581 = vst [vmem:[#allocation70_spill] sm:$0xff] %v15021_v3 }
 0xc1c   : > { %6425 = vbcast.lane.b32.xlu1 %v6419_v9, 264  ;;  %6421 = vbcast.lane.b32.xlu0 %v6419_v9, 256  ;;  %16589 = vst [vmem:[#allocation78_spill] sm:$0xff] %v15051_v62 }
 0xc1e   : > { %v15027_v55 = vpop.permute.xlu1 %4881  ;;  %v15029_v26 = vpop.permute.xlu0 %4877 }
 0xc1f   : > { %16582 = vst [vmem:[#allocation71_spill] sm:$0xff] %v15027_v55  ;;  %16583 = vst [vmem:[#allocation72_spill] sm:$0xff] %v15029_v26  ;;  %v5260_v55 = vrot.slane %v5246_v46, %v14140_v59 }
 0xc20   : > { %6139 = vbcast.lane.b32.xlu1 %v6133_v52, 264  ;;  %6135 = vbcast.lane.b32.xlu0 %v6133_v52, 256 }
 0xc21   : > { %v13221_v26 = vpop.eup %13220 }
 0xc22   : > { %v15033_v48 = vpop.permute.xlu1 %4862  ;;  %v15035_v27 = vpop.permute.xlu0 %4858 }
 0xc23   : > { %16584 = vst [vmem:[#allocation73_spill] sm:$0xff] %v15033_v48  ;;  %16585 = vst [vmem:[#allocation74_spill] sm:$0xff] %v15035_v27  ;;  %v15047_v48 = vsub.f32 0.0, %v13217_v39  ;;  %v6526_v39 = vrot.slane %v6512_v19, %v14140_v59  ;;  %v13223_v25 = vpop.eup %13222  ;;  %v5253_v19 = vrot.slane %v14842_v11, %v14140_v59 }
 0xc24   : > { %6406 = vbcast.lane.b32.xlu1 %v6400_v40, 264  ;;  %6402 = vbcast.lane.b32.xlu0 %v6400_v40, 256  ;;  %v15073_v46 = vsub.f32 0.0, %v13223_v25 }
 0xc25   : > { %16588 = vst [vmem:[#allocation77_spill] sm:$0xff] %v15047_v48  ;;  %v6528_v24 = vcombine.high %v6526_v39, %v6526_v39 }
 0xc26   : > { %v15039_v49 = vpop.permute.xlu1 %6501  ;;  %v15041_v18 = vpop.permute.xlu0 %6497  ;;  %16595 = vst [vmem:[#allocation84_spill] sm:$0xff] %v15073_v46  ;;  %v5027_v11 = vmul.f32 %v14961_v30, %v15073_v46 }
 0xc27   : > { %16586 = vst [vmem:[#allocation75_spill] sm:$0xff] %v15039_v49  ;;  %16587 = vst [vmem:[#allocation76_spill] sm:$0xff] %v15041_v18  ;;  %v5026_v49 = vmul.f32 %v14949_v53, %v15047_v48  ;;  %v5025_v18 = vmul.f32 %v14951_v2, %v15051_v62  ;;  %v15067_v2 = vsub.f32 0.0, %v13221_v26 }
 0xc28   : > { %6120 = vbcast.lane.b32.xlu1 %v6114_v36, 264  ;;  %6116 = vbcast.lane.b32.xlu0 %v6114_v36, 256 }
 0xc29   : > { %v5087_v3 = vmul.f32 1.442695, %v5026_v49  ;;  %v5085_v7 = vmul.f32 1.442695, %v5025_v18  ;;  %16594 = vst [vmem:[#allocation83_spill] sm:$0xff] %v15067_v2  ;;  %v5021_v49 = vmul.f32 %v14955_v6, %v15051_v62  ;;  %v6542_v18 = vrot.slane %v6526_v39, %v14140_v59 }
 0xc2a   : > { %v15057_v27 = vpop.permute.xlu1 %6482  ;;  %v15059_v51 = vpop.permute.xlu0 %6478  ;;  %v15091_v6 = vrot.slane %v6528_v24, %v14140_v59  ;;  %v15104_v24 = vrot.slane %v5253_v19, %v14140_v59 }
 0xc2b   : > { %16590 = vst [vmem:[#allocation79_spill] sm:$0xff] %v15057_v27  ;;  %16591 = vst [vmem:[#allocation80_spill] sm:$0xff] %v15059_v51  ;;  %v5022_v51 = vmul.f32 %v14953_v13, %v15047_v48  ;;  %v5262_v27 = vcombine.high %v5260_v55, %v5260_v55  ;;  %13224 = vpow2.f32 %v5087_v3  ;;  %v15082_v13 = vrot.slane %v14840_v44, %v14140_v59 }
 0xc2c   : > { %6433 = vbcast.lane.b32.xlu1 %v6419_v9, 280  ;;  %6429 = vbcast.lane.b32.xlu0 %v6419_v9, 272  ;;  %v5028_v9 = vmul.f32 %v14959_v42, %v15067_v2  ;;  %13226 = vpow2.f32 %v5085_v7  ;;  %v5261_v3 = vcombine.high %v5253_v19, %v5253_v19  ;;  %v5077_v42 = vmul.f32 1.442695, %v5021_v49 }
 0xc2d   : > { %16596 = vst [vmem:[#allocation85_spill] sm:$0xff] %v15082_v13  ;;  %v15094_v39 = vrot.slane %v5262_v27, %v14140_v59  ;;  %v6558_v44 = vcombine.high %v6542_v18, %v6542_v18  ;;  %v6292_v7 = vmul.f32 %v14886_v56, %v15047_v48  ;;  %v5276_v56 = vrot.slane %v5260_v55, %v14140_v59 }
 0xc2e   : > { %v15063_v34 = vpop.permute.xlu1 %6509  ;;  %v15065_v53 = vpop.permute.xlu0 %6505  ;;  %v5091_v30 = vmul.f32 1.442695, %v5028_v9  ;;  %v5024_v9 = vmul.f32 %v14965_v50, %v15067_v2  ;;  %v6291_v55 = vmul.f32 %v14888_v5, %v15051_v62  ;;  %v5017_v13 = vmul.f32 %v14971_v17, %v15051_v62 }
 0xc2f   : > { %16592 = vst [vmem:[#allocation81_spill] sm:$0xff] %v15063_v34  ;;  %16593 = vst [vmem:[#allocation82_spill] sm:$0xff] %v15065_v53  ;;  %v5294_v19 = vcombine.high %v15094_v39, %v15094_v39  ;;  %v5292_v5 = vcombine.high %v5276_v56, %v5276_v56  ;;  %v5014_v17 = vmul.f32 %v14973_v63, %v15047_v48 }
 0xc30   : > { %6147 = vbcast.lane.b32.xlu1 %v6133_v52, 280  ;;  %6143 = vbcast.lane.b32.xlu0 %v6133_v52, 272  ;;  %v5079_v52 = vmul.f32 1.442695, %v5022_v51  ;;  %v5089_v51 = vmul.f32 1.442695, %v5027_v11  ;;  %v5023_v11 = vmul.f32 %v14967_v43, %v15073_v46 }
 0xc32   : > { %v15086_v26 = vpop.permute.xlu1 %6490  ;;  %v15088_v25 = vpop.permute.xlu0 %6486  ;;  %13228 = vpow2.f32 %v5079_v52  ;;  %v15125_v52 = vrot.slane %v6558_v44, %v14017_v20  ;;  %v5083_v44 = vmul.f32 1.442695, %v5024_v9  ;;  %v6362_v9 = vrot.slane %v14880_v57, %v14017_v20 }
 0xc33   : > { %16597 = vst [vmem:[#allocation86_spill] sm:$0xff] %v15086_v26  ;;  %16598 = vst [vmem:[#allocation87_spill] sm:$0xff] %v15088_v25  ;;  %v15101_v25 = vrot.slane %v6542_v18, %v14017_v20  ;;  %v15116_v18 = vrot.slane %v5261_v3, %v14140_v59  ;;  %13230 = vpow2.f32 %v5077_v42  ;;  %v6353_v26 = vmul.f32 1.442695, %v6292_v7 }
 0xc34   : > { %6414 = vbcast.lane.b32.xlu1 %v6400_v40, 280  ;;  %6410 = vbcast.lane.b32.xlu0 %v6400_v40, 272  ;;  %13232 = vpow2.f32 %v5091_v30  ;;  %v5018_v3 = vmul.f32 %v14969_v47, %v15047_v48  ;;  %v15138_v30 = vrot.slane %v5276_v56, %v14017_v20  ;;  %v5081_v47 = vmul.f32 1.442695, %v5023_v11 }
 0xc35   : > { %16599 = vst [vmem:[#allocation88_spill] sm:$0xff] %v15101_v25  ;;  %13234 = vpow2.f32 %v5089_v51  ;;  %v13225_v7 = vpop.eup %13224  ;;  %v6351_v59 = vmul.f32 1.442695, %v6291_v55  ;;  %v6288_v56 = vmul.f32 %v14890_v28, %v15047_v48  ;;  %v6287_v40 = vmul.f32 %v14892_v14, %v15051_v62 }
 0xc36   : > { %v15106_v27 = vpop.permute.xlu1 %6463  ;;  %v15108_v49 = vpop.permute.xlu0 %6459  ;;  %13236 = vpow2.f32 %v6353_v26  ;;  %v5368_v51 = vmul.f32 0.0, %v13225_v7  ;;  %v5071_v11 = vmul.f32 1.442695, %v5018_v3  ;;  %v5069_v55 = vmul.f32 1.442695, %v5017_v13 }
 0xc37   : > { %16600 = vst [vmem:[#allocation89_spill] sm:$0xff] %v15106_v27  ;;  %16601 = vst [vmem:[#allocation90_spill] sm:$0xff] %v15108_v49  ;;  %v13227_v50 = vpop.eup %13226  ;;  %13238 = vpow2.f32 %v5083_v44  ;;  %v5013_v28 = vmul.f32 %v14975_v58, %v15051_v62  ;;  %v6345_v3 = vmul.f32 1.442695, %v6288_v56  ;;  %v5020_v13 = vmul.f32 %v14979_v41, %v15067_v2 }
 0xc38   : > { %6128 = vbcast.lane.b32.xlu1 %v6114_v36, 280  ;;  %6124 = vbcast.lane.b32.xlu0 %v6114_v36, 272  ;;  %v6381_v36 = vrot.slane %v14880_v57, %v16565_v15  ;;  %v5326_v15 = vrot.slane %v5294_v19, %v14017_v20  ;;  %13240 = vpow2.f32 %v5081_v47  ;;  %v15157_v57 = vrot.slane %v5292_v5, %v14017_v20 }
 0xc39   : > { %13242 = vpow2.f32 %v6351_v59  ;;  %v5061_v59 = vmul.f32 1.442695, %v5013_v28  ;;  %v6294_v41 = vmul.f32 %v14903_v8, %v15067_v2  ;;  %v5015_v28 = vmul.f32 %v14987_v32, %v15073_v46 }
 0xc3a   : > { %v15131_v42 = vpop.permute.xlu1 %6444  ;;  %v15133_v43 = vpop.permute.xlu0 %6440  ;;  %13244 = vpow2.f32 %v5071_v11  ;;  %v5075_v11 = vmul.f32 1.442695, %v5020_v13  ;;  %v5010_v32 = vmul.f32 %v14989_v0, %v15047_v48  ;;  %v5009_v0 = vmul.f32 %v14991_v33, %v15051_v62 }
 0xc3b   : > { %16602 = vst [vmem:[#allocation91_spill] sm:$0xff] %v15131_v42  ;;  %16603 = vst [vmem:[#allocation92_spill] sm:$0xff] %v15133_v43  ;;  %v5367_v42 = vmul.f32 0.0, %v13227_v50  ;;  %v6343_v50 = vmul.f32 1.442695, %v6287_v40  ;;  %13246 = vpow2.f32 %v5069_v55 }
 0xc3c   : > { %6387 = vbcast.lane.b32.xlu1 %v6381_v36, 264  ;;  %6383 = vbcast.lane.b32.xlu0 %v6381_v36, 256  ;;  %v13229_v14 = vpop.eup %13228  ;;  %13248 = vpow2.f32 %v6345_v3 }
 0xc3d   : > { %v13231_v49 = vpop.eup %13230 }
 0xc3e   : > { %v5236_v43 = vpop.permute.xlu1 %5235  ;;  %v5232_v25 = vpop.permute.xlu0 %5231 }
 0xc3f   : > { %v5364_v26 = vmul.f32 %v5326_v15, %v5236_v43  ;;  %v5363_v19 = vmul.f32 %v5326_v15, %v5232_v25  ;;  %v5063_v43 = vmul.f32 1.442695, %v5014_v17  ;;  %v13233_v58 = vpop.eup %13232 }
 0xc40   : > { %6368 = vbcast.lane.b32.xlu1 %v6362_v9, 264  ;;  %6364 = vbcast.lane.b32.xlu0 %v6362_v9, 256  ;;  %v13235_v34 = vpop.eup %13234 }
 0xc41   : > { %v5372_v63 = vadd.f32 %v5368_v51, %v5364_v26  ;;  %v5371_v7 = vadd.f32 %v5367_v42, %v5363_v19  ;;  %v5019_v42 = vmul.f32 %v14981_v12, %v15073_v46  ;;  %v6293_v51 = vmul.f32 %v14905_v54, %v15073_v46 }
 0xc42   : > { %v5217_v25 = vpop.permute.xlu1 %5216  ;;  %v5213_v44 = vpop.permute.xlu0 %5212  ;;  %v5016_v12 = vmul.f32 %v14985_v61, %v15067_v2  ;;  %v5369_v8 = vmul.f32 0.0, %v13235_v34  ;;  %13250 = vpow2.f32 %v5063_v43  ;;  %v16604_v34 = vcombine.high %v15104_v24, %v15104_v24 }
 0xc43   : > { %v12674_v47 = vpack.c.bf16 %v5372_v63, %v5371_v7  ;;  %v5462_v27 = vmul.f32 %v13229_v14, %v5372_v63  ;;  %v5360_v5 = vmul.f32 %v15157_v57, %v5217_v25  ;;  %v5461_v53 = vmul.f32 %v13231_v49, %v5371_v7  ;;  %v1262_v7 = vld [vmem:[%s13833_s27] sm:$0xff] }
 0xc44   : > { %v5359_v40 = vmul.f32 %v15157_v57, %v5213_v44  ;;  %6395 = vbcast.lane.b32.xlu1 %v6381_v36, 280  ;;  %6391 = vbcast.lane.b32.xlu0 %v6381_v36, 272  ;;  %v5370_v49 = vmul.f32 0.0, %v13233_v58  ;;  %v15174_v36 = vpop.eup %13236  ;;  %13252 = vpow2.f32 %v5061_v59  ;;  %v5073_v55 = vmul.f32 1.442695, %v5019_v42 }
 0xc45   : > { %v5466_v56 = vadd.f32 %v5462_v27, %v5360_v5  ;;  %12676 = vmatpush3.bf16.xpose.msk.msra.mxu1 %vm14224_vm11, %v12674_v47  ;;  %v13239_v61 = vpop.eup %13238  ;;  %13254 = vpow2.f32 %v6343_v50  ;;  %v5067_v43 = vmul.f32 1.442695, %v5016_v12  ;;  %v5065_v42 = vmul.f32 1.442695, %v5015_v28 }
 0xc46   : > { %v5465_v17 = vadd.f32 %v5461_v53, %v5359_v40  ;;  %v5244_v26 = vpop.permute.xlu1 %5243  ;;  %v5240_v19 = vpop.permute.xlu0 %5239  ;;  %12677 = vmatprep.subr.bf16.mxu1 %v16543_v1  ;;  %v6357_v53 = vmul.f32 1.442695, %v6294_v41  ;;  %13256 = vpow2.f32 %v5075_v11  ;;  %v6355_v41 = vmul.f32 1.442695, %v6293_v51 }
 0xc47   : > { %v5366_v54 = vmul.f32 %v5326_v15, %v5244_v26  ;;  %v5365_v27 = vmul.f32 %v5326_v15, %v5240_v19  ;;  %v13241_v13 = vpop.eup %13240  ;;  %v15183_v15 = vrot.slane %v16604_v34, %v14017_v20  ;;  %13258 = vpow2.f32 %v5073_v55 }
 0xc48   : > { %v12682_v14 = vpack.c.bf16 %v5466_v56, %v5465_v17  ;;  %6376 = vbcast.lane.b32.xlu1 %v6362_v9, 280  ;;  %6372 = vbcast.lane.b32.xlu0 %v6362_v9, 272  ;;  %v15189_v25 = vpop.eup %13242  ;;  %13260 = vpow2.f32 %v6357_v53  ;;  %v5318_v11 = vrot.slane %v15094_v39, %v14017_v20  ;;  %v5055_v26 = vmul.f32 1.442695, %v5010_v32 }
 0xc49   : > { %v5374_v3 = vadd.f32 %v5370_v49, %v5366_v54  ;;  %v5373_v63 = vadd.f32 %v5369_v8, %v5365_v27  ;;  %v13245_v59 = vpop.eup %13244  ;;  %13262 = vpow2.f32 %v5067_v43  ;;  %v5006_v19 = vmul.f32 %v14993_v31, %v15047_v48 }
 0xc4a   : > { %12684 = vmatpush3.bf16.xpose.msk.msra.mxu0 %vm14224_vm11, %v12682_v14  ;;  %v5225_v9 = vpop.permute.xlu1 %5224  ;;  %v5221_v50 = vpop.permute.xlu0 %5220  ;;  %v5555_v51 = vmul.f32 %v13245_v59, %v5466_v56  ;;  %13264 = vpow2.f32 %v5065_v42  ;;  %v5053_v14 = vmul.f32 1.442695, %v5009_v0  ;;  %v5005_v39 = vmul.f32 %v14995_v29, %v15051_v62 }
 0xc4b   : > { %v12678_v44 = vpack.c.bf16 %v5374_v3, %v5373_v63  ;;  %v5464_v58 = vmul.f32 %v13239_v61, %v5374_v3  ;;  %v5362_v47 = vmul.f32 %v15157_v57, %v5225_v9  ;;  %v5463_v5 = vmul.f32 %v13241_v13, %v5373_v63  ;;  %12685 = vmatprep.subr.bf16.mxu0 %v16543_v1  ;;  %v13247_v12 = vpop.eup %13246 }
 0xc4c   : > { %v5361_v40 = vmul.f32 %v15157_v57, %v5221_v50  ;;  %4514 = vperm.xlu0 %13014, %v1262_v7   ;;  %v15203_v57 = vpop.eup %13248  ;;  %v5554_v55 = vmul.f32 %v13247_v12, %v5465_v17  ;;  %v6290_v31 = vmul.f32 %v14913_v21, %v15067_v2  ;;  %v6289_v3 = vmul.f32 %v14915_v35, %v15073_v46 }
 0xc4d   : > { %v5468_v49 = vadd.f32 %v5464_v58, %v5362_v47  ;;  %12680 = vmatpush3.bf16.xpose.msk.msra.mxu1 %vm14224_vm11, %v12678_v44  ;;  %v13251_v53 = vpop.eup %13250  ;;  %13266 = vpow2.f32 %v5055_v26  ;;  %v5047_v56 = vmul.f32 1.442695, %v5006_v19  ;;  %v5012_v17 = vmul.f32 %v14999_v45, %v15067_v2 }
 0xc4e   : > { %v5467_v8 = vadd.f32 %v5463_v5, %v5361_v40  ;;  %v5198_v33 = vpop.permute.xlu1 %5197  ;;  %v5194_v54 = vpop.permute.xlu0 %5193  ;;  %12689 = vmatprep.subr.bf16.mxu1 %v16543_v1  ;;  %v5469_v43 = vrot.slane %v14846_v38, 6  ;;  %13268 = vpow2.f32 %v5053_v14  ;;  %v5045_v58 = vmul.f32 1.442695, %v5005_v39 }
 0xc4f   : > { %v5356_v27 = vmul.f32 %v5318_v11, %v5198_v33  ;;  %v5355_v28 = vmul.f32 %v5318_v11, %v5194_v54  ;;  %v13253_v13 = vpop.eup %13252  ;;  %v5011_v45 = vmul.f32 %v15001_v23, %v15073_v46  ;;  %v16605_v5 = vrot.slane %v14846_v38, 7 }
 0xc50   : > { %v12686_v61 = vpack.c.bf16 %v5468_v49, %v5467_v8  ;;  %v15216_v32 = vpop.eup %13254  ;;  %13270 = vpow2.f32 %v6355_v41  ;;  %v6349_v59 = vmul.f32 1.442695, %v6290_v31  ;;  %v6347_v42 = vmul.f32 1.442695, %v6289_v3 }
 0xc51   : > { %v5559_v63 = vadd.f32 %v5555_v51, %v5356_v27  ;;  %v5558_v7 = vadd.f32 %v5554_v55, %v5355_v28  ;;  %v13257_v44 = vpop.eup %13256  ;;  %13272 = vpow2.f32 %v5047_v56  ;;  %v5059_v12 = vmul.f32 1.442695, %v5012_v17 }
 0xc52   : > { %12688 = vmatpush3.bf16.xpose.msk.msra.mxu0 %vm14224_vm11, %v12686_v61  ;;  %v5179_v29 = vpop.permute.xlu1 %5178  ;;  %v5175_v34 = vpop.permute.xlu0 %5174  ;;  %v5008_v23 = vmul.f32 %v15005_v10, %v15067_v2  ;;  %v5557_v54 = vmul.f32 %v13257_v44, %v5468_v49  ;;  %13274 = vpow2.f32 %v5045_v58  ;;  %v5057_v14 = vmul.f32 1.442695, %v5011_v45 }
 0xc53   : > { %v12690_v21 = vpack.c.bf16 %v5559_v63, %v5558_v7  ;;  %v5648_v9 = vmul.f32 %v13251_v53, %v5559_v63  ;;  %v5352_v35 = vmul.f32 %v15138_v30, %v5179_v29  ;;  %v5647_v50 = vmul.f32 %v13253_v13, %v5558_v7  ;;  %12697 = vmatprep.subr.bf16.mxu0 %v16543_v1  ;;  %v13259_v40 = vpop.eup %13258 }
 0xc54   : > { %v5351_v47 = vmul.f32 %v15138_v30, %v5175_v34  ;;  %12082 = vmatmul.mubr.msk.f32.vlgmr.msra.gmra.mrb[30].mxu1 %vm1180_vm2, %v16605_v5  ;;  %v15233_v41 = vpop.eup %13260  ;;  %v5556_v27 = vmul.f32 %v13259_v40, %v5467_v8  ;;  %v5007_v39 = vmul.f32 %v15007_v16, %v15073_v46  ;;  %13276 = vpow2.f32 %v6349_v59  ;;  %v16607_v34 = vld [vmem:[#allocation68_spill] sm:$0xff] }
 0xc55   : > { %v5652_v0 = vadd.f32 %v5648_v9, %v5352_v35  ;;  %12692 = vmatpush3.bf16.xpose.msk.msra.mxu1 %vm14224_vm11, %v12690_v21  ;;  %12103 = vmatprep.mubr.msk.f32.mxu1 %vm13660_vm1, %v16544_v4  ;;  %v13263_v28 = vpop.eup %13262  ;;  %v6284_v10 = vmul.f32 %v14919_v60, %v15047_v48  ;;  %13278 = vpow2.f32 %v5059_v12  ;;  %v5051_v49 = vmul.f32 1.442695, %v5008_v23  ;;  %v16608_v35 = vld [vmem:[#allocation42_spill] sm:$0xff] }
 0xc56   : > { %v5651_v26 = vadd.f32 %v5647_v50, %v5351_v47  ;;  %v5206_v19 = vpop.permute.xlu1 %5205  ;;  %v5202_v33 = vpop.permute.xlu0 %5201  ;;  %12693 = vmatprep.subr.bf16.mxu1 %v16543_v1  ;;  %v16606_v63 = vcombine.high %v15116_v18, %v15116_v18  ;;  %13280 = vpow2.f32 %v5057_v14  ;;  %v5049_v29 = vmul.f32 1.442695, %v5007_v39  ;;  %v16609_v47 = vld [vmem:[#allocation69_spill] sm:$0xff] }
 0xc57   : > { %v5358_v51 = vmul.f32 %v5318_v11, %v5206_v19  ;;  %v5357_v55 = vmul.f32 %v5318_v11, %v5202_v33  ;;  %v13265_v3 = vpop.eup %13264  ;;  %v5002_v11 = vmul.f32 %v15013_v22, %v15047_v48  ;;  %13282 = vpow2.f32 %v6347_v42 }
 0xc58   : > { %v12698_v61 = vpack.c.bf16 %v5652_v0, %v5651_v26  ;;  %v15248_v60 = vrot.slane %v16606_v63, %v14017_v20  ;;  %v13267_v22 = vpop.eup %13266  ;;  %v6337_v9 = vmul.f32 1.442695, %v6284_v10  ;;  %v6283_v50 = vmul.f32 %v16608_v35, %v15051_v62 }
 0xc59   : > { %v5561_v53 = vadd.f32 %v5557_v54, %v5358_v51  ;;  %v5560_v31 = vadd.f32 %v5556_v27, %v5357_v55  ;;  %12093 = vmatmul.mubr.msk.f32.vlgmr.msra.gmra.mrb[34].mxu0 %vm1180_vm2, %v5469_v43  ;;  %v5001_v43 = vmul.f32 %v16607_v34, %v15051_v62  ;;  %v13269_v58 = vpop.eup %13268  ;;  %13284 = vpow2.f32 %v5051_v49  ;;  %v16610_v27 = vld [vmem:[#allocation70_spill] sm:$0xff]  ;;  %v16613_v34 = vld [vmem:[#allocation43_spill] sm:$0xff] }
 0xc5a   : > { %12700 = vmatpush3.bf16.xpose.msk.msra.mxu0 %vm14224_vm11, %v12698_v61  ;;  %v5187_v8 = vpop.permute.xlu1 %5186  ;;  %v5183_v16 = vpop.permute.xlu0 %5182  ;;  %12114 = vmatprep.mubr.msk.f32.mxu0 %vm13660_vm1, %v16544_v4  ;;  %v5039_v45 = vmul.f32 1.442695, %v5002_v11  ;;  %v4998_v5 = vmul.f32 %v16609_v47, %v15047_v48  ;;  %v5741_v42 = vmul.f32 %v13267_v22, %v5652_v0  ;;  %v5740_v19 = vmul.f32 %v13269_v58, %v5651_v26  ;;  %v16611_v0 = vld [vmem:[#allocation71_spill] sm:$0xff] }
 0xc5b   : > { %v12694_v7 = vpack.c.bf16 %v5561_v53, %v5560_v31  ;;  %v5650_v13 = vmul.f32 %v13263_v28, %v5561_v53  ;;  %v5354_v56 = vmul.f32 %v15138_v30, %v5187_v8  ;;  %v5649_v17 = vmul.f32 %v13265_v3, %v5560_v31  ;;  %12701 = vmatprep.subr.bf16.mxu0 %v16543_v1 }
 0xc5c   : > { %v5353_v21 = vmul.f32 %v15138_v30, %v5183_v16  ;;  %v15264_v30 = vpop.eup %13270  ;;  %13286 = vpow2.f32 %v5049_v29  ;;  %v5037_v51 = vmul.f32 1.442695, %v5001_v43  ;;  %v4997_v55 = vmul.f32 %v16610_v27, %v15051_v62  ;;  %v16615_v27 = vld [vmem:[#allocation73_spill] sm:$0xff] }
 0xc5d   : > { %v5654_v44 = vadd.f32 %v5650_v13, %v5354_v56  ;;  %12696 = vmatpush3.bf16.xpose.msk.msra.mxu1 %vm14224_vm11, %v12694_v7  ;;  %v13273_v54 = vpop.eup %13272  ;;  %13288 = vpow2.f32 %v6337_v9  ;;  %v6335_v14 = vmul.f32 1.442695, %v6283_v50  ;;  %v5031_v53 = vmul.f32 1.442695, %v4998_v5  ;;  %v16614_v50 = vld [vmem:[#allocation59_spill] sm:$0xff] }
 0xc5e   : > { %v5653_v59 = vadd.f32 %v5649_v17, %v5353_v21  ;;  %v5160_v40 = vpop.permute.xlu1 %5159  ;;  %v5156_v12 = vpop.permute.xlu0 %5155  ;;  %12705 = vmatprep.subr.bf16.mxu1 %v16543_v1  ;;  %13290 = vpow2.f32 %v5039_v45  ;;  %v5004_v31 = vmul.f32 %v16611_v0, %v15067_v2  ;;  %v5562_v49 = vrot.slane %v14846_v38, 5  ;;  %v16612_v17 = vld [vmem:[#allocation72_spill] sm:$0xff] }
 0xc5f   : > { %v5348_v23 = vmul.f32 %v15248_v60, %v5160_v40  ;;  %v5347_v33 = vmul.f32 %v15248_v60, %v5156_v12  ;;  %v13275_v10 = vpop.eup %13274  ;;  %13292 = vpow2.f32 %v5037_v51  ;;  %v5029_v56 = vmul.f32 1.442695, %v4997_v55  ;;  %v16617_v0 = vld [vmem:[#allocation60_spill] sm:$0xff] }
 0xc60   : > { %v12702_v28 = vpack.c.bf16 %v5654_v44, %v5653_v59  ;;  %v15275_v11 = vpop.eup %13276  ;;  %v5003_v22 = vmul.f32 %v16612_v17, %v15073_v46  ;;  %13294 = vpow2.f32 %v6335_v14  ;;  %v6280_v43 = vmul.f32 %v16613_v34, %v15047_v48 }
 0xc61   : > { %v5745_v39 = vadd.f32 %v5741_v42, %v5348_v23  ;;  %v5744_v61 = vadd.f32 %v5740_v19, %v5347_v33  ;;  %v13279_v13 = vpop.eup %13278  ;;  %v5655_v9 = vrot.slane %v14846_v38, 4  ;;  %v6279_v58 = vmul.f32 %v16614_v50, %v15051_v62 }
 0xc62   : > { %12704 = vmatpush3.bf16.xpose.msk.msra.mxu0 %vm14224_vm11, %v12702_v28  ;;  %v5141_v26 = vpop.permute.xlu1 %5140  ;;  %v5137_v3 = vpop.permute.xlu0 %5136  ;;  %13296 = vpow2.f32 %v5031_v53  ;;  %v5043_v45 = vmul.f32 1.442695, %v5004_v31  ;;  %v5743_v42 = vmul.f32 %v13279_v13, %v5654_v44  ;;  %v5041_v51 = vmul.f32 1.442695, %v5003_v22  ;;  %v16618_v13 = vld [vmem:[#allocation61_spill] sm:$0xff] }
 0xc63   : > { %v12706_v8 = vpack.c.bf16 %v5745_v39, %v5744_v61  ;;  %v5834_v16 = vmul.f32 %v13273_v54, %v5745_v39  ;;  %v5344_v63 = vmul.f32 %v15183_v15, %v5141_v26  ;;  %v5833_v7 = vmul.f32 %v13275_v10, %v5744_v61  ;;  %12713 = vmatprep.subr.bf16.mxu0 %v16543_v1  ;;  %v13281_v35 = vpop.eup %13280  ;;  %v16616_v39 = vld [vmem:[#allocation74_spill] sm:$0xff] }
 0xc64   : > { %v5343_v29 = vmul.f32 %v15183_v15, %v5137_v3  ;;  %12104 = vmatmul.mubr.msk.f32.vlgmr.msra.gmra.mrb[40].mxu1 %vm1180_vm2, %v5562_v49  ;;  %v15293_v12 = vpop.eup %13282  ;;  %v5742_v19 = vmul.f32 %v13281_v35, %v5653_v59  ;;  %13298 = vpow2.f32 %v5029_v56  ;;  %v5000_v55 = vmul.f32 %v16615_v27, %v15067_v2 }
 0xc65   : > { %v5838_v21 = vadd.f32 %v5834_v16, %v5344_v63  ;;  %12708 = vmatpush3.bf16.xpose.msk.msra.mxu1 %vm14224_vm11, %v12706_v8  ;;  %12125 = vmatprep.mubr.msk.f32.mxu1 %vm13660_vm1, %v16544_v4  ;;  %v13285_v54 = vpop.eup %13284  ;;  %v6329_v14 = vmul.f32 1.442695, %v6280_v43  ;;  %v4999_v61 = vmul.f32 %v16616_v39, %v15073_v46  ;;  %v15304_v59 = vrot.slane %v15116_v18, %v14017_v20 }
 0xc66   : > { %v5837_v47 = vadd.f32 %v5833_v7, %v5343_v29  ;;  %v5168_v5 = vpop.permute.xlu1 %5167  ;;  %v5164_v40 = vpop.permute.xlu0 %5163  ;;  %12709 = vmatprep.subr.bf16.mxu1 %v16543_v1  ;;  %v6286_v31 = vmul.f32 %v16617_v0, %v15067_v2  ;;  %13300 = vpow2.f32 %v5043_v45  ;;  %v6285_v56 = vmul.f32 %v16618_v13, %v15073_v46  ;;  %v16619_v29 = vld [vmem:[#allocation62_spill] sm:$0xff] }
 0xc67   : > { %v5350_v23 = vmul.f32 %v15248_v60, %v5168_v5  ;;  %v5349_v33 = vmul.f32 %v15248_v60, %v5164_v40  ;;  %v13287_v44 = vpop.eup %13286  ;;  %v6327_v60 = vmul.f32 1.442695, %v6279_v58  ;;  %13302 = vpow2.f32 %v5041_v51 }
 0xc68   : > { %v12714_v28 = vpack.c.bf16 %v5838_v21, %v5837_v47  ;;  %v15312_v49 = vpop.eup %13288  ;;  %v5035_v17 = vmul.f32 1.442695, %v5000_v55  ;;  %13304 = vpow2.f32 %v6329_v14  ;;  %v6282_v34 = vmul.f32 %v16619_v29, %v15067_v2 }
 0xc69   : > { %v5747_v10 = vadd.f32 %v5743_v42, %v5350_v23  ;;  %v5746_v53 = vadd.f32 %v5742_v19, %v5349_v33  ;;  %12115 = vmatmul.mubr.msk.f32.vlgmr.msra.gmra.mrb[44].mxu0 %vm1180_vm2, %v5655_v9  ;;  %v13291_v7 = vpop.eup %13290  ;;  %v5033_v43 = vmul.f32 1.442695, %v4999_v61  ;;  %v15325_v50 = vrot.slane %v15104_v24, %v14017_v20  ;;  %v16620_v24 = vld [vmem:[#allocation63_spill] sm:$0xff] }
 0xc6a   : > { %12716 = vmatpush3.bf16.xpose.msk.msra.mxu0 %vm14224_vm11, %v12714_v28  ;;  %v5149_v26 = vpop.permute.xlu1 %5148  ;;  %v5145_v3 = vpop.permute.xlu0 %5144  ;;  %12136 = vmatprep.mubr.msk.f32.mxu0 %vm13660_vm1, %v16544_v4  ;;  %13306 = vpow2.f32 %v6327_v60  ;;  %v6341_v58 = vmul.f32 1.442695, %v6286_v31  ;;  %v5927_v42 = vmul.f32 %v13291_v7, %v5838_v21  ;;  %v6339_v51 = vmul.f32 1.442695, %v6285_v56 }
 0xc6b   : > { %v12710_v8 = vpack.c.bf16 %v5747_v10, %v5746_v53  ;;  %v5836_v16 = vmul.f32 %v13285_v54, %v5747_v10  ;;  %v5346_v18 = vmul.f32 %v15183_v15, %v5149_v26  ;;  %v5835_v63 = vmul.f32 %v13287_v44, %v5746_v53  ;;  %12717 = vmatprep.subr.bf16.mxu0 %v16543_v1  ;;  %v13293_v35 = vpop.eup %13292 }
 0xc6c   : > { %v5345_v22 = vmul.f32 %v15183_v15, %v5145_v3  ;;  %v15328_v15 = vpop.eup %13294  ;;  %v5926_v19 = vmul.f32 %v13293_v35, %v5837_v47  ;;  %v6281_v27 = vmul.f32 %v16620_v24, %v15073_v46  ;;  %13308 = vpow2.f32 %v5035_v17  ;;  %v16625_v24 = vld [vmem:[#allocation76_spill] sm:$0xff] }
 0xc6d   : > { %v5840_v9 = vadd.f32 %v5836_v16, %v5346_v18  ;;  %12712 = vmatpush3.bf16.xpose.msk.msra.mxu1 %vm14224_vm11, %v12710_v8  ;;  %v13297_v54 = vpop.eup %13296  ;;  %v6333_v28 = vmul.f32 1.442695, %v6282_v34  ;;  %13310 = vpow2.f32 %v5033_v43  ;;  %v16621_v21 = vcombine.high %v15091_v6, %v15091_v6  ;;  %v16624_v34 = vld [vmem:[#allocation75_spill] sm:$0xff] }
 0xc6e   : > { %v5839_v45 = vadd.f32 %v5835_v63, %v5345_v22  ;;  %v5122_v5 = vpop.permute.xlu1 %5121  ;;  %v5118_v40 = vpop.permute.xlu0 %5117  ;;  %12721 = vmatprep.subr.bf16.mxu1 %v16543_v1  ;;  %13312 = vpow2.f32 %v6341_v58  ;;  %v15342_v10 = vrot.slane %v15091_v6, %v14017_v20  ;;  %v5748_v60 = vrot.slane %v14846_v38, 3  ;;  %v16622_v63 = vld [vmem:[#allocation64_spill] sm:$0xff]  ;;  %v16623_v22 = vld [vmem:[#allocation65_spill] sm:$0xff] }
 0xc6f   : > { %v5340_v23 = vmul.f32 %v15304_v59, %v5122_v5  ;;  %v5339_v33 = vmul.f32 %v15304_v59, %v5118_v40  ;;  %v13299_v61 = vpop.eup %13298  ;;  %v15338_v47 = vrot.slane %v16621_v21, %v14017_v20  ;;  %13314 = vpow2.f32 %v6339_v51  ;;  %v16626_v21 = vld [vmem:[#allocation79_spill] sm:$0xff] }
 0xc70   : > { %v12718_v55 = vpack.c.bf16 %v5840_v9, %v5839_v45  ;;  %v13301_v8 = vpop.eup %13300  ;;  %v6331_v16 = vmul.f32 1.442695, %v6281_v27  ;;  %v5841_v18 = vrot.slane %v14846_v38, 2  ;;  %13316 = vpow2.f32 %v6333_v28 }
 0xc71   : > { %v5931_v14 = vadd.f32 %v5927_v42, %v5340_v23  ;;  %v5930_v39 = vadd.f32 %v5926_v19, %v5339_v33  ;;  %v6276_v7 = vmul.f32 %v16622_v63, %v15047_v48  ;;  %v5934_v56 = vrot.slane %v14846_v38, 1  ;;  %v13303_v17 = vpop.eup %13302 }
 0xc72   : > { %12720 = vmatpush3.bf16.xpose.msk.msra.mxu0 %vm14224_vm11, %v12718_v55  ;;  %v5103_v53 = vpop.permute.xlu1 %5102  ;;  %v5099_v44 = vpop.permute.xlu0 %5098  ;;  %v6275_v29 = vmul.f32 %v16623_v22, %v15051_v62  ;;  %v6630_v43 = vmul.f32 %v15338_v47, %v16624_v34  ;;  %v5929_v58 = vmul.f32 %v13301_v8, %v5840_v9  ;;  %v5928_v33 = vmul.f32 %v13303_v17, %v5839_v45  ;;  %v16628_v17 = vld [vmem:[#allocation66_spill] sm:$0xff] }
 0xc73   : > { %v12722_v0 = vpack.c.bf16 %v5931_v14, %v5930_v39  ;;  %v6020_v31 = vmul.f32 %v13297_v54, %v5931_v14  ;;  %v5336_v26 = vmul.f32 %v15325_v50, %v5103_v53  ;;  %v6019_v3 = vmul.f32 %v13299_v61, %v5930_v39  ;;  %12729 = vmatprep.subr.bf16.mxu0 %v16543_v1  ;;  %v15364_v42 = vpop.eup %13304  ;;  %v16627_v53 = vld [vmem:[#allocation80_spill] sm:$0xff] }
 0xc74   : > { %v5335_v6 = vmul.f32 %v15325_v50, %v5099_v44  ;;  %12126 = vmatmul.mubr.msk.f32.vlgmr.msra.gmra.mrb[42].mxu1 %vm1180_vm2, %v5748_v60  ;;  %v15369_v51 = vpop.eup %13306  ;;  %13318 = vpow2.f32 %v6331_v16  ;;  %v6629_v27 = vmul.f32 %v15338_v47, %v16625_v24  ;;  %v6321_v28 = vmul.f32 1.442695, %v6276_v7  ;;  %v16632_v24 = vld [vmem:[#allocation90_spill] sm:$0xff] }
 0xc75   : > { %v6024_v13 = vadd.f32 %v6020_v31, %v5336_v26  ;;  %12724 = vmatpush3.bf16.xpose.msk.msra.mxu1 %vm14224_vm11, %v12722_v0  ;;  %12147 = vmatprep.mubr.msk.f32.mxu1 %vm13660_vm1, %v16544_v4  ;;  %v6319_v45 = vmul.f32 1.442695, %v6275_v29  ;;  %v6625_v44 = vmul.f32 %v15125_v52, %v16627_v53 }
 0xc76   : > { %v6023_v35 = vadd.f32 %v6019_v3, %v5335_v6  ;;  %v5130_v5 = vpop.permute.xlu1 %5129  ;;  %v5126_v40 = vpop.permute.xlu0 %5125  ;;  %12725 = vmatprep.subr.bf16.mxu1 %v16543_v1  ;;  %13320 = vpow2.f32 %v6321_v28 }
 0xc77   : > { %v6634_v23 = vmul.f32 %v15174_v36, %v6024_v13  ;;  %v5342_v19 = vmul.f32 %v15304_v59, %v5130_v5  ;;  %v5341_v54 = vmul.f32 %v15304_v59, %v5126_v40  ;;  %v13309_v36 = vpop.eup %13308  ;;  %v6626_v59 = vmul.f32 %v15125_v52, %v16626_v21 }
 0xc78   : > { %v12730_v9 = vpack.c.bf16 %v6024_v13, %v6023_v35  ;;  %v6633_v55 = vmul.f32 %v15189_v25, %v6023_v35  ;;  %v13311_v31 = vpop.eup %13310  ;;  %13322 = vpow2.f32 %v6319_v45 }
 0xc79   : > { %v15374_v14 = vadd.f32 %v6634_v23, %v6630_v43  ;;  %v5933_v39 = vadd.f32 %v5929_v58, %v5342_v19  ;;  %v5932_v61 = vadd.f32 %v5928_v33, %v5341_v54  ;;  %12137 = vmatmul.mubr.msk.f32.vlgmr.msra.gmra.mrb[46].mxu0 %vm1180_vm2, %v5841_v18  ;;  %v13313_v6 = vpop.eup %13312  ;;  %v16629_v43 = vld [vmem:[#allocation81_spill] sm:$0xff]  ;;  %v16630_v58 = vld [vmem:[#allocation82_spill] sm:$0xff] }
 0xc7a   : > { %v15381_v60 = vadd.f32 %v6633_v55, %v6629_v27  ;;  %12732 = vmatpush3.bf16.xpose.msk.msra.mxu0 %vm14224_vm11, %v12730_v9  ;;  %v5111_v25 = vpop.permute.xlu1 %5110  ;;  %v5107_v0 = vpop.permute.xlu0 %5106  ;;  %12158 = vmatprep.mubr.msk.f32.mxu0 %vm13660_vm1, %v16544_v4  ;;  %v6632_v35 = vmul.f32 %v15338_v47, %v16629_v43  ;;  %v16631_v33 = vld [vmem:[#allocation89_spill] sm:$0xff]  ;;  %v6621_v27 = vmul.f32 %v15342_v10, %v16632_v24 }
 0xc7b   : > { %v6728_v26 = vmul.f32 %v15203_v57, %v15374_v14  ;;  %v12726_v3 = vpack.c.bf16 %v5933_v39, %v5932_v61  ;;  %v6022_v8 = vmul.f32 %v13309_v36, %v5933_v39  ;;  %v5338_v16 = vmul.f32 %v15325_v50, %v5111_v25  ;;  %12733 = vmatprep.subr.bf16.mxu0 %v16543_v1  ;;  %v13315_v34 = vpop.eup %13314 }
 0xc7c   : > { %v12738_v18 = vpack.c.bf16 %v15374_v14, %v15381_v60  ;;  %v6727_v63 = vmul.f32 %v15216_v32, %v15381_v60  ;;  %v6021_v7 = vmul.f32 %v13311_v31, %v5932_v61  ;;  %v5337_v13 = vmul.f32 %v15325_v50, %v5107_v0  ;;  %v13317_v19 = vpop.eup %13316  ;;  %v16633_v61 = vld [vmem:[#allocation67_spill] sm:$0xff]  ;;  %v16637_v31 = vld [vmem:[#allocation88_spill] sm:$0xff] }
 0xc7d   : > { %v6272_v57 = vmul.f32 %v16628_v17, %v15047_v48  ;;  %v15398_v22 = vadd.f32 %v6728_v26, %v6626_v59  ;;  %v6026_v29 = vadd.f32 %v6022_v8, %v5338_v16  ;;  %12728 = vmatpush3.bf16.xpose.msk.msra.mxu1 %vm14224_vm11, %v12726_v3  ;;  %v6631_v32 = vmul.f32 %v15338_v47, %v16630_v58  ;;  %v16635_v60 = vld [vmem:[#allocation87_spill] sm:$0xff]  ;;  %v16638_v3 = vld [vmem:[#allocation92_spill] sm:$0xff] }
 0xc7e   : > { %v6731_v5 = vadd.f32 %v6727_v63, %v6625_v44  ;;  %v6025_v40 = vadd.f32 %v6021_v7, %v5337_v13  ;;  %v6472_v50 = vpop.permute.xlu1 %6471  ;;  %v6468_v23 = vpop.permute.xlu0 %6467  ;;  %12737 = vmatprep.subr.bf16.mxu1 %v16543_v1  ;;  %v6622_v54 = vmul.f32 %v15342_v10, %v16631_v33  ;;  %v6271_v36 = vmul.f32 %v16633_v61, %v15051_v62  ;;  %v16634_v44 = vld [vmem:[#allocation86_spill] sm:$0xff]  ;;  %v16636_v0 = vld [vmem:[#allocation91_spill] sm:$0xff] }
 0xc7f   : > { %v6636_v9 = vmul.f32 %v15233_v41, %v6026_v29  ;;  %v6821_v55 = vmul.f32 %v15312_v49, %v15398_v22  ;;  %v13319_v53 = vpop.eup %13318  ;;  %v6628_v41 = vmul.f32 %v15125_v52, %v16634_v44  ;;  %v6627_v49 = vmul.f32 %v15125_v52, %v16635_v60 }
 0xc80   : > { %v12734_v28 = vpack.c.bf16 %v6026_v29, %v6025_v40  ;;  %v6635_v47 = vmul.f32 %v15264_v30, %v6025_v40  ;;  %v12746_v14 = vpack.c.bf16 %v15398_v22, %v6731_v5  ;;  %v6820_v39 = vmul.f32 %v15328_v15, %v6731_v5  ;;  %v16639_v22 = vld [vmem:[#allocation56_spill] sm:$0xff] }
 0xc81   : > { %v6640_v21 = vadd.f32 %v6636_v9, %v6632_v35  ;;  %v15419_v59 = vadd.f32 %v6821_v55, %v6622_v54  ;;  %v6618_v26 = vmul.f32 %v16637_v31, %v16636_v0  ;;  %v6617_v8 = vmul.f32 %v16637_v31, %v16638_v3 }
 0xc82   : > { %v6639_v25 = vadd.f32 %v6635_v47, %v6631_v32  ;;  %12736 = vmatpush3.bf16.xpose.msk.msra.mxu0 %vm14224_vm11, %v12734_v28  ;;  %v6186_v30 = vpop.permute.xlu1 %6185  ;;  %v6182_v15 = vpop.permute.xlu0 %6181  ;;  %v15427_v45 = vadd.f32 %v6820_v39, %v6621_v27  ;;  %v6313_v5 = vmul.f32 1.442695, %v6272_v57  ;;  %v6624_v33 = vmul.f32 %v15342_v10, %v6472_v50 }
 0xc83   : > { %v6730_v16 = vmul.f32 %v15275_v11, %v6640_v21  ;;  %12745 = vmatprep.subr.bf16.mxu0 %v16543_v1  ;;  %v6914_v52 = vmul.f32 %v15364_v42, %v15419_v59  ;;  %v16640_v11 = vld [vmem:[#allocation85_spill] sm:$0xff]  ;;  %v13321_v32 = vpop.eup %13320  ;;  %v6311_v54 = vmul.f32 1.442695, %v6271_v36  ;;  %v6623_v27 = vmul.f32 %v15342_v10, %v6468_v23 }
 0xc84   : > { %v12742_v63 = vpack.c.bf16 %v6640_v21, %v6639_v25  ;;  %v6729_v7 = vmul.f32 %v15293_v12, %v6639_v25  ;;  %12148 = vmatmul.mubr.msk.f32.vlgmr.msra.gmra.mrb[44].mxu1 %vm1180_vm2, %v5934_v56  ;;  %v6913_v13 = vmul.f32 %v15369_v51, %v15427_v45  ;;  %v12754_v17 = vpack.c.bf16 %v15419_v59, %v15427_v45  ;;  %v13323_v23 = vpop.eup %13322 }
 0xc85   : > { %v16641_v29 = vcombine.high %v16640_v11, %v16640_v11  ;;  %v6734_v42 = vadd.f32 %v6730_v16, %v6628_v41  ;;  %12740 = vmatpush3.bf16.xpose.msk.msra.mxu1 %vm14224_vm11, %v12738_v18  ;;  %v15453_v12 = vadd.f32 %v6914_v52, %v6618_v26  ;;  %12169 = vmatprep.mubr.msk.f32.mxu1 %vm13660_vm1, %v16544_v4  ;;  %13324 = vpow2.f32 %v6313_v5 }
 0xc86   : > { %v6733_v56 = vadd.f32 %v6729_v7, %v6627_v49  ;;  %v6453_v51 = vpop.permute.xlu1 %6452  ;;  %v6449_v35 = vpop.permute.xlu0 %6448  ;;  %12741 = vmatprep.subr.bf16.mxu1 %v16543_v1  ;;  %v15458_v58 = vadd.f32 %v6913_v13, %v6617_v8  ;;  %v6278_v28 = vmul.f32 %v6186_v30, %v15067_v2  ;;  %v6277_v50 = vmul.f32 %v6182_v15, %v15073_v46  ;;  %v16642_v7 = vld [vmem:[#allocation41_spill] sm:$0xff] }
 0xc87   : > { %v15449_v43 = vrot.slane %v16641_v29, %v16639_v22  ;;  %v6823_v40 = vmul.f32 %v13313_v6, %v6734_v42  ;;  %13326 = vpow2.f32 %v6311_v54  ;;  %v15487_v36 = vrot.slane %v16640_v11, %v16639_v22 }
 0xc88   : > { %v12750_v24 = vpack.c.bf16 %v6734_v42, %v6733_v56  ;;  %v6822_v18 = vmul.f32 %v13315_v34, %v6733_v56  ;;  %v12762_v6 = vpack.c.bf16 %v15453_v12, %v15458_v58  ;;  %v6325_v21 = vmul.f32 1.442695, %v6278_v28 }
 0xc89   : > { %v6559_v9 = vcombine.high %v15449_v43, %v15449_v43  ;;  %v15464_v55 = vadd.f32 %v6823_v40, %v6624_v33  ;;  %12159 = vmatmul.mubr.msk.f32.vlgmr.msra.gmra.mrb[48].mxu0 %vm1180_vm2, %v14846_v38  ;;  %v6620_v38 = vmul.f32 %v16637_v31, %v6453_v51  ;;  %v6323_v41 = vmul.f32 1.442695, %v6277_v50 }
 0xc8a   : > { %v15471_v57 = vadd.f32 %v6822_v18, %v6623_v27  ;;  %12748 = vmatpush3.bf16.xpose.msk.msra.mxu0 %vm14224_vm11, %v12746_v14  ;;  %v6167_v10 = vpop.permute.xlu1 %6166  ;;  %v6163_v34 = vpop.permute.xlu0 %6162  ;;  %12180 = vmatprep.mubr.msk.f32.mxu0 %vm13660_vm1, %v16544_v4  ;;  %v6619_v14 = vmul.f32 %v16637_v31, %v6449_v35  ;;  %v7007_v25 = vmul.f32 %v13321_v32, %v15453_v12  ;;  %13328 = vpow2.f32 %v6325_v21 }
 0xc8b   : > { %v6916_v47 = vmul.f32 %v13317_v19, %v15464_v55  ;;  %12749 = vmatprep.subr.bf16.mxu0 %v16543_v1  ;;  %v15494_v19 = vrot.slane %v6559_v9, %v14017_v20  ;;  %v7006_v15 = vmul.f32 %v13323_v23, %v15458_v58  ;;  %v6557_v26 = vcombine.high %v15487_v36, %v15487_v36 }
 0xc8c   : > { %v12758_v39 = vpack.c.bf16 %v15464_v55, %v15471_v57  ;;  %v6915_v61 = vmul.f32 %v13319_v53, %v15471_v57  ;;  %13330 = vpow2.f32 %v6323_v41  ;;  %v6274_v16 = vmul.f32 %v6167_v10, %v15067_v2 }
 0xc8d   : > { %v15489_v44 = vadd.f32 %v6916_v47, %v6620_v38  ;;  %12744 = vmatpush3.bf16.xpose.msk.msra.mxu1 %vm14224_vm11, %v12742_v63  ;;  %v6642_v13 = vrot.slane %v16642_v7, 7  ;;  %v6273_v29 = vmul.f32 %v6163_v34, %v15073_v46  ;;  %v15521_v56 = vrot.slane %v6557_v26, %v14017_v20 }
 0xc8e   : > { %v15496_v60 = vadd.f32 %v6915_v61, %v6619_v14  ;;  %v6426_v49 = vpop.permute.xlu1 %6425  ;;  %v6422_v53 = vpop.permute.xlu0 %6421  ;;  %12753 = vmatprep.subr.bf16.mxu1 %v16543_v1  ;;  %v6317_v35 = vmul.f32 1.442695, %v6274_v16  ;;  %v6735_v40 = vrot.slane %v16642_v7, 6 }
 0xc8f   : > { %v6614_v30 = vmul.f32 %v15494_v19, %v6426_v49  ;;  %v6613_v0 = vmul.f32 %v15494_v19, %v6422_v53  ;;  %v13325_v42 = vpop.eup %13324 }
 0xc90   : > { %v12766_v31 = vpack.c.bf16 %v15489_v44, %v15496_v60  ;;  %13332 = vpow2.f32 %v6317_v35 }
 0xc91   : > { %v15507_v3 = vadd.f32 %v7007_v25, %v6614_v30  ;;  %v15509_v8 = vadd.f32 %v7006_v15, %v6613_v0  ;;  %v13327_v51 = vpop.eup %13326 }
 0xc92   : > { %12752 = vmatpush3.bf16.xpose.msk.msra.mxu0 %vm14224_vm11, %v12750_v24  ;;  %v6140_v52 = vpop.permute.xlu1 %6139  ;;  %v6136_v63 = vpop.permute.xlu0 %6135 }
 0xc93   : > { %v12770_v11 = vpack.c.bf16 %v15507_v3, %v15509_v8  ;;  %12761 = vmatprep.subr.bf16.mxu0 %v16543_v1  ;;  %v7100_v33 = vmul.f32 %v13325_v42, %v15507_v3  ;;  %v7099_v59 = vmul.f32 %v13327_v51, %v15509_v8  ;;  %v6268_v24 = vmul.f32 %v6140_v52, %v15047_v48 }
 0xc94   : > { %12170 = vmatmul.mubr.msk.f32.vlgmr.msra.gmra.mrb[46].mxu1 %vm1180_vm2, %v6642_v13  ;;  %v6267_v9 = vmul.f32 %v6136_v63, %v15051_v62  ;;  %v13329_v10 = vpop.eup %13328  ;;  %v6921_v13 = vrot.slane %v16642_v7, 4 }
 0xc95   : > { %12756 = vmatpush3.bf16.xpose.msk.msra.mxu1 %vm14224_vm11, %v12754_v17  ;;  %12191 = vmatprep.mubr.msk.f32.mxu1 %vm13660_vm1, %v16544_v4  ;;  %v6315_v17 = vmul.f32 1.442695, %v6273_v29  ;;  %v6305_v47 = vmul.f32 1.442695, %v6268_v24  ;;  %v7009_v61 = vmul.f32 %v13329_v10, %v15489_v44  ;;  %v6828_v44 = vrot.slane %v16642_v7, 5 }
 0xc96   : > { %v6407_v32 = vpop.permute.xlu1 %6406  ;;  %v6403_v5 = vpop.permute.xlu0 %6402  ;;  %12757 = vmatprep.subr.bf16.mxu1 %v16543_v1  ;;  %v6303_v12 = vmul.f32 1.442695, %v6267_v9 }
 0xc97   : > { %v6610_v54 = vmul.f32 %v15521_v56, %v6407_v32  ;;  %v6609_v45 = vmul.f32 %v15521_v56, %v6403_v5  ;;  %v13331_v23 = vpop.eup %13330  ;;  %13334 = vpow2.f32 %v6315_v17 }
 0xc98   : > { %v7008_v21 = vmul.f32 %v13331_v23, %v15496_v60  ;;  %13336 = vpow2.f32 %v6305_v47 }
 0xc99   : > { %v15537_v18 = vadd.f32 %v7100_v33, %v6610_v54  ;;  %v15539_v27 = vadd.f32 %v7099_v59, %v6609_v45  ;;  %12181 = vmatmul.mubr.msk.f32.vlgmr.msra.gmra.mrb[50].mxu0 %vm1180_vm2, %v6735_v40  ;;  %13338 = vpow2.f32 %v6303_v12  ;;  %v6568_v59 = vrot.slane %v15449_v43, %v14017_v20 }
 0xc9a   : > { %12764 = vmatpush3.bf16.xpose.msk.msra.mxu0 %vm14224_vm11, %v12762_v6  ;;  %v6121_v28 = vpop.permute.xlu1 %6120  ;;  %v6117_v50 = vpop.permute.xlu0 %6116  ;;  %12202 = vmatprep.mubr.msk.f32.mxu0 %vm13660_vm1, %v16544_v4  ;;  %v6564_v43 = vrot.slane %v15487_v36, %v14017_v20 }
 0xc9b   : > { %v12778_v34 = vpack.c.bf16 %v15537_v18, %v15539_v27  ;;  %12765 = vmatprep.subr.bf16.mxu0 %v16543_v1  ;;  %v6264_v58 = vmul.f32 %v6121_v28, %v15047_v48  ;;  %v6263_v55 = vmul.f32 %v6117_v50, %v15051_v62  ;;  %v13333_v0 = vpop.eup %13332 }
 0xc9d   : > { %12760 = vmatpush3.bf16.xpose.msk.msra.mxu1 %vm14224_vm11, %v12758_v39  ;;  %v6297_v49 = vmul.f32 1.442695, %v6264_v58 }
 0xc9e   : > { %v6434_v6 = vpop.permute.xlu1 %6433  ;;  %v6430_v38 = vpop.permute.xlu0 %6429  ;;  %12769 = vmatprep.subr.bf16.mxu1 %v16543_v1 }
 0xc9f   : > { %v6616_v14 = vmul.f32 %v15494_v19, %v6434_v6  ;;  %v6615_v41 = vmul.f32 %v15494_v19, %v6430_v38  ;;  %v6295_v19 = vmul.f32 1.442695, %v6263_v55  ;;  %13340 = vpow2.f32 %v6297_v49 }
 0xca0   : > { %v7014_v38 = vrot.slane %v16642_v7, 3 }
 0xca1   : > { %v7013_v57 = vadd.f32 %v7009_v61, %v6616_v14  ;;  %v7012_v39 = vadd.f32 %v7008_v21, %v6615_v41  ;;  %13342 = vpow2.f32 %v6295_v19 }
 0xca2   : > { %12768 = vmatpush3.bf16.xpose.msk.msra.mxu0 %vm14224_vm11, %v12766_v31  ;;  %v6148_v53 = vpop.permute.xlu1 %6147  ;;  %v6144_v25 = vpop.permute.xlu0 %6143 }
 0xca3   : > { %v12774_v30 = vpack.c.bf16 %v7013_v57, %v7012_v39  ;;  %v6270_v15 = vmul.f32 %v6148_v53, %v15067_v2  ;;  %v6269_v60 = vmul.f32 %v6144_v25, %v15073_v46  ;;  %12777 = vmatprep.subr.bf16.mxu0 %v16543_v1  ;;  %v13335_v31 = vpop.eup %13334  ;;  %v7102_v29 = vmul.f32 %v13333_v0, %v7013_v57 }
 0xca4   : > { %12192 = vmatmul.mubr.msk.f32.vlgmr.msra.gmra.mrb[48].mxu1 %vm1180_vm2, %v6828_v44  ;;  %v7101_v51 = vmul.f32 %v13335_v31, %v7012_v39  ;;  %v13337_v5 = vpop.eup %13336  ;;  %v7107_v25 = vrot.slane %v16642_v7, 2 }
 0xca5   : > { %v6309_v26 = vmul.f32 1.442695, %v6270_v15  ;;  %12772 = vmatpush3.bf16.xpose.msk.msra.mxu1 %vm14224_vm11, %v12770_v11  ;;  %12213 = vmatprep.mubr.msk.f32.mxu1 %vm13660_vm1, %v16544_v4  ;;  %v6307_v16 = vmul.f32 1.442695, %v6269_v60  ;;  %v13339_v54 = vpop.eup %13338  ;;  %v7193_v24 = vmul.f32 %v13337_v5, %v15537_v18  ;;  %v16643_v5 = vld [vmem:[#allocation40_spill] sm:$0xff] }
 0xca6   : > { %v6415_v52 = vpop.permute.xlu1 %6414  ;;  %v6411_v63 = vpop.permute.xlu0 %6410  ;;  %12773 = vmatprep.subr.bf16.mxu1 %v16543_v1  ;;  %v7192_v10 = vmul.f32 %v13339_v54, %v15539_v27  ;;  %v13528_v54 = vld [vmem:[%s13723_s19] sm:$0xff]  }
 0xca7   : > { %v6612_v42 = vmul.f32 %v15521_v56, %v6415_v52  ;;  %v6611_v3 = vmul.f32 %v15521_v56, %v6411_v63  ;;  %13344 = vpow2.f32 %v6309_v26 }
 0xca8   : > { %13346 = vpow2.f32 %v6307_v16 }
 0xca9   : > { %v7106_v8 = vadd.f32 %v7102_v29, %v6612_v42  ;;  %v7105_v11 = vadd.f32 %v7101_v51, %v6611_v3  ;;  %12203 = vmatmul.mubr.msk.f32.vlgmr.msra.gmra.mrb[52].mxu0 %vm1180_vm2, %v6921_v13  ;;  %v13341_v23 = vpop.eup %13340 }
 0xcaa   : > { %12780 = vmatpush3.bf16.xpose.msk.msra.mxu0 %vm14224_vm11, %v12778_v34  ;;  %v6129_v35 = vpop.permute.xlu1 %6128  ;;  %v6125_v32 = vpop.permute.xlu0 %6124  ;;  %12224 = vmatprep.mubr.msk.f32.mxu0 %vm13660_vm1, %v16544_v4 }
 0xcab   : > { %v12782_v40 = vpack.c.bf16 %v7106_v8, %v7105_v11  ;;  %v6266_v33 = vmul.f32 %v6129_v35, %v15067_v2  ;;  %v6265_v56 = vmul.f32 %v6125_v32, %v15073_v46  ;;  %12781 = vmatprep.subr.bf16.mxu0 %v16543_v1  ;;  %v13343_v58 = vpop.eup %13342  ;;  %v7200_v32 = vrot.slane %v16642_v7, 1 }
 0xcad   : > { %v6301_v45 = vmul.f32 1.442695, %v6266_v33  ;;  %v6299_v17 = vmul.f32 1.442695, %v6265_v56  ;;  %12776 = vmatpush3.bf16.xpose.msk.msra.mxu1 %vm14224_vm11, %v12774_v30  ;;  %v15636_v56 = vld [vmem:[%s16497_s6] sm:$0xff]  ;;  %s16647_s6 = smov %s16646_s26 }
 0xcae   : > { %v6388_v9 = vpop.permute.xlu1 %6387  ;;  %v6384_v28 = vpop.permute.xlu0 %6383  ;;  %12785 = vmatprep.subr.bf16.mxu1 %v16543_v1 }
 0xcaf   : > { %13348 = vpow2.f32 %v6301_v45  ;;  %v6606_v50 = vmul.f32 %v6568_v59, %v6388_v9  ;;  %v6605_v34 = vmul.f32 %v6568_v59, %v6384_v28 }
 0xcb0   : > { %13350 = vpow2.f32 %v6299_v17 }
 0xcb1   : > { %v7197_v47 = vadd.f32 %v7193_v24, %v6606_v50  ;;  %v7196_v12 = vadd.f32 %v7192_v10, %v6605_v34  ;;  %v13345_v61 = vpop.eup %13344 }
 0xcb2   : > { %12784 = vmatpush3.bf16.xpose.msk.msra.mxu0 %vm14224_vm11, %v12782_v40  ;;  %v6369_v18 = vpop.permute.xlu1 %6368  ;;  %v6365_v6 = vpop.permute.xlu0 %6364  ;;  %v7195_v44 = vmul.f32 %v13345_v61, %v7106_v8  ;;  %v16644_v40 = vld [vmem:[#allocation39_spill] sm:$0xff] }
 0xcb3   : > { %v12786_v14 = vpack.c.bf16 %v7197_v47, %v7196_v12  ;;  %v7286_v21 = vmul.f32 %v13341_v23, %v7197_v47  ;;  %v6602_v27 = vmul.f32 %v6564_v43, %v6369_v18  ;;  %v7285_v41 = vmul.f32 %v13343_v58, %v7196_v12  ;;  %12793 = vmatprep.subr.bf16.mxu0 %v16543_v1  ;;  %v13347_v55 = vpop.eup %13346 }
 0xcb4   : > { %v6601_v57 = vmul.f32 %v6564_v43, %v6365_v6  ;;  %12214 = vmatmul.mubr.msk.f32.vlgmr.msra.gmra.mrb[50].mxu1 %vm1180_vm2, %v7014_v38  ;;  %v7194_v15 = vmul.f32 %v13347_v55, %v7105_v11  ;;  %v16645_v33 = vpack.c.bf16 %v16643_v5, %v16644_v40 }
 0xcb5   : > { %v7290_v36 = vadd.f32 %v7286_v21, %v6602_v27  ;;  %12788 = vmatpush3.bf16.xpose.msk.msra.mxu1 %vm14224_vm11, %v12786_v14  ;;  %12235 = vmatprep.mubr.msk.f32.mxu1 %vm13660_vm1, %v16544_v4 }
 0xcb6   : > { %v7289_v39 = vadd.f32 %v7285_v41, %v6601_v57  ;;  %v6396_v49 = vpop.permute.xlu1 %6395  ;;  %v6392_v53 = vpop.permute.xlu0 %6391  ;;  %12789 = vmatprep.subr.bf16.mxu1 %v16543_v1 }
 0xcb7   : > { %v6608_v30 = vmul.f32 %v6568_v59, %v6396_v49  ;;  %v6607_v60 = vmul.f32 %v6568_v59, %v6392_v53 }
 0xcb8   : > { %v12794_v19 = vpack.c.bf16 %v7290_v36, %v7289_v39 }
 0xcb9   : > { %v13349_v0 = vpop.eup %13348  ;;  %v7199_v26 = vadd.f32 %v7195_v44, %v6608_v30  ;;  %v7198_v31 = vadd.f32 %v7194_v15, %v6607_v60  ;;  %12225 = vmatmul.mubr.msk.f32.vlgmr.msra.gmra.mrb[54].mxu0 %vm1180_vm2, %v7107_v25 }
 0xcba   : > { %v13351_v16 = vpop.eup %13350  ;;  %12796 = vmatpush3.bf16.xpose.msk.msra.mxu0 %vm14224_vm11, %v12794_v19  ;;  %v6377_v52 = vpop.permute.xlu1 %6376  ;;  %12246 = vmatprep.mubr.msk.f32.mxu0 %vm13660_vm1, %v16544_v4 }
 0xcbb   : > { %v6373_v63 = vpop.permute.xlu0 %6372  ;;  %v12790_v13 = vpack.c.bf16 %v7199_v26, %v7198_v31  ;;  %v7288_v29 = vmul.f32 %v13349_v0, %v7199_v26  ;;  %v6604_v42 = vmul.f32 %v6564_v43, %v6377_v52  ;;  %v7287_v51 = vmul.f32 %v13351_v16, %v7198_v31  ;;  %12797 = vmatprep.subr.bf16.mxu0 %v16543_v1 }
 0xcbc   : > { %v6603_v3 = vmul.f32 %v6564_v43, %v6373_v63 }
 0xcbd   : > { %v7292_v8 = vadd.f32 %v7288_v29, %v6604_v42  ;;  %12792 = vmatpush3.bf16.xpose.msk.msra.mxu1 %vm14224_vm11, %v12790_v13 }
 0xcbe   : > { %v7291_v11 = vadd.f32 %v7287_v51, %v6603_v3  ;;  %12801 = vmatprep.subr.bf16.mxu1 %v16543_v1  ;;  %v16649_v51 = vld [vmem:[#allocation45_spill] sm:$0xff] }
 0xcc0   : > { %v12798_v35 = vpack.c.bf16 %v7292_v8, %v7291_v11 }
 0xcc2   : > { %12800 = vmatpush3.bf16.xpose.msk.msra.mxu0 %vm14224_vm11, %v12798_v35 }
 0xcc3   : > { %12804 = vmatprep.subr.bf16.mxu0 %v16543_v1 }
 0xcc4   : > { %12236 = vmatmul.mubr.msk.f32.vlgmr.msra.gmra.mrb[52].mxu1 %vm1180_vm2, %v7200_v32 }
 0xcc5   : > { %12253 = vmatprep.mubr.msk.f32.mxu1 %vm13660_vm1, %v16544_v4 }
 0xcc9   : > { %12247 = vmatmul.mubr.msk.f32.vlgmr.msra.gmra.mrb[56].mxu0 %vm1180_vm2, %v16642_v7  ;;  %v13529_v7 = vld [vmem:[%s13723_s19 + $0x8] sm:$0xff]  }
 0xcca   : > { %12806 = vmatpush3.bf16.msra.mxu0 %v16645_v33  ;;  %12260 = vmatprep.mubr.msk.f32.mxu0 %vm13660_vm1, %v16544_v4 }
 0xccb   : > { %12268 = vmatprep.subr.bf16.mxu0 %v16544_v4  ;;  %v15653_v42 = vpop.permute.xlu0 %4514 }
 0xccc   : > { %16648 = vst [vmem:[#allocation68_spill] sm:$0xff] %v15653_v42  ;;  %v4517_v3 = vmul.f32 %v15653_v42, %v16649_v51 }
 0xccd   : > { %12261 = vmatmul.mubr.msk.f32.vlgmr.msra.gmra.mrb[58].mxu0 %vm1074_vm0, %v15636_v56 }
 0xcce   : > { %12269 = vmatpush3.bf16.msra.mxu0 %v13528_v54  ;;  %12272 = vmatprep.mubr.msk.bf16.mxu0 %vm13660_vm1, %v16544_v4  ;;  %v11271_v35 = vmul.f32 -1.442695, %v4517_v3 }
 0xccf   : > { %12270 = vmatprep.subr.bf16.mxu0 %v16544_v4 }
 0xcd0   : > { %13352 = vpow2.f32 %v11271_v35 }
 0xcd2   : > { %12271 = vmatpush3.bf16.msra.mxu0 %v13529_v7 }
 0xcd3   : > { %12284 = vmatprep.subr.bf16.mxu0 %v16544_v4 }
 0xd27   : > { %v5457_v59 = vpop.f32.mrb[30].mxu1 }
 0xd28   : > { %v12083_v45 = vpop.f32.mrb[31].mxu1  ;;  %v7417_v49 = vrot.slane %v5457_v59, 1 }
 0xd2c   : > { %v5550_v17 = vpop.f32.mrb[34].mxu0 }
 0xd2d   : > { %v12094_v24 = vpop.f32.mrb[35].mxu0  ;;  %v7414_v36 = vrot.slane %v5550_v17, 2  ;;  %v11366_v17 = vld [vmem:[%s16646_s26] ss:$0 sm:$0xff]  ;;  %s16652_s26 = sld [smem:[#allocation32_spill]] }
 0xd33   : > { %s16653_s16 = smov %s16652_s26 }
 0xd34   : > { %v13558_v37 = vld [vmem:[%s16653_s16] sm:$0xff] }
 0xd37   : > { %v5643_v9 = vpop.f32.mrb[40].mxu1 }
 0xd38   : > { %v12105_v28 = vpop.f32.mrb[41].mxu1  ;;  %v7411_v55 = vrot.slane %v5643_v9, 3 }
 0xd3c   : > { %v5736_v50 = vpop.f32.mrb[44].mxu0 }
 0xd3d   : > { %v12116_v10 = vpop.f32.mrb[45].mxu0  ;;  %v7408_v27 = vrot.slane %v5736_v50, 4 }
 0xd47   : > { %v5829_v34 = vpop.f32.mrb[42].mxu1 }
 0xd48   : > { %v12127_v23 = vpop.f32.mrb[43].mxu1  ;;  %v7405_v61 = vrot.slane %v5829_v34, 5 }
 0xd4c   : > { %v5922_v43 = vpop.f32.mrb[46].mxu0 }
 0xd4d   : > { %v12138_v47 = vpop.f32.mrb[47].mxu0  ;;  %v7402_v6 = vrot.slane %v5922_v43, 6 }
 0xd57   : > { %v6015_v12 = vpop.f32.mrb[44].mxu1 }
 0xd58   : > { %v12149_v58 = vpop.f32.mrb[45].mxu1  ;;  %v7399_v18 = vrot.slane %v6015_v12, 7  ;;  %v16650_v12 = vld [vmem:[#allocation58_spill] sm:$0xff] }
 0xd59   : > { %v7439_v58 = vmul.f32 %v11366_v17, %v16650_v12 }
 0xd5c   : > { %v6107_v38 = vpop.f32.mrb[48].mxu0 }
 0xd5d   : > { %v7426_v14 = vsel %vm4411_vm12, %v6107_v38, %v7399_v18  ;;  %v12160_v21 = vpop.f32.mrb[49].mxu0  ;;  %v16651_v18 = vld [vmem:[#allocation44_spill] sm:$0xff] }
 0xd5e   : > { %v7427_v41 = vsel %vm4413_vm13, %v7426_v14, %v7402_v6  ;;  %v7440_v6 = vmul.f32 %v11366_v17, %v16651_v18  ;;  %v13532_v17 = vld [vmem:[%s16496_s8] ss:$0 sm:$0xff]  ;;  %s13664_s8 = smov [#allocation2]  }
 0xd5f   : > { %v7428_v57 = vsel %vm4415_vm14, %v7427_v41, %v7405_v61  ;;  %v13353_v41 = vpop.eup %13352 }
 0xd60   : > { %v7429_v39 = vsel %vm4417_vm15, %v7428_v57, %v7408_v27 }
 0xd61   : > { %v7430_v53 = vsel %vm4419_vm3, %v7429_v39, %v7411_v55  ;;  %v4521_v55 = vadd.f32 1.0, %v13353_v41 }
 0xd62   : > { %v7431_v25 = vsel %vm4421_vm4, %v7430_v53, %v7414_v36 }
 0xd63   : > { %v7432_v44 = vsel %vm4423_vm5, %v7431_v25, %v7417_v49 }
 0xd64   : > { %v7442_v21 = vadd.f32 %v7440_v6, %v7432_v44  ;;  %v13538_v6 = vld [vmem:[%s16513_s18] ss:$0 sm:$0xff] }
 0xd67   : > { %v6723_v30 = vpop.f32.mrb[46].mxu1 }
 0xd68   : > { %v12171_v15 = vpop.f32.mrb[47].mxu1  ;;  %v7396_v34 = vrot.slane %v6723_v30, 1 }
 0xd6c   : > { %v6816_v60 = vpop.f32.mrb[50].mxu0 }
 0xd6d   : > { %v12182_v19 = vpop.f32.mrb[51].mxu0  ;;  %v7393_v28 = vrot.slane %v6816_v60, 2 }
 0xd77   : > { %v6909_v0 = vpop.f32.mrb[48].mxu1 }
 0xd78   : > { %v12193_v26 = vpop.f32.mrb[49].mxu1  ;;  %v7390_v24 = vrot.slane %v6909_v0, 3 }
 0xd7c   : > { %v7002_v31 = vpop.f32.mrb[52].mxu0 }
 0xd7d   : > { %v12204_v16 = vpop.f32.mrb[53].mxu0  ;;  %v7387_v59 = vrot.slane %v7002_v31, 4 }
 0xd87   : > { %v7095_v52 = vpop.f32.mrb[50].mxu1 }
 0xd88   : > { %v12215_v63 = vpop.f32.mrb[51].mxu1  ;;  %v7384_v33 = vrot.slane %v7095_v52, 5 }
 0xd89   : > { %v16654_v63 = vld [vmem:[#allocation38_spill] sm:$0xff] }
 0xd8c   : > { %v7188_v13 = vpop.f32.mrb[54].mxu0 }
 0xd8d   : > { %v12226_v29 = vpop.f32.mrb[55].mxu0  ;;  %v7381_v5 = vrot.slane %v7188_v13, 6 }
 0xd97   : > { %v7281_v8 = vpop.f32.mrb[52].mxu1 }
 0xd98   : > { %v12237_v11 = vpop.f32.mrb[53].mxu1  ;;  %v7378_v32 = vrot.slane %v7281_v8, 7 }
 0xd9c   : > { %v7373_v40 = vpop.f32.mrb[56].mxu0 }
 0xd9d   : > { %v7419_v54 = vsel %vm4411_vm12, %v7373_v40, %v7378_v32  ;;  %v12248_v7 = vpop.f32.mrb[57].mxu0  ;;  %v7602_v32 = vld [vmem:[%s16652_s26] sm:$0xff]  ;;  %v13531_v40 = vld [vmem:[%s13733_s30 + $0x8] sm:$0xff]   ;;  %s1061_s26 = sand.u32 1, %s13614_s23  }
 0xd9e   : > { %v7420_v45 = vsel %vm4413_vm13, %v7419_v54, %v7381_v5  ;;  %v13530_v5 = vld [vmem:[%s13733_s30] sm:$0xff]  }
 0xd9f   : > { %v7421_v9 = vsel %vm4415_vm14, %v7420_v45, %v7384_v33 }
 0xda0   : > { %v7422_v50 = vsel %vm4417_vm15, %v7421_v9, %v7387_v59  ;;  %v7587_v10 = vpop.f32.mrb[58].mxu0  ;;  %v13533_v9 = vld [vmem:[%s13718_s14] ss:$0 sm:$0xff] }
 0xda1   : > { %v7423_v23 = vsel %vm4419_vm3, %v7422_v50, %v7390_v24  ;;  %v11370_v43 = vmul.f32 -1.442695, %v7587_v10  ;;  %v12262_v47 = vpop.f32.mrb[59].mxu0 }
 0xda2   : > { %v7424_v38 = vsel %vm4421_vm4, %v7423_v23, %v7393_v28  ;;  %v13536_v23 = vld [vmem:[%s13743_s12 + $0x8] sm:$0xff]  }
 0xda3   : > { %13354 = vpow2.f32 %v11370_v43  ;;  %v7425_v61 = vsel %vm4423_vm5, %v7424_v38, %v7396_v34  ;;  %v13535_v34 = vld [vmem:[%s16515_s1] sm:$0xff]   ;;  %v13537_v43 = vld [vmem:[%s16515_s1 + $0x8] sm:$0xff]   ;;  %s11154_s1 = sshll.u32 %s1061_s26, 3 }
 0xda4   : > { %v7441_v14 = vadd.f32 %v7439_v58, %v7425_v61  ;;  %13356 = vrcp.f32 %v4521_v55 }
 0xda6   : > { %v12802_v27 = vpack.c.bf16 %v7442_v21, %v7441_v14 }
 0xda8   : > { %12803 = vmatpush3.bf16.msra.mxu1 %v12802_v27 }
 0xda9   : > { %12263 = vmatprep.subr.mxu1 %v16544_v4 }
 0xdab   : > { %12254 = vmatmul.mubr.msk.f32.vlgmr.msra.gmra.mrb[54].mxu1 %vm1074_vm0, %v15636_v56  ;;  %vm7603_vm0 = vcmask 64512  }
 0xdac   : > { %12265 = vmatprep.mubr.msk.f32.mxu1 %vm13660_vm1, %v16544_v4 }
 0xdad   : > { %v13355_v57 = vpop.eup %13354 }
 0xdae   : > { %v7594_v36 = vadd.f32 1.0, %v13355_v57  ;;  %v13357_v39 = vpop.eup %13356 }
 0xdaf   : > { %v4524_v53 = vmul.f32 %v13357_v39, %v4517_v3  ;;  %v13540_v39 = vld [vmem:[%s16516_s7 + $0x8] sm:$0xff]  }
 0xdb0   : > { %13358 = vrcp.f32 %v7594_v36  ;;  %v13539_v36 = vld [vmem:[%s16516_s7] sm:$0xff]  }
 0xdba   : > { %v13359_v49 = vpop.eup %13358 }
 0xdbb   : > { %v7597_v25 = vmul.f32 %v13359_v49, %v7587_v10  ;;  %v13534_v10 = vld [vmem:[%s13743_s12] sm:$0xff]  }
 0xdbd   : > { %v7598_v44 = vmul.f32 %v7597_v25, %v4524_v53  ;;  %v13541_v53 = vld [vmem:[%s16519_s3] ss:$0 sm:$0xff]  ;;  %s1063_s3 = scalar_lea.vmem [#allocation2], %s11154_s1 }
 0xe7e   : > { %v7509_v30 = vpop.f32.mrb[54].mxu1 }
 0xe7f   : > { %v7513_v15 = vmul.f32 %v7509_v30, %v15653_v42  ;;  %v12255_v60 = vpop.f32.mrb[55].mxu1 }
 0xe81   : > { %v11368_v19 = vmul.f32 -1.442695, %v7513_v15 }
 0xe83   : > { %13360 = vpow2.f32 %v11368_v19 }
 0xe8d   : > { %v13361_v0 = vpop.eup %13360 }
 0xe8e   : > { %v7517_v56 = vadd.f32 1.0, %v13361_v0 }
 0xe90   : > { %13362 = vrcp.f32 %v7517_v56 }
 0xe9a   : > { %v13363_v26 = vpop.eup %13362 }
 0xe9b   : > { %v7520_v31 = vmul.f32 %v13363_v26, %v7513_v15 }
 0xe9d   : > { %v7599_v16 = vmul.f32 %v7597_v25, %v7520_v31 }
 0xe9f   : > { %v7600_v52 = vadd.f32 %v7599_v16, %v7598_v44 }
 0xea1   : > { %v7601_v13 = vadd.f32 %v7600_v52, %v16654_v63 }
 0xea3   : > { %12264 = vmatpush3.msra.mxu1 %v7601_v13  ;;  %v7677_v29 = vsel %vm1180_vm2, %v7601_v13, 0.0 }
 0xea4   : > { %7678 = vadd.xlane.f32.xlu1 %v7677_v29  ;;  %12276 = vmatprep.subr.bf16.mxu1 %v16544_v4 }
 0xea5   : > { %12266 = vmatmul.mubr.msk.f32.vlgmr.msra.gmra.mrb[56].mxu1 %vm7603_vm0, %v7602_v32  ;;  %v13542_v32 = vld [vmem:[%s16521_s5] sm:$0xff]  }
 0xea6   : > { %12277 = vmatpush3.bf16.msra.mxu1 %v13530_v5  ;;  %12280 = vmatprep.mubr.msk.bf16.mxu1 %vm13660_vm1, %v16544_v4  ;;  %v13543_v5 = vld [vmem:[%s16521_s5 + $0x8] sm:$0xff]   ;;  %s11056_s5 = sshll.u32 %s1063_s3, 4  ;;  %s16337_s5 = int_to_ptr.vmem [resolvable:$true] %s11056_s5 }
 0xea7   : > { %12278 = vmatprep.subr.bf16.mxu1 %v16544_v4  ;;  %s13560_s7 = scalar_lea.vmem %s16337_s5, 128 }
 0xea8   : > { %p13561_p11 = scmp.ne.s32.totalorder %s16337_s5, %s13560_s7 }
 0xeaa   : > { %12279 = vmatpush3.bf16.msra.mxu1 %v13531_v40  ;;  %p13562_p12 = pnand %p13561_p11, %p13888_p5 }
 0xeab   : > { %12292 = vmatprep.subr.bf16.mxu1 %v16544_v4 }
 0xeac   : > { %p13563_p13 = pneg %p13562_p12 }
 0xf31   : > { %v7679_v51 = vpop.xlane.xlu1 %7678 }
 0xf32   : > { %v7680_v3 = vmul.f32 0.03125, %v7679_v51 }
 0xf34   : > { %v7681_v8 = vsub.f32 %v7601_v13, %v7680_v3 }
 0xf36   : > { %v7682_v11 = vmul.f32 %v7681_v8, %v7681_v8 }
 0xf38   : > { %v7683_v35 = vsel %vm1180_vm2, %v7682_v11, 0.0 }
 0xf39   : > { %7684 = vadd.xlane.f32.xlu0 %v7683_v35 }
 0xf78   : > { %v15701_v47 = vpop.f32.mrb[56].mxu1 }
 0xf79   : > { %16655 = vst [vmem:[#allocation42_spill] sm:$0xff] %v15701_v47  ;;  %v12267_v12 = vpop.f32.mrb[57].mxu1 }
 0xfc6   : > { %v7685_v33 = vpop.xlane.xlu0 %7684 }
 0xfc7   : > { %v7686_v54 = vmul.f32 0.03125, %v7685_v33 }
 0xfc9   : > { %v7687_v7 = vadd.f32 1e-05, %v7686_v54  ;;  %v13544_v54 = vld [vmem:[%s16522_s9] ss:$0 sm:$0xff] }
 0xfcb   : > { %13364 = vrsqrt.f32 %v7687_v7 }
 0xfd5   : > { %v13365_v59 = vpop.eup %13364 }
 0xfd6   : > { %v7689_v45 = vmul.f32 %v13365_v59, %v7681_v8 }
 0xfd8   : > { %v7690_v24 = vmul.f32 %v13532_v17, %v7689_v45 }
 0xfda   : > { %v7691_v28 = vadd.f32 %v13533_v9, %v7690_v24 }
 0xfdc   : > { %v7692_v50 = vpack.c.bf16 %v7691_v28, %v7691_v28 }
 0xfde   : > { %12273 = vmatmul.mubr.msk.bf16.vlgmr.msra.gmra.mrb[60].mxu0 %vm1180_vm2, %v7692_v50  ;;  %12281 = vmatmul.mubr.msk.bf16.vlgmr.msra.gmra.mrb[60].mxu1 %vm1180_vm2, %v7692_v50 }
 0xfdf   : > { %12285 = vmatpush3.bf16.msra.mxu0 %v13534_v10  ;;  %12288 = vmatprep.mubr.msk.bf16.mxu0 %vm13660_vm1, %v16544_v4 }
 0xfe0   : > { %12286 = vmatprep.subr.bf16.mxu0 %v16544_v4  ;;  %12293 = vmatpush3.bf16.msra.mxu1 %v13535_v34 }
 0xfe1   : > { %12294 = vmatprep.subr.bf16.mxu1 %v16544_v4  ;;  %12296 = vmatprep.mubr.msk.bf16.mxu1 %vm13660_vm1, %v16544_v4 }
 0xfe3   : > { %12287 = vmatpush3.bf16.msra.mxu0 %v13536_v23 }
 0xfe4   : > { %12300 = vmatprep.subr.bf16.mxu0 %v16544_v4  ;;  %12295 = vmatpush3.bf16.msra.mxu1 %v13537_v43 }
 0xfe5   : > { %12308 = vmatprep.subr.bf16.mxu1 %v16544_v4 }
0x10b1   : > { %v15703_v58 = vpop.f32.mrb[60].mxu0  ;;  %v7770_v18 = vpop.f32.mrb[60].mxu1 }
0x10b2   : > { %16656 = vst [vmem:[#allocation69_spill] sm:$0xff] %v15703_v58  ;;  %v7771_v38 = vadd.f32 %v13538_v6, %v7770_v18  ;;  %v12274_v61 = vpop.f32.mrb[61].mxu0  ;;  %v12282_v14 = vpop.f32.mrb[61].mxu1 }
0x10b3   : > { %v7733_v21 = vpop.f32.mrb[62].mxu0  ;;  %v7773_v27 = vpop.f32.mrb[62].mxu1 }
0x10b4   : > { %v15706_v41 = vpack.c.bf16 %v7771_v38, %v7771_v38  ;;  %v12275_v55 = vpop.f32.mrb[63].mxu0  ;;  %v12283_v57 = vpop.f32.mrb[63].mxu1 }
0x10b6   : > { %12289 = vmatmul.mubr.msk.bf16.vlgmr.msra.gmra.mrb[64].mxu0 %vm1180_vm2, %v15706_v41 }
0x10b7   : > { %12301 = vmatpush3.bf16.msra.mxu0 %v13539_v36  ;;  %12304 = vmatprep.mubr.msk.bf16.mxu0 %vm13660_vm1, %v16544_v4 }
0x10b8   : > { %12302 = vmatprep.subr.bf16.mxu0 %v16544_v4 }
0x10bb   : > { %12303 = vmatpush3.bf16.msra.mxu0 %v13540_v39 }
0x10bc   : > { %12807 = vmatprep.subr.bf16.mxu0 %v16543_v1 }
0x1189   : > { %v7814_v49 = vpop.f32.mrb[64].mxu0 }
0x118a   : > { %v7815_v25 = vadd.f32 %v13541_v53, %v7814_v49  ;;  %v12290_v44 = vpop.f32.mrb[65].mxu0 }
0x118b   : > { %v7817_v30 = vpop.f32.mrb[66].mxu0  ;;  %v16657_v44 = vld [vmem:[#allocation46_spill] sm:$0xff] }
0x118c   : > { %v7823_v15 = vand.u32 2147483647, %v7815_v25  ;;  %v12291_v60 = vpop.f32.mrb[67].mxu0  ;;  %v7820_v51 = vmax.f32 %v7815_v25, 0.0  ;;  %vm7821_vm10 = vcmp.ne.f32.partialorder %v7815_v25, %v7815_v25 }
0x118e   : > { %v7824_v19 = vsub.f32 0.0, %v7823_v15  ;;  %v16658_v15 = vld [vmem:[#allocation47_spill] sm:$0xff] }
0x1190   : > { %v7825_v0 = vmul.f32 1.442695, %v7824_v19  ;;  %v16659_v19 = vld [vmem:[#allocation48_spill] sm:$0xff] }
0x1192   : > { %13366 = vpow2.f32 %v7825_v0 }
0x119c   : > { %v13367_v56 = vpop.eup %13366 }
0x119d   : > { %v7827_v26 = vadd.f32 1.0, %v13367_v56  ;;  %v7830_v31 = vmul.f32 -0.5, %v13367_v56  ;;  %v7833_v52 = vand.u32 2147483647, %v13367_v56 }
0x119f   : > { %13368 = vlog2.f32 %v7827_v26  ;;  %v7831_v16 = vadd.f32 1.0, %v7830_v31  ;;  %vm7834_vm9 = vcmp.lt.f32.partialorder %v7833_v52, 0.0004427343  ;;  %v16661_v31 = vld [vmem:[#allocation50_spill] sm:$0xff]  ;;  %v16662_v52 = vld [vmem:[#allocation51_spill] sm:$0xff] }
0x11a1   : > { %v7832_v29 = vmul.f32 %v13367_v56, %v7831_v16  ;;  %v16660_v56 = vld [vmem:[#allocation49_spill] sm:$0xff] }
0x11a9   : > { %v13369_v63 = vpop.eup %13368 }
0x11aa   : > { %v7829_v13 = vmul.f32 0.6931472, %v13369_v63 }
0x11ac   : > { %v7835_v3 = vsel %vm7834_vm9, %v7832_v29, %v7829_v13  ;;  %v16663_v13 = vld [vmem:[#allocation52_spill] sm:$0xff] }
0x11ad   : > { %v7836_v8 = vadd.f32 %v7835_v3, %v7820_v51 }
0x11af   : > { %v15717_v11 = vsel %vm7821_vm10, %v7815_v25, %v7836_v8 }
0x11b0   : > { %v7838_v35 = vpack.c.bf16 %v15717_v11, %v15717_v11 }
0x11b2   : > { %12297 = vmatmul.mubr.msk.bf16.vlgmr.msra.gmra.mrb[64].mxu1 %vm1180_vm2, %v7838_v35  ;;  %12305 = vmatmul.mubr.msk.bf16.vlgmr.msra.gmra.mrb[68].mxu0 %vm1180_vm2, %v7838_v35 }
0x11b3   : > { %12309 = vmatpush3.bf16.msra.mxu1 %v13542_v32  ;;  %12312 = vmatprep.mubr.msk.bf16.mxu1 %vm13660_vm1, %v16544_v4 }
0x11b4   : > { %12310 = vmatprep.subr.bf16.mxu1 %v16544_v4  ;;  %12324 = vmatprep.mubr.msk.f32.mxu0 %vm13660_vm1, %v16544_v4 }
0x11b7   : > { %12311 = vmatpush3.bf16.msra.mxu1 %v13543_v5 }
0x11b8   : > { %12815 = vmatprep.subr.bf16.mxu1 %v16543_v1 }
0x11ba   : > { %12313 = vmatmul.mubr.msk.bf16.vlgmr.msra.gmra.mrb[68].mxu1 %vm1180_vm2, %v7838_v35 }
0x11bb   : > { %12335 = vmatprep.mubr.msk.f32.mxu1 %vm13660_vm1, %v16544_v4 }
0x1285   : > { %v7876_v40 = vpop.f32.mrb[64].mxu1  ;;  %v15734_v33 = vpop.f32.mrb[68].mxu0 }
0x1286   : > { %v7877_v7 = vadd.f32 %v13544_v54, %v7876_v40  ;;  %v12298_v59 = vpop.f32.mrb[65].mxu1  ;;  %v12306_v45 = vpop.f32.mrb[69].mxu0 }
0x1287   : > { %v7879_v17 = vpop.f32.mrb[66].mxu1  ;;  %v7937_v24 = vpop.f32.mrb[70].mxu0 }
0x1288   : > { %v7885_v9 = vand.u32 2147483647, %v7877_v7  ;;  %v12299_v28 = vpop.f32.mrb[67].mxu1  ;;  %v12307_v50 = vpop.f32.mrb[71].mxu0  ;;  %v7882_v36 = vmax.f32 %v7877_v7, 0.0  ;;  %vm7883_vm7 = vcmp.ne.f32.partialorder %v7877_v7, %v7877_v7 }
0x128a   : > { %v7886_v10 = vsub.f32 0.0, %v7885_v9 }
0x128c   : > { %v7887_v34 = vmul.f32 1.442695, %v7886_v10 }
0x128d   : > { %v15737_v23 = vpop.f32.mrb[68].mxu1 }
0x128e   : > { %13370 = vpow2.f32 %v7887_v34  ;;  %v12314_v43 = vpop.f32.mrb[69].mxu1 }
0x128f   : > { %v7977_v12 = vpop.f32.mrb[70].mxu1 }
0x1290   : > { %v12315_v18 = vpop.f32.mrb[71].mxu1 }
0x1298   : > { %v13371_v6 = vpop.eup %13370 }
0x1299   : > { %v7889_v38 = vadd.f32 1.0, %v13371_v6  ;;  %v7892_v61 = vmul.f32 -0.5, %v13371_v6  ;;  %v7895_v21 = vand.u32 2147483647, %v13371_v6 }
0x129b   : > { %13372 = vlog2.f32 %v7889_v38  ;;  %v7893_v14 = vadd.f32 1.0, %v7892_v61  ;;  %vm7896_vm6 = vcmp.lt.f32.partialorder %v7895_v21, 0.0004427343 }
0x129d   : > { %v7894_v57 = vmul.f32 %v13371_v6, %v7893_v14 }
0x12a5   : > { %v13373_v27 = vpop.eup %13372 }
0x12a6   : > { %v7891_v55 = vmul.f32 0.6931472, %v13373_v27 }
0x12a8   : > { %v7897_v39 = vsel %vm7896_vm6, %v7894_v57, %v7891_v55 }
0x12a9   : > { %v7898_v49 = vadd.f32 %v7897_v39, %v7882_v36 }
0x12ab   : > { %v7899_v53 = vsel %vm7883_vm7, %v7877_v7, %v7898_v49  ;;  %v16664_v49 = vld [vmem:[#allocation53_spill] sm:$0xff] }
0x12ac   : > { %v7984_v25 = vrot.slane %v7899_v53, %v14017_v20  ;;  %v8003_v30 = vrot.slane %v7899_v53, %v16657_v44  ;;  %v8022_v60 = vrot.slane %v7899_v53, %v16658_v15  ;;  %v8041_v0 = vrot.slane %v7899_v53, %v16659_v19 }
0x12ad   : > { %v8060_v26 = vrot.slane %v7899_v53, %v16660_v56  ;;  %v8079_v16 = vrot.slane %v7899_v53, %v16661_v31  ;;  %v8098_v63 = vrot.slane %v7899_v53, %v16662_v52  ;;  %v8117_v29 = vrot.slane %v7899_v53, %v16663_v13 }
0x12ae   : > { %7990 = vbcast.lane.b32.xlu1 %v7984_v25, 264  ;;  %7986 = vbcast.lane.b32.xlu0 %v7984_v25, 256  ;;  %v7980_v51 = vmul.f32 %v7899_v53, %v15717_v11 }
0x12b0   : > { %v8232_v3 = vrot.slane %v7980_v51, %v14017_v20  ;;  %v8251_v8 = vrot.slane %v7980_v51, %v16657_v44  ;;  %v8270_v35 = vrot.slane %v7980_v51, %v16658_v15  ;;  %v8289_v32 = vrot.slane %v7980_v51, %v16659_v19 }
0x12b1   : > { %v8308_v5 = vrot.slane %v7980_v51, %v16660_v56  ;;  %v8327_v40 = vrot.slane %v7980_v51, %v16661_v31  ;;  %v8346_v54 = vrot.slane %v7980_v51, %v16662_v52  ;;  %v8365_v7 = vrot.slane %v7980_v51, %v16663_v13 }
0x12b2   : > { %8005 = vbcast.lane.b32.xlu1 %v8003_v30, 256  ;;  %7994 = vbcast.lane.b32.xlu0 %v7984_v25, 272 }
0x12b6   : > { %8009 = vbcast.lane.b32.xlu1 %v8003_v30, 264  ;;  %8013 = vbcast.lane.b32.xlu0 %v8003_v30, 272 }
0x12ba   : > { %7998 = vbcast.lane.b32.xlu1 %v7984_v25, 280  ;;  %8024 = vbcast.lane.b32.xlu0 %v8022_v60, 256 }
0x12be   : > { %8017 = vbcast.lane.b32.xlu1 %v8003_v30, 280  ;;  %8043 = vbcast.lane.b32.xlu0 %v8041_v0, 256 }
0x12c2   : > { %8028 = vbcast.lane.b32.xlu1 %v8022_v60, 264  ;;  %8032 = vbcast.lane.b32.xlu0 %v8022_v60, 272 }
0x12c6   : > { %8047 = vbcast.lane.b32.xlu1 %v8041_v0, 264  ;;  %8051 = vbcast.lane.b32.xlu0 %v8041_v0, 272 }
0x12ca   : > { %8036 = vbcast.lane.b32.xlu1 %v8022_v60, 280  ;;  %8062 = vbcast.lane.b32.xlu0 %v8060_v26, 256  ;;  %v16665_v60 = vld [vmem:[#allocation54_spill] sm:$0xff] }
0x12ce   : > { %8055 = vbcast.lane.b32.xlu1 %v8041_v0, 280  ;;  %8081 = vbcast.lane.b32.xlu0 %v8079_v16, 256 }
0x12d2   : > { %8066 = vbcast.lane.b32.xlu1 %v8060_v26, 264  ;;  %8070 = vbcast.lane.b32.xlu0 %v8060_v26, 272 }
0x12d6   : > { %8085 = vbcast.lane.b32.xlu1 %v8079_v16, 264  ;;  %8089 = vbcast.lane.b32.xlu0 %v8079_v16, 272 }
0x12da   : > { %8074 = vbcast.lane.b32.xlu1 %v8060_v26, 280  ;;  %8100 = vbcast.lane.b32.xlu0 %v8098_v63, 256 }
0x12de   : > { %8093 = vbcast.lane.b32.xlu1 %v8079_v16, 280  ;;  %8119 = vbcast.lane.b32.xlu0 %v8117_v29, 256 }
0x12e2   : > { %8104 = vbcast.lane.b32.xlu1 %v8098_v63, 264  ;;  %8108 = vbcast.lane.b32.xlu0 %v8098_v63, 272 }
0x12e6   : > { %8123 = vbcast.lane.b32.xlu1 %v8117_v29, 264  ;;  %8127 = vbcast.lane.b32.xlu0 %v8117_v29, 272 }
0x12ea   : > { %8112 = vbcast.lane.b32.xlu1 %v8098_v63, 280  ;;  %8234 = vbcast.lane.b32.xlu0 %v8232_v3, 256 }
0x12ee   : > { %8131 = vbcast.lane.b32.xlu1 %v8117_v29, 280  ;;  %8253 = vbcast.lane.b32.xlu0 %v8251_v8, 256  ;;  %v16666_v29 = vld [vmem:[#allocation55_spill] sm:$0xff] }
0x12f2   : > { %8238 = vbcast.lane.b32.xlu1 %v8232_v3, 264  ;;  %8242 = vbcast.lane.b32.xlu0 %v8232_v3, 272 }
0x12f6   : > { %8257 = vbcast.lane.b32.xlu1 %v8251_v8, 264  ;;  %8261 = vbcast.lane.b32.xlu0 %v8251_v8, 272 }
0x12fa   : > { %8246 = vbcast.lane.b32.xlu1 %v8232_v3, 280  ;;  %8272 = vbcast.lane.b32.xlu0 %v8270_v35, 256 }
0x12fe   : > { %8265 = vbcast.lane.b32.xlu1 %v8251_v8, 280  ;;  %8291 = vbcast.lane.b32.xlu0 %v8289_v32, 256 }
0x1302   : > { %8276 = vbcast.lane.b32.xlu1 %v8270_v35, 264  ;;  %8280 = vbcast.lane.b32.xlu0 %v8270_v35, 272 }
0x1306   : > { %8295 = vbcast.lane.b32.xlu1 %v8289_v32, 264  ;;  %8299 = vbcast.lane.b32.xlu0 %v8289_v32, 272 }
0x130a   : > { %8284 = vbcast.lane.b32.xlu1 %v8270_v35, 280  ;;  %8310 = vbcast.lane.b32.xlu0 %v8308_v5, 256 }
0x130e   : > { %8303 = vbcast.lane.b32.xlu1 %v8289_v32, 280  ;;  %8329 = vbcast.lane.b32.xlu0 %v8327_v40, 256 }
0x1312   : > { %8314 = vbcast.lane.b32.xlu1 %v8308_v5, 264  ;;  %8318 = vbcast.lane.b32.xlu0 %v8308_v5, 272 }
0x1316   : > { %8333 = vbcast.lane.b32.xlu1 %v8327_v40, 264  ;;  %8337 = vbcast.lane.b32.xlu0 %v8327_v40, 272 }
0x131a   : > { %8322 = vbcast.lane.b32.xlu1 %v8308_v5, 280  ;;  %8348 = vbcast.lane.b32.xlu0 %v8346_v54, 256  ;;  %v8389_v5 = vrot.slane %v15734_v33, %v16639_v22 }
0x131e   : > { %8341 = vbcast.lane.b32.xlu1 %v8327_v40, 280  ;;  %8367 = vbcast.lane.b32.xlu0 %v8365_v7, 256 }
0x1320   : > { %v7991_v59 = vpop.permute.xlu1 %7990  ;;  %v7987_v45 = vpop.permute.xlu0 %7986 }
0x1321   : > { %v8133_v53 = vmul.f32 %v7987_v45, %v16664_v49  ;;  %v8134_v0 = vmul.f32 %v7991_v59, %v16665_v60  ;;  %v16667_v59 = vld [vmem:[#allocation57_spill] sm:$0xff] }
0x1322   : > { %8352 = vbcast.lane.b32.xlu1 %v8346_v54, 264  ;;  %8356 = vbcast.lane.b32.xlu0 %v8346_v54, 272 }
0x1323   : > { %v8165_v26 = vmul.f32 1.442695, %v8133_v53  ;;  %v8167_v3 = vmul.f32 1.442695, %v8134_v0 }
0x1324   : > { %v8006_v17 = vpop.permute.xlu1 %8005  ;;  %v7995_v24 = vpop.permute.xlu0 %7994 }
0x1325   : > { %v8135_v51 = vmul.f32 %v7995_v24, %v16666_v29  ;;  %13374 = vpow2.f32 %v8165_v26  ;;  %v8137_v8 = vmul.f32 %v8006_v17, %v16664_v49  ;;  %v15803_v17 = vrot.slane %v8389_v5, %v16639_v22 }
0x1326   : > { %8371 = vbcast.lane.b32.xlu1 %v8365_v7, 264  ;;  %8375 = vbcast.lane.b32.xlu0 %v8365_v7, 272  ;;  %13376 = vpow2.f32 %v8167_v3  ;;  %v8397_v26 = vcombine.high %v8389_v5, %v8389_v5 }
0x1328   : > { %v8010_v9 = vpop.permute.xlu1 %8009  ;;  %v8014_v28 = vpop.permute.xlu0 %8013  ;;  %v15816_v5 = vrot.slane %v8397_v26, %v16639_v22 }
0x1329   : > { %v8138_v40 = vmul.f32 %v8010_v9, %v16665_v60  ;;  %v8139_v47 = vmul.f32 %v8014_v28, %v16666_v29 }
0x132a   : > { %8360 = vbcast.lane.b32.xlu1 %v8346_v54, 280  ;;  %v8169_v54 = vmul.f32 1.442695, %v8135_v51 }
0x132b   : > { %v8175_v0 = vmul.f32 1.442695, %v8138_v40  ;;  %v8177_v28 = vmul.f32 1.442695, %v8139_v47 }
0x132c   : > { %v7999_v50 = vpop.permute.xlu1 %7998  ;;  %v8025_v10 = vpop.permute.xlu0 %8024  ;;  %13378 = vpow2.f32 %v8169_v54 }
0x132d   : > { %v8136_v45 = vmul.f32 %v7999_v50, %v16667_v59  ;;  %v15810_v50 = vrot.slane %v15803_v17, %v14017_v20  ;;  %v8141_v3 = vmul.f32 %v8025_v10, %v16664_v49 }
0x132e   : > { %8379 = vbcast.lane.b32.xlu1 %v8365_v7, 280  ;;  %v8173_v7 = vmul.f32 1.442695, %v8137_v8 }
0x132f   : > { %v8171_v42 = vmul.f32 1.442695, %v8136_v45  ;;  %v13375_v8 = vpop.eup %13374  ;;  %v8181_v45 = vmul.f32 1.442695, %v8141_v3 }
0x1330   : > { %v8018_v34 = vpop.permute.xlu1 %8017  ;;  %v8044_v43 = vpop.permute.xlu0 %8043  ;;  %13380 = vpow2.f32 %v8173_v7  ;;  %v8503_v46 = vmul.f32 0.0, %v13375_v8 }
0x1331   : > { %13382 = vpow2.f32 %v8175_v0  ;;  %v8140_v58 = vmul.f32 %v8018_v34, %v16667_v59  ;;  %v13377_v2 = vpop.eup %13376  ;;  %v15823_v34 = vrot.slane %v15816_v5, %v14017_v20  ;;  %v8145_v0 = vmul.f32 %v8044_v43, %v16664_v49 }
0x1332   : > { %13384 = vpow2.f32 %v8171_v42  ;;  %v8504_v3 = vmul.f32 0.0, %v13377_v2 }
0x1333   : > { %v8179_v62 = vmul.f32 1.442695, %v8140_v58  ;;  %13386 = vpow2.f32 %v8177_v28 }
0x1334   : > { %v8029_v12 = vpop.permute.xlu1 %8028  ;;  %v15756_v18 = vpop.permute.xlu0 %8032  ;;  %13388 = vpow2.f32 %v8181_v45  ;;  %v8427_v45 = vcombine.high %v15803_v17, %v15803_v17 }
0x1335   : > { %v8142_v10 = vmul.f32 %v8029_v12, %v16665_v60  ;;  %13390 = vpow2.f32 %v8179_v62 }
0x1336   : > { %v13379_v42 = vpop.eup %13378  ;;  %v15841_v17 = vrot.slane %v8427_v45, %v14017_v20 }
0x1337   : > { %v8505_v2 = vmul.f32 0.0, %v13379_v42 }
0x1338   : > { %v15758_v6 = vpop.permute.xlu1 %8047  ;;  %v15760_v38 = vpop.permute.xlu0 %8051 }
0x1339   : > { %v8146_v12 = vmul.f32 %v15758_v6, %v16665_v60 }
0x133a   : > { %v13381_v8 = vpop.eup %13380 }
0x133b   : > { %v13383_v15 = vpop.eup %13382 }
0x133c   : > { %v15762_v61 = vpop.permute.xlu1 %8036  ;;  %v15764_v14 = vpop.permute.xlu0 %8062 }
0x133d   : > { %v13385_v6 = vpop.eup %13384 }
0x133e   : > { %v13387_v42 = vpop.eup %13386 }
0x1340   : > { %v15766_v21 = vpop.permute.xlu1 %8055  ;;  %v15768_v27 = vpop.permute.xlu0 %8081 }
0x1344   : > { %v15770_v55 = vpop.permute.xlu1 %8066  ;;  %v15772_v57 = vpop.permute.xlu0 %8070 }
0x1348   : > { %v15774_v36 = vpop.permute.xlu1 %8085  ;;  %v15776_v39 = vpop.permute.xlu0 %8089 }
0x134c   : > { %v15779_v25 = vpop.permute.xlu1 %8074  ;;  %v15781_v30 = vpop.permute.xlu0 %8100 }
0x1350   : > { %v15784_v16 = vpop.permute.xlu1 %8093  ;;  %v15786_v63 = vpop.permute.xlu0 %8119 }
0x1354   : > { %v15790_v35 = vpop.permute.xlu1 %8104  ;;  %v15792_v32 = vpop.permute.xlu0 %8108 }
0x1358   : > { %v15798_v53 = vpop.permute.xlu1 %8123  ;;  %v15800_v24 = vpop.permute.xlu0 %8127 }
0x135c   : > { %v15806_v9 = vpop.permute.xlu1 %8112  ;;  %v8235_v51 = vpop.permute.xlu0 %8234 }
0x135d   : > { %v8471_v40 = vmul.f32 %v15810_v50, %v8235_v51  ;;  %v8143_v51 = vmul.f32 %v15756_v18, %v16666_v29  ;;  %v8189_v18 = vmul.f32 1.442695, %v8145_v0 }
0x135f   : > { %v8507_v48 = vadd.f32 %v8503_v46, %v8471_v40  ;;  %v8183_v46 = vmul.f32 1.442695, %v8142_v10  ;;  %v8185_v56 = vmul.f32 1.442695, %v8143_v51  ;;  %v8382_v51 = vcombine.high %v15734_v33, %v15734_v33 }
0x1360   : > { %v15818_v54 = vpop.permute.xlu1 %8131  ;;  %v8254_v7 = vpop.permute.xlu0 %8253 }
0x1361   : > { %v8475_v40 = vmul.f32 %v15823_v34, %v8254_v7  ;;  %v8596_v28 = vmul.f32 %v13381_v8, %v8507_v48  ;;  %13392 = vpow2.f32 %v8183_v46  ;;  %v8191_v7 = vmul.f32 1.442695, %v8146_v12  ;;  %v13389_v12 = vpop.eup %13388 }
0x1362   : > { %13394 = vpow2.f32 %v8189_v18 }
0x1363   : > { %13396 = vpow2.f32 %v8185_v56 }
0x1364   : > { %v8239_v26 = vpop.permute.xlu1 %8238  ;;  %v8243_v47 = vpop.permute.xlu0 %8242  ;;  %13398 = vpow2.f32 %v8191_v7 }
0x1365   : > { %v8472_v58 = vmul.f32 %v15810_v50, %v8239_v26  ;;  %v8473_v44 = vmul.f32 %v15810_v50, %v8243_v47  ;;  %v8600_v47 = vadd.f32 %v8596_v28, %v8475_v40 }
0x1367   : > { %v8508_v43 = vadd.f32 %v8504_v3, %v8472_v58  ;;  %v8144_v3 = vmul.f32 %v15762_v61, %v16667_v59  ;;  %v8509_v58 = vadd.f32 %v8505_v2, %v8473_v44 }
0x1368   : > { %v8258_v19 = vpop.permute.xlu1 %8257  ;;  %v8262_v26 = vpop.permute.xlu0 %8261 }
0x1369   : > { %v12808_v62 = vpack.c.bf16 %v8508_v43, %v8507_v48  ;;  %v8476_v10 = vmul.f32 %v15823_v34, %v8258_v19  ;;  %v8597_v31 = vmul.f32 %v13383_v15, %v8508_v43  ;;  %v8147_v48 = vmul.f32 %v15760_v38, %v16666_v29 }
0x136a   : > { %v8149_v15 = vmul.f32 %v15764_v14, %v16664_v49  ;;  %v8187_v46 = vmul.f32 1.442695, %v8144_v3  ;;  %v8148_v38 = vmul.f32 %v15766_v21, %v16667_v59  ;;  %v8477_v14 = vmul.f32 %v15823_v34, %v8262_v26 }
0x136b   : > { %v8601_v8 = vadd.f32 %v8597_v31, %v8476_v10  ;;  %12810 = vmatpush3.bf16.xpose.msk.msra.mxu0 %vm14224_vm11, %v12808_v62  ;;  %v8506_v31 = vmul.f32 0.0, %v13385_v6  ;;  %v8598_v40 = vmul.f32 %v13387_v42, %v8509_v58  ;;  %v8429_v43 = vcombine.high %v15816_v5, %v15816_v5 }
0x136c   : > { %v8247_v19 = vpop.permute.xlu1 %8246  ;;  %v8273_v0 = vpop.permute.xlu0 %8272  ;;  %12811 = vmatprep.subr.bf16.mxu0 %v16543_v1  ;;  %v8193_v33 = vmul.f32 1.442695, %v8147_v48  ;;  %v8197_v45 = vmul.f32 1.442695, %v8149_v15  ;;  %v8689_v62 = vmul.f32 %v13389_v12, %v8600_v47  ;;  %v15862_v6 = vrot.slane %v8382_v51, %v16639_v22 }
0x136d   : > { %v12816_v44 = vpack.c.bf16 %v8601_v8, %v8600_v47  ;;  %v8474_v61 = vmul.f32 %v15810_v50, %v8247_v19  ;;  %v8479_v56 = vmul.f32 %v15841_v17, %v8273_v0  ;;  %v13391_v50 = vpop.eup %13390  ;;  %13400 = vpow2.f32 %v8187_v46 }
0x136e   : > { %v8195_v7 = vmul.f32 1.442695, %v8148_v38  ;;  %v8150_v3 = vmul.f32 %v15770_v55, %v16665_v60  ;;  %v8602_v5 = vadd.f32 %v8598_v40, %v8477_v14  ;;  %v13393_v19 = vpop.eup %13392  ;;  %13402 = vpow2.f32 %v8193_v33 }
0x136f   : > { %v8510_v28 = vadd.f32 %v8506_v31, %v8474_v61  ;;  %12818 = vmatpush3.bf16.xpose.msk.msra.mxu1 %vm14224_vm11, %v12816_v44  ;;  %v8693_v48 = vadd.f32 %v8689_v62, %v8479_v56  ;;  %v8151_v47 = vmul.f32 %v15772_v57, %v16666_v29  ;;  %13404 = vpow2.f32 %v8197_v45  ;;  %v13395_v42 = vpop.eup %13394 }
0x1370   : > { %v8266_v18 = vpop.permute.xlu1 %8265  ;;  %v8292_v2 = vpop.permute.xlu0 %8291  ;;  %12819 = vmatprep.subr.bf16.mxu1 %v16543_v1  ;;  %v8690_v61 = vmul.f32 %v13393_v19, %v8601_v8  ;;  %v15879_v51 = vrot.slane %v15862_v6, %v16639_v22  ;;  %13406 = vpow2.f32 %v8195_v7  ;;  %v8154_v57 = vmul.f32 %v15774_v36, %v16665_v60 }
0x1371   : > { %v12812_v21 = vpack.c.bf16 %v8510_v28, %v8509_v58  ;;  %v8478_v26 = vmul.f32 %v15823_v34, %v8266_v18  ;;  %v8599_v10 = vmul.f32 %v13391_v50, %v8510_v28  ;;  %v8153_v34 = vmul.f32 %v15768_v27, %v16664_v49  ;;  %v13397_v46 = vpop.eup %13396 }
0x1372   : > { %v15873_v58 = vrot.slane %v8429_v43, %v14017_v20  ;;  %v8199_v27 = vmul.f32 1.442695, %v8150_v3  ;;  %v8782_v12 = vmul.f32 %v13395_v42, %v8693_v48  ;;  %v13399_v8 = vpop.eup %13398  ;;  %v8398_v28 = vcombine.high %v15862_v6, %v15862_v6 }
0x1373   : > { %v8603_v15 = vadd.f32 %v8599_v10, %v8478_v26  ;;  %12814 = vmatpush3.bf16.xpose.msk.msra.mxu0 %vm14224_vm11, %v12812_v21  ;;  %v8205_v56 = vmul.f32 1.442695, %v8153_v34  ;;  %v8201_v50 = vmul.f32 1.442695, %v8151_v47  ;;  %v8691_v45 = vmul.f32 %v13397_v46, %v8602_v5 }
0x1374   : > { %v8277_v0 = vpop.permute.xlu1 %8276  ;;  %v8281_v44 = vpop.permute.xlu0 %8280  ;;  %12823 = vmatprep.subr.bf16.mxu0 %v16543_v1  ;;  %v8483_v38 = vmul.f32 %v15873_v58, %v8292_v2  ;;  %v15893_v21 = vrot.slane %v15879_v51, %v14017_v20  ;;  %13408 = vpow2.f32 %v8199_v27  ;;  %v8207_v62 = vmul.f32 1.442695, %v8154_v57 }
0x1375   : > { %v12820_v55 = vpack.c.bf16 %v8603_v15, %v8602_v5  ;;  %v8480_v31 = vmul.f32 %v15841_v17, %v8277_v0  ;;  %v8481_v40 = vmul.f32 %v15841_v17, %v8281_v44  ;;  %v8152_v26 = vmul.f32 %v15779_v25, %v16667_v59 }
0x1376   : > { %v8786_v10 = vadd.f32 %v8782_v12, %v8483_v38  ;;  %13410 = vpow2.f32 %v8205_v56  ;;  %v8155_v5 = vmul.f32 %v15776_v39, %v16666_v29  ;;  %v8157_v25 = vmul.f32 %v15781_v30, %v16664_v49 }
0x1377   : > { %v8694_v14 = vadd.f32 %v8690_v61, %v8480_v31  ;;  %12822 = vmatpush3.bf16.xpose.msk.msra.mxu1 %vm14224_vm11, %v12820_v55  ;;  %v8695_v6 = vadd.f32 %v8691_v45, %v8481_v40  ;;  %v13401_v3 = vpop.eup %13400  ;;  %v8604_v34 = vrot.slane %v15737_v23, 1  ;;  %13412 = vpow2.f32 %v8201_v50 }
0x1378   : > { %v8296_v43 = vpop.permute.xlu1 %8295  ;;  %v8300_v33 = vpop.permute.xlu0 %8299  ;;  %12831 = vmatprep.subr.bf16.mxu1 %v16543_v1  ;;  %v8692_v44 = vmul.f32 %v13401_v3, %v8603_v15  ;;  %13414 = vpow2.f32 %v8207_v62  ;;  %v8203_v31 = vmul.f32 1.442695, %v8152_v26  ;;  %v8156_v39 = vmul.f32 %v15784_v16, %v16667_v59 }
0x1379   : > { %v12824_v36 = vpack.c.bf16 %v8694_v14, %v8693_v48  ;;  %v8484_v18 = vmul.f32 %v15873_v58, %v8296_v43  ;;  %v8783_v2 = vmul.f32 %v13399_v8, %v8694_v14  ;;  %v13403_v55 = vpop.eup %13402  ;;  %v8485_v61 = vmul.f32 %v15873_v58, %v8300_v33 }
0x137a   : > { %12325 = vmatmul.mubr.msk.f32.vlgmr.msra.gmra.mrb[72].mxu0 %vm1180_vm2, %v15737_v23  ;;  %v13405_v30 = vpop.eup %13404  ;;  %v8784_v42 = vmul.f32 %v13403_v55, %v8695_v6  ;;  %v15920_v15 = vrot.slane %v8398_v28, %v16639_v22  ;;  %v8209_v16 = vmul.f32 1.442695, %v8155_v5  ;;  %v8213_v46 = vmul.f32 1.442695, %v8157_v25 }
0x137b   : > { %v8787_v7 = vadd.f32 %v8783_v2, %v8484_v18  ;;  %12826 = vmatpush3.bf16.xpose.msk.msra.mxu0 %vm14224_vm11, %v12824_v36  ;;  %12346 = vmatprep.mubr.msk.f32.mxu0 %vm13660_vm1, %v16544_v4  ;;  %v8875_v40 = vmul.f32 %v13405_v30, %v8786_v10  ;;  %13416 = vpow2.f32 %v8203_v31  ;;  %v8211_v50 = vmul.f32 1.442695, %v8156_v39 }
0x137c   : > { %v8285_v48 = vpop.permute.xlu1 %8284  ;;  %v8311_v19 = vpop.permute.xlu0 %8310  ;;  %12827 = vmatprep.subr.bf16.mxu0 %v16543_v1  ;;  %v8158_v43 = vmul.f32 %v15790_v35, %v16665_v60  ;;  %v8788_v33 = vadd.f32 %v8784_v42, %v8485_v61  ;;  %13418 = vpow2.f32 %v8209_v16  ;;  %v8161_v18 = vmul.f32 %v15786_v63, %v16664_v49 }
0x137d   : > { %v12832_v47 = vpack.c.bf16 %v8787_v7, %v8786_v10  ;;  %v8482_v0 = vmul.f32 %v15841_v17, %v8285_v48  ;;  %v8487_v57 = vmul.f32 %v15893_v21, %v8311_v19  ;;  %v13407_v17 = vpop.eup %13406  ;;  %v15934_v2 = vrot.slane %v15920_v15, %v14017_v20 }
0x137e   : > { %12336 = vmatmul.mubr.msk.f32.vlgmr.msra.gmra.mrb[58].mxu1 %vm1180_vm2, %v8604_v34  ;;  %v13409_v45 = vpop.eup %13408  ;;  %13420 = vpow2.f32 %v8213_v46  ;;  %v8215_v5 = vmul.f32 1.442695, %v8158_v43  ;;  %v8162_v49 = vmul.f32 %v15798_v53, %v16665_v60  ;;  %v8697_v60 = vrot.slane %v15737_v23, 2 }
0x137f   : > { %v8696_v27 = vadd.f32 %v8692_v44, %v8482_v0  ;;  %12834 = vmatpush3.bf16.xpose.msk.msra.mxu1 %vm14224_vm11, %v12832_v47  ;;  %12357 = vmatprep.mubr.msk.f32.mxu1 %vm13660_vm1, %v16544_v4  ;;  %v8879_v36 = vadd.f32 %v8875_v40, %v8487_v57  ;;  %13422 = vpow2.f32 %v8211_v50  ;;  %v8221_v47 = vmul.f32 1.442695, %v8161_v18 }
0x1380   : > { %v8304_v38 = vpop.permute.xlu1 %8303  ;;  %v8330_v12 = vpop.permute.xlu0 %8329  ;;  %12835 = vmatprep.subr.bf16.mxu1 %v16543_v1  ;;  %13424 = vpow2.f32 %v8215_v5  ;;  %v8223_v30 = vmul.f32 1.442695, %v8162_v49  ;;  %v8160_v42 = vmul.f32 %v15806_v9, %v16667_v59  ;;  %v8163_v16 = vmul.f32 %v15800_v24, %v16666_v29 }
0x1381   : > { %v12828_v14 = vpack.c.bf16 %v8696_v27, %v8695_v6  ;;  %v8486_v8 = vmul.f32 %v15873_v58, %v8304_v38  ;;  %v8785_v56 = vmul.f32 %v13407_v17, %v8696_v27  ;;  %v8159_v58 = vmul.f32 %v15792_v32, %v16666_v29  ;;  %v13411_v3 = vpop.eup %13410 }
0x1382   : > { %v8876_v6 = vmul.f32 %v13409_v45, %v8787_v7  ;;  %v13413_v63 = vpop.eup %13412  ;;  %v8491_v32 = vmul.f32 %v15934_v2, %v8330_v12  ;;  %v8968_v25 = vmul.f32 %v13411_v3, %v8879_v36  ;;  %v8428_v7 = vcombine.high %v15879_v51, %v15879_v51 }
0x1383   : > { %v8789_v28 = vadd.f32 %v8785_v56, %v8486_v8  ;;  %12830 = vmatpush3.bf16.xpose.msk.msra.mxu0 %vm14224_vm11, %v12828_v14  ;;  %v13415_v34 = vpop.eup %13414  ;;  %v8217_v0 = vmul.f32 1.442695, %v8159_v58  ;;  %v8877_v31 = vmul.f32 %v13413_v63, %v8788_v33  ;;  %13426 = vpow2.f32 %v8221_v47 }
0x1384   : > { %v8315_v62 = vpop.permute.xlu1 %8314  ;;  %v8319_v35 = vpop.permute.xlu0 %8318  ;;  %12839 = vmatprep.subr.bf16.mxu0 %v16543_v1  ;;  %v8972_v51 = vadd.f32 %v8968_v25, %v8491_v32  ;;  %v15959_v9 = vrot.slane %v8428_v7, %v14017_v20  ;;  %v8790_v12 = vrot.slane %v15737_v23, 3  ;;  %v8219_v50 = vmul.f32 1.442695, %v8160_v42 }
0x1385   : > { %v12836_v26 = vpack.c.bf16 %v8789_v28, %v8788_v33  ;;  %v8488_v10 = vmul.f32 %v15893_v21, %v8315_v62  ;;  %v8489_v19 = vmul.f32 %v15893_v21, %v8319_v35  ;;  %v13417_v17 = vpop.eup %13416  ;;  %13428 = vpow2.f32 %v8217_v0 }
0x1386   : > { %v8878_v8 = vmul.f32 %v13417_v17, %v8789_v28  ;;  %v13419_v56 = vpop.eup %13418  ;;  %13430 = vpow2.f32 %v8223_v30  ;;  %v8164_v29 = vmul.f32 %v15818_v54, %v16667_v59  ;;  %v8430_v28 = vcombine.high %v15920_v15, %v15920_v15 }
0x1387   : > { %v8880_v48 = vadd.f32 %v8876_v6, %v8488_v10  ;;  %12838 = vmatpush3.bf16.xpose.msk.msra.mxu1 %vm14224_vm11, %v12836_v26  ;;  %v8881_v27 = vadd.f32 %v8877_v31, %v8489_v19  ;;  %v8225_v59 = vmul.f32 1.442695, %v8163_v16  ;;  %13432 = vpow2.f32 %v8219_v50 }
0x1388   : > { %v8334_v44 = vpop.permute.xlu1 %8333  ;;  %v8338_v55 = vpop.permute.xlu0 %8337  ;;  %12847 = vmatprep.subr.bf16.mxu1 %v16543_v1  ;;  %v8227_v10 = vmul.f32 1.442695, %v8164_v29  ;;  %v8462_v25 = vrot.slane %v8430_v28, %v14017_v20  ;;  %v9069_v28 = vrot.slane %v15737_v23, 6 }
0x1389   : > { %v12840_v53 = vpack.c.bf16 %v8880_v48, %v8879_v36  ;;  %v8492_v39 = vmul.f32 %v15934_v2, %v8334_v44  ;;  %v8969_v61 = vmul.f32 %v13415_v34, %v8880_v48  ;;  %v8493_v24 = vmul.f32 %v15934_v2, %v8338_v55  ;;  %v13421_v43 = vpop.eup %13420 }
0x138a   : > { %12347 = vmatmul.mubr.msk.f32.vlgmr.msra.gmra.mrb[74].mxu0 %vm1180_vm2, %v8697_v60  ;;  %v8970_v33 = vmul.f32 %v13419_v56, %v8881_v27  ;;  %v9061_v62 = vmul.f32 %v13421_v43, %v8972_v51  ;;  %13434 = vpow2.f32 %v8225_v59  ;;  %v9162_v59 = vrot.slane %v15737_v23, 7 }
0x138b   : > { %v8973_v57 = vadd.f32 %v8969_v61, %v8492_v39  ;;  %12842 = vmatpush3.bf16.xpose.msk.msra.mxu0 %vm14224_vm11, %v12840_v53  ;;  %12368 = vmatprep.mubr.msk.f32.mxu0 %vm13660_vm1, %v16544_v4  ;;  %13436 = vpow2.f32 %v8227_v10  ;;  %v8883_v53 = vrot.slane %v15737_v23, 4 }
0x138c   : > { %v8323_v46 = vpop.permute.xlu1 %8322  ;;  %v8349_v38 = vpop.permute.xlu0 %8348  ;;  %12843 = vmatprep.subr.bf16.mxu0 %v16543_v1  ;;  %v8974_v6 = vadd.f32 %v8970_v33, %v8493_v24 }
0x138d   : > { %v12848_v14 = vpack.c.bf16 %v8973_v57, %v8972_v51  ;;  %v8490_v40 = vmul.f32 %v15893_v21, %v8323_v46  ;;  %v8495_v45 = vmul.f32 %v15959_v9, %v8349_v38  ;;  %v13423_v21 = vpop.eup %13422  ;;  %v8976_v46 = vrot.slane %v15737_v23, 5  ;;  %v13548_v23 = vld [vmem:[%s16551_s17 + $0x8] sm:$0xff]  }
0x138e   : > { %12358 = vmatmul.mubr.msk.f32.vlgmr.msra.gmra.mrb[72].mxu1 %vm1180_vm2, %v8790_v12  ;;  %v13425_v49 = vpop.eup %13424 }
0x138f   : > { %v8882_v36 = vadd.f32 %v8878_v8, %v8490_v40  ;;  %12850 = vmatpush3.bf16.xpose.msk.msra.mxu1 %vm14224_vm11, %v12848_v14  ;;  %12379 = vmatprep.mubr.msk.f32.mxu1 %vm13660_vm1, %v16544_v4  ;;  %v9065_v3 = vadd.f32 %v9061_v62, %v8495_v45  ;;  %v9062_v48 = vmul.f32 %v13425_v49, %v8973_v57  ;;  %v13427_v19 = vpop.eup %13426 }
0x1390   : > { %v8342_v54 = vpop.permute.xlu1 %8341  ;;  %v8368_v18 = vpop.permute.xlu0 %8367  ;;  %12851 = vmatprep.subr.bf16.mxu1 %v16543_v1 }
0x1391   : > { %v12844_v58 = vpack.c.bf16 %v8882_v36, %v8881_v27  ;;  %v8494_v35 = vmul.f32 %v15934_v2, %v8342_v54  ;;  %v8971_v26 = vmul.f32 %v13423_v21, %v8882_v36  ;;  %v13429_v34 = vpop.eup %13428  ;;  %v8499_v7 = vmul.f32 %v8462_v25, %v8368_v18  ;;  %v13545_v54 = vld [vmem:[%s16549_s13] sm:$0xff]   ;;  %v13546_v18 = vld [vmem:[%s16549_s13 + $0x8] sm:$0xff]  }
0x1392   : > { %v9154_v47 = vmul.f32 %v13427_v19, %v9065_v3  ;;  %v13431_v55 = vpop.eup %13430  ;;  %v9063_v39 = vmul.f32 %v13429_v34, %v8974_v6 }
0x1393   : > { %v8975_v5 = vadd.f32 %v8971_v26, %v8494_v35  ;;  %12846 = vmatpush3.bf16.xpose.msk.msra.mxu0 %vm14224_vm11, %v12844_v58  ;;  %v13433_v57 = vpop.eup %13432  ;;  %v13547_v58 = vld [vmem:[%s16551_s17] sm:$0xff]  }
0x1394   : > { %v8353_v15 = vpop.permute.xlu1 %8352  ;;  %v8357_v63 = vpop.permute.xlu0 %8356  ;;  %12855 = vmatprep.subr.bf16.mxu0 %v16543_v1  ;;  %v9158_v42 = vadd.f32 %v9154_v47, %v8499_v7 }
0x1395   : > { %v12852_v32 = vpack.c.bf16 %v8975_v5, %v8974_v6  ;;  %v8496_v2 = vmul.f32 %v15959_v9, %v8353_v15  ;;  %v8497_v44 = vmul.f32 %v15959_v9, %v8357_v63  ;;  %v9064_v14 = vmul.f32 %v13433_v57, %v8975_v5  ;;  %v13435_v40 = vpop.eup %13434 }
0x1396   : > { %v13437_v29 = vpop.eup %13436 }
0x1397   : > { %v9066_v0 = vadd.f32 %v9062_v48, %v8496_v2  ;;  %12854 = vmatpush3.bf16.xpose.msk.msra.mxu1 %vm14224_vm11, %v12852_v32  ;;  %v9067_v51 = vadd.f32 %v9063_v39, %v8497_v44 }
0x1398   : > { %v8372_v60 = vpop.permute.xlu1 %8371  ;;  %12863 = vmatprep.subr.bf16.mxu1 %v16543_v1  ;;  %v8376_v17 = vpop.permute.xlu0 %8375 }
0x1399   : > { %v12856_v31 = vpack.c.bf16 %v9066_v0, %v9065_v3  ;;  %v8500_v61 = vmul.f32 %v8462_v25, %v8372_v60  ;;  %v9155_v30 = vmul.f32 %v13431_v55, %v9066_v0  ;;  %v8501_v8 = vmul.f32 %v8462_v25, %v8376_v17 }
0x139a   : > { %12369 = vmatmul.mubr.msk.f32.vlgmr.msra.gmra.mrb[76].mxu0 %vm1180_vm2, %v8883_v53  ;;  %v9156_v56 = vmul.f32 %v13435_v40, %v9067_v51 }
0x139b   : > { %v9159_v27 = vadd.f32 %v9155_v30, %v8500_v61  ;;  %12858 = vmatpush3.bf16.xpose.msk.msra.mxu0 %vm14224_vm11, %v12856_v31  ;;  %12390 = vmatprep.mubr.msk.f32.mxu0 %vm13660_vm1, %v16544_v4 }
0x139c   : > { %v8361_v16 = vpop.permute.xlu1 %8360  ;;  %12859 = vmatprep.subr.bf16.mxu0 %v16543_v1  ;;  %v9160_v36 = vadd.f32 %v9156_v56, %v8501_v8 }
0x139d   : > { %v12864_v38 = vpack.c.bf16 %v9159_v27, %v9158_v42  ;;  %v8498_v12 = vmul.f32 %v15959_v9, %v8361_v16  ;;  %v13550_v16 = vld [vmem:[%s16653_s16] sm:$0xff] }
0x139e   : > { %12380 = vmatmul.mubr.msk.f32.vlgmr.msra.gmra.mrb[74].mxu1 %vm1180_vm2, %v8976_v46 }
0x139f   : > { %v9068_v50 = vadd.f32 %v9064_v14, %v8498_v12  ;;  %12866 = vmatpush3.bf16.xpose.msk.msra.mxu1 %vm14224_vm11, %v12864_v38  ;;  %12401 = vmatprep.mubr.msk.f32.mxu1 %vm13660_vm1, %v16544_v4  ;;  %v13551_v38 = vld [vmem:[%s16554_s29] sm:$0xff]  }
0x13a0   : > { %v8380_v24 = vpop.permute.xlu1 %8379  ;;  %12867 = vmatprep.subr.bf16.mxu1 %v16543_v1  ;;  %v13552_v12 = vld [vmem:[%s16553_s25] ss:$0 sm:$0xff] }
0x13a1   : > { %v12860_v43 = vpack.c.bf16 %v9068_v50, %v9067_v51  ;;  %v8502_v9 = vmul.f32 %v8462_v25, %v8380_v24  ;;  %v9157_v33 = vmul.f32 %v13437_v29, %v9068_v50  ;;  %v13549_v51 = vld [vmem:[%s16552_s21] ss:$0 sm:$0xff]  ;;  %v13553_v50 = vld [vmem:[%s16554_s29 + $0x8] sm:$0xff]  }
0x13a2   : > { %v9275_v27 = vmul.f32 %v13549_v51, %v15717_v11 }
0x13a3   : > { %v9161_v45 = vadd.f32 %v9157_v33, %v8502_v9  ;;  %12862 = vmatpush3.bf16.xpose.msk.msra.mxu0 %vm14224_vm11, %v12860_v43 }
0x13a4   : > { %12404 = vmatprep.subr.mxu0 %v16544_v4 }
0x13a5   : > { %v12868_v21 = vpack.c.bf16 %v9161_v45, %v9160_v36 }
0x13a7   : > { %12870 = vmatpush3.bf16.xpose.msk.msra.mxu1 %vm14224_vm11, %v12868_v21 }
0x13a8   : > { %12409 = vmatprep.subr.bf16.mxu1 %v16544_v4 }
0x13aa   : > { %12391 = vmatmul.mubr.msk.f32.vlgmr.msra.gmra.mrb[78].mxu0 %vm1180_vm2, %v9069_v28 }
0x13ab   : > { %12406 = vmatprep.mubr.msk.f32.mxu0 %vm13660_vm1, %v16544_v4 }
0x13ae   : > { %12402 = vmatmul.mubr.msk.f32.vlgmr.msra.gmra.mrb[76].mxu1 %vm1180_vm2, %v9162_v59 }
0x13af   : > { %12410 = vmatpush3.bf16.msra.mxu1 %v13545_v54  ;;  %12413 = vmatprep.mubr.msk.bf16.mxu1 %vm13660_vm1, %v16544_v4 }
0x13b0   : > { %12411 = vmatprep.subr.bf16.mxu1 %v16544_v4 }
0x13b3   : > { %12412 = vmatpush3.bf16.msra.mxu1 %v13546_v18 }
0x13b4   : > { %12425 = vmatprep.subr.bf16.mxu1 %v16544_v4 }
0x13b6   : > { %12414 = vmatmul.mubr.msk.bf16.vlgmr.msra.gmra.mrb[80].mxu1 %vm1180_vm2, %v15706_v41 }
0x13b7   : > { %12426 = vmatpush3.bf16.msra.mxu1 %v13547_v58  ;;  %12429 = vmatprep.mubr.msk.bf16.mxu1 %vm13660_vm1, %v16544_v4 }
0x13b8   : > { %12427 = vmatprep.subr.bf16.mxu1 %v16544_v4 }
0x13bb   : > { %12428 = vmatpush3.bf16.msra.mxu1 %v13548_v23 }
0x13bc   : > { %12871 = vmatprep.subr.bf16.mxu1 %v16543_v1 }
0x144d   : > { %v8592_v62 = vpop.f32.mrb[72].mxu0 }
0x144e   : > { %v12326_v35 = vpop.f32.mrb[73].mxu0 }
0x144f   : > { %v13554_v35 = vld [vmem:[%s16557_s11] sm:$0xff]  }
0x1451   : > { %v8685_v26 = vpop.f32.mrb[58].mxu1 }
0x1452   : > { %v9248_v10 = vrot.slane %v8685_v26, 7  ;;  %v12337_v6 = vpop.f32.mrb[59].mxu1  ;;  %v13555_v26 = vld [vmem:[%s16557_s11 + $0x8] sm:$0xff]  }
0x1454   : > { %v9268_v3 = vsel %vm4411_vm12, %v8592_v62, %v9248_v10 }
0x145d   : > { %v8778_v5 = vpop.f32.mrb[74].mxu0 }
0x145e   : > { %v9251_v41 = vrot.slane %v8778_v5, 6  ;;  %v12348_v49 = vpop.f32.mrb[75].mxu0 }
0x1460   : > { %v9269_v15 = vsel %vm4413_vm13, %v9268_v3, %v9251_v41  ;;  %v13556_v41 = vld [vmem:[%s16561_s2] ss:$0 sm:$0xff]  ;;  %s11471_s2 = sshll.u32 %s13871_s0, 7  ;;  %s13564_s0 = sshll.u32 %s13664_s8, 4  ;;  %s13565_s0 = int_to_ptr.vmem [resolvable:$false] %s13564_s0 }
0x1461   : > { %v8871_v63 = vpop.f32.mrb[72].mxu1  ;;  %s13566_s1 = scalar_lea.vmem %s13565_s0, 256  ;;  %p13567_p0 = scmp.lt.s32.totalorder %s16337_s5, %s13565_s0 }
0x1462   : > { %v9254_v32 = vrot.slane %v8871_v63, 5  ;;  %v12359_v25 = vpop.f32.mrb[73].mxu1  ;;  %p13568_p1 = scmp.lt.s32.totalorder %s13566_s1, %s13560_s7 }
0x1464   : > { %v9270_v2 = vsel %vm4415_vm14, %v9269_v15, %v9254_v32  ;;  %p13569_p2 = por %p13568_p1, %p13567_p0 }
0x1466   : > { %p13570_p3 = pnand %p13569_p2, %p13563_p13 }
0x146d   : > { %v8964_v48 = vpop.f32.mrb[76].mxu0 }
0x146e   : > { %v9257_v19 = vrot.slane %v8964_v48, 4  ;;  %v12370_v34 = vpop.f32.mrb[77].mxu0 }
0x1470   : > { %v9271_v7 = vsel %vm4417_vm15, %v9270_v2, %v9257_v19 }
0x1471   : > { %v9057_v47 = vpop.f32.mrb[74].mxu1 }
0x1472   : > { %v9260_v0 = vrot.slane %v9057_v47, 3  ;;  %v12381_v44 = vpop.f32.mrb[75].mxu1 }
0x1474   : > { %v9272_v55 = vsel %vm4419_vm3, %v9271_v7, %v9260_v0 }
0x147d   : > { %v9150_v60 = vpop.f32.mrb[78].mxu0 }
0x147e   : > { %v9263_v53 = vrot.slane %v9150_v60, 2  ;;  %v12392_v31 = vpop.f32.mrb[79].mxu0 }
0x1480   : > { %v9273_v39 = vsel %vm4421_vm4, %v9272_v55, %v9263_v53 }
0x1481   : > { %v9243_v61 = vpop.f32.mrb[76].mxu1 }
0x1482   : > { %v9266_v30 = vrot.slane %v9243_v61, 1  ;;  %v12403_v42 = vpop.f32.mrb[77].mxu1 }
0x1484   : > { %v9274_v57 = vsel %vm4423_vm5, %v9273_v39, %v9266_v30 }
0x1485   : > { %v9276_v17 = vadd.f32 %v9275_v27, %v9274_v57 }
0x1487   : > { %12405 = vmatpush3.msra.mxu0 %v9276_v17 }
0x1488   : > { %12407 = vmatmul.mubr.msk.f32.vlgmr.msra.gmra.mrb[80].mxu0 %vm7603_vm0, %v13550_v16  ;;  %12417 = vmatprep.subr.bf16.mxu0 %v16544_v4 }
0x1489   : > { %v9389_v46 = vpop.f32.mrb[80].mxu1  ;;  %12418 = vmatpush3.bf16.msra.mxu0 %v13551_v38  ;;  %12421 = vmatprep.mubr.msk.bf16.mxu0 %vm13660_vm1, %v16544_v4 }
0x148a   : > { %v9390_v14 = vadd.f32 %v13552_v12, %v9389_v46  ;;  %v12415_v40 = vpop.f32.mrb[81].mxu1  ;;  %12419 = vmatprep.subr.bf16.mxu0 %v16544_v4  ;;  %v16668_v12 = vld [vmem:[#allocation50_spill] sm:$0xff] }
0x148b   : > { %v9392_v11 = vpop.f32.mrb[82].mxu1  ;;  %v16669_v40 = vld [vmem:[#allocation49_spill] sm:$0xff] }
0x148c   : > { %v9398_v8 = vand.u32 2147483647, %v9390_v14  ;;  %v12416_v56 = vpop.f32.mrb[83].mxu1  ;;  %v9395_v54 = vmax.f32 %v9390_v14, 0.0  ;;  %vm9396_vm9 = vcmp.ne.f32.partialorder %v9390_v14, %v9390_v14 }
0x148d   : > { %12420 = vmatpush3.bf16.msra.mxu0 %v13553_v50  ;;  %v16671_v50 = vld [vmem:[#allocation47_spill] sm:$0xff] }
0x148e   : > { %v9399_v29 = vsub.f32 0.0, %v9398_v8  ;;  %12433 = vmatprep.subr.bf16.mxu0 %v16544_v4  ;;  %v16670_v8 = vld [vmem:[#allocation48_spill] sm:$0xff] }
0x1490   : > { %v9400_v24 = vmul.f32 1.442695, %v9399_v29 }
0x1492   : > { %13438 = vpow2.f32 %v9400_v24  ;;  %v16672_v24 = vld [vmem:[#allocation46_spill] sm:$0xff] }
0x149c   : > { %v13439_v43 = vpop.eup %13438 }
0x149d   : > { %v9402_v9 = vadd.f32 1.0, %v13439_v43  ;;  %v9405_v33 = vmul.f32 -0.5, %v13439_v43  ;;  %v9408_v45 = vand.u32 2147483647, %v13439_v43 }
0x149f   : > { %13440 = vlog2.f32 %v9402_v9  ;;  %v9406_v36 = vadd.f32 1.0, %v9405_v33  ;;  %vm9409_vm8 = vcmp.lt.f32.partialorder %v9408_v45, 0.0004427343 }
0x14a1   : > { %v9407_v59 = vmul.f32 %v13439_v43, %v9406_v36 }
0x14a9   : > { %v13441_v21 = vpop.eup %13440 }
0x14aa   : > { %v9404_v28 = vmul.f32 0.6931472, %v13441_v21 }
0x14ac   : > { %v9410_v18 = vsel %vm9409_vm8, %v9407_v59, %v9404_v28 }
0x14ad   : > { %v9411_v58 = vadd.f32 %v9410_v18, %v9395_v54 }
0x14af   : > { %v16046_v23 = vsel %vm9396_vm9, %v9390_v14, %v9411_v58 }
0x14b0   : > { %v9413_v62 = vpack.c.bf16 %v16046_v23, %v16046_v23 }
0x14b2   : > { %12422 = vmatmul.mubr.msk.bf16.vlgmr.msra.gmra.mrb[84].mxu0 %vm1180_vm2, %v9413_v62  ;;  %12430 = vmatmul.mubr.msk.bf16.vlgmr.msra.gmra.mrb[84].mxu1 %vm1180_vm2, %v9413_v62 }
0x14b3   : > { %12434 = vmatpush3.bf16.msra.mxu0 %v13554_v35  ;;  %12437 = vmatprep.mubr.msk.bf16.mxu0 %vm13660_vm1, %v16544_v4 }
0x14b4   : > { %12435 = vmatprep.subr.bf16.mxu0 %v16544_v4  ;;  %12449 = vmatprep.mubr.msk.f32.mxu1 %vm13660_vm1, %v16544_v4 }
0x14b7   : > { %12436 = vmatpush3.bf16.msra.mxu0 %v13555_v26 }
0x14b8   : > { %12879 = vmatprep.subr.bf16.mxu0 %v16543_v1 }
0x14ba   : > { %12438 = vmatmul.mubr.msk.bf16.vlgmr.msra.gmra.mrb[88].mxu0 %vm1180_vm2, %v9413_v62 }
0x14bb   : > { %12460 = vmatprep.mubr.msk.f32.mxu0 %vm13660_vm1, %v16544_v4 }
0x155b   : > { %v16063_v10 = vpop.f32.mrb[80].mxu0 }
0x155c   : > { %v12408_v6 = vpop.f32.mrb[81].mxu0 }
0x1585   : > { %v9451_v3 = vpop.f32.mrb[84].mxu0  ;;  %v16065_v5 = vpop.f32.mrb[84].mxu1 }
0x1586   : > { %v9452_v49 = vadd.f32 %v13556_v41, %v9451_v3  ;;  %v12423_v15 = vpop.f32.mrb[85].mxu0  ;;  %v12431_v63 = vpop.f32.mrb[85].mxu1 }
0x1587   : > { %v9454_v32 = vpop.f32.mrb[86].mxu0  ;;  %v9512_v25 = vpop.f32.mrb[86].mxu1 }
0x1588   : > { %v9460_v2 = vand.u32 2147483647, %v9452_v49  ;;  %v12424_v48 = vpop.f32.mrb[87].mxu0  ;;  %v12432_v19 = vpop.f32.mrb[87].mxu1  ;;  %v9457_v27 = vmax.f32 %v9452_v49, 0.0  ;;  %vm9458_vm6 = vcmp.ne.f32.partialorder %v9452_v49, %v9452_v49 }
0x158a   : > { %v9461_v34 = vsub.f32 0.0, %v9460_v2 }
0x158c   : > { %v9462_v7 = vmul.f32 1.442695, %v9461_v34 }
0x158d   : > { %v16068_v47 = vpop.f32.mrb[88].mxu0 }
0x158e   : > { %13442 = vpow2.f32 %v9462_v7  ;;  %v12439_v0 = vpop.f32.mrb[89].mxu0 }
0x158f   : > { %v9552_v44 = vpop.f32.mrb[90].mxu0 }
0x1590   : > { %v12440_v55 = vpop.f32.mrb[91].mxu0 }
0x1598   : > { %v13443_v60 = vpop.eup %13442 }
0x1599   : > { %v9464_v53 = vadd.f32 1.0, %v13443_v60  ;;  %v9467_v31 = vmul.f32 -0.5, %v13443_v60  ;;  %v9470_v61 = vand.u32 2147483647, %v13443_v60 }
0x159b   : > { %13444 = vlog2.f32 %v9464_v53  ;;  %v9468_v39 = vadd.f32 1.0, %v9467_v31  ;;  %vm9471_vm10 = vcmp.lt.f32.partialorder %v9470_v61, 0.0004427343  ;;  %v9957_v53 = vcombine.high %v16065_v5, %v16065_v5  ;;  %v16673_v31 = vld [vmem:[#allocation77_spill] sm:$0xff]  ;;  %v16674_v61 = vld [vmem:[#allocation78_spill] sm:$0xff] }
0x159d   : > { %v9469_v51 = vmul.f32 %v13443_v60, %v9468_v39 }
0x15a5   : > { %v13445_v30 = vpop.eup %13444 }
0x15a6   : > { %v9466_v42 = vmul.f32 0.6931472, %v13445_v30 }
0x15a8   : > { %v9472_v57 = vsel %vm9471_vm10, %v9469_v51, %v9466_v42 }
0x15a9   : > { %v9473_v17 = vadd.f32 %v9472_v57, %v9457_v27  ;;  %v9971_v27 = vrot.slane %v9957_v53, %v16639_v22 }
0x15ab   : > { %v9474_v16 = vsel %vm9458_vm6, %v9452_v49, %v9473_v17 }
0x15ac   : > { %v9692_v46 = vrot.slane %v9474_v16, %v16663_v13  ;;  %v9673_v38 = vrot.slane %v9474_v16, %v16662_v52  ;;  %v9654_v14 = vrot.slane %v9474_v16, %v16668_v12  ;;  %v9635_v11 = vrot.slane %v9474_v16, %v16669_v40 }
0x15ad   : > { %v9616_v56 = vrot.slane %v9474_v16, %v16670_v8  ;;  %v9597_v29 = vrot.slane %v9474_v16, %v16671_v50  ;;  %v9578_v43 = vrot.slane %v9474_v16, %v16672_v24  ;;  %v9559_v9 = vrot.slane %v9474_v16, %v14017_v20 }
0x15ae   : > { %9698 = vbcast.lane.b32.xlu1 %v9692_v46, 264  ;;  %9694 = vbcast.lane.b32.xlu0 %v9692_v46, 256  ;;  %v9555_v33 = vmul.f32 %v9474_v16, %v16046_v23 }
0x15b0   : > { %v9940_v36 = vrot.slane %v9555_v33, %v16663_v13  ;;  %v9921_v45 = vrot.slane %v9555_v33, %v16662_v52  ;;  %v9902_v21 = vrot.slane %v9555_v33, %v16668_v12  ;;  %v9883_v28 = vrot.slane %v9555_v33, %v16669_v40  ;;  %v16675_v40 = vld [vmem:[#allocation83_spill] sm:$0xff] }
0x15b1   : > { %v9864_v52 = vrot.slane %v9555_v33, %v16670_v8  ;;  %v9845_v13 = vrot.slane %v9555_v33, %v16671_v50  ;;  %v9826_v59 = vrot.slane %v9555_v33, %v16672_v24  ;;  %v9807_v58 = vrot.slane %v9555_v33, %v14017_v20  ;;  %v16676_v8 = vld [vmem:[#allocation84_spill] sm:$0xff] }
0x15b2   : > { %9679 = vbcast.lane.b32.xlu1 %v9673_v38, 264  ;;  %9675 = vbcast.lane.b32.xlu0 %v9673_v38, 256 }
0x15b6   : > { %9706 = vbcast.lane.b32.xlu1 %v9692_v46, 280  ;;  %9702 = vbcast.lane.b32.xlu0 %v9692_v46, 272 }
0x15ba   : > { %9687 = vbcast.lane.b32.xlu1 %v9673_v38, 280  ;;  %9683 = vbcast.lane.b32.xlu0 %v9673_v38, 272 }
0x15be   : > { %9660 = vbcast.lane.b32.xlu1 %v9654_v14, 264  ;;  %9656 = vbcast.lane.b32.xlu0 %v9654_v14, 256 }
0x15c2   : > { %9641 = vbcast.lane.b32.xlu1 %v9635_v11, 264  ;;  %9637 = vbcast.lane.b32.xlu0 %v9635_v11, 256 }
0x15c6   : > { %9668 = vbcast.lane.b32.xlu1 %v9654_v14, 280  ;;  %9664 = vbcast.lane.b32.xlu0 %v9654_v14, 272  ;;  %v9973_v14 = vcombine.high %v9971_v27, %v9971_v27 }
0x15ca   : > { %9649 = vbcast.lane.b32.xlu1 %v9635_v11, 280  ;;  %9645 = vbcast.lane.b32.xlu0 %v9635_v11, 272 }
0x15ce   : > { %9622 = vbcast.lane.b32.xlu1 %v9616_v56, 264  ;;  %9618 = vbcast.lane.b32.xlu0 %v9616_v56, 256 }
0x15d2   : > { %9603 = vbcast.lane.b32.xlu1 %v9597_v29, 264  ;;  %9599 = vbcast.lane.b32.xlu0 %v9597_v29, 256 }
0x15d6   : > { %9630 = vbcast.lane.b32.xlu1 %v9616_v56, 280  ;;  %9626 = vbcast.lane.b32.xlu0 %v9616_v56, 272 }
0x15da   : > { %9611 = vbcast.lane.b32.xlu1 %v9597_v29, 280  ;;  %9607 = vbcast.lane.b32.xlu0 %v9597_v29, 272 }
0x15de   : > { %9584 = vbcast.lane.b32.xlu1 %v9578_v43, 264  ;;  %9580 = vbcast.lane.b32.xlu0 %v9578_v43, 256 }
0x15e2   : > { %9565 = vbcast.lane.b32.xlu1 %v9559_v9, 264  ;;  %9561 = vbcast.lane.b32.xlu0 %v9559_v9, 256 }
0x15e6   : > { %9592 = vbcast.lane.b32.xlu1 %v9578_v43, 280  ;;  %9588 = vbcast.lane.b32.xlu0 %v9578_v43, 272 }
0x15ea   : > { %9573 = vbcast.lane.b32.xlu1 %v9559_v9, 280  ;;  %9569 = vbcast.lane.b32.xlu0 %v9559_v9, 272  ;;  %v16131_v9 = vrot.slane %v9973_v14, %v16639_v22 }
0x15ee   : > { %9946 = vbcast.lane.b32.xlu1 %v9940_v36, 264  ;;  %9942 = vbcast.lane.b32.xlu0 %v9940_v36, 256 }
0x15f2   : > { %9927 = vbcast.lane.b32.xlu1 %v9921_v45, 264  ;;  %9923 = vbcast.lane.b32.xlu0 %v9921_v45, 256 }
0x15f6   : > { %9954 = vbcast.lane.b32.xlu1 %v9940_v36, 280  ;;  %9950 = vbcast.lane.b32.xlu0 %v9940_v36, 272 }
0x15fa   : > { %9935 = vbcast.lane.b32.xlu1 %v9921_v45, 280  ;;  %9931 = vbcast.lane.b32.xlu0 %v9921_v45, 272 }
0x15fe   : > { %9908 = vbcast.lane.b32.xlu1 %v9902_v21, 264  ;;  %9904 = vbcast.lane.b32.xlu0 %v9902_v21, 256 }
0x1602   : > { %9889 = vbcast.lane.b32.xlu1 %v9883_v28, 264  ;;  %9885 = vbcast.lane.b32.xlu0 %v9883_v28, 256 }
0x1606   : > { %9916 = vbcast.lane.b32.xlu1 %v9902_v21, 280  ;;  %9912 = vbcast.lane.b32.xlu0 %v9902_v21, 272 }
0x160a   : > { %9897 = vbcast.lane.b32.xlu1 %v9883_v28, 280  ;;  %9893 = vbcast.lane.b32.xlu0 %v9883_v28, 272 }
0x160e   : > { %9870 = vbcast.lane.b32.xlu1 %v9864_v52, 264  ;;  %9866 = vbcast.lane.b32.xlu0 %v9864_v52, 256 }
0x1612   : > { %9851 = vbcast.lane.b32.xlu1 %v9845_v13, 264  ;;  %9847 = vbcast.lane.b32.xlu0 %v9845_v13, 256 }
0x1616   : > { %9878 = vbcast.lane.b32.xlu1 %v9864_v52, 280  ;;  %9874 = vbcast.lane.b32.xlu0 %v9864_v52, 272 }
0x161a   : > { %9859 = vbcast.lane.b32.xlu1 %v9845_v13, 280  ;;  %9855 = vbcast.lane.b32.xlu0 %v9845_v13, 272  ;;  %v16140_v13 = vrot.slane %v9971_v27, %v16639_v22 }
0x161e   : > { %9832 = vbcast.lane.b32.xlu1 %v9826_v59, 264  ;;  %9828 = vbcast.lane.b32.xlu0 %v9826_v59, 256 }
0x1620   : > { %v9699_v54 = vpop.permute.xlu1 %9698  ;;  %v9695_v18 = vpop.permute.xlu0 %9694 }
0x1621   : > { %v9737_v39 = vmul.f32 %v9699_v54, %v16673_v31  ;;  %v9736_v30 = vmul.f32 %v9695_v18, %v16674_v61 }
0x1622   : > { %9813 = vbcast.lane.b32.xlu1 %v9807_v58, 264  ;;  %9809 = vbcast.lane.b32.xlu0 %v9807_v58, 256 }
0x1623   : > { %v9798_v57 = vmul.f32 1.442695, %v9737_v39  ;;  %v9796_v17 = vmul.f32 1.442695, %v9736_v30 }
0x1624   : > { %v9680_v62 = vpop.permute.xlu1 %9679  ;;  %v9676_v35 = vpop.permute.xlu0 %9675 }
0x1625   : > { %v9733_v38 = vmul.f32 %v9680_v62, %v16673_v31  ;;  %v9732_v12 = vmul.f32 %v9676_v35, %v16674_v61  ;;  %13446 = vpow2.f32 %v9798_v57 }
0x1626   : > { %9840 = vbcast.lane.b32.xlu1 %v9826_v59, 280  ;;  %9836 = vbcast.lane.b32.xlu0 %v9826_v59, 272  ;;  %13448 = vpow2.f32 %v9796_v17  ;;  %v10005_v59 = vcombine.high %v16131_v9, %v16131_v9 }
0x1627   : > { %v9790_v24 = vmul.f32 1.442695, %v9733_v38  ;;  %v9788_v43 = vmul.f32 1.442695, %v9732_v12 }
0x1628   : > { %v9707_v26 = vpop.permute.xlu1 %9706  ;;  %v9703_v6 = vpop.permute.xlu0 %9702  ;;  %v10037_v53 = vrot.slane %v10005_v59, %v14017_v20 }
0x1629   : > { %v9739_v11 = vmul.f32 %v9707_v26, %v16675_v40  ;;  %v9738_v56 = vmul.f32 %v9703_v6, %v16676_v8  ;;  %13450 = vpow2.f32 %v9790_v24 }
0x162a   : > { %9821 = vbcast.lane.b32.xlu1 %v9807_v58, 280  ;;  %9817 = vbcast.lane.b32.xlu0 %v9807_v58, 272  ;;  %13452 = vpow2.f32 %v9788_v43 }
0x162b   : > { %v9802_v33 = vmul.f32 1.442695, %v9739_v11  ;;  %v9800_v36 = vmul.f32 1.442695, %v9738_v56 }
0x162c   : > { %v9688_v3 = vpop.permute.xlu1 %9687  ;;  %v9684_v41 = vpop.permute.xlu0 %9683 }
0x162d   : > { %v9735_v28 = vmul.f32 %v9688_v3, %v16675_v40  ;;  %v9734_v52 = vmul.f32 %v9684_v41, %v16676_v8  ;;  %13454 = vpow2.f32 %v9802_v33  ;;  %v10003_v41 = vcombine.high %v16140_v13, %v16140_v13 }
0x162e   : > { %13456 = vpow2.f32 %v9800_v36 }
0x162f   : > { %v13447_v62 = vpop.eup %13446  ;;  %v9794_v35 = vmul.f32 1.442695, %v9735_v28  ;;  %v9792_v6 = vmul.f32 1.442695, %v9734_v52  ;;  %v10033_v43 = vrot.slane %v10003_v41, %v14017_v20 }
0x1630   : > { %v9661_v49 = vpop.permute.xlu1 %9660  ;;  %v9657_v15 = vpop.permute.xlu0 %9656  ;;  %v10079_v39 = vmul.f32 0.0, %v13447_v62 }
0x1631   : > { %v9729_v54 = vmul.f32 %v9661_v49, %v16673_v31  ;;  %v13449_v26 = vpop.eup %13448  ;;  %v9728_v3 = vmul.f32 %v9657_v15, %v16674_v61  ;;  %13458 = vpow2.f32 %v9794_v35 }
0x1632   : > { %v10078_v17 = vmul.f32 0.0, %v13449_v26  ;;  %13460 = vpow2.f32 %v9792_v6 }
0x1633   : > { %v9782_v30 = vmul.f32 1.442695, %v9729_v54  ;;  %v9780_v14 = vmul.f32 1.442695, %v9728_v3  ;;  %v13451_v11 = vpop.eup %13450 }
0x1634   : > { %v9642_v63 = vpop.permute.xlu1 %9641  ;;  %v16087_v32 = vpop.permute.xlu0 %9637 }
0x1635   : > { %v9725_v27 = vmul.f32 %v9642_v63, %v16673_v31  ;;  %v9724_v15 = vmul.f32 %v16087_v32, %v16674_v61  ;;  %v13453_v33 = vpop.eup %13452  ;;  %13462 = vpow2.f32 %v9782_v30 }
0x1636   : > { %13464 = vpow2.f32 %v9780_v14 }
0x1637   : > { %v9774_v36 = vmul.f32 1.442695, %v9725_v27  ;;  %v13455_v59 = vpop.eup %13454  ;;  %v9772_v32 = vmul.f32 1.442695, %v9724_v15 }
0x1638   : > { %v16089_v25 = vpop.permute.xlu1 %9668  ;;  %v16091_v2 = vpop.permute.xlu0 %9664  ;;  %v10081_v30 = vmul.f32 0.0, %v13455_v59 }
0x1639   : > { %v9731_v63 = vmul.f32 %v16089_v25, %v16675_v40  ;;  %v13457_v6 = vpop.eup %13456  ;;  %v9730_v3 = vmul.f32 %v16091_v2, %v16676_v8  ;;  %13466 = vpow2.f32 %v9774_v36 }
0x163a   : > { %13468 = vpow2.f32 %v9772_v32 }
0x163b   : > { %v9786_v25 = vmul.f32 1.442695, %v9731_v63  ;;  %v9784_v2 = vmul.f32 1.442695, %v9730_v3  ;;  %v10029_v3 = vrot.slane %v16131_v9, %v14017_v20 }
0x163c   : > { %v16093_v48 = vpop.permute.xlu1 %9649  ;;  %v16095_v19 = vpop.permute.xlu0 %9645 }
0x163d   : > { %v9727_v27 = vmul.f32 %v16093_v48, %v16675_v40  ;;  %v9726_v15 = vmul.f32 %v16095_v19, %v16676_v8  ;;  %13470 = vpow2.f32 %v9786_v25 }
0x163e   : > { %13472 = vpow2.f32 %v9784_v2 }
0x163f   : > { %v9778_v48 = vmul.f32 1.442695, %v9727_v27 }
0x1640   : > { %v16097_v34 = vpop.permute.xlu1 %9622  ;;  %v16099_v7 = vpop.permute.xlu0 %9618 }
0x1641   : > { %13474 = vpow2.f32 %v9778_v48 }
0x1644   : > { %v16101_v0 = vpop.permute.xlu1 %9603  ;;  %v16103_v44 = vpop.permute.xlu0 %9599 }
0x1645   : > { %v9717_v25 = vmul.f32 %v16101_v0, %v16673_v31  ;;  %v9716_v9 = vmul.f32 %v16103_v44, %v16674_v61  ;;  %v16192_v0 = vrot.slane %v16140_v13, %v14017_v20 }
0x1648   : > { %v16105_v55 = vpop.permute.xlu1 %9630  ;;  %v16107_v60 = vpop.permute.xlu0 %9626 }
0x164c   : > { %v16113_v42 = vpop.permute.xlu1 %9611  ;;  %v16115_v51 = vpop.permute.xlu0 %9607 }
0x1650   : > { %v16118_v16 = vpop.permute.xlu1 %9584  ;;  %v16120_v46 = vpop.permute.xlu0 %9580 }
0x1654   : > { %v16126_v50 = vpop.permute.xlu1 %9565  ;;  %v16128_v29 = vpop.permute.xlu0 %9561 }
0x1658   : > { %v16133_v45 = vpop.permute.xlu1 %9592  ;;  %v16135_v21 = vpop.permute.xlu0 %9588 }
0x165c   : > { %v16145_v18 = vpop.permute.xlu1 %9573  ;;  %v16147_v58 = vpop.permute.xlu0 %9569 }
0x1660   : > { %v9947_v49 = vpop.permute.xlu1 %9946  ;;  %v9943_v57 = vpop.permute.xlu0 %9942 }
0x1661   : > { %v10075_v38 = vmul.f32 %v10037_v53, %v9947_v49  ;;  %v10074_v12 = vmul.f32 %v10037_v53, %v9943_v57 }
0x1663   : > { %v10083_v56 = vadd.f32 %v10079_v39, %v10075_v38  ;;  %v10082_v24 = vadd.f32 %v10078_v17, %v10074_v12  ;;  %v10080_v38 = vmul.f32 0.0, %v13457_v6 }
0x1664   : > { %v9928_v28 = vpop.permute.xlu1 %9927  ;;  %v9924_v52 = vpop.permute.xlu0 %9923 }
0x1665   : > { %v12872_v54 = vpack.c.bf16 %v10083_v56, %v10082_v24  ;;  %v10173_v62 = vmul.f32 %v13451_v11, %v10083_v56  ;;  %v10071_v35 = vmul.f32 %v10033_v43, %v9928_v28  ;;  %v10172_v26 = vmul.f32 %v13453_v33, %v10082_v24  ;;  %v13459_v56 = vpop.eup %13458 }
0x1666   : > { %v10070_v41 = vmul.f32 %v10033_v43, %v9924_v52  ;;  %v13461_v63 = vpop.eup %13460  ;;  %v9721_v28 = vmul.f32 %v16097_v34, %v16673_v31  ;;  %v16177_v34 = vrot.slane %v16065_v5, %v16639_v22 }
0x1667   : > { %v10177_v39 = vadd.f32 %v10173_v62, %v10071_v35  ;;  %12874 = vmatpush3.bf16.xpose.msk.msra.mxu1 %vm14224_vm11, %v12872_v54  ;;  %v13463_v19 = vpop.eup %13462  ;;  %v9776_v35 = vmul.f32 1.442695, %v9726_v15 }
0x1668   : > { %v10176_v49 = vadd.f32 %v10172_v26, %v10070_v41  ;;  %v9955_v57 = vpop.permute.xlu1 %9954  ;;  %v9951_v17 = vpop.permute.xlu0 %9950  ;;  %12875 = vmatprep.subr.bf16.mxu1 %v16543_v1  ;;  %v9720_v26 = vmul.f32 %v16099_v7, %v16674_v61  ;;  %v9972_v15 = vcombine.high %v16177_v34, %v16177_v34 }
0x1669   : > { %v10077_v12 = vmul.f32 %v10037_v53, %v9955_v57  ;;  %v10076_v14 = vmul.f32 %v10037_v53, %v9951_v17  ;;  %v13465_v41 = vpop.eup %13464  ;;  %v10266_v5 = vmul.f32 %v13463_v19, %v10177_v39  ;;  %13476 = vpow2.f32 %v9776_v35 }
0x166a   : > { %v12880_v11 = vpack.c.bf16 %v10177_v39, %v10176_v49  ;;  %v10265_v17 = vmul.f32 %v13465_v41, %v10176_v49  ;;  %v13467_v2 = vpop.eup %13466  ;;  %v9758_v49 = vmul.f32 1.442695, %v9717_v25  ;;  %v10180_v19 = vrot.slane %v16068_v47, 6 }
0x166b   : > { %v10085_v24 = vadd.f32 %v10081_v30, %v10077_v12  ;;  %v10084_v33 = vadd.f32 %v10080_v38, %v10076_v14  ;;  %v9766_v30 = vmul.f32 1.442695, %v9721_v28  ;;  %v9764_v12 = vmul.f32 1.442695, %v9720_v26  ;;  %v13469_v39 = vpop.eup %13468 }
0x166c   : > { %12882 = vmatpush3.bf16.xpose.msk.msra.mxu0 %vm14224_vm11, %v12880_v11  ;;  %v9936_v36 = vpop.permute.xlu1 %9935  ;;  %v9932_v53 = vpop.permute.xlu0 %9931 }
0x166d   : > { %v12876_v52 = vpack.c.bf16 %v10085_v24, %v10084_v33  ;;  %v10175_v59 = vmul.f32 %v13459_v56, %v10085_v24  ;;  %v10073_v54 = vmul.f32 %v10033_v43, %v9936_v36  ;;  %v10174_v62 = vmul.f32 %v13461_v63, %v10084_v33  ;;  %12883 = vmatprep.subr.bf16.mxu0 %v16543_v1 }
0x166e   : > { %v10072_v6 = vmul.f32 %v10033_v43, %v9932_v53  ;;  %13478 = vpow2.f32 %v9766_v30  ;;  %v9723_v24 = vmul.f32 %v16105_v55, %v16675_v40  ;;  %v10087_v63 = vrot.slane %v16068_v47, 7  ;;  %v13471_v53 = vpop.eup %13470 }
0x166f   : > { %v10179_v32 = vadd.f32 %v10175_v59, %v10073_v54  ;;  %12878 = vmatpush3.bf16.xpose.msk.msra.mxu1 %vm14224_vm11, %v12876_v52  ;;  %13480 = vpow2.f32 %v9764_v12  ;;  %v9756_v52 = vmul.f32 1.442695, %v9716_v9  ;;  %v9722_v55 = vmul.f32 %v16107_v60, %v16676_v8  ;;  %v13473_v35 = vpop.eup %13472 }
0x1670   : > { %v10178_v27 = vadd.f32 %v10174_v62, %v10072_v6  ;;  %v9909_v7 = vpop.permute.xlu1 %9908  ;;  %v9905_v43 = vpop.permute.xlu0 %9904  ;;  %12887 = vmatprep.subr.bf16.mxu1 %v16543_v1  ;;  %v16206_v54 = vrot.slane %v9972_v15, %v16639_v22  ;;  %13482 = vpow2.f32 %v9758_v49  ;;  %v9770_v26 = vmul.f32 1.442695, %v9723_v24 }
0x1671   : > { %v10067_v57 = vmul.f32 %v10029_v3, %v9909_v7  ;;  %v10066_v38 = vmul.f32 %v10029_v3, %v9905_v43  ;;  %v9719_v60 = vmul.f32 %v16113_v42, %v16675_v40  ;;  %v10268_v25 = vmul.f32 %v13471_v53, %v10179_v32 }
0x1672   : > { %v12884_v14 = vpack.c.bf16 %v10179_v32, %v10178_v27  ;;  %v10267_v43 = vmul.f32 %v13473_v35, %v10178_v27  ;;  %13484 = vpow2.f32 %v9756_v52  ;;  %v16220_v9 = vrot.slane %v16177_v34, %v16639_v22 }
0x1673   : > { %v10270_v11 = vadd.f32 %v10266_v5, %v10067_v57  ;;  %v10269_v56 = vadd.f32 %v10265_v17, %v10066_v38  ;;  %v13475_v57 = vpop.eup %13474  ;;  %v9768_v17 = vmul.f32 1.442695, %v9722_v55  ;;  %v9718_v38 = vmul.f32 %v16115_v51, %v16676_v8 }
0x1674   : > { %12886 = vmatpush3.bf16.xpose.msk.msra.mxu0 %vm14224_vm11, %v12884_v14  ;;  %v9890_v44 = vpop.permute.xlu1 %9889  ;;  %v9886_v33 = vpop.permute.xlu0 %9885  ;;  %v10004_v42 = vcombine.high %v16206_v54, %v16206_v54  ;;  %13486 = vpow2.f32 %v9770_v26  ;;  %v9713_v27 = vmul.f32 %v16118_v16, %v16673_v31  ;;  %v9712_v16 = vmul.f32 %v16120_v46, %v16674_v61 }
0x1675   : > { %v12888_v48 = vpack.c.bf16 %v10270_v11, %v10269_v56  ;;  %v10359_v28 = vmul.f32 %v13467_v2, %v10270_v11  ;;  %v10063_v13 = vmul.f32 %v16192_v0, %v9890_v44  ;;  %v10358_v36 = vmul.f32 %v13469_v39, %v10269_v56  ;;  %12895 = vmatprep.subr.bf16.mxu0 %v16543_v1  ;;  %v13477_v32 = vpop.eup %13476 }
0x1676   : > { %v10062_v59 = vmul.f32 %v16192_v0, %v9886_v33  ;;  %12450 = vmatmul.mubr.msk.f32.vlgmr.msra.gmra.mrb[78].mxu1 %vm1180_vm2, %v10087_v63  ;;  %13488 = vpow2.f32 %v9768_v17  ;;  %v9760_v49 = vmul.f32 1.442695, %v9718_v38  ;;  %v10002_v44 = vcombine.high %v16220_v9, %v16220_v9 }
0x1677   : > { %v10363_v62 = vadd.f32 %v10359_v28, %v10063_v13  ;;  %12890 = vmatpush3.bf16.xpose.msk.msra.mxu1 %vm14224_vm11, %v12888_v48  ;;  %12471 = vmatprep.mubr.msk.f32.mxu1 %vm13660_vm1, %v16544_v4  ;;  %v10021_v63 = vrot.slane %v10004_v42, %v14017_v20  ;;  %v9750_v28 = vmul.f32 1.442695, %v9713_v27  ;;  %v9709_v13 = vmul.f32 %v16126_v50, %v16673_v31 }
0x1678   : > { %v10362_v6 = vadd.f32 %v10358_v36, %v10062_v59  ;;  %v9917_v41 = vpop.permute.xlu1 %9916  ;;  %v9913_v30 = vpop.permute.xlu0 %9912  ;;  %12891 = vmatprep.subr.bf16.mxu1 %v16543_v1  ;;  %v9748_v35 = vmul.f32 1.442695, %v9712_v16  ;;  %v9708_v26 = vmul.f32 %v16128_v29, %v16674_v61 }
0x1679   : > { %v10069_v7 = vmul.f32 %v10029_v3, %v9917_v41  ;;  %v10068_v5 = vmul.f32 %v10029_v3, %v9913_v30  ;;  %v9762_v3 = vmul.f32 1.442695, %v9719_v60  ;;  %v13479_v39 = vpop.eup %13478  ;;  %v10017_v41 = vrot.slane %v10002_v44, %v14017_v20 }
0x167a   : > { %v12896_v12 = vpack.c.bf16 %v10363_v62, %v10362_v6  ;;  %v13481_v48 = vpop.eup %13480  ;;  %v9740_v38 = vmul.f32 1.442695, %v9708_v26 }
0x167b   : > { %v10272_v14 = vadd.f32 %v10268_v25, %v10069_v7  ;;  %v10271_v2 = vadd.f32 %v10267_v43, %v10068_v5  ;;  %12461 = vmatmul.mubr.msk.f32.vlgmr.msra.gmra.mrb[82].mxu0 %vm1180_vm2, %v10180_v19  ;;  %13490 = vpow2.f32 %v9762_v3  ;;  %v10451_v55 = vmul.f32 %v13481_v48, %v10362_v6  ;;  %v13483_v19 = vpop.eup %13482 }
0x167c   : > { %12898 = vmatpush3.bf16.xpose.msk.msra.mxu0 %vm14224_vm11, %v12896_v12  ;;  %v9898_v51 = vpop.permute.xlu1 %9897  ;;  %v9894_v15 = vpop.permute.xlu0 %9893  ;;  %12482 = vmatprep.mubr.msk.f32.mxu0 %vm13660_vm1, %v16544_v4  ;;  %13492 = vpow2.f32 %v9760_v49  ;;  %v9742_v25 = vmul.f32 1.442695, %v9709_v13  ;;  %v10273_v43 = vrot.slane %v16068_v47, 5  ;;  %v9714_v12 = vmul.f32 %v16135_v21, %v16676_v8 }
0x167d   : > { %v12892_v22 = vpack.c.bf16 %v10272_v14, %v10271_v2  ;;  %v10361_v34 = vmul.f32 %v13475_v57, %v10272_v14  ;;  %v10065_v11 = vmul.f32 %v16192_v0, %v9898_v51  ;;  %v10360_v56 = vmul.f32 %v13477_v32, %v10271_v2  ;;  %12899 = vmatprep.subr.bf16.mxu0 %v16543_v1  ;;  %v13485_v50 = vpop.eup %13484 }
0x167e   : > { %v10064_v24 = vmul.f32 %v16192_v0, %v9894_v15  ;;  %v10452_v0 = vmul.f32 %v13479_v39, %v10363_v62  ;;  %13494 = vpow2.f32 %v9750_v28  ;;  %v9715_v62 = vmul.f32 %v16133_v45, %v16675_v40  ;;  %v13487_v17 = vpop.eup %13486 }
0x167f   : > { %v10365_v33 = vadd.f32 %v10361_v34, %v10065_v11  ;;  %12894 = vmatpush3.bf16.xpose.msk.msra.mxu1 %vm14224_vm11, %v12892_v22  ;;  %13496 = vpow2.f32 %v9748_v35  ;;  %v10366_v14 = vrot.slane %v16068_v47, 4  ;;  %v9711_v3 = vmul.f32 %v16145_v18, %v16675_v40 }
0x1680   : > { %v10364_v36 = vadd.f32 %v10360_v56, %v10064_v24  ;;  %v9871_v53 = vpop.permute.xlu1 %9870  ;;  %v9867_v46 = vpop.permute.xlu0 %9866  ;;  %12903 = vmatprep.subr.bf16.mxu1 %v16543_v1  ;;  %13498 = vpow2.f32 %v9742_v25  ;;  %v9754_v32 = vmul.f32 1.442695, %v9715_v62  ;;  %v9752_v39 = vmul.f32 1.442695, %v9714_v12 }
0x1681   : > { %v10059_v52 = vmul.f32 %v10021_v63, %v9871_v53  ;;  %v10058_v59 = vmul.f32 %v10021_v63, %v9867_v46  ;;  %v13489_v2 = vpop.eup %13488  ;;  %v10454_v15 = vmul.f32 %v13487_v17, %v10365_v33  ;;  %13500 = vpow2.f32 %v9740_v38 }
0x1682   : > { %v12900_v60 = vpack.c.bf16 %v10365_v33, %v10364_v36  ;;  %v10453_v34 = vmul.f32 %v13489_v2, %v10364_v36  ;;  %v9710_v49 = vmul.f32 %v16147_v58, %v16676_v8  ;;  %13502 = vpow2.f32 %v9754_v32 }
0x1683   : > { %v10456_v30 = vadd.f32 %v10452_v0, %v10059_v52  ;;  %v10455_v31 = vadd.f32 %v10451_v55, %v10058_v59  ;;  %v9746_v18 = vmul.f32 1.442695, %v9711_v3  ;;  %13504 = vpow2.f32 %v9752_v39 }
0x1684   : > { %12902 = vmatpush3.bf16.xpose.msk.msra.mxu0 %vm14224_vm11, %v12900_v60  ;;  %v9852_v6 = vpop.permute.xlu1 %9851  ;;  %v9848_v7 = vpop.permute.xlu0 %9847  ;;  %v9744_v36 = vmul.f32 1.442695, %v9710_v49  ;;  %v10013_v46 = vrot.slane %v16206_v54, %v14017_v20  ;;  %v10009_v54 = vrot.slane %v16220_v9, %v14017_v20 }
0x1685   : > { %v12904_v5 = vpack.c.bf16 %v10456_v30, %v10455_v31  ;;  %v10545_v61 = vmul.f32 %v13483_v19, %v10456_v30  ;;  %v10055_v29 = vmul.f32 %v10017_v41, %v9852_v6  ;;  %v10544_v57 = vmul.f32 %v13485_v50, %v10455_v31  ;;  %12911 = vmatprep.subr.bf16.mxu0 %v16543_v1  ;;  %v13491_v56 = vpop.eup %13490 }
0x1686   : > { %v10054_v45 = vmul.f32 %v10017_v41, %v9848_v7  ;;  %12472 = vmatmul.mubr.msk.f32.vlgmr.msra.gmra.mrb[88].mxu1 %vm1180_vm2, %v10273_v43  ;;  %v13493_v40 = vpop.eup %13492  ;;  %13506 = vpow2.f32 %v9746_v18  ;;  %v10459_v43 = vrot.slane %v16068_v47, 3 }
0x1687   : > { %v10549_v42 = vadd.f32 %v10545_v61, %v10055_v29  ;;  %12906 = vmatpush3.bf16.xpose.msk.msra.mxu1 %vm14224_vm11, %v12904_v5  ;;  %12493 = vmatprep.mubr.msk.f32.mxu1 %vm13660_vm1, %v16544_v4  ;;  %13508 = vpow2.f32 %v9744_v36 }
0x1688   : > { %v10548_v27 = vadd.f32 %v10544_v57, %v10054_v45  ;;  %v9879_v21 = vpop.permute.xlu1 %9878  ;;  %v9875_v51 = vpop.permute.xlu0 %9874  ;;  %12907 = vmatprep.subr.bf16.mxu1 %v16543_v1 }
0x1689   : > { %v10061_v22 = vmul.f32 %v10021_v63, %v9879_v21  ;;  %v10060_v11 = vmul.f32 %v10021_v63, %v9875_v51  ;;  %v13495_v58 = vpop.eup %13494 }
0x168a   : > { %v12912_v16 = vpack.c.bf16 %v10549_v42, %v10548_v27  ;;  %v13497_v52 = vpop.eup %13496  ;;  %v10638_v35 = vmul.f32 %v13495_v58, %v10549_v42 }
0x168b   : > { %v10458_v24 = vadd.f32 %v10454_v15, %v10061_v22  ;;  %v10457_v44 = vadd.f32 %v10453_v34, %v10060_v11  ;;  %12483 = vmatmul.mubr.msk.f32.vlgmr.msra.gmra.mrb[92].mxu0 %vm1180_vm2, %v10366_v14  ;;  %v10637_v60 = vmul.f32 %v13497_v52, %v10548_v27  ;;  %v13499_v31 = vpop.eup %13498  ;;  %v10552_v14 = vrot.slane %v16068_v47, 2 }
0x168c   : > { %12914 = vmatpush3.bf16.xpose.msk.msra.mxu0 %vm14224_vm11, %v12912_v16  ;;  %v9860_v33 = vpop.permute.xlu1 %9859  ;;  %v9856_v48 = vpop.permute.xlu0 %9855  ;;  %12504 = vmatprep.mubr.msk.f32.mxu0 %vm13660_vm1, %v16544_v4 }
0x168d   : > { %v12908_v63 = vpack.c.bf16 %v10458_v24, %v10457_v44  ;;  %v10547_v28 = vmul.f32 %v13491_v56, %v10458_v24  ;;  %v10057_v13 = vmul.f32 %v10017_v41, %v9860_v33  ;;  %v10546_v8 = vmul.f32 %v13493_v40, %v10457_v44  ;;  %12915 = vmatprep.subr.bf16.mxu0 %v16543_v1  ;;  %v13501_v62 = vpop.eup %13500 }
0x168e   : > { %v10056_v53 = vmul.f32 %v10017_v41, %v9856_v48  ;;  %v13503_v17 = vpop.eup %13502  ;;  %v10645_v48 = vrot.slane %v16068_v47, 1 }
0x168f   : > { %v10551_v0 = vadd.f32 %v10547_v28, %v10057_v13  ;;  %12910 = vmatpush3.bf16.xpose.msk.msra.mxu1 %vm14224_vm11, %v12908_v63  ;;  %v13505_v9 = vpop.eup %13504  ;;  %v16677_v63 = vld [vmem:[#allocation69_spill] sm:$0xff] }
0x1690   : > { %v10550_v55 = vadd.f32 %v10546_v8, %v10056_v53  ;;  %v9833_v59 = vpop.permute.xlu1 %9832  ;;  %v9829_v19 = vpop.permute.xlu0 %9828  ;;  %12919 = vmatprep.subr.bf16.mxu1 %v16543_v1 }
0x1691   : > { %v10051_v26 = vmul.f32 %v10013_v46, %v9833_v59  ;;  %v10050_v30 = vmul.f32 %v10013_v46, %v9829_v19  ;;  %v10640_v2 = vmul.f32 %v13503_v17, %v10551_v0  ;;  %v13507_v21 = vpop.eup %13506 }
0x1692   : > { %v12916_v41 = vpack.c.bf16 %v10551_v0, %v10550_v55  ;;  %v10639_v3 = vmul.f32 %v13505_v9, %v10550_v55  ;;  %v13509_v34 = vpop.eup %13508 }
0x1693   : > { %v10642_v50 = vadd.f32 %v10638_v35, %v10051_v26  ;;  %v10641_v25 = vadd.f32 %v10637_v60, %v10050_v30 }
0x1694   : > { %12918 = vmatpush3.bf16.xpose.msk.msra.mxu0 %vm14224_vm11, %v12916_v41  ;;  %v9814_v6 = vpop.permute.xlu1 %9813  ;;  %v9810_v7 = vpop.permute.xlu0 %9809 }
0x1695   : > { %v12920_v5 = vpack.c.bf16 %v10642_v50, %v10641_v25  ;;  %v10731_v61 = vmul.f32 %v13499_v31, %v10642_v50  ;;  %v10047_v29 = vmul.f32 %v10009_v54, %v9814_v6  ;;  %v10730_v57 = vmul.f32 %v13501_v62, %v10641_v25  ;;  %12927 = vmatprep.subr.bf16.mxu0 %v16543_v1 }
0x1696   : > { %v10046_v38 = vmul.f32 %v10009_v54, %v9810_v7  ;;  %12494 = vmatmul.mubr.msk.f32.vlgmr.msra.gmra.mrb[90].mxu1 %vm1180_vm2, %v10459_v43 }
0x1697   : > { %v10735_v20 = vadd.f32 %v10731_v61, %v10047_v29  ;;  %12922 = vmatpush3.bf16.xpose.msk.msra.mxu1 %vm14224_vm11, %v12920_v5  ;;  %12515 = vmatprep.mubr.msk.f32.mxu1 %vm13660_vm1, %v16544_v4 }
0x1698   : > { %v10734_v12 = vadd.f32 %v10730_v57, %v10046_v38  ;;  %v9841_v45 = vpop.permute.xlu1 %9840  ;;  %v9837_v42 = vpop.permute.xlu0 %9836  ;;  %12923 = vmatprep.subr.bf16.mxu1 %v16543_v1 }
0x1699   : > { %v10053_v32 = vmul.f32 %v10013_v46, %v9841_v45  ;;  %v10052_v27 = vmul.f32 %v10013_v46, %v9837_v42 }
0x169a   : > { %v12928_v51 = vpack.c.bf16 %v10735_v20, %v10734_v12  ;;  %v13559_v12 = vld [vmem:[%s16647_s6] ss:$0 sm:$0xff]  ;;  %s16335_s6 = scalar_lea.hbm %s13848_s20, %s11471_s2 }
0x169b   : > { %v10644_v15 = vadd.f32 %v10640_v2, %v10053_v32  ;;  %v10643_v22 = vadd.f32 %v10639_v3, %v10052_v27  ;;  %12505 = vmatmul.mubr.msk.f32.vlgmr.msra.gmra.mrb[94].mxu0 %vm1180_vm2, %v10552_v14  ;;  %v10850_v45 = vmul.f32 %v13559_v12, %v16046_v23 }
0x169c   : > { %12930 = vmatpush3.bf16.xpose.msk.msra.mxu0 %vm14224_vm11, %v12928_v51  ;;  %v9822_v11 = vpop.permute.xlu1 %9821  ;;  %v9818_v56 = vpop.permute.xlu0 %9817  ;;  %12526 = vmatprep.mubr.msk.f32.mxu0 %vm13660_vm1, %v16544_v4 }
0x169d   : > { %v12924_v39 = vpack.c.bf16 %v10644_v15, %v10643_v22  ;;  %v10733_v49 = vmul.f32 %v13507_v21, %v10644_v15  ;;  %v10049_v16 = vmul.f32 %v10009_v54, %v9822_v11  ;;  %v10732_v24 = vmul.f32 %v13509_v34, %v10643_v22  ;;  %12931 = vmatprep.subr.bf16.mxu0 %v16543_v1  ;;  %v13557_v1 = vld [vmem:[%s16512_s10] ss:$0 sm:$0xff] }
0x169e   : > { %v10048_v44 = vmul.f32 %v10009_v54, %v9818_v56  ;;  %v7731_v28 = vadd.f32 %v13557_v1, %v16677_v63 }
0x169f   : > { %v10737_v40 = vadd.f32 %v10733_v49, %v10049_v16  ;;  %12926 = vmatpush3.bf16.xpose.msk.msra.mxu1 %vm14224_vm11, %v12924_v39 }
0x16a0   : > { %v10736_v18 = vadd.f32 %v10732_v24, %v10048_v44  ;;  %12529 = vmatprep.subr.mxu1 %v16544_v4 }
0x16a2   : > { %v12932_v33 = vpack.c.bf16 %v10737_v40, %v10736_v18 }
0x16a4   : > { %12934 = vmatpush3.bf16.xpose.msk.msra.mxu0 %vm14224_vm11, %v12932_v33  ;;  %v16680_v33 = vld [vmem:[#allocation42_spill] sm:$0xff] }
0x16a5   : > { %12534 = vmatprep.subr.mxu0 %v16544_v4 }
0x16a6   : > { %12516 = vmatmul.mubr.msk.f32.vlgmr.msra.gmra.mrb[92].mxu1 %vm1180_vm2, %v10645_v48 }
0x16a7   : > { %12531 = vmatprep.mubr.msk.f32.mxu1 %vm13660_vm1, %v16544_v4 }
0x16ab   : > { %12527 = vmatmul.mubr.msk.f32.vlgmr.msra.gmra.mrb[96].mxu0 %vm1180_vm2, %v16068_v47  ;;  %v16678_v47 = vld [vmem:[#allocation68_spill] sm:$0xff] }
0x16ac   : > { %12535 = vmatpush3.msra.mxu0 %v7731_v28  ;;  %12536 = vmatprep.mubr.msk.f32.mxu0 %vm13660_vm1, %v16544_v4  ;;  %v9347_v26 = vmul.f32 %v16063_v10, %v16678_v47 }
0x16ae   : > { %v11419_v30 = vmul.f32 -1.442695, %v9347_v26 }
0x16af   : > { %12537 = vmatmul.mubr.msk.f32.vlgmr.msra.gmra.mrb[98].mxu0 %vm7603_vm0, %v13558_v37 }
0x16b0   : > { %13510 = vpow2.f32 %v11419_v30 }
0x16ba   : > { %v13511_v2 = vpop.eup %13510 }
0x16bb   : > { %v9351_v32 = vadd.f32 1.0, %v13511_v2 }
0x1749   : > { %v10168_v13 = vpop.f32.mrb[78].mxu1 }
0x174a   : > { %v12451_v8 = vpop.f32.mrb[79].mxu1  ;;  %v10841_v57 = vrot.slane %v10168_v13, 1 }
0x174e   : > { %v10261_v58 = vpop.f32.mrb[82].mxu0 }
0x174f   : > { %v12462_v36 = vpop.f32.mrb[83].mxu0  ;;  %v10838_v61 = vrot.slane %v10261_v58, 2 }
0x1759   : > { %v10354_v53 = vpop.f32.mrb[88].mxu1 }
0x175a   : > { %v12473_v46 = vpop.f32.mrb[89].mxu1  ;;  %v10835_v43 = vrot.slane %v10354_v53, 3 }
0x175e   : > { %v10447_v0 = vpop.f32.mrb[92].mxu0 }
0x175f   : > { %v12484_v52 = vpop.f32.mrb[93].mxu0  ;;  %v10832_v6 = vrot.slane %v10447_v0, 4  ;;  %v11468_v0 = vld [vmem:[%s16679_s4] ss:$0 sm:$0xff]  ;;  %s11043_s4 = scalar_lea.sflag [#allocation3], %s1061_s26 }
0x1769   : > { %v10540_v55 = vpop.f32.mrb[90].mxu1 }
0x176a   : > { %v12495_v59 = vpop.f32.mrb[91].mxu1  ;;  %v10829_v50 = vrot.slane %v10540_v55, 5  ;;  %v11469_v55 = vld [vmem:[%s13843_s24] ss:$0 sm:$0xff] }
0x176e   : > { %v10633_v19 = vpop.f32.mrb[94].mxu0 }
0x176f   : > { %v12506_v35 = vpop.f32.mrb[95].mxu0  ;;  %v10826_v41 = vrot.slane %v10633_v19, 6 }
0x1779   : > { %v10726_v60 = vpop.f32.mrb[92].mxu1 }
0x177a   : > { %v12517_v4 = vpop.f32.mrb[93].mxu1  ;;  %v10823_v31 = vrot.slane %v10726_v60, 7 }
0x177e   : > { %v10818_v54 = vpop.f32.mrb[96].mxu0 }
0x177f   : > { %v10843_v25 = vsel %vm4411_vm12, %v10818_v54, %v10823_v31  ;;  %v12528_v62 = vpop.f32.mrb[97].mxu0 }
0x1780   : > { %v10844_v7 = vsel %vm4413_vm13, %v10843_v25, %v10826_v41 }
0x1781   : > { %v10845_v5 = vsel %vm4415_vm14, %v10844_v7, %v10829_v50 }
0x1782   : > { %v10846_v10 = vsel %vm4417_vm15, %v10845_v5, %v10832_v6  ;;  %v10996_v29 = vpop.f32.mrb[98].mxu0 }
0x1783   : > { %v10847_v17 = vsel %vm4419_vm3, %v10846_v10, %v10835_v43  ;;  %v11467_v38 = vmul.f32 -1.442695, %v10996_v29  ;;  %v12538_v20 = vpop.f32.mrb[99].mxu0 }
0x1784   : > { %v10848_v9 = vsel %vm4421_vm4, %v10847_v17, %v10838_v61 }
0x1785   : > { %13512 = vpow2.f32 %v11467_v38  ;;  %v10849_v42 = vsel %vm4423_vm5, %v10848_v9, %v10841_v57 }
0x1786   : > { %v10851_v14 = vadd.f32 %v10850_v45, %v10849_v42  ;;  %13514 = vrcp.f32 %v9351_v32 }
0x1788   : > { %12530 = vmatpush3.msra.mxu1 %v10851_v14 }
0x1789   : > { %12532 = vmatmul.mubr.msk.f32.vlgmr.msra.gmra.mrb[94].mxu1 %vm7603_vm0, %v13558_v37 }
0x178f   : > { %v13513_v3 = vpop.eup %13512 }
0x1790   : > { %v11003_v27 = vadd.f32 1.0, %v13513_v3  ;;  %v13515_v21 = vpop.eup %13514 }
0x1791   : > { %v9354_v15 = vmul.f32 %v13515_v21, %v9347_v26 }
0x1792   : > { %13516 = vrcp.f32 %v11003_v27 }
0x179c   : > { %v13517_v51 = vpop.eup %13516 }
0x179d   : > { %v11006_v22 = vmul.f32 %v13517_v51, %v10996_v29 }
0x179f   : > { %v11007_v34 = vmul.f32 %v11006_v22, %v9354_v15 }
0x185c   : > { %v10918_v11 = vpop.f32.mrb[94].mxu1 }
0x185d   : > { %v10922_v23 = vmul.f32 %v10918_v11, %v16678_v47  ;;  %v12533_v56 = vpop.f32.mrb[95].mxu1 }
0x185f   : > { %v11465_v39 = vmul.f32 -1.442695, %v10922_v23 }
0x1861   : > { %13518 = vpow2.f32 %v11465_v39 }
0x186b   : > { %v13519_v49 = vpop.eup %13518 }
0x186c   : > { %v10926_v16 = vadd.f32 1.0, %v13519_v49 }
0x186e   : > { %13520 = vrcp.f32 %v10926_v16 }
0x1878   : > { %v13521_v24 = vpop.eup %13520 }
0x1879   : > { %v10929_v44 = vmul.f32 %v13521_v24, %v10922_v23 }
0x187b   : > { %v11008_v40 = vmul.f32 %v11006_v22, %v10929_v44 }
0x187d   : > { %v11009_v18 = vadd.f32 %v11008_v40, %v11007_v34 }
0x187f   : > { %v11010_v48 = vadd.f32 %v11009_v18, %v16680_v33 }
0x1881   : > { %v11013_v1 = vsel %vm1180_vm2, %v11010_v48, 0.0 }
0x1882   : > { %11014 = vadd.xlane.f32.xlu0 %v11013_v1 }
0x190f   : > { %v11015_v63 = vpop.xlane.xlu0 %11014 }
0x1910   : > { %v11016_v28 = vmul.f32 0.03125, %v11015_v63 }
0x1912   : > { %v11017_v37 = vsub.f32 %v11010_v48, %v11016_v28 }
0x1914   : > { %v11018_v13 = vmul.f32 %v11017_v37, %v11017_v37 }
0x1916   : > { %v11019_v8 = vsel %vm1180_vm2, %v11018_v13, 0.0 }
0x1917   : > { %11020 = vadd.xlane.f32.xlu1 %v11019_v8 }
0x19a4   : > { %v11021_v58 = vpop.xlane.xlu1 %11020 }
0x19a5   : > { %v11022_v36 = vmul.f32 0.03125, %v11021_v58 }
0x19a7   : > { %v11023_v53 = vadd.f32 1e-05, %v11022_v36 }
0x19a9   : > { %13522 = vrsqrt.f32 %v11023_v53 }
0x19b3   : > { %v13523_v46 = vpop.eup %13522 }
0x19b4   : > { %v11025_v52 = vmul.f32 %v13523_v46, %v11017_v37 }
0x19b6   : > { %v11032_v59 = vmul.f32 %v11468_v0, %v11025_v52 }
0x19b8   : > { %v11039_v19 = vadd.f32 %v11469_v55, %v11032_v59 }
0x19ba   : > { %13524 = vtanh.f32 %v11039_v19 }
0x19c4   : > { %v13525_v35 = vpop.eup %13524 }
0x19c5   : > { %11041 = vst.msk [vmem:[%s1063_s3] sm:$0xff] %vm1180_vm2, %v13525_v35 }
0x19c6   : > { %13573 = shalt.err (!%p13570_p3)
}
0x19c7   : > { %s13574_s3 = scalar_lea.hbm %s16335_s6, 128  ;;  %s13578_s8 = scalar_lea.hbm %s13848_s20, 256 }
0x19c8   : > { %p13575_p4 = scmp.ne.s32.totalorder %s16335_s6, %s13574_s3  ;;  %p13579_p9 = scmp.lt.u32.totalorder %s16335_s6, %s13848_s20 }
0x19c9   : > { %p13580_p10 = scmp.lt.u32.totalorder %s13578_s8, %s13574_s3  ;;  %p13582_p12 = scmp.lt.u32.totalorder %s13574_s3, %s16335_s6 }
0x19ca   : > { %p13576_p7 = pnand %p13575_p4, %p13888_p5 }
0x19cb   : > { %p13581_p11 = por %p13580_p10, %p13579_p9 }
0x19cc   : > { %p13577_p8 = pneg %p13576_p7 }
0x19cd   : > { %p13583_p0 = por %p13582_p12, %p13581_p11 }
0x19cf   : > { %p13584_p13 = pnand %p13583_p0, %p13577_p8 }
0x19d1   : > { %13587 = shalt.err (!%p13584_p13)
}
0x19d2   : > { %12935 = dma.vmem_to_hbm [thread:$0]  (%p13888_p5), %s16337_s5, 128, %s16335_s6, %s11043_s4  }
0x19d3 PF: > { %p12941_p1 = scmp.ge.s32.totalorder %s13622_s28, 2  ;;  %s11068_s7 = sand.u32 1, %s13610_s22  }
0x19d4   : > { %s11069_s26 = scalar_lea.sflag [#allocation3], %s11068_s7 }
0x19d5   : > { %p12938_p2 = pnand %p12941_p1, %p13892_p6 }
0x19d7   : > { %13605 = dma.done.wait (!%p12938_p2), %s11069_s26, 128  }
0x19d8   : > { %13607 = vsyncadd (!%p12938_p2), %s11069_s26, 4294967168  ;;  %s16682_s28 = sld [smem:[#allocation35_spill]]  ;;  %s16683_s0 = sld [smem:[#allocation34_spill]] }
0x19d9   : > { %s16684_s26 = sld [smem:[#allocation36_spill]]  ;;  %s16685_s22 = smov %s13614_s23 }
0x19de   : > { %p81_p3 = scmp.ge.s32.totalorder %s16682_s28, 4   ;;  %s16686_s23 = smov %s16683_s0 }
0x19e0   :  { %83 = sbr.rel (!%p81_p3) target bundleno = 76 (0x4c), region = 230 }
0x19e7   :  { %11074 = vsyncpa [#allocation3], 1 }
0x19e8   :  { %11076 = vsyncpa [#allocation3 + $0x1], 1 }

</bundles_post_ra>
